<compile_context>
chip_gen: v5e
topology: v5e:2x2
jax: 0.10.0
libtpu: 0.0.40
codegen_flags: <defaults>
</compile_context>

<pallas_src>
import math
import jax
import jax.numpy as jnp
from jax.experimental import pallas as pl
from jax.experimental.pallas import tpu as pltpu

LN_EPS = 1e-5
INV_SQRT2 = 1.0 / math.sqrt(2.0)


def _round_up(n, m):
    return ((n + m - 1) // m) * m


def _vmem_capacity_bytes():
    try:
        return int(pltpu.get_tpu_info().vmem_capacity_bytes)
    except Exception:
        return 64 * 1024 * 1024  # conservative (v7x-sized) fallback


def _layernorm(h, gamma, beta):
    # var = E[x^2] - mu^2: two independent cross-lane reductions that can
    # overlap on the XLU; saves one (tm, D) subtract/square pass.
    mu = jnp.mean(h, axis=-1, keepdims=True)
    var = jnp.mean(h * h, axis=-1, keepdims=True) - mu * mu
    return (h - mu) * jax.lax.rsqrt(var + LN_EPS) * gamma + beta


def ffn_kernel(x_ref, g_out_ref, b_out_ref, g_in_ref, b_in_ref,
               w1_ref, b1_ref, w2_ref, b2_ref, o_ref):
    # f32 elementwise path (LN / GELU / bias) on VPU/EUP; bf16 only on the MXU.
    x = x_ref[...].astype(jnp.float32)

    # self.norm (outer LayerNorm), then net[0] (inner LayerNorm).
    h = _layernorm(x, g_out_ref[...], b_out_ref[...])
    h = _layernorm(h, g_in_ref[...], b_in_ref[...])

    # net[1]: Linear(dim -> hidden): bf16 MXU inputs, f32 accumulation.
    h = jnp.dot(h.astype(jnp.bfloat16), w1_ref[...],
                preferred_element_type=jnp.float32)

    # net[2]+net[3]: fused bias + exact (erf) GELU + bf16 downcast, dropout=id.
    h = h + b1_ref[...]
    h = (0.5 * h * (1.0 + jax.lax.erf(h * INV_SQRT2))).astype(jnp.bfloat16)

    # net[4]: Linear(hidden -> dim), f32 accumulation; net[5]: dropout=id.
    h = jnp.dot(h, w2_ref[...], preferred_element_type=jnp.float32) + b2_ref[...]

    o_ref[...] = h.astype(o_ref.dtype)


def _estimate_vmem_bytes(tm, D, H):
    in_out = 2 * 2 * tm * D * 4              # double-buffered in/out f32 row tiles
    weights = 2 * D * H * 2                  # single-buffered bf16 w1 + w2
    small = (4 * D + H + D) * 4              # LN params + biases
    interm = tm * H * (4 + 2) + tm * D * 4   # f32 + bf16 hidden slab, f32 out temp
    return in_out + weights + small + interm


def feed_forward(x, params, *, tm=None, out_dtype=None):
    """x: (batch, seq, dim) float32. Returns (batch, seq, dim)."""
    B, S, D = x.shape
    H = params["w1"].shape[1]
    N = B * S
    out_dtype = out_dtype or x.dtype

    vmem_cap = _vmem_capacity_bytes()
    # Leave headroom for compiler-internal scratch (esp. on 64 MiB v7x VMEM).
    vmem_limit = min(int(vmem_cap * 0.85), 112 * 1024 * 1024)
    vmem_limit = max(vmem_limit, 32 * 1024 * 1024)

    if tm is None:
        tm = 512 if vmem_cap >= 100 * 1024 * 1024 else 256

    # Row tile: multiple of 128 (MXU/lane friendly), bounded by the (padded)
    # row count, never below 128, and shrunk until it fits the VMEM budget.
    tm = max(128, min(_round_up(tm, 128), _round_up(N, 128)))
    while tm > 128 and _estimate_vmem_bytes(tm, D, H) > vmem_limit:
        tm -= 128
    # Keep >=2 grid steps where possible so v7x megacore sharding has work.
    while tm > 128 and _round_up(N, tm) // tm < 2:
        tm -= 128

    N_pad = _round_up(N, tm)
    x2 = x.reshape(N, D)
    if N_pad != N:
        x2 = jnp.pad(x2, ((0, N_pad - N), (0, 0)))

    # bf16 weights for the MXU (f32 accumulation inside the kernel).
    w1_bf = params["w1"].astype(jnp.bfloat16)
    w2_bf = params["w2"].astype(jnp.bfloat16)

    grid = (N_pad // tm,)

    cost = pl.CostEstimate(
        flops=4 * N_pad * D * H,
        transcendentals=N_pad * H,
        bytes_accessed=(N_pad * D * 4                      # input rows
                        + N_pad * D * jnp.dtype(out_dtype).itemsize  # output rows
                        + 2 * D * H * 2                    # bf16 weights (one pass)
                        + (4 * D + H + D) * 4),            # LN params + biases
    )

    def build_and_run(single_buffer):
        def const_spec(shape):
            if single_buffer:
                return pl.BlockSpec(shape, lambda i: (0,) * len(shape),
                                    pipeline_mode=pl.Buffered(1))
            return pl.BlockSpec(shape, lambda i: (0,) * len(shape))

        row_spec = pl.BlockSpec((tm, D), lambda i: (i, 0))
        vec_d = const_spec((1, D))
        vec_h = const_spec((1, H))
        w1_spec = const_spec((D, H))
        w2_spec = const_spec((H, D))

        return pl.pallas_call(
            ffn_kernel,
            out_shape=jax.ShapeDtypeStruct((N_pad, D), out_dtype),
            grid_spec=pltpu.PrefetchScalarGridSpec(
                num_scalar_prefetch=0,
                grid=grid,
                in_specs=[row_spec, vec_d, vec_d, vec_d, vec_d,
                          w1_spec, vec_h, w2_spec, vec_d],
                out_specs=row_spec,
            ),
            compiler_params=pltpu.CompilerParams(
                dimension_semantics=("parallel",),
                vmem_limit_bytes=vmem_limit,
            ),
            cost_estimate=cost,
        )(x2,
          params["g_out"], params["b_out"],
          params["g_in"], params["b_in"],
          w1_bf, params["b1"],
          w2_bf, params["b2"])

    try:
        out = build_and_run(single_buffer=True)
    except Exception:
        # Fallback if this Pallas build rejects single-buffered constant specs.
        out = build_and_run(single_buffer=False)

    return out[:N].reshape(B, S, D)


def init_params(key, dim, hidden_dim):
    """Deterministic synthetic parameters matching nn.LayerNorm / nn.Linear shapes."""
    ks = jax.random.split(key, 8)
    g_out = 1.0 + 0.01 * jax.random.normal(ks[0], (1, dim), jnp.float32)
    b_out = 0.01 * jax.random.normal(ks[1], (1, dim), jnp.float32)
    g_in = 1.0 + 0.01 * jax.random.normal(ks[2], (1, dim), jnp.float32)
    b_in = 0.01 * jax.random.normal(ks[3], (1, dim), jnp.float32)
    # PyTorch Linear weight is (out, in); stored pre-transposed (in, out).
    lim1 = 1.0 / math.sqrt(dim)
    w1 = jax.random.uniform(ks[4], (dim, hidden_dim), jnp.float32, -lim1, lim1)
    b1 = jax.random.uniform(ks[5], (1, hidden_dim), jnp.float32, -lim1, lim1)
    lim2 = 1.0 / math.sqrt(hidden_dim)
    w2 = jax.random.uniform(ks[6], (hidden_dim, dim), jnp.float32, -lim2, lim2)
    b2 = jax.random.uniform(ks[7], (1, dim), jnp.float32, -lim2, lim2)
    return dict(g_out=g_out, b_out=b_out, g_in=g_in, b_in=b_in,
                w1=w1, b1=b1, w2=w2, b2=b2)


def _ln_ref(h, g, b):
    mu = jnp.mean(h, axis=-1, keepdims=True)
    var = jnp.mean((h - mu) ** 2, axis=-1, keepdims=True)
    return (h - mu) * jax.lax.rsqrt(var + LN_EPS) * g + b


def feed_forward_ref_f32(x, params):
    """True f32 reference (matches PyTorch eval-mode FeedForward numerics)."""
    h = _ln_ref(x, params["g_out"][0], params["b_out"][0])
    h = _ln_ref(h, params["g_in"][0], params["b_in"][0])
    h = jnp.dot(h, params["w1"]) + params["b1"][0]
    h = 0.5 * h * (1.0 + jax.lax.erf(h * INV_SQRT2))
    h = jnp.dot(h, params["w2"]) + params["b2"][0]
    return h


def feed_forward_ref_bf16(x, params):
    """Reference with the same bf16-matmul / f32-accumulate recipe as the kernel."""
    h = _ln_ref(x, params["g_out"][0], params["b_out"][0])
    h = _ln_ref(h, params["g_in"][0], params["b_in"][0])
    h = jnp.dot(h.astype(jnp.bfloat16), params["w1"].astype(jnp.bfloat16),
                preferred_element_type=jnp.float32) + params["b1"][0]
    h = 0.5 * h * (1.0 + jax.lax.erf(h * INV_SQRT2))
    h = jnp.dot(h.astype(jnp.bfloat16), params["w2"].astype(jnp.bfloat16),
                preferred_element_type=jnp.float32) + params["b2"][0]
    return h


if __name__ == "__main__":
    # Small but lane-dense shapes (D, H multiples of 128 so stores are unmasked).
    B, S, D, H = 2, 8, 128, 256
    key = jax.random.PRNGKey(0)
    kx, kp = jax.random.split(key)
    x = jax.random.normal(kx, (B, S, D), jnp.float32)
    params = init_params(kp, D, H)

    out = feed_forward(x, params)
    out = jax.block_until_ready(out)
    assert out.shape == (B, S, D)

    # Tight check vs a reference using the identical bf16 matmul recipe.
    ref_bf16 = feed_forward_ref_bf16(x, params)
    assert jnp.allclose(out, ref_bf16, atol=1e-2, rtol=1e-2), \
        "mismatch vs bf16-recipe reference"

    # Looser check vs the true f32 reference (catches bf16 quantization drift).
    ref_f32 = feed_forward_ref_f32(x, params)
    assert jnp.allclose(out, ref_f32, atol=3e-2, rtol=3e-2), \
        "mismatch vs f32 reference"

    print("KERNEL_OK")
</pallas_src>

<mosaic_0001>
module attributes {stable_mosaic.version = 11 : i64} {
  func.func @ffn_kernel(%arg0: i32, %arg1: memref<128x128xf32, #tpu.memory_space<vmem>>, %arg2: memref<1x128xf32, #tpu.memory_space<vmem>>, %arg3: memref<1x128xf32, #tpu.memory_space<vmem>>, %arg4: memref<1x128xf32, #tpu.memory_space<vmem>>, %arg5: memref<1x128xf32, #tpu.memory_space<vmem>>, %arg6: memref<128x256xbf16, #tpu.memory_space<vmem>>, %arg7: memref<1x256xf32, #tpu.memory_space<vmem>>, %arg8: memref<256x128xbf16, #tpu.memory_space<vmem>>, %arg9: memref<1x128xf32, #tpu.memory_space<vmem>>, %arg10: memref<128x128xf32, #tpu.memory_space<vmem>>) attributes {dimension_semantics = [#tpu.dimension_semantics<parallel>], iteration_bounds = array<i64: 1>, scalar_prefetch = 0 : i64, scratch_operands = 0 : i64, tpu.core_type = #tpu.core_type<tc>, window_params = [{transform_indices = @transform_0, window_bounds = array<i64: 128, 128>}, {pipeline_mode = #tpu.pipeline_mode<synchronous>, transform_indices = @transform_1, window_bounds = array<i64: 1, 128>}, {pipeline_mode = #tpu.pipeline_mode<synchronous>, transform_indices = @transform_2, window_bounds = array<i64: 1, 128>}, {pipeline_mode = #tpu.pipeline_mode<synchronous>, transform_indices = @transform_3, window_bounds = array<i64: 1, 128>}, {pipeline_mode = #tpu.pipeline_mode<synchronous>, transform_indices = @transform_4, window_bounds = array<i64: 1, 128>}, {pipeline_mode = #tpu.pipeline_mode<synchronous>, transform_indices = @transform_5, window_bounds = array<i64: 128, 256>}, {pipeline_mode = #tpu.pipeline_mode<synchronous>, transform_indices = @transform_6, window_bounds = array<i64: 1, 256>}, {pipeline_mode = #tpu.pipeline_mode<synchronous>, transform_indices = @transform_7, window_bounds = array<i64: 256, 128>}, {pipeline_mode = #tpu.pipeline_mode<synchronous>, transform_indices = @transform_8, window_bounds = array<i64: 1, 128>}, {transform_indices = @transform_9, window_bounds = array<i64: 128, 128>}]} {
    %c0 = arith.constant 0 : index
    %c0_0 = arith.constant 0 : index
    %0 = vector.load %arg1[%c0, %c0_0] : memref<128x128xf32, #tpu.memory_space<vmem>>, vector<128x128xf32>
    %c0_1 = arith.constant 0 : index
    %c0_2 = arith.constant 0 : index
    %1 = vector.load %arg2[%c0_1, %c0_2] : memref<1x128xf32, #tpu.memory_space<vmem>>, vector<1x128xf32>
    %c0_3 = arith.constant 0 : index
    %c0_4 = arith.constant 0 : index
    %2 = vector.load %arg3[%c0_3, %c0_4] : memref<1x128xf32, #tpu.memory_space<vmem>>, vector<1x128xf32>
    %cst = arith.constant dense<0.000000e+00> : vector<128xf32>
    %3 = vector.multi_reduction <add>, %0, %cst [1] : vector<128x128xf32> to vector<128xf32>
    %4 = vector.shape_cast %3 : vector<128xf32> to vector<128x1xf32>
    %cst_5 = arith.constant 1.280000e+02 : f32
    %5 = vector.broadcast %cst_5 : f32 to vector<128x1xf32>
    %6 = arith.divf %4, %5 : vector<128x1xf32>
    %7 = arith.mulf %0, %0 : vector<128x128xf32>
    %cst_6 = arith.constant dense<0.000000e+00> : vector<128xf32>
    %8 = vector.multi_reduction <add>, %7, %cst_6 [1] : vector<128x128xf32> to vector<128xf32>
    %9 = vector.shape_cast %8 : vector<128xf32> to vector<128x1xf32>
    %cst_7 = arith.constant 1.280000e+02 : f32
    %10 = vector.broadcast %cst_7 : f32 to vector<128x1xf32>
    %11 = arith.divf %9, %10 : vector<128x1xf32>
    %12 = arith.mulf %6, %6 : vector<128x1xf32>
    %13 = arith.subf %11, %12 : vector<128x1xf32>
    %14 = vector.broadcast %6 : vector<128x1xf32> to vector<128x128xf32>
    %15 = arith.subf %0, %14 : vector<128x128xf32>
    %cst_8 = arith.constant 9.99999974E-6 : f32
    %16 = vector.broadcast %cst_8 : f32 to vector<128x1xf32>
    %17 = arith.addf %13, %16 : vector<128x1xf32>
    %18 = math.rsqrt %17 : vector<128x1xf32>
    %19 = vector.broadcast %18 : vector<128x1xf32> to vector<128x128xf32>
    %20 = arith.mulf %15, %19 : vector<128x128xf32>
    %21 = vector.broadcast %1 : vector<1x128xf32> to vector<128x128xf32>
    %22 = arith.mulf %20, %21 : vector<128x128xf32>
    %23 = vector.broadcast %2 : vector<1x128xf32> to vector<128x128xf32>
    %24 = arith.addf %22, %23 : vector<128x128xf32>
    %c0_9 = arith.constant 0 : index
    %c0_10 = arith.constant 0 : index
    %25 = vector.load %arg4[%c0_9, %c0_10] : memref<1x128xf32, #tpu.memory_space<vmem>>, vector<1x128xf32>
    %c0_11 = arith.constant 0 : index
    %c0_12 = arith.constant 0 : index
    %26 = vector.load %arg5[%c0_11, %c0_12] : memref<1x128xf32, #tpu.memory_space<vmem>>, vector<1x128xf32>
    %cst_13 = arith.constant dense<0.000000e+00> : vector<128xf32>
    %27 = vector.multi_reduction <add>, %24, %cst_13 [1] : vector<128x128xf32> to vector<128xf32>
    %28 = vector.shape_cast %27 : vector<128xf32> to vector<128x1xf32>
    %cst_14 = arith.constant 1.280000e+02 : f32
    %29 = vector.broadcast %cst_14 : f32 to vector<128x1xf32>
    %30 = arith.divf %28, %29 : vector<128x1xf32>
    %31 = arith.mulf %24, %24 : vector<128x128xf32>
    %cst_15 = arith.constant dense<0.000000e+00> : vector<128xf32>
    %32 = vector.multi_reduction <add>, %31, %cst_15 [1] : vector<128x128xf32> to vector<128xf32>
    %33 = vector.shape_cast %32 : vector<128xf32> to vector<128x1xf32>
    %cst_16 = arith.constant 1.280000e+02 : f32
    %34 = vector.broadcast %cst_16 : f32 to vector<128x1xf32>
    %35 = arith.divf %33, %34 : vector<128x1xf32>
    %36 = arith.mulf %30, %30 : vector<128x1xf32>
    %37 = arith.subf %35, %36 : vector<128x1xf32>
    %38 = vector.broadcast %30 : vector<128x1xf32> to vector<128x128xf32>
    %39 = arith.subf %24, %38 : vector<128x128xf32>
    %cst_17 = arith.constant 9.99999974E-6 : f32
    %40 = vector.broadcast %cst_17 : f32 to vector<128x1xf32>
    %41 = arith.addf %37, %40 : vector<128x1xf32>
    %42 = math.rsqrt %41 : vector<128x1xf32>
    %43 = vector.broadcast %42 : vector<128x1xf32> to vector<128x128xf32>
    %44 = arith.mulf %39, %43 : vector<128x128xf32>
    %45 = vector.broadcast %25 : vector<1x128xf32> to vector<128x128xf32>
    %46 = arith.mulf %44, %45 : vector<128x128xf32>
    %47 = vector.broadcast %26 : vector<1x128xf32> to vector<128x128xf32>
    %48 = arith.addf %46, %47 : vector<128x128xf32>
    %49 = arith.truncf %48 : vector<128x128xf32> to vector<128x128xbf16>
    %c0_18 = arith.constant 0 : index
    %c0_19 = arith.constant 0 : index
    %50 = vector.load %arg6[%c0_18, %c0_19] : memref<128x256xbf16, #tpu.memory_space<vmem>>, vector<128x256xbf16>
    %cst_20 = arith.constant dense<0.000000e+00> : vector<128x256xf32>
    %51 = tpu.matmul %49, %50, %cst_20 {dimension_numbers = #tpu.dot_dimension_numbers<[1], [0], [0], [1], [0, 0, 1, 1], [], []>} : vector<128x128xbf16>, vector<128x256xbf16>, vector<128x256xf32> -> vector<128x256xf32>
    %c0_21 = arith.constant 0 : index
    %c0_22 = arith.constant 0 : index
    %52 = vector.load %arg7[%c0_21, %c0_22] : memref<1x256xf32, #tpu.memory_space<vmem>>, vector<1x256xf32>
    %53 = vector.broadcast %52 : vector<1x256xf32> to vector<128x256xf32>
    %54 = arith.addf %51, %53 : vector<128x256xf32>
    %cst_23 = arith.constant 5.000000e-01 : f32
    %55 = vector.broadcast %cst_23 : f32 to vector<128x256xf32>
    %56 = arith.mulf %55, %54 : vector<128x256xf32>
    %cst_24 = arith.constant 0.707106769 : f32
    %57 = vector.broadcast %cst_24 : f32 to vector<128x256xf32>
    %58 = arith.mulf %54, %57 : vector<128x256xf32>
    %59 = math.erf %58 : vector<128x256xf32>
    %cst_25 = arith.constant 1.000000e+00 : f32
    %60 = vector.broadcast %cst_25 : f32 to vector<128x256xf32>
    %61 = arith.addf %60, %59 : vector<128x256xf32>
    %62 = arith.mulf %56, %61 : vector<128x256xf32>
    %63 = arith.truncf %62 : vector<128x256xf32> to vector<128x256xbf16>
    %c0_26 = arith.constant 0 : index
    %c0_27 = arith.constant 0 : index
    %64 = vector.load %arg8[%c0_26, %c0_27] : memref<256x128xbf16, #tpu.memory_space<vmem>>, vector<256x128xbf16>
    %cst_28 = arith.constant dense<0.000000e+00> : vector<128x128xf32>
    %65 = tpu.matmul %63, %64, %cst_28 {dimension_numbers = #tpu.dot_dimension_numbers<[1], [0], [0], [1], [0, 0, 1, 1], [], []>} : vector<128x256xbf16>, vector<256x128xbf16>, vector<128x128xf32> -> vector<128x128xf32>
    %c0_29 = arith.constant 0 : index
    %c0_30 = arith.constant 0 : index
    %66 = vector.load %arg9[%c0_29, %c0_30] : memref<1x128xf32, #tpu.memory_space<vmem>>, vector<1x128xf32>
    %67 = vector.broadcast %66 : vector<1x128xf32> to vector<128x128xf32>
    %68 = arith.addf %65, %67 : vector<128x128xf32>
    %c0_31 = arith.constant 0 : index
    %c0_32 = arith.constant 0 : index
    %69 = vector.load %arg10[%c0_31, %c0_32] : memref<128x128xf32, #tpu.memory_space<vmem>>, vector<128x128xf32>
    tpu.vector_store %arg10[%c0_31, %c0_32], %68 {strides = array<i32>} : memref<128x128xf32, #tpu.memory_space<vmem>>, vector<128x128xf32>,
    return
  }
  func.func @transform_0(%arg0: i32) -> (i32, i32) {
    %c0_i32 = arith.constant 0 : i32
    %c0_i32_0 = arith.constant 0 : i32
    return %arg0, %c0_i32 : i32, i32
  }
  func.func @transform_1(%arg0: i32) -> (i32, i32) {
    %c0_i32 = arith.constant 0 : i32
    %c0_i32_0 = arith.constant 0 : i32
    %c0_i32_1 = arith.constant 0 : i32
    return %c0_i32, %c0_i32_0 : i32, i32
  }
  func.func @transform_2(%arg0: i32) -> (i32, i32) {
    %c0_i32 = arith.constant 0 : i32
    %c0_i32_0 = arith.constant 0 : i32
    %c0_i32_1 = arith.constant 0 : i32
    return %c0_i32, %c0_i32_0 : i32, i32
  }
  func.func @transform_3(%arg0: i32) -> (i32, i32) {
    %c0_i32 = arith.constant 0 : i32
    %c0_i32_0 = arith.constant 0 : i32
    %c0_i32_1 = arith.constant 0 : i32
    return %c0_i32, %c0_i32_0 : i32, i32
  }
  func.func @transform_4(%arg0: i32) -> (i32, i32) {
    %c0_i32 = arith.constant 0 : i32
    %c0_i32_0 = arith.constant 0 : i32
    %c0_i32_1 = arith.constant 0 : i32
    return %c0_i32, %c0_i32_0 : i32, i32
  }
  func.func @transform_5(%arg0: i32) -> (i32, i32) {
    %c0_i32 = arith.constant 0 : i32
    %c0_i32_0 = arith.constant 0 : i32
    %c0_i32_1 = arith.constant 0 : i32
    return %c0_i32, %c0_i32_0 : i32, i32
  }
  func.func @transform_6(%arg0: i32) -> (i32, i32) {
    %c0_i32 = arith.constant 0 : i32
    %c0_i32_0 = arith.constant 0 : i32
    %c0_i32_1 = arith.constant 0 : i32
    return %c0_i32, %c0_i32_0 : i32, i32
  }
  func.func @transform_7(%arg0: i32) -> (i32, i32) {
    %c0_i32 = arith.constant 0 : i32
    %c0_i32_0 = arith.constant 0 : i32
    %c0_i32_1 = arith.constant 0 : i32
    return %c0_i32, %c0_i32_0 : i32, i32
  }
  func.func @transform_8(%arg0: i32) -> (i32, i32) {
    %c0_i32 = arith.constant 0 : i32
    %c0_i32_0 = arith.constant 0 : i32
    %c0_i32_1 = arith.constant 0 : i32
    return %c0_i32, %c0_i32_0 : i32, i32
  }
  func.func @transform_9(%arg0: i32) -> (i32, i32) {
    %c0_i32 = arith.constant 0 : i32
    %c0_i32_0 = arith.constant 0 : i32
    return %arg0, %c0_i32 : i32, i32
  }
}

module attributes {stable_mosaic.version = 11 : i64} {
  func.func @ffn_kernel(%arg0: i32, %arg1: memref<128x128xf32, #tpu.memory_space<vmem>>, %arg2: memref<1x128xf32, #tpu.memory_space<vmem>>, %arg3: memref<1x128xf32, #tpu.memory_space<vmem>>, %arg4: memref<1x128xf32, #tpu.memory_space<vmem>>, %arg5: memref<1x128xf32, #tpu.memory_space<vmem>>, %arg6: memref<128x256xbf16, #tpu.memory_space<vmem>>, %arg7: memref<1x256xf32, #tpu.memory_space<vmem>>, %arg8: memref<256x128xbf16, #tpu.memory_space<vmem>>, %arg9: memref<1x128xf32, #tpu.memory_space<vmem>>, %arg10: memref<128x128xf32, #tpu.memory_space<vmem>>) attributes {dimension_semantics = [#tpu.dimension_semantics<parallel>], iteration_bounds = array<i64: 1>, scalar_prefetch = 0 : i64, scratch_operands = 0 : i64, tpu.core_type = #tpu.core_type<tc>, window_params = [{transform_indices = @transform_0, window_bounds = array<i64: 128, 128>}, {pipeline_mode = #tpu.pipeline_mode<synchronous>, transform_indices = @transform_1, window_bounds = array<i64: 1, 128>}, {pipeline_mode = #tpu.pipeline_mode<synchronous>, transform_indices = @transform_2, window_bounds = array<i64: 1, 128>}, {pipeline_mode = #tpu.pipeline_mode<synchronous>, transform_indices = @transform_3, window_bounds = array<i64: 1, 128>}, {pipeline_mode = #tpu.pipeline_mode<synchronous>, transform_indices = @transform_4, window_bounds = array<i64: 1, 128>}, {pipeline_mode = #tpu.pipeline_mode<synchronous>, transform_indices = @transform_5, window_bounds = array<i64: 128, 256>}, {pipeline_mode = #tpu.pipeline_mode<synchronous>, transform_indices = @transform_6, window_bounds = array<i64: 1, 256>}, {pipeline_mode = #tpu.pipeline_mode<synchronous>, transform_indices = @transform_7, window_bounds = array<i64: 256, 128>}, {pipeline_mode = #tpu.pipeline_mode<synchronous>, transform_indices = @transform_8, window_bounds = array<i64: 1, 128>}, {transform_indices = @transform_9, window_bounds = array<i64: 128, 128>}]} {
    %c0 = arith.constant 0 : index
    %c0_0 = arith.constant 0 : index
    %0 = vector.load %arg1[%c0, %c0_0] : memref<128x128xf32, #tpu.memory_space<vmem>>, vector<128x128xf32>
    %c0_1 = arith.constant 0 : index
    %c0_2 = arith.constant 0 : index
    %1 = vector.load %arg2[%c0_1, %c0_2] : memref<1x128xf32, #tpu.memory_space<vmem>>, vector<1x128xf32>
    %c0_3 = arith.constant 0 : index
    %c0_4 = arith.constant 0 : index
    %2 = vector.load %arg3[%c0_3, %c0_4] : memref<1x128xf32, #tpu.memory_space<vmem>>, vector<1x128xf32>
    %cst = arith.constant dense<0.000000e+00> : vector<128xf32>
    %3 = vector.multi_reduction <add>, %0, %cst [1] : vector<128x128xf32> to vector<128xf32>
    %4 = vector.shape_cast %3 : vector<128xf32> to vector<128x1xf32>
    %cst_5 = arith.constant 1.280000e+02 : f32
    %5 = vector.broadcast %cst_5 : f32 to vector<128x1xf32>
    %6 = arith.divf %4, %5 : vector<128x1xf32>
    %7 = arith.mulf %0, %0 : vector<128x128xf32>
    %cst_6 = arith.constant dense<0.000000e+00> : vector<128xf32>
    %8 = vector.multi_reduction <add>, %7, %cst_6 [1] : vector<128x128xf32> to vector<128xf32>
    %9 = vector.shape_cast %8 : vector<128xf32> to vector<128x1xf32>
    %cst_7 = arith.constant 1.280000e+02 : f32
    %10 = vector.broadcast %cst_7 : f32 to vector<128x1xf32>
    %11 = arith.divf %9, %10 : vector<128x1xf32>
    %12 = arith.mulf %6, %6 : vector<128x1xf32>
    %13 = arith.subf %11, %12 : vector<128x1xf32>
    %14 = vector.broadcast %6 : vector<128x1xf32> to vector<128x128xf32>
    %15 = arith.subf %0, %14 : vector<128x128xf32>
    %cst_8 = arith.constant 9.99999974E-6 : f32
    %16 = vector.broadcast %cst_8 : f32 to vector<128x1xf32>
    %17 = arith.addf %13, %16 : vector<128x1xf32>
    %18 = math.rsqrt %17 : vector<128x1xf32>
    %19 = vector.broadcast %18 : vector<128x1xf32> to vector<128x128xf32>
    %20 = arith.mulf %15, %19 : vector<128x128xf32>
    %21 = vector.broadcast %1 : vector<1x128xf32> to vector<128x128xf32>
    %22 = arith.mulf %20, %21 : vector<128x128xf32>
    %23 = vector.broadcast %2 : vector<1x128xf32> to vector<128x128xf32>
    %24 = arith.addf %22, %23 : vector<128x128xf32>
    %c0_9 = arith.constant 0 : index
    %c0_10 = arith.constant 0 : index
    %25 = vector.load %arg4[%c0_9, %c0_10] : memref<1x128xf32, #tpu.memory_space<vmem>>, vector<1x128xf32>
    %c0_11 = arith.constant 0 : index
    %c0_12 = arith.constant 0 : index
    %26 = vector.load %arg5[%c0_11, %c0_12] : memref<1x128xf32, #tpu.memory_space<vmem>>, vector<1x128xf32>
    %cst_13 = arith.constant dense<0.000000e+00> : vector<128xf32>
    %27 = vector.multi_reduction <add>, %24, %cst_13 [1] : vector<128x128xf32> to vector<128xf32>
    %28 = vector.shape_cast %27 : vector<128xf32> to vector<128x1xf32>
    %cst_14 = arith.constant 1.280000e+02 : f32
    %29 = vector.broadcast %cst_14 : f32 to vector<128x1xf32>
    %30 = arith.divf %28, %29 : vector<128x1xf32>
    %31 = arith.mulf %24, %24 : vector<128x128xf32>
    %cst_15 = arith.constant dense<0.000000e+00> : vector<128xf32>
    %32 = vector.multi_reduction <add>, %31, %cst_15 [1] : vector<128x128xf32> to vector<128xf32>
    %33 = vector.shape_cast %32 : vector<128xf32> to vector<128x1xf32>
    %cst_16 = arith.constant 1.280000e+02 : f32
    %34 = vector.broadcast %cst_16 : f32 to vector<128x1xf32>
    %35 = arith.divf %33, %34 : vector<128x1xf32>
    %36 = arith.mulf %30, %30 : vector<128x1xf32>
    %37 = arith.subf %35, %36 : vector<128x1xf32>
    %38 = vector.broadcast %30 : vector<128x1xf32> to vector<128x128xf32>
    %39 = arith.subf %24, %38 : vector<128x128xf32>
    %cst_17 = arith.constant 9.99999974E-6 : f32
    %40 = vector.broadcast %cst_17 : f32 to vector<128x1xf32>
    %41 = arith.addf %37, %40 : vector<128x1xf32>
    %42 = math.rsqrt %41 : vector<128x1xf32>
    %43 = vector.broadcast %42 : vector<128x1xf32> to vector<128x128xf32>
    %44 = arith.mulf %39, %43 : vector<128x128xf32>
    %45 = vector.broadcast %25 : vector<1x128xf32> to vector<128x128xf32>
    %46 = arith.mulf %44, %45 : vector<128x128xf32>
    %47 = vector.broadcast %26 : vector<1x128xf32> to vector<128x128xf32>
    %48 = arith.addf %46, %47 : vector<128x128xf32>
    %49 = arith.truncf %48 : vector<128x128xf32> to vector<128x128xbf16>
    %c0_18 = arith.constant 0 : index
    %c0_19 = arith.constant 0 : index
    %50 = vector.load %arg6[%c0_18, %c0_19] : memref<128x256xbf16, #tpu.memory_space<vmem>>, vector<128x256xbf16>
    %cst_20 = arith.constant dense<0.000000e+00> : vector<128x256xf32>
    %51 = tpu.matmul %49, %50, %cst_20 {dimension_numbers = #tpu.dot_dimension_numbers<[1], [0], [0], [1], [0, 0, 1, 1], [], []>} : vector<128x128xbf16>, vector<128x256xbf16>, vector<128x256xf32> -> vector<128x256xf32>
    %c0_21 = arith.constant 0 : index
    %c0_22 = arith.constant 0 : index
    %52 = vector.load %arg7[%c0_21, %c0_22] : memref<1x256xf32, #tpu.memory_space<vmem>>, vector<1x256xf32>
    %53 = vector.broadcast %52 : vector<1x256xf32> to vector<128x256xf32>
    %54 = arith.addf %51, %53 : vector<128x256xf32>
    %cst_23 = arith.constant 5.000000e-01 : f32
    %55 = vector.broadcast %cst_23 : f32 to vector<128x256xf32>
    %56 = arith.mulf %55, %54 : vector<128x256xf32>
    %cst_24 = arith.constant 0.707106769 : f32
    %57 = vector.broadcast %cst_24 : f32 to vector<128x256xf32>
    %58 = arith.mulf %54, %57 : vector<128x256xf32>
    %59 = math.erf %58 : vector<128x256xf32>
    %cst_25 = arith.constant 1.000000e+00 : f32
    %60 = vector.broadcast %cst_25 : f32 to vector<128x256xf32>
    %61 = arith.addf %60, %59 : vector<128x256xf32>
    %62 = arith.mulf %56, %61 : vector<128x256xf32>
    %63 = arith.truncf %62 : vector<128x256xf32> to vector<128x256xbf16>
    %c0_26 = arith.constant 0 : index
    %c0_27 = arith.constant 0 : index
    %64 = vector.load %arg8[%c0_26, %c0_27] : memref<256x128xbf16, #tpu.memory_space<vmem>>, vector<256x128xbf16>
    %cst_28 = arith.constant dense<0.000000e+00> : vector<128x128xf32>
    %65 = tpu.matmul %63, %64, %cst_28 {dimension_numbers = #tpu.dot_dimension_numbers<[1], [0], [0], [1], [0, 0, 1, 1], [], []>} : vector<128x256xbf16>, vector<256x128xbf16>, vector<128x128xf32> -> vector<128x128xf32>
    %c0_29 = arith.constant 0 : index
    %c0_30 = arith.constant 0 : index
    %66 = vector.load %arg9[%c0_29, %c0_30] : memref<1x128xf32, #tpu.memory_space<vmem>>, vector<1x128xf32>
    %67 = vector.broadcast %66 : vector<1x128xf32> to vector<128x128xf32>
    %68 = arith.addf %65, %67 : vector<128x128xf32>
    %c0_31 = arith.constant 0 : index
    %c0_32 = arith.constant 0 : index
    %69 = vector.load %arg10[%c0_31, %c0_32] : memref<128x128xf32, #tpu.memory_space<vmem>>, vector<128x128xf32>
    tpu.vector_store %arg10[%c0_31, %c0_32], %68 {strides = array<i32>} : memref<128x128xf32, #tpu.memory_space<vmem>>, vector<128x128xf32>,
    return
  }
  func.func @transform_0(%arg0: i32) -> (i32, i32) {
    %c0_i32 = arith.constant 0 : i32
    %c0_i32_0 = arith.constant 0 : i32
    return %arg0, %c0_i32 : i32, i32
  }
  func.func @transform_1(%arg0: i32) -> (i32, i32) {
    %c0_i32 = arith.constant 0 : i32
    %c0_i32_0 = arith.constant 0 : i32
    %c0_i32_1 = arith.constant 0 : i32
    return %c0_i32, %c0_i32_0 : i32, i32
  }
  func.func @transform_2(%arg0: i32) -> (i32, i32) {
    %c0_i32 = arith.constant 0 : i32
    %c0_i32_0 = arith.constant 0 : i32
    %c0_i32_1 = arith.constant 0 : i32
    return %c0_i32, %c0_i32_0 : i32, i32
  }
  func.func @transform_3(%arg0: i32) -> (i32, i32) {
    %c0_i32 = arith.constant 0 : i32
    %c0_i32_0 = arith.constant 0 : i32
    %c0_i32_1 = arith.constant 0 : i32
    return %c0_i32, %c0_i32_0 : i32, i32
  }
  func.func @transform_4(%arg0: i32) -> (i32, i32) {
    %c0_i32 = arith.constant 0 : i32
    %c0_i32_0 = arith.constant 0 : i32
    %c0_i32_1 = arith.constant 0 : i32
    return %c0_i32, %c0_i32_0 : i32, i32
  }
  func.func @transform_5(%arg0: i32) -> (i32, i32) {
    %c0_i32 = arith.constant 0 : i32
    %c0_i32_0 = arith.constant 0 : i32
    %c0_i32_1 = arith.constant 0 : i32
    return %c0_i32, %c0_i32_0 : i32, i32
  }
  func.func @transform_6(%arg0: i32) -> (i32, i32) {
    %c0_i32 = arith.constant 0 : i32
    %c0_i32_0 = arith.constant 0 : i32
    %c0_i32_1 = arith.constant 0 : i32
    return %c0_i32, %c0_i32_0 : i32, i32
  }
  func.func @transform_7(%arg0: i32) -> (i32, i32) {
    %c0_i32 = arith.constant 0 : i32
    %c0_i32_0 = arith.constant 0 : i32
    %c0_i32_1 = arith.constant 0 : i32
    return %c0_i32, %c0_i32_0 : i32, i32
  }
  func.func @transform_8(%arg0: i32) -> (i32, i32) {
    %c0_i32 = arith.constant 0 : i32
    %c0_i32_0 = arith.constant 0 : i32
    %c0_i32_1 = arith.constant 0 : i32
    return %c0_i32, %c0_i32_0 : i32, i32
  }
  func.func @transform_9(%arg0: i32) -> (i32, i32) {
    %c0_i32 = arith.constant 0 : i32
    %c0_i32_0 = arith.constant 0 : i32
    return %arg0, %c0_i32 : i32, i32
  }
}

</mosaic_0001>

<bundles_post_ra>
// kernel: tpu_custom_call.1
= control target key start
LH: loop header
LB: loop body
LE: loop exit
PB: predicated region body
PF: predicated region fallthrough
CT: control target
= control target key end

     0   :  { %14 = vsyncpa [#allocation3], 0  ;;  %s5707_s0 = inlined_call_operand.hbm [shape: f32[128,128], index: 0, kind: input, shape index: {}]   ;;  %s5708_s1 = inlined_call_operand.hbm [shape: f32[1,128], index: 1, kind: input, shape index: {}]   ;;  %s5709_s2 = inlined_call_operand.vmem [shape: f32[1,128], index: 2, kind: input, shape index: {}]   ;;  %s5710_s3 = inlined_call_operand.hbm [shape: f32[1,128], index: 3, kind: input, shape index: {}]   ;;  %s5711_s4 = inlined_call_operand.hbm [shape: f32[1,128], index: 4, kind: input, shape index: {}]   ;;  %s5712_s5 = inlined_call_operand.hbm [shape: bf16[128,256], index: 5, kind: input, shape index: {}]   ;;  %s5713_s6 = inlined_call_operand.vmem [shape: f32[1,256], index: 6, kind: input, shape index: {}]   ;;  %s5714_s7 = inlined_call_operand.hbm [shape: bf16[256,128], index: 7, kind: input, shape index: {}]   ;;  %s5715_s8 = inlined_call_operand.vmem [shape: f32[1,128], index: 8, kind: input, shape index: {}]   ;;  %s5716_s9 = inlined_call_operand.hbm [shape: f32[128,128], index: 9, kind: output, shape index: {}]  }
   0x1   :  { %15 = vsyncpa [#allocation6], 0 }
   0x2   :  { %16 = vsyncpa [#allocation9], 0 }
   0x3   :  { %17 = vsyncpa [#allocation12], 0  ;;  %s37_s11 = sshll.u32 %s5708_s1, 4  ;;  %s38_s11 = int_to_ptr.hbm [resolvable:$true] %s37_s11 }
   0x4   :  { %18 = vsyncpa [#allocation4], 0  ;;  %s3349_s12 = smov [#allocation5]   ;;  %s61_s16 = sshll.u32 %s5711_s4, 4  ;;  %s62_s16 = int_to_ptr.hbm [resolvable:$true] %s61_s16 }
   0x5   :  { %s39_s13 = sshll.u32 %s3349_s12, 4  ;;  %s3350_s17 = smov [#allocation8]   ;;  %s40_s13 = int_to_ptr.vmem [resolvable:$true] %s39_s13 }
   0x6   :  { %42 = dma.hbm_to_vmem [thread:$0]  %s38_s11, 16, %s40_s13, [#allocation6]  }
   0x7   :  { %s63_s18 = sshll.u32 %s3350_s17, 4  ;;  %s23_s21 = sshll.u32 %s5707_s0, 4  ;;  %s64_s18 = int_to_ptr.vmem [resolvable:$true] %s63_s18  ;;  %s24_s21 = int_to_ptr.hbm [resolvable:$true] %s23_s21 }
   0x8   :  { %66 = dma.hbm_to_vmem [thread:$0]  %s62_s16, 16, %s64_s18, [#allocation9]  }
   0x9   :  { %s3351_s1 = smov [#allocation2]   ;;  %s50_s25 = sshll.u32 %s5710_s3, 4  ;;  %s51_s25 = int_to_ptr.hbm [resolvable:$true] %s50_s25 }
   0xa   :  { %s25_s22 = sshll.u32 %s3351_s1, 4  ;;  %s3352_s26 = smov 128   ;;  %s26_s22 = int_to_ptr.vmem [resolvable:$true] %s25_s22 }
   0xb   :  { %s3353_s4 = smov 8   ;;  %s3354_s27 = smov [#allocation7]  }
   0xc   :  { %31 = dma.hbm_to_vmem [thread:$0]  %s24_s21, 2048, %s26_s22, [#allocation3], %s3352_s26, %s3352_s26, %s3353_s4  }
   0xd   :  { %s52_s28 = sshll.u32 %s3354_s27, 4  ;;  %s71_s30 = sshll.u32 %s5712_s5, 4  ;;  %s53_s28 = int_to_ptr.vmem [resolvable:$true] %s52_s28  ;;  %s72_s30 = int_to_ptr.hbm [resolvable:$true] %s71_s30 }
   0xe   :  { %55 = dma.hbm_to_vmem [thread:$0]  %s51_s25, 16, %s53_s28, [#allocation6]  }
   0xf   :  { %s86_s3 = sshll.u32 %s5714_s7, 4  ;;  %s3355_s12 = smov [#allocation10]   ;;  %s87_s3 = int_to_ptr.hbm [resolvable:$true] %s86_s3 }
  0x10   :  { %s73_s13 = sshll.u32 %s3355_s12, 4  ;;  %s3356_s14 = smov [#allocation11]   ;;  %s74_s13 = int_to_ptr.vmem [resolvable:$true] %s73_s13 }
  0x11   :  { %79 = dma.hbm_to_vmem [thread:$0]  %s72_s30, 2048, %s74_s13, [#allocation9], %s3352_s26, %s3352_s26, %s3353_s4  }
  0x12   :  { %s88_s15 = sshll.u32 %s3356_s14, 4  ;;  %s3357_s16 = smov 64   ;;  %s89_s15 = int_to_ptr.vmem [resolvable:$true] %s88_s15 }
  0x13   :  { %s3358_s5 = smov 4  }
  0x14   :  { %94 = dma.hbm_to_vmem [thread:$0]  %s87_s3, 2048, %s89_s15, [#allocation12], %s3357_s16, %s3357_s16, %s3358_s5  }
  0x15   :  { %3339 = dma.done.wait [#allocation3], 2048  }
  0x16   :  { %3340 = vsyncadd [#allocation3], 4294965248 }
  0x17   :  { %3341 = dma.done.wait [#allocation6], 32  }
  0x18   :  { %3342 = vsyncadd [#allocation6], 4294967264 }
  0x19   :  { %3343 = dma.done.wait [#allocation9], 2064  }
  0x1a   :  { %3344 = vsyncadd [#allocation9], 4294965232 }
  0x1b   :  { %3345 = dma.done.wait [#allocation12], 2048  }
  0x1c   :  { %3346 = vsyncadd [#allocation12], 4294965248  ;;  %v3435_v0 = vld [vmem:[#allocation2] sm:$0xff]  ;;  %v3437_v1 = vld [vmem:[#allocation2 + $0x10] sm:$0xff]  ;;  %v3359_v24 = vmov 128.0   ;;  %s2812_s24 = sshll.u32 %s5716_s9, 4  ;;  %s2813_s24 = int_to_ptr.hbm [resolvable:$true] %s2812_s24 }
  0x1d   :  { %139 = vadd.xlane.f32.xlu0 %v3435_v0  ;;  %143 = vadd.xlane.f32.xlu2 %v3437_v1  ;;  %v194_v2 = vmul.f32 %v3435_v0, %v3435_v0  ;;  %v3443_v3 = vld [vmem:[#allocation2 + $0x8] sm:$0xff]  ;;  %v3445_v4 = vld [vmem:[#allocation2 + $0x18] sm:$0xff]  ;;  %v196_v6 = vmul.f32 %v3437_v1, %v3437_v1  ;;  %v3453_v7 = vld [vmem:[#allocation2 + $0x20] sm:$0xff]  ;;  %3037 = vrcp.f32 %v3359_v24 }
  0x1e   :  { %v195_v5 = vmul.f32 %v3443_v3, %v3443_v3  ;;  %v197_v8 = vmul.f32 %v3445_v4, %v3445_v4  ;;  %v3458_v9 = vld [vmem:[#allocation2 + $0x28] sm:$0xff]  ;;  %v198_v11 = vmul.f32 %v3453_v7, %v3453_v7  ;;  %v3465_v12 = vld [vmem:[#allocation2 + $0x30] sm:$0xff]  ;;  %v3469_v14 = vld [vmem:[#allocation2 + $0x38] sm:$0xff] }
  0x1f   :  { %210 = vadd.xlane.f32.xlu1 %v194_v2  ;;  %v199_v10 = vmul.f32 %v3458_v9, %v3458_v9  ;;  %v200_v13 = vmul.f32 %v3465_v12, %v3465_v12  ;;  %v201_v15 = vmul.f32 %v3469_v14, %v3469_v14  ;;  %v3475_v16 = vld [vmem:[#allocation2 + $0x48] sm:$0xff]  ;;  %v3477_v17 = vld [vmem:[#allocation2 + $0x40] sm:$0xff]  ;;  %v3481_v18 = vld [vmem:[#allocation2 + $0x50] sm:$0xff] }
  0x20   :  { %v202_v19 = vmul.f32 %v3477_v17, %v3477_v17  ;;  %v204_v20 = vmul.f32 %v3481_v18, %v3481_v18  ;;  %v203_v21 = vmul.f32 %v3475_v16, %v3475_v16  ;;  %v3489_v22 = vld [vmem:[#allocation2 + $0x58] sm:$0xff] }
  0x21   :  { %v205_v23 = vmul.f32 %v3489_v22, %v3489_v22 }
  0x23   :  { %v3038_v25 = vpop.eup %3037 }
  0x24   :  { %v172_v26 = vmul.f32 128.0, %v3038_v25  ;;  %vm176_vm0 = vweird.f32 %v3038_v25 }
  0x25   :  { %141 = vadd.xlane.f32.xlu0 %v3443_v3  ;;  %145 = vadd.xlane.f32.xlu2 %v3445_v4 }
  0x26   :  { %v173_v27 = vsub.f32 1.0, %v172_v26 }
  0x27   :  { %212 = vadd.xlane.f32.xlu1 %v195_v5 }
  0x28   :  { %v174_v28 = vmul.f32 %v3038_v25, %v173_v27  ;;  %v3536_v27 = vld [vmem:[#allocation5] ss:$0 sm:$0xff] }
  0x2a   :  { %v175_v29 = vadd.f32 %v3038_v25, %v174_v28 }
  0x2c   :  { %v3495_v30 = vsel %vm176_vm0, %v3038_v25, %v175_v29 }
  0x2d   :  { %214 = vadd.xlane.f32.xlu0 %v196_v6  ;;  %147 = vadd.xlane.f32.xlu2 %v3453_v7 }
  0x2f   :  { %216 = vadd.xlane.f32.xlu1 %v197_v8 }
  0x35   :  { %149 = vadd.xlane.f32.xlu0 %v3458_v9  ;;  %220 = vadd.xlane.f32.xlu2 %v199_v10 }
  0x37   :  { %218 = vadd.xlane.f32.xlu1 %v198_v11 }
  0x3d   :  { %151 = vadd.xlane.f32.xlu0 %v3465_v12  ;;  %222 = vadd.xlane.f32.xlu2 %v200_v13 }
  0x3f   :  { %153 = vadd.xlane.f32.xlu1 %v3469_v14 }
  0x45   :  { %224 = vadd.xlane.f32.xlu0 %v201_v15  ;;  %157 = vadd.xlane.f32.xlu2 %v3475_v16 }
  0x47   :  { %155 = vadd.xlane.f32.xlu1 %v3477_v17 }
  0x4d   :  { %226 = vadd.xlane.f32.xlu0 %v202_v19  ;;  %230 = vadd.xlane.f32.xlu2 %v204_v20 }
  0x4f   :  { %228 = vadd.xlane.f32.xlu1 %v203_v21 }
  0x55   :  { %159 = vadd.xlane.f32.xlu0 %v3481_v18 }
  0x57   :  { %161 = vadd.xlane.f32.xlu1 %v3489_v22 }
  0x5d   :  { %232 = vadd.xlane.f32.xlu0 %v205_v23 }
  0x90   :  { %v140_v31 = vpop.xlane.xlu0 %139  ;;  %v144_v32 = vpop.xlane.xlu2 %143 }
  0x91   :  { %v178_v33 = vmul.f32 %v3495_v30, %v140_v31  ;;  %v3503_v43 = vmul.f32 %v3495_v30, %v144_v32 }
  0x92   :  { %v211_v34 = vpop.xlane.xlu1 %210 }
  0x93   :  { %v258_v35 = vmul.f32 %v178_v33, %v178_v33  ;;  %v242_v36 = vmul.f32 %v211_v34, %v3495_v30  ;;  %v260_v48 = vmul.f32 %v3503_v43, %v3503_v43  ;;  %v290_v23 = vsub.f32 %v3435_v0, %v178_v33  ;;  %v3542_v0 = vld [vmem:[%s5709_s2] ss:$0 sm:$0xff] }
  0x95   :  { %v274_v37 = vsub.f32 %v242_v36, %v258_v35 }
  0x97   :  { %v306_v38 = vadd.f32 1e-05, %v274_v37 }
  0x98   :  { %v142_v39 = vpop.xlane.xlu0 %141  ;;  %v146_v40 = vpop.xlane.xlu2 %145 }
  0x99   :  { %v3500_v41 = vmul.f32 %v3495_v30, %v142_v39  ;;  %3039 = vrsqrt.f32 %v306_v38  ;;  %v3509_v46 = vmul.f32 %v3495_v30, %v146_v40  ;;  %vm328_vm2 = vweird.f32 %v306_v38 }
  0x9a   :  { %v213_v42 = vpop.xlane.xlu1 %212 }
  0x9b   :  { %v259_v44 = vmul.f32 %v3500_v41, %v3500_v41  ;;  %v243_v45 = vmul.f32 %v213_v42, %v3495_v30  ;;  %v261_v55 = vmul.f32 %v3509_v46, %v3509_v46 }
  0x9d   :  { %v275_v47 = vsub.f32 %v243_v45, %v259_v44 }
  0x9f   :  { %v3040_v49 = vpop.eup %3039  ;;  %v307_v50 = vadd.f32 1e-05, %v275_v47 }
  0xa0   :  { %v215_v51 = vpop.xlane.xlu0 %214  ;;  %v148_v52 = vpop.xlane.xlu2 %147  ;;  %v323_v53 = vmul.f32 %v3040_v49, %v306_v38  ;;  %vm329_vm1 = vweird.f32 %v3040_v49 }
  0xa1   :  { %v244_v54 = vmul.f32 %v215_v51, %v3495_v30  ;;  %3041 = vrsqrt.f32 %v307_v50  ;;  %v3520_v62 = vmul.f32 %v3495_v30, %v148_v52  ;;  %vm330_vm3 = vmor %vm328_vm2, %vm329_vm1  ;;  %vm338_vm5 = vweird.f32 %v307_v50 }
  0xa2   :  { %v217_v56 = vpop.xlane.xlu1 %216  ;;  %v324_v57 = vmul.f32 %v3040_v49, %v323_v53 }
  0xa3   :  { %v276_v58 = vsub.f32 %v244_v54, %v260_v48  ;;  %v245_v59 = vmul.f32 %v217_v56, %v3495_v30  ;;  %v262_v15 = vmul.f32 %v3520_v62, %v3520_v62  ;;  %v291_v48 = vsub.f32 %v3443_v3, %v3500_v41 }
  0xa4   :  { %v325_v60 = vmul.f32 0.5, %v324_v57  ;;  %v292_v41 = vsub.f32 %v3437_v1, %v3503_v43 }
  0xa5   :  { %v3517_v61 = vadd.f32 1e-05, %v276_v58  ;;  %v277_v63 = vsub.f32 %v245_v59, %v261_v55 }
  0xa6   :  { %v326_v2 = vsub.f32 1.5, %v325_v60 }
  0xa7   :  { %3043 = vrsqrt.f32 %v3517_v61  ;;  %v3042_v5 = vpop.eup %3041  ;;  %v3523_v6 = vadd.f32 1e-05, %v277_v63  ;;  %vm348_vm8 = vweird.f32 %v3517_v61 }
  0xa8   :  { %v150_v8 = vpop.xlane.xlu0 %149  ;;  %v221_v10 = vpop.xlane.xlu2 %220  ;;  %v327_v11 = vmul.f32 %v3040_v49, %v326_v2  ;;  %v333_v13 = vmul.f32 %v3042_v5, %v307_v50  ;;  %vm339_vm4 = vweird.f32 %v3042_v5 }
  0xa9   :  { %v3528_v19 = vmul.f32 %v3495_v30, %v150_v8  ;;  %3045 = vrsqrt.f32 %v3523_v6  ;;  %v247_v20 = vmul.f32 %v221_v10, %v3495_v30  ;;  %vm340_vm6 = vmor %vm338_vm5, %vm339_vm4  ;;  %vm358_vm10 = vweird.f32 %v3523_v6 }
  0xaa   :  { %v219_v21 = vpop.xlane.xlu1 %218  ;;  %v334_v24 = vmul.f32 %v3042_v5, %v333_v13  ;;  %v331_v28 = vsel %vm330_vm3, %v3040_v49, %v327_v11 }
  0xab   :  { %v263_v25 = vmul.f32 %v3528_v19, %v3528_v19  ;;  %v246_v26 = vmul.f32 %v219_v21, %v3495_v30  ;;  %v482_v35 = vmul.f32 %v331_v28, %v290_v23  ;;  %v293_v21 = vsub.f32 %v3445_v4, %v3509_v46 }
  0xac   :  { %v335_v31 = vmul.f32 0.5, %v334_v24 }
  0xad   :  { %v3044_v29 = vpop.eup %3043  ;;  %v279_v32 = vsub.f32 %v247_v20, %v263_v25  ;;  %v278_v34 = vsub.f32 %v246_v26, %v262_v15  ;;  %v501_v39 = vmul.f32 %v3536_v27, %v482_v35 }
  0xae   :  { %v343_v36 = vmul.f32 %v3044_v29, %v3517_v61  ;;  %v336_v33 = vsub.f32 1.5, %v335_v31  ;;  %vm349_vm7 = vweird.f32 %v3044_v29 }
  0xaf   :  { %v3544_v37 = vadd.f32 1e-05, %v279_v32  ;;  %v3546_v38 = vadd.f32 1e-05, %v278_v34  ;;  %v3046_v40 = vpop.eup %3045  ;;  %v3556_v53 = vadd.f32 %v3542_v0, %v501_v39  ;;  %vm350_vm9 = vmor %vm348_vm8, %vm349_vm7 }
  0xb0   :  { %v344_v42 = vmul.f32 %v3044_v29, %v343_v36  ;;  %v152_v44 = vpop.xlane.xlu0 %151  ;;  %v337_v45 = vmul.f32 %v3042_v5, %v336_v33  ;;  %v353_v47 = vmul.f32 %v3046_v40, %v3523_v6  ;;  %v223_v57 = vpop.xlane.xlu2 %222  ;;  %vm359_vm11 = vweird.f32 %v3046_v40 }
  0xb1   :  { %3047 = vrsqrt.f32 %v3544_v37  ;;  %538 = vadd.xlane.f32.xlu2 %v3556_v53  ;;  %v3563_v3 = vmul.f32 %v3495_v30, %v152_v44  ;;  %vm360_vm12 = vmor %vm358_vm10, %vm359_vm11  ;;  %vm368_vm13 = vweird.f32 %v3546_v38  ;;  %vm378_vm0 = vweird.f32 %v3544_v37 }
  0xb2   :  { %v345_v49 = vmul.f32 0.5, %v344_v42  ;;  %3049 = vrsqrt.f32 %v3546_v38  ;;  %v154_v51 = vpop.xlane.xlu1 %153  ;;  %v354_v52 = vmul.f32 %v3046_v40, %v353_v47  ;;  %v341_v54 = vsel %vm340_vm6, %v3042_v5, %v337_v45 }
  0xb3   :  { %v483_v50 = vmul.f32 %v341_v54, %v291_v48  ;;  %v3559_v56 = vmul.f32 %v3495_v30, %v154_v51  ;;  %v248_v5 = vmul.f32 %v223_v57, %v3495_v30  ;;  %v264_v20 = vmul.f32 %v3563_v3, %v3563_v3 }
  0xb4   :  { %v346_v55 = vsub.f32 1.5, %v345_v49  ;;  %v355_v58 = vmul.f32 0.5, %v354_v52 }
  0xb5   :  { %v502_v60 = vmul.f32 %v3536_v27, %v483_v50  ;;  %v265_v61 = vmul.f32 %v3559_v56, %v3559_v56  ;;  %v280_v33 = vsub.f32 %v248_v5, %v264_v20 }
  0xb6   :  { %v347_v59 = vmul.f32 %v3044_v29, %v346_v55  ;;  %v356_v2 = vsub.f32 1.5, %v355_v58 }
  0xb7   :  { %v3569_v63 = vpop.eup %3047  ;;  %v3578_v1 = vadd.f32 %v3542_v0, %v502_v60  ;;  %v3617_v54 = vadd.f32 1e-05, %v280_v33 }
  0xb8   :  { %v3573_v8 = vpop.eup %3049  ;;  %v373_v10 = vmul.f32 %v3569_v63, %v3544_v37  ;;  %v351_v43 = vsel %vm350_vm9, %v3044_v29, %v347_v59  ;;  %v225_v11 = vpop.xlane.xlu0 %224  ;;  %v357_v13 = vmul.f32 %v3046_v40, %v356_v2  ;;  %vm379_vm1 = vweird.f32 %v3569_v63 }
  0xb9   :  { %v363_v6 = vmul.f32 %v3573_v8, %v3546_v38  ;;  %v484_v15 = vmul.f32 %v351_v43, %v292_v41  ;;  %540 = vadd.xlane.f32.xlu0 %v3578_v1  ;;  %v249_v24 = vmul.f32 %v225_v11, %v3495_v30  ;;  %v158_v35 = vpop.xlane.xlu2 %157  ;;  %vm369_vm14 = vweird.f32 %v3573_v8  ;;  %vm3646_vm2 = vmor %vm378_vm0, %vm379_vm1 }
  0xba   :  { %v374_v23 = vmul.f32 %v3569_v63, %v373_v10  ;;  %v156_v25 = vpop.xlane.xlu1 %155  ;;  %v361_v29 = vsel %vm360_vm12, %v3046_v40, %v357_v13  ;;  %v3605_v40 = vld [vmem:[#allocation2 + $0x68] sm:$0xff]  ;;  %v3610_v47 = vmul.f32 %v3495_v30, %v158_v35  ;;  %vm3622_vm15 = vmor %vm368_vm13, %vm369_vm14  ;;  %v586_v38 = vmul.f32 %v3556_v53, %v3556_v53 }
  0xbb   :  { %v364_v26 = vmul.f32 %v3573_v8, %v363_v6  ;;  %v503_v28 = vmul.f32 %v3536_v27, %v484_v15  ;;  %v3594_v31 = vmul.f32 %v3495_v30, %v156_v25  ;;  %v485_v32 = vmul.f32 %v361_v29, %v293_v21 }
  0xbc   :  { %v281_v34 = vsub.f32 %v249_v24, %v265_v61  ;;  %v375_v4 = vmul.f32 0.5, %v374_v23  ;;  %v267_v57 = vmul.f32 %v3610_v47, %v3610_v47  ;;  %v294_v37 = vsub.f32 %v3453_v7, %v3520_v62  ;;  %v3659_v62 = vld [vmem:[#allocation2 + $0x60] sm:$0xff] }
  0xbd   :  { %v365_v46 = vmul.f32 0.5, %v364_v26  ;;  %v3597_v36 = vadd.f32 %v3542_v0, %v503_v28  ;;  %v504_v39 = vmul.f32 %v3536_v27, %v485_v32  ;;  %v266_v45 = vmul.f32 %v3594_v31, %v3594_v31 }
  0xbe   :  { %v3601_v42 = vadd.f32 1e-05, %v281_v34  ;;  %v376_v51 = vsub.f32 1.5, %v375_v4  ;;  %v295_v11 = vsub.f32 %v3458_v9, %v3528_v19  ;;  %v587_v7 = vmul.f32 %v3578_v1, %v3578_v1 }
  0xbf   :  { %v366_v44 = vsub.f32 1.5, %v365_v46  ;;  %542 = vadd.xlane.f32.xlu1 %v3597_v36  ;;  %v3613_v48 = vadd.f32 %v3542_v0, %v504_v39  ;;  %v588_v6 = vmul.f32 %v3597_v36, %v3597_v36  ;;  %v206_v26 = vmul.f32 %v3659_v62, %v3659_v62 }
  0xc0   :  { %3051 = vrsqrt.f32 %v3601_v42  ;;  %v227_v49 = vpop.xlane.xlu0 %226  ;;  %v377_v60 = vmul.f32 %v3569_v63, %v376_v51  ;;  %vm398_vm3 = vweird.f32 %v3601_v42  ;;  %vm388_vm6 = vweird.f32 %v3617_v54 }
  0xc1   :  { %v367_v52 = vmul.f32 %v3573_v8, %v366_v44  ;;  %v250_v55 = vmul.f32 %v227_v49, %v3495_v30  ;;  %165 = vadd.xlane.f32.xlu0 %v3605_v40  ;;  %544 = vadd.xlane.f32.xlu2 %v3613_v48  ;;  %3053 = vrsqrt.f32 %v3617_v54  ;;  %v231_v13 = vpop.xlane.xlu2 %230 }
  0xc2   :  { %v229_v58 = vpop.xlane.xlu1 %228  ;;  %v381_v9 = vsel %vm3646_vm2, %v3569_v63, %v377_v60  ;;  %v252_v23 = vmul.f32 %v231_v13, %v3495_v30  ;;  %v589_v60 = vmul.f32 %v3613_v48, %v3613_v48 }
  0xc3   :  { %v282_v41 = vsub.f32 %v250_v55, %v266_v45  ;;  %v251_v59 = vmul.f32 %v229_v58, %v3495_v30  ;;  %v371_v2 = vsel %vm3622_vm15, %v3573_v8, %v367_v52  ;;  %v487_v32 = vmul.f32 %v381_v9, %v295_v11 }
  0xc4   :  { %v486_v15 = vmul.f32 %v371_v2, %v294_v37  ;;  %v207_v37 = vmul.f32 %v3605_v40, %v3605_v40 }
  0xc5   :  { %v3640_v5 = vadd.f32 1e-05, %v282_v41  ;;  %v283_v61 = vsub.f32 %v251_v59, %v267_v57  ;;  %v506_v51 = vmul.f32 %v3536_v27, %v487_v32 }
  0xc6   :  { %v3642_v10 = vpop.eup %3051  ;;  %v505_v29 = vmul.f32 %v3536_v27, %v486_v15 }
  0xc7   :  { %602 = vadd.xlane.f32.xlu1 %v586_v38  ;;  %v393_v8 = vmul.f32 %v3642_v10, %v3601_v42  ;;  %3055 = vrsqrt.f32 %v3640_v5  ;;  %v3661_v20 = vadd.f32 1e-05, %v283_v61  ;;  %v3671_v24 = vpop.eup %3053  ;;  %v3707_v59 = vadd.f32 %v3542_v0, %v506_v51 }
  0xc8   :  { %v160_v21 = vpop.xlane.xlu0 %159  ;;  %v383_v4 = vmul.f32 %v3671_v24, %v3617_v54  ;;  %v3693_v49 = vadd.f32 %v3542_v0, %v505_v29  ;;  %vm399_vm4 = vweird.f32 %v3642_v10  ;;  %vm389_vm7 = vweird.f32 %v3671_v24  ;;  %v2886_v29 = vld [vmem:[#allocation10 + $0x70] sm:$0xf] }
  0xc9   :  { %v3667_v19 = vmul.f32 %v3495_v30, %v160_v21  ;;  %606 = vadd.xlane.f32.xlu0 %v588_v6  ;;  %604 = vadd.xlane.f32.xlu2 %v587_v7  ;;  %3057 = vrsqrt.f32 %v3661_v20  ;;  %v394_v25 = vmul.f32 %v3642_v10, %v393_v8  ;;  %vm3719_vm5 = vmor %vm398_vm3, %vm399_vm4  ;;  %v591_v6 = vmul.f32 %v3707_v59, %v3707_v59 }
  0xca   :  { %v162_v63 = vpop.xlane.xlu1 %161  ;;  %v384_v55 = vmul.f32 %v3671_v24, %v383_v4  ;;  %v297_v7 = vsub.f32 %v3469_v14, %v3559_v56  ;;  %vm408_vm8 = vweird.f32 %v3640_v5  ;;  %vm3744_vm10 = vmor %vm388_vm6, %vm389_vm7  ;;  %vm418_vm12 = vweird.f32 %v3661_v20 }
  0xcb   :  { %v268_v28 = vmul.f32 %v3667_v19, %v3667_v19  ;;  %v3684_v46 = vmul.f32 %v3495_v30, %v162_v63  ;;  %v395_v33 = vmul.f32 0.5, %v394_v25  ;;  %v3729_v25 = vld [vmem:[#allocation2 + $0x70] sm:$0xff]  ;;  %v296_v4 = vsub.f32 %v3465_v12, %v3563_v3  ;;  %v2999_v3 = vld [vmem:[#allocation10 + $0x54] sm:$0xf0] }
  0xcc   :  { %v385_v2 = vmul.f32 0.5, %v384_v55  ;;  %v208_v14 = vmul.f32 %v3729_v25, %v3729_v25 }
  0xcd   :  { %v3679_v34 = vpop.eup %3055  ;;  %v284_v35 = vsub.f32 %v252_v23, %v268_v28  ;;  %v269_v50 = vmul.f32 %v3684_v46, %v3684_v46  ;;  %v396_v58 = vsub.f32 1.5, %v395_v33  ;;  %v298_v33 = vsub.f32 %v3477_v17, %v3594_v31 }
  0xce   :  { %v403_v39 = vmul.f32 %v3679_v34, %v3640_v5  ;;  %v386_v15 = vsub.f32 1.5, %v385_v2  ;;  %vm409_vm9 = vweird.f32 %v3679_v34  ;;  %v3750_v5 = vld [vmem:[#allocation2 + $0x78] sm:$0xff]  ;;  %v299_v17 = vsub.f32 %v3475_v16, %v3610_v47 }
  0xcf   :  { %234 = vadd.xlane.f32.xlu1 %v206_v26  ;;  %v3688_v44 = vadd.f32 1e-05, %v284_v35  ;;  %v3690_v45 = vpop.eup %3057  ;;  %v397_v61 = vmul.f32 %v3642_v10, %v396_v58  ;;  %vm3753_vm11 = vmor %vm408_vm8, %vm409_vm9  ;;  %v2888_v35 = vld [vmem:[#allocation10 + $0x78] sm:$0xf0] }
  0xd0   :  { %v233_v52 = vpop.xlane.xlu0 %232  ;;  %v404_v41 = vmul.f32 %v3679_v34, %v403_v39  ;;  %v413_v38 = vmul.f32 %v3690_v45, %v3661_v20  ;;  %v387_v63 = vmul.f32 %v3671_v24, %v386_v15  ;;  %vm419_vm13 = vweird.f32 %v3690_v45 }
  0xd1   :  { %163 = vadd.xlane.f32.xlu2 %v3659_v62  ;;  %546 = vadd.xlane.f32.xlu0 %v3693_v49  ;;  %3059 = vrsqrt.f32 %v3688_v44  ;;  %v253_v57 = vmul.f32 %v233_v52, %v3495_v30  ;;  %v401_v28 = vsel %vm3719_vm5, %v3642_v10, %v397_v61  ;;  %vm3772_vm14 = vmor %vm418_vm12, %vm419_vm13  ;;  %vm428_vm15 = vweird.f32 %v3688_v44 }
  0xd2   :  { %v405_v11 = vmul.f32 0.5, %v404_v41  ;;  %v414_v8 = vmul.f32 %v3690_v45, %v413_v38  ;;  %v489_v56 = vmul.f32 %v401_v28, %v297_v7  ;;  %v391_v20 = vsel %vm3744_vm10, %v3671_v24, %v387_v63 }
  0xd3   :  { %v285_v43 = vsub.f32 %v253_v57, %v269_v50  ;;  %v488_v50 = vmul.f32 %v391_v20, %v296_v4  ;;  %v590_v41 = vmul.f32 %v3693_v49, %v3693_v49  ;;  %v2880_v20 = vld [vmem:[#allocation10 + $0x68] sm:$0xf0] }
  0xd4   :  { %v406_v9 = vsub.f32 1.5, %v405_v11  ;;  %v415_v23 = vmul.f32 0.5, %v414_v8  ;;  %v508_v39 = vmul.f32 %v3536_v27, %v489_v56 }
  0xd5   :  { %v3727_v21 = vadd.f32 1e-05, %v285_v43  ;;  %v507_v16 = vmul.f32 %v3536_v27, %v488_v50 }
  0xd6   :  { %v407_v54 = vmul.f32 %v3679_v34, %v406_v9  ;;  %v416_v10 = vsub.f32 1.5, %v415_v23  ;;  %v3779_v31 = vadd.f32 %v3542_v0, %v508_v39  ;;  %v301_v23 = vsub.f32 %v3489_v22, %v3684_v46  ;;  %v3001_v39 = vld [vmem:[#allocation10 + $0x64] sm:$0xf0] }
  0xd7   :  { %608 = vadd.xlane.f32.xlu1 %v589_v60  ;;  %v3717_v13 = vpop.eup %3059  ;;  %3061 = vrsqrt.f32 %v3727_v21  ;;  %vm438_vm2 = vweird.f32 %v3727_v21 }
  0xd8   :  { %v423_v26 = vmul.f32 %v3717_v13, %v3688_v44  ;;  %v417_v51 = vmul.f32 %v3690_v45, %v416_v10  ;;  %v411_v55 = vsel %vm3753_vm11, %v3679_v34, %v407_v54  ;;  %vm429_vm0 = vweird.f32 %v3717_v13  ;;  %v3003_v54 = vld [vmem:[#allocation10 + $0x74] sm:$0xf0]  ;;  %v3002_v10 = vld [vmem:[#allocation10 + $0x74] sm:$0xf] }
  0xd9   :  { %236 = vadd.xlane.f32.xlu2 %v207_v37  ;;  %612 = vadd.xlane.f32.xlu0 %v591_v6  ;;  %v490_v57 = vmul.f32 %v411_v55, %v298_v33  ;;  %vm430_vm1 = vmor %vm428_vm15, %vm429_vm0  ;;  %v300_v44 = vsub.f32 %v3481_v18, %v3667_v19  ;;  %v3799_v37 = vadd.f32 %v3542_v0, %v507_v16  ;;  %v2878_v33 = vld [vmem:[#allocation10 + $0x60] sm:$0xf] }
  0xda   :  { %v424_v32 = vmul.f32 %v3717_v13, %v423_v26  ;;  %v421_v34 = vsel %vm3772_vm14, %v3690_v45, %v417_v51  ;;  %v209_v45 = vmul.f32 %v3750_v5, %v3750_v5  ;;  %v593_v7 = vmul.f32 %v3779_v31, %v3779_v31  ;;  %v3000_v51 = vld [vmem:[#allocation10 + $0x64] sm:$0xf] }
  0xdb   :  { %v509_v47 = vmul.f32 %v3536_v27, %v490_v57  ;;  %v491_v38 = vmul.f32 %v421_v34, %v299_v17  ;;  %v592_v6 = vmul.f32 %v3799_v37, %v3799_v37  ;;  %v2891_v4 = vor.u32 %v3002_v10, %v2888_v35  ;;  %v2998_v17 = vld [vmem:[#allocation10 + $0x54] sm:$0xf]  ;;  %v2872_v57 = vld [vmem:[#allocation10 + $0x58] sm:$0xf0]  ;;  %v2997_v34 = vld [vmem:[#allocation10 + $0x44] sm:$0xf0] }
  0xdc   :  { %v425_v52 = vmul.f32 0.5, %v424_v32  ;;  %v2887_v32 = vor.u32 %v3003_v54, %v2886_v29  ;;  %v2883_v55 = vor.u32 %v3000_v51, %v2880_v20  ;;  %v2840_v29 = vld [vmem:[#allocation10 + $0x18] sm:$0xf0]  ;;  %v2830_v51 = vld [vmem:[#allocation10] sm:$0xf] }
  0xdd   :  { %v3062_v12 = vpop.eup %3061  ;;  %v3802_v43 = vadd.f32 %v3542_v0, %v509_v47  ;;  %v510_v61 = vmul.f32 %v3536_v27, %v491_v38  ;;  %1087 = vmatpush.bf16.msra.mxu1 %v2891_v4  ;;  %v2864_v47 = vld [vmem:[#allocation10 + $0x48] sm:$0xf0]  ;;  %v2988_v20 = vld [vmem:[#allocation10 + $0x4] sm:$0xf] }
  0xde   :  { %v426_v24 = vsub.f32 1.5, %v425_v52  ;;  %v433_v58 = vmul.f32 %v3062_v12, %v3727_v21  ;;  %vm439_vm3 = vweird.f32 %v3062_v12  ;;  %1038 = vmatpush.bf16.msra.mxu0 %v2887_v32  ;;  %v2879_v52 = vor.u32 %v3001_v39, %v2878_v33 }
  0xdf   :  { %548 = vadd.xlane.f32.xlu1 %v3707_v59  ;;  %v3809_v42 = vadd.f32 %v3542_v0, %v510_v61  ;;  %vm440_vm4 = vmor %vm438_vm2, %vm439_vm3  ;;  %v594_v28 = vmul.f32 %v3802_v43, %v3802_v43  ;;  %v2994_v61 = vld [vmem:[#allocation10 + $0x34] sm:$0xf] }
  0xe0   :  { %v427_v60 = vmul.f32 %v3717_v13, %v426_v24  ;;  %v434_v2 = vmul.f32 %v3062_v12, %v433_v58  ;;  %v2875_v24 = vor.u32 %v2998_v17, %v2872_v57  ;;  %v2862_v58 = vld [vmem:[#allocation10 + $0x40] sm:$0xf] }
  0xe1   :  { %169 = vadd.xlane.f32.xlu2 %v3750_v5  ;;  %238 = vadd.xlane.f32.xlu0 %v208_v14  ;;  %v2863_v16 = vor.u32 %v2997_v34, %v2862_v58 }
  0xe2   :  { %v435_v11 = vmul.f32 0.5, %v434_v2  ;;  %v431_v8 = vsel %vm430_vm1, %v3717_v13, %v427_v60  ;;  %v595_v13 = vmul.f32 %v3809_v42, %v3809_v42  ;;  %1039 = vmatpush.bf16.msra.mxu0 %v2879_v52  ;;  %1088 = vmatpush.bf16.msra.mxu1 %v2883_v55  ;;  %v2989_v52 = vld [vmem:[#allocation10 + $0x4] sm:$0xf0] }
  0xe3   :  { %v492_v18 = vmul.f32 %v431_v8, %v300_v44  ;;  %v2995_v44 = vld [vmem:[#allocation10 + $0x34] sm:$0xf0]  ;;  %v2856_v8 = vld [vmem:[#allocation10 + $0x38] sm:$0xf0]  ;;  %v2831_v55 = vor.u32 %v2989_v52, %v2830_v51 }
  0xe4   :  { %v436_v19 = vsub.f32 1.5, %v435_v11 }
  0xe5   :  { %v511_v15 = vmul.f32 %v3536_v27, %v492_v18  ;;  %v2859_v18 = vor.u32 %v2994_v61, %v2856_v8 }
  0xe6   :  { %v437_v9 = vmul.f32 %v3062_v12, %v436_v19  ;;  %1089 = vmatpush.bf16.msra.mxu1 %v2875_v24 }
  0xe7   :  { %167 = vadd.xlane.f32.xlu1 %v3729_v25  ;;  %v3822_v26 = vadd.f32 %v3542_v0, %v511_v15 }
  0xe8   :  { %v441_v21 = vsel %vm440_vm4, %v3062_v12, %v437_v9  ;;  %v2870_v12 = vld [vmem:[#allocation10 + $0x50] sm:$0xf]  ;;  %v2848_v9 = vld [vmem:[#allocation10 + $0x28] sm:$0xf0] }
  0xe9   :  { %610 = vadd.xlane.f32.xlu2 %v590_v41  ;;  %552 = vadd.xlane.f32.xlu0 %v3779_v31  ;;  %v596_v14 = vmul.f32 %v3822_v26, %v3822_v26  ;;  %v493_v56 = vmul.f32 %v441_v21, %v301_v23  ;;  %v2871_v50 = vor.u32 %v2999_v3, %v2870_v12  ;;  %v2996_v41 = vld [vmem:[#allocation10 + $0x44] sm:$0xf]  ;;  %v2832_v12 = vld [vmem:[#allocation10 + $0x8] sm:$0xf0] }
  0xea   :  { %v2867_v2 = vor.u32 %v2996_v41, %v2864_v47  ;;  %v2835_v57 = vor.u32 %v2988_v20, %v2832_v12 }
  0xeb   :  { %v512_v63 = vmul.f32 %v3536_v27, %v493_v56  ;;  %1040 = vmatpush.bf16.msra.mxu0 %v2871_v50  ;;  %v2838_v56 = vld [vmem:[#allocation10 + $0x10] sm:$0xf] }
  0xec   :  { %1090 = vmatpush.bf16.msra.mxu1 %v2867_v2 }
  0xed   :  { %v3831_v22 = vadd.f32 %v3542_v0, %v512_v63  ;;  %v2991_v63 = vld [vmem:[#allocation10 + $0x14] sm:$0xf0] }
  0xee   :  { %v2839_v54 = vor.u32 %v2991_v63, %v2838_v56 }
  0xef   :  { %240 = vadd.xlane.f32.xlu1 %v209_v45  ;;  %v597_v46 = vmul.f32 %v3831_v22, %v3831_v22  ;;  %1041 = vmatpush.bf16.msra.mxu0 %v2863_v16  ;;  %v2854_v45 = vld [vmem:[#allocation10 + $0x30] sm:$0xf] }
  0xf0   :  { %v2855_v11 = vor.u32 %v2995_v44, %v2854_v45  ;;  %1091 = vmatpush.bf16.msra.mxu1 %v2859_v18 }
  0xf1   :  { %550 = vadd.xlane.f32.xlu2 %v3799_v37  ;;  %554 = vadd.xlane.f32.xlu0 %v3802_v43 }
  0xf3   :  { %1042 = vmatpush.bf16.msra.mxu0 %v2855_v11 }
  0xf7   :  { %614 = vadd.xlane.f32.xlu1 %v592_v6  ;;  %v2846_v6 = vld [vmem:[#allocation10 + $0x20] sm:$0xf] }
  0xf9   :  { %616 = vadd.xlane.f32.xlu2 %v593_v7  ;;  %620 = vadd.xlane.f32.xlu0 %v595_v13  ;;  %v2993_v7 = vld [vmem:[#allocation10 + $0x24] sm:$0xf0]  ;;  %v2992_v13 = vld [vmem:[#allocation10 + $0x24] sm:$0xf] }
  0xfa   :  { %v2847_v15 = vor.u32 %v2993_v7, %v2846_v6 }
  0xfc   :  { %1043 = vmatpush.bf16.msra.mxu0 %v2847_v15 }
  0xff   :  { %556 = vadd.xlane.f32.xlu1 %v3809_v42 }
 0x100   :  { %1044 = vmatpush.bf16.msra.mxu0 %v2839_v54 }
 0x101   :  { %618 = vadd.xlane.f32.xlu2 %v594_v28  ;;  %622 = vadd.xlane.f32.xlu0 %v596_v14  ;;  %v2851_v28 = vor.u32 %v2992_v13, %v2848_v9 }
 0x103   :  { %1092 = vmatpush.bf16.msra.mxu1 %v2851_v28 }
 0x104   :  { %1045 = vmatpush.bf16.msra.mxu0 %v2831_v55 }
 0x107   :  { %558 = vadd.xlane.f32.xlu1 %v3822_v26 }
 0x109   :  { %560 = vadd.xlane.f32.xlu2 %v3831_v22 }
 0x10f   :  { %624 = vadd.xlane.f32.xlu1 %v597_v46  ;;  %v2990_v46 = vld [vmem:[#allocation10 + $0x14] sm:$0xf] }
 0x110   :  { %v2843_v10 = vor.u32 %v2990_v46, %v2840_v29 }
 0x112   :  { %1093 = vmatpush.bf16.msra.mxu1 %v2843_v10 }
 0x116   :  { %1094 = vmatpush.bf16.msra.mxu1 %v2835_v57 }
 0x124   :  { %v539_v38 = vpop.xlane.xlu2 %538 }
 0x125   :  { %v3838_v14 = vmul.f32 %v539_v38, %v3495_v30 }
 0x127   :  { %v650_v33 = vmul.f32 %v3838_v14, %v3838_v14 }
 0x12c   :  { %v541_v60 = vpop.xlane.xlu0 %540 }
 0x12d   :  { %v3841_v32 = vmul.f32 %v541_v60, %v3495_v30 }
 0x12f   :  { %v651_v24 = vmul.f32 %v3841_v32, %v3841_v32 }
 0x132   :  { %v543_v19 = vpop.xlane.xlu1 %542 }
 0x133   :  { %v3844_v35 = vmul.f32 %v543_v19, %v3495_v30 }
 0x134   :  { %v166_v23 = vpop.xlane.xlu0 %165  ;;  %v545_v21 = vpop.xlane.xlu2 %544 }
 0x135   :  { %v652_v58 = vmul.f32 %v3844_v35, %v3844_v35  ;;  %v3862_v18 = vmul.f32 %v545_v21, %v3495_v30  ;;  %v3870_v63 = vmul.f32 %v3495_v30, %v166_v23 }
 0x137   :  { %v653_v46 = vmul.f32 %v3862_v18, %v3862_v18  ;;  %v271_v23 = vmul.f32 %v3870_v63, %v3870_v63 }
 0x13a   :  { %v603_v4 = vpop.xlane.xlu1 %602 }
 0x13b   :  { %v634_v39 = vmul.f32 %v603_v4, %v3495_v30 }
 0x13c   :  { %v607_v17 = vpop.xlane.xlu0 %606  ;;  %v605_v50 = vpop.xlane.xlu2 %604 }
 0x13d   :  { %v666_v3 = vsub.f32 %v634_v39, %v650_v33  ;;  %v636_v34 = vmul.f32 %v607_v17, %v3495_v30  ;;  %v635_v41 = vmul.f32 %v605_v50, %v3495_v30 }
 0x13f   :  { %v698_v16 = vadd.f32 1e-05, %v666_v3  ;;  %v668_v47 = vsub.f32 %v636_v34, %v652_v58  ;;  %v667_v38 = vsub.f32 %v635_v41, %v651_v24 }
 0x141   :  { %3063 = vrsqrt.f32 %v698_v16  ;;  %v3855_v60 = vadd.f32 1e-05, %v668_v47  ;;  %v699_v2 = vadd.f32 1e-05, %v667_v38  ;;  %vm720_vm6 = vweird.f32 %v698_v16 }
 0x142   :  { %v235_v45 = vpop.xlane.xlu1 %234 }
 0x143   :  { %3065 = vrsqrt.f32 %v3855_v60  ;;  %v254_v6 = vmul.f32 %v235_v45, %v3495_v30  ;;  %v682_v45 = vsub.f32 %v3556_v53, %v3838_v14  ;;  %vm730_vm9 = vweird.f32 %v699_v2 }
 0x144   :  { %3067 = vrsqrt.f32 %v699_v2  ;;  %v164_v44 = vpop.xlane.xlu2 %163  ;;  %v547_v61 = vpop.xlane.xlu0 %546  ;;  %v684_v53 = vsub.f32 %v3597_v36, %v3844_v35  ;;  %vm740_vm12 = vweird.f32 %v3855_v60 }
 0x145   :  { %v3859_v11 = vmul.f32 %v3495_v30, %v164_v44 }
 0x147   :  { %v3064_v8 = vpop.eup %3063  ;;  %v270_v7 = vmul.f32 %v3859_v11, %v3859_v11 }
 0x148   :  { %v715_v19 = vmul.f32 %v3064_v8, %v698_v16  ;;  %vm721_vm5 = vweird.f32 %v3064_v8 }
 0x149   :  { %v3867_v13 = vpop.eup %3065  ;;  %v286_v9 = vsub.f32 %v254_v6, %v270_v7  ;;  %vm3887_vm7 = vmor %vm720_vm6, %vm721_vm5 }
 0x14a   :  { %v716_v15 = vmul.f32 %v3064_v8, %v715_v19  ;;  %v609_v28 = vpop.xlane.xlu1 %608  ;;  %v3068_v56 = vpop.eup %3067  ;;  %v735_v4 = vmul.f32 %v3867_v13, %v3855_v60  ;;  %v3899_v19 = vmul.f32 %v547_v61, %v3495_v30  ;;  %vm741_vm11 = vweird.f32 %v3867_v13 }
 0x14b   :  { %v637_v21 = vmul.f32 %v609_v28, %v3495_v30  ;;  %v725_v54 = vmul.f32 %v3068_v56, %v699_v2  ;;  %v3875_v10 = vadd.f32 1e-05, %v286_v9  ;;  %vm731_vm8 = vweird.f32 %v3068_v56  ;;  %vm3981_vm4 = vmor %vm740_vm12, %vm741_vm11 }
 0x14c   :  { %v717_v29 = vmul.f32 0.5, %v716_v15  ;;  %v237_v39 = vpop.xlane.xlu2 %236  ;;  %v613_v51 = vpop.xlane.xlu0 %612  ;;  %v736_v50 = vmul.f32 %v3867_v13, %v735_v4  ;;  %v683_v28 = vsub.f32 %v3578_v1, %v3841_v32  ;;  %vm3910_vm10 = vmor %vm730_vm9, %vm731_vm8 }
 0x14d   :  { %v669_v33 = vsub.f32 %v637_v21, %v653_v46  ;;  %v726_v20 = vmul.f32 %v3068_v56, %v725_v54  ;;  %3069 = vrsqrt.f32 %v3875_v10  ;;  %v255_v12 = vmul.f32 %v237_v39, %v3495_v30 }
 0x14e   :  { %v718_v52 = vsub.f32 1.5, %v717_v29  ;;  %v737_v6 = vmul.f32 0.5, %v736_v50  ;;  %v639_v61 = vmul.f32 %v613_v51, %v3495_v30  ;;  %v302_v46 = vsub.f32 %v3659_v62, %v3859_v11  ;;  %v3923_v29 = vld [vmem:[#allocation7] ss:$0 sm:$0xff] }
 0x14f   :  { %v3882_v55 = vadd.f32 1e-05, %v669_v33  ;;  %v727_v17 = vmul.f32 0.5, %v726_v20  ;;  %v287_v57 = vsub.f32 %v255_v12, %v271_v23  ;;  %v654_v54 = vmul.f32 %v3899_v19, %v3899_v19 }
 0x150   :  { %v719_v3 = vmul.f32 %v3064_v8, %v718_v52  ;;  %v738_v39 = vsub.f32 1.5, %v737_v6  ;;  %vm448_vm13 = vweird.f32 %v3875_v10 }
 0x151   :  { %3071 = vrsqrt.f32 %v3882_v55  ;;  %v728_v24 = vsub.f32 1.5, %v727_v17  ;;  %v3891_v41 = vadd.f32 1e-05, %v287_v57  ;;  %v3943_v57 = vld [vmem:[#allocation8] ss:$0 sm:$0xff]  ;;  %vm750_vm15 = vweird.f32 %v3882_v55 }
 0x152   :  { %v549_v58 = vpop.xlane.xlu1 %548  ;;  %v723_v16 = vsel %vm3887_vm7, %v3064_v8, %v719_v3  ;;  %v739_v34 = vmul.f32 %v3867_v13, %v738_v39 }
 0x153   :  { %v3894_v47 = vmul.f32 %v549_v58, %v3495_v30  ;;  %v3070_v38 = vpop.eup %3069  ;;  %v729_v44 = vmul.f32 %v3068_v56, %v728_v24  ;;  %3073 = vrsqrt.f32 %v3891_v41  ;;  %v874_v32 = vmul.f32 %v723_v16, %v682_v45 }
 0x154   :  { %v443_v7 = vmul.f32 %v3070_v38, %v3875_v10  ;;  %v170_v15 = vpop.xlane.xlu2 %169  ;;  %v239_v9 = vpop.xlane.xlu0 %238  ;;  %vm449_vm14 = vweird.f32 %v3070_v38  ;;  %vm458_vm5 = vweird.f32 %v3891_v41 }
 0x155   :  { %v655_v2 = vmul.f32 %v3894_v47, %v3894_v47  ;;  %v733_v1 = vsel %vm3910_vm10, %v3068_v56, %v729_v44  ;;  %v256_v52 = vmul.f32 %v239_v9, %v3495_v30  ;;  %v893_v17 = vmul.f32 %v3923_v29, %v874_v32  ;;  %vm450_vm0 = vmor %vm448_vm13, %vm449_vm14 }
 0x156   :  { %v444_v21 = vmul.f32 %v3070_v38, %v443_v7  ;;  %v875_v11 = vmul.f32 %v733_v1, %v683_v28  ;;  %v3951_v44 = vmul.f32 %v3495_v30, %v170_v15 }
 0x157   :  { %v3917_v8 = vpop.eup %3071  ;;  %v671_v33 = vsub.f32 %v639_v61, %v655_v2  ;;  %v912_v15 = vadd.f32 %v3943_v57, %v893_v17  ;;  %v743_v17 = vsel %vm3981_vm4, %v3867_v13, %v739_v34 }
 0x158   :  { %v745_v4 = vmul.f32 %v3917_v8, %v3882_v55  ;;  %v445_v62 = vmul.f32 0.5, %v444_v21  ;;  %v894_v50 = vmul.f32 %v3923_v29, %v875_v11  ;;  %vm751_vm1 = vweird.f32 %v3917_v8 }
 0x159   :  { %v3933_v51 = vadd.f32 1e-05, %v671_v33  ;;  %v3936_v23 = vpop.eup %3073  ;;  %vm3966_vm2 = vmor %vm750_vm15, %vm751_vm1 }
 0x15a   :  { %v746_v56 = vmul.f32 %v3917_v8, %v745_v4  ;;  %v168_v20 = vpop.xlane.xlu1 %167  ;;  %v446_v12 = vsub.f32 1.5, %v445_v62  ;;  %v453_v58 = vmul.f32 %v3936_v23, %v3891_v41  ;;  %v913_v21 = vadd.f32 %v3943_v57, %v894_v50 }
 0x15b   :  { %v3939_v3 = vmul.f32 %v3495_v30, %v168_v20  ;;  %3075 = vrsqrt.f32 %v3933_v51  ;;  %vm459_vm3 = vweird.f32 %v3936_v23  ;;  %vm770_vm7 = vweird.f32 %v3933_v51 }
 0x15c   :  { %v747_v24 = vmul.f32 0.5, %v746_v56  ;;  %v447_v45 = vmul.f32 %v3070_v38, %v446_v12  ;;  %v611_v6 = vpop.xlane.xlu2 %610  ;;  %v553_v7 = vpop.xlane.xlu0 %552  ;;  %v454_v28 = vmul.f32 %v3936_v23, %v453_v58  ;;  %v928_v62 = vpack.c.bf16 %v913_v21, %v912_v15  ;;  %vm460_vm6 = vmor %vm458_vm5, %vm459_vm3 }
 0x15d   :  { %v272_v16 = vmul.f32 %v3939_v3, %v3939_v3  ;;  %v638_v14 = vmul.f32 %v611_v6, %v3495_v30  ;;  %v685_v12 = vsub.f32 %v3613_v48, %v3862_v18  ;;  %v303_v48 = vsub.f32 %v3605_v40, %v3870_v63 }
 0x15e   :  { %v748_v9 = vsub.f32 1.5, %v747_v24  ;;  %v451_v61 = vsel %vm450_vm0, %v3070_v38, %v447_v45  ;;  %v455_v4 = vmul.f32 0.5, %v454_v28  ;;  %v273_v38 = vmul.f32 %v3951_v44, %v3951_v44  ;;  %1046 = vmatmul.bf16.vlgmr.msra.gmra.mxu0 %v928_v62  ;;  %1095 = vmatmul.bf16.vlgmr.msra.gmra.mxu1 %v928_v62 }
 0x15f   :  { %v288_v2 = vsub.f32 %v256_v52, %v272_v16  ;;  %v494_v1 = vmul.f32 %v451_v61, %v302_v46  ;;  %v670_v33 = vsub.f32 %v638_v14, %v654_v54  ;;  %v876_v16 = vmul.f32 %v743_v17, %v684_v53 }
 0x160   :  { %v749_v32 = vmul.f32 %v3917_v8, %v748_v9  ;;  %v456_v46 = vsub.f32 1.5, %v455_v4  ;;  %v687_v28 = vsub.f32 %v3707_v59, %v3894_v47  ;;  %v4037_v47 = vmul.f32 %v553_v7, %v3495_v30 }
 0x161   :  { %v3973_v39 = vadd.f32 1e-05, %v288_v2  ;;  %v3975_v11 = vpop.eup %3075  ;;  %v3985_v54 = vadd.f32 1e-05, %v670_v33  ;;  %v513_v52 = vmul.f32 %v3536_v27, %v494_v1  ;;  %v895_v21 = vmul.f32 %v3923_v29, %v876_v16 }
 0x162   :  { %v241_v56 = vpop.xlane.xlu1 %240  ;;  %v753_v20 = vsel %vm3966_vm2, %v3917_v8, %v749_v32  ;;  %v765_v60 = vmul.f32 %v3975_v11, %v3933_v51  ;;  %v457_v50 = vmul.f32 %v3936_v23, %v456_v46  ;;  %vm771_vm8 = vweird.f32 %v3975_v11 }
 0x163   :  { %3077 = vrsqrt.f32 %v3973_v39  ;;  %v257_v8 = vmul.f32 %v241_v56, %v3495_v30  ;;  %v4009_v58 = vadd.f32 %v3542_v0, %v513_v52  ;;  %v877_v13 = vmul.f32 %v753_v20, %v685_v12  ;;  %vm4059_vm10 = vmor %vm770_vm7, %vm771_vm8 }
 0x164   :  { %3079 = vrsqrt.f32 %v3985_v54  ;;  %v766_v18 = vmul.f32 %v3975_v11, %v765_v60  ;;  %v551_v24 = vpop.xlane.xlu2 %550  ;;  %v555_v45 = vpop.xlane.xlu0 %554  ;;  %v461_v41 = vsel %vm460_vm6, %v3936_v23, %v457_v50  ;;  %v304_v4 = vsub.f32 %v3729_v25, %v3939_v3 }
 0x165   :  { %v289_v34 = vsub.f32 %v257_v8, %v273_v38  ;;  %v4016_v40 = vmul.f32 %v551_v24, %v3495_v30  ;;  %562 = vadd.xlane.f32.xlu2 %v4009_v58  ;;  %v598_v63 = vmul.f32 %v4009_v58, %v4009_v58  ;;  %v495_v9 = vmul.f32 %v461_v41, %v303_v48 }
 0x166   :  { %v767_v6 = vmul.f32 0.5, %v766_v18  ;;  %v896_v61 = vmul.f32 %v3923_v29, %v877_v13  ;;  %v657_v33 = vmul.f32 %v4037_v47, %v4037_v47  ;;  %vm468_vm9 = vweird.f32 %v3973_v39 }
 0x167   :  { %v4024_v23 = vadd.f32 1e-05, %v289_v34  ;;  %v656_v35 = vmul.f32 %v4016_v40, %v4016_v40  ;;  %626 = vadd.xlane.f32.xlu1 %v598_v63  ;;  %v514_v53 = vmul.f32 %v3536_v27, %v495_v9  ;;  %v914_v52 = vadd.f32 %v3943_v57, %v895_v21 }
 0x168   :  { %v768_v36 = vsub.f32 1.5, %v767_v6  ;;  %v915_v46 = vadd.f32 %v3943_v57, %v896_v61  ;;  %v4072_v60 = vmul.f32 %v555_v45, %v3495_v30  ;;  %vm760_vm14 = vweird.f32 %v3985_v54 }
 0x169   :  { %v4026_v14 = vpop.eup %3077  ;;  %3081 = vrsqrt.f32 %v4024_v23  ;;  %v4052_v10 = vadd.f32 %v3542_v0, %v514_v53  ;;  %vm478_vm1 = vweird.f32 %v4024_v23 }
 0x16a   :  { %v4032_v2 = vpop.eup %3079  ;;  %v463_v59 = vmul.f32 %v4026_v14, %v3973_v39  ;;  %v615_v15 = vpop.xlane.xlu1 %614  ;;  %v769_v1 = vmul.f32 %v3975_v11, %v768_v36  ;;  %vm469_vm11 = vweird.f32 %v4026_v14  ;;  %v658_v36 = vmul.f32 %v4072_v60, %v4072_v60 }
 0x16b   :  { %v755_v27 = vmul.f32 %v4032_v2, %v3985_v54  ;;  %v640_v32 = vmul.f32 %v615_v15, %v3495_v30  ;;  %564 = vadd.xlane.f32.xlu0 %v4052_v10  ;;  %v599_v56 = vmul.f32 %v4052_v10, %v4052_v10  ;;  %vm761_vm12 = vweird.f32 %v4032_v2  ;;  %vm470_vm13 = vmor %vm468_vm9, %vm469_vm11 }
 0x16c   :  { %v464_v7 = vmul.f32 %v4026_v14, %v463_v59  ;;  %v617_v55 = vpop.xlane.xlu2 %616  ;;  %v621_v20 = vpop.xlane.xlu0 %620  ;;  %v773_v12 = vsel %vm4059_vm10, %v3975_v11, %v769_v1  ;;  %v929_v11 = vpack.c.bf16 %v915_v46, %v914_v52  ;;  %v686_v39 = vsub.f32 %v3693_v49, %v3899_v19  ;;  %vm762_vm15 = vmor %vm760_vm14, %vm761_vm12  ;;  %v3167_v49 = vld [vmem:[#allocation5] ss:$0 sm:$0xff] }
 0x16d   :  { %v756_v38 = vmul.f32 %v4032_v2, %v755_v27  ;;  %v672_v62 = vsub.f32 %v640_v32, %v656_v35  ;;  %v641_v0 = vmul.f32 %v617_v55, %v3495_v30  ;;  %628 = vadd.xlane.f32.xlu2 %v599_v56  ;;  %v879_v13 = vmul.f32 %v773_v12, %v687_v28  ;;  %v3168_v55 = vld [vmem:[%s5709_s2] ss:$0 sm:$0xff] }
 0x16e   :  { %v465_v3 = vmul.f32 0.5, %v464_v7  ;;  %v643_v16 = vmul.f32 %v621_v20, %v3495_v30  ;;  %1051 = vmatmul.bf16.gmra.mxu0 %v929_v11  ;;  %1100 = vmatmul.bf16.gmra.mxu1 %v929_v11 }
 0x16f   :  { %v757_v51 = vmul.f32 0.5, %v756_v38  ;;  %v4074_v17 = vadd.f32 1e-05, %v672_v62  ;;  %v4076_v50 = vpop.eup %3081  ;;  %v673_v48 = vsub.f32 %v641_v0, %v657_v33  ;;  %v898_v15 = vmul.f32 %v3923_v29, %v879_v13 }
 0x170   :  { %v466_v8 = vsub.f32 1.5, %v465_v3  ;;  %v473_v24 = vmul.f32 %v4076_v50, %v4024_v23  ;;  %vm479_vm0 = vweird.f32 %v4076_v50 }
 0x171   :  { %v758_v18 = vsub.f32 1.5, %v757_v51  ;;  %3083 = vrsqrt.f32 %v4074_v17  ;;  %v4084_v45 = vadd.f32 1e-05, %v673_v48  ;;  %vm780_vm2 = vweird.f32 %v4074_v17  ;;  %vm4136_vm3 = vmor %vm478_vm1, %vm479_vm0 }
 0x172   :  { %v467_v34 = vmul.f32 %v4026_v14, %v466_v8  ;;  %v557_v41 = vpop.xlane.xlu1 %556  ;;  %v474_v63 = vmul.f32 %v4076_v50, %v473_v24  ;;  %v917_v20 = vadd.f32 %v3943_v57, %v898_v15 }
 0x173   :  { %v759_v6 = vmul.f32 %v4032_v2, %v758_v18  ;;  %v4092_v9 = vmul.f32 %v557_v41, %v3495_v30  ;;  %3085 = vrsqrt.f32 %v4084_v45  ;;  %vm790_vm5 = vweird.f32 %v4084_v45 }
 0x174   :  { %v471_v28 = vsel %vm470_vm13, %v4026_v14, %v467_v34  ;;  %v475_v53 = vmul.f32 0.5, %v474_v63  ;;  %v619_v59 = vpop.xlane.xlu2 %618  ;;  %v623_v38 = vpop.xlane.xlu0 %622 }
 0x175   :  { %v496_v35 = vmul.f32 %v471_v28, %v304_v4  ;;  %v659_v61 = vmul.f32 %v4092_v9, %v4092_v9  ;;  %v642_v14 = vmul.f32 %v619_v59, %v3495_v30  ;;  %v763_v54 = vsel %vm762_vm15, %v4032_v2, %v759_v6 }
 0x176   :  { %v476_v1 = vsub.f32 1.5, %v475_v53  ;;  %v878_v32 = vmul.f32 %v763_v54, %v686_v39  ;;  %v305_v4 = vsub.f32 %v3750_v5, %v3951_v44  ;;  %v644_v52 = vmul.f32 %v623_v38, %v3495_v30 }
 0x177   :  { %v4108_v21 = vpop.eup %3083  ;;  %v675_v27 = vsub.f32 %v643_v16, %v659_v61  ;;  %v515_v19 = vmul.f32 %v3167_v49, %v496_v35  ;;  %v674_v33 = vsub.f32 %v642_v14, %v658_v36 }
 0x178   :  { %v775_v7 = vmul.f32 %v4108_v21, %v4074_v17  ;;  %v477_v2 = vmul.f32 %v4076_v50, %v476_v1  ;;  %v897_v25 = vmul.f32 %v3923_v29, %v878_v32  ;;  %vm781_vm4 = vweird.f32 %v4108_v21 }
 0x179   :  { %v4116_v62 = vadd.f32 1e-05, %v675_v27  ;;  %v4121_v46 = vadd.f32 %v3168_v55, %v515_v19  ;;  %v3086_v5 = vpop.eup %3085  ;;  %v4127_v3 = vadd.f32 1e-05, %v674_v33  ;;  %vm4156_vm6 = vmor %vm780_vm2, %vm781_vm4  ;;  %v688_v17 = vsub.f32 %v3799_v37, %v4016_v40 }
 0x17a   :  { %v776_v44 = vmul.f32 %v4108_v21, %v775_v7  ;;  %v559_v0 = vpop.xlane.xlu1 %558  ;;  %v785_v56 = vmul.f32 %v3086_v5, %v4084_v45  ;;  %v916_v18 = vadd.f32 %v3943_v57, %v897_v25  ;;  %v481_v11 = vsel %vm4136_vm3, %v4076_v50, %v477_v2 }
 0x17b   :  { %3087 = vrsqrt.f32 %v4116_v62  ;;  %566 = vadd.xlane.f32.xlu0 %v4121_v46  ;;  %v4143_v51 = vmul.f32 %v559_v0, %v3495_v30  ;;  %v600_v24 = vmul.f32 %v4121_v46, %v4121_v46  ;;  %vm791_vm7 = vweird.f32 %v3086_v5 }
 0x17c   :  { %v777_v12 = vmul.f32 0.5, %v776_v44  ;;  %3089 = vrsqrt.f32 %v4127_v3  ;;  %v786_v8 = vmul.f32 %v3086_v5, %v785_v56  ;;  %v561_v48 = vpop.xlane.xlu2 %560  ;;  %v930_v6 = vpack.c.bf16 %v917_v20, %v916_v18  ;;  %vm4168_vm8 = vmor %vm790_vm5, %vm791_vm7 }
 0x17d   :  { %v660_v34 = vmul.f32 %v4143_v51, %v4143_v51  ;;  %630 = vadd.xlane.f32.xlu2 %v600_v24  ;;  %v497_v63 = vmul.f32 %v481_v11, %v305_v4  ;;  %v4162_v36 = vmul.f32 %v561_v48, %v3495_v30  ;;  %v689_v45 = vsub.f32 %v3779_v31, %v4037_v47 }
 0x17e   :  { %v778_v13 = vsub.f32 1.5, %v777_v12  ;;  %v787_v16 = vmul.f32 0.5, %v786_v8  ;;  %1056 = vmatmul.bf16.gmra.mxu0 %v930_v6  ;;  %1105 = vmatmul.bf16.gmra.mxu1 %v930_v6  ;;  %vm810_vm9 = vweird.f32 %v4116_v62  ;;  %vm800_vm11 = vweird.f32 %v4127_v3 }
 0x17f   :  { %v676_v50 = vsub.f32 %v644_v52, %v660_v34  ;;  %v516_v53 = vmul.f32 %v3167_v49, %v497_v63  ;;  %v661_v54 = vmul.f32 %v4162_v36, %v4162_v36  ;;  %v693_v59 = vsub.f32 %v3831_v22, %v4162_v36  ;;  %v952_v36 = vld [vmem:[%s5713_s6] sm:$0x3] }
 0x180   :  { %v779_v28 = vmul.f32 %v4108_v21, %v778_v13  ;;  %v788_v35 = vsub.f32 1.5, %v787_v16  ;;  %v690_v13 = vsub.f32 %v3802_v43, %v4072_v60 }
 0x181   :  { %v3088_v39 = vpop.eup %3087  ;;  %v4179_v37 = vadd.f32 1e-05, %v676_v50  ;;  %v4181_v40 = vadd.f32 %v3168_v55, %v516_v53 }
 0x182   :  { %v3090_v61 = vpop.eup %3089  ;;  %v805_v14 = vmul.f32 %v3088_v39, %v4116_v62  ;;  %v625_v15 = vpop.xlane.xlu1 %624  ;;  %v783_v1 = vsel %vm4156_vm6, %v4108_v21, %v779_v28  ;;  %v789_v27 = vmul.f32 %v3086_v5, %v788_v35  ;;  %vm811_vm10 = vweird.f32 %v3088_v39 }
 0x183   :  { %v795_v49 = vmul.f32 %v3090_v61, %v4127_v3  ;;  %v645_v32 = vmul.f32 %v625_v15, %v3495_v30  ;;  %568 = vadd.xlane.f32.xlu1 %v4181_v40  ;;  %v601_v21 = vmul.f32 %v4181_v40, %v4181_v40  ;;  %v880_v33 = vmul.f32 %v783_v1, %v688_v17  ;;  %vm812_vm13 = vmor %vm810_vm9, %vm811_vm10 }
 0x184   :  { %v806_v19 = vmul.f32 %v3088_v39, %v805_v14  ;;  %v793_v7 = vsel %vm4168_vm8, %v3086_v5, %v789_v27  ;;  %3091 = vrsqrt.f32 %v4179_v37  ;;  %vm801_vm12 = vweird.f32 %v3090_v61 }
 0x185   :  { %v796_v4 = vmul.f32 %v3090_v61, %v795_v49  ;;  %v677_v2 = vsub.f32 %v645_v32, %v661_v54  ;;  %v881_v55 = vmul.f32 %v793_v7, %v689_v45  ;;  %632 = vadd.xlane.f32.xlu0 %v601_v21  ;;  %v899_v44 = vmul.f32 %v3923_v29, %v880_v33  ;;  %vm802_vm14 = vmor %vm800_vm11, %vm801_vm12 }
 0x186   :  { %v807_v38 = vmul.f32 0.5, %v806_v19  ;;  %v691_v3 = vsub.f32 %v3809_v42, %v4092_v9  ;;  %vm820_vm1 = vweird.f32 %v4179_v37  ;;  %v692_v54 = vsub.f32 %v3822_v26, %v4143_v51 }
 0x187   :  { %v797_v25 = vmul.f32 0.5, %v796_v4  ;;  %v709_v31 = vadd.f32 1e-05, %v677_v2  ;;  %v900_v47 = vmul.f32 %v3923_v29, %v881_v55  ;;  %v918_v20 = vadd.f32 %v3943_v57, %v899_v44 }
 0x188   :  { %v808_v56 = vsub.f32 1.5, %v807_v38  ;;  %v4222_v51 = vperm.slane %v952_v36, 0  ;;  %v4224_v32 = vperm.slane %v952_v36, 1 }
 0x189   :  { %v798_v0 = vsub.f32 1.5, %v797_v25  ;;  %3093 = vrsqrt.f32 %v709_v31  ;;  %v919_v5 = vadd.f32 %v3943_v57, %v900_v47  ;;  %vm830_vm15 = vweird.f32 %v709_v31 }
 0x18a   :  { %v3092_v52 = vpop.eup %3091  ;;  %v809_v12 = vmul.f32 %v3088_v39, %v808_v56  ;;  %5765 = vst [vmem:[#allocation19_spill] sm:$0xff] %v4222_v51 }
 0x18b   :  { %v799_v23 = vmul.f32 %v3090_v61, %v798_v0  ;;  %v931_v8 = vpack.c.bf16 %v919_v5, %v918_v20  ;;  %v815_v18 = vmul.f32 %v3092_v52, %v4179_v37  ;;  %vm821_vm2 = vweird.f32 %v3092_v52  ;;  %5766 = vst [vmem:[#allocation20_spill] sm:$0xff] %v4224_v32 }
 0x18c   :  { %v813_v62 = vsel %vm812_vm13, %v3088_v39, %v809_v12  ;;  %vm822_vm4 = vmor %vm820_vm1, %vm821_vm2 }
 0x18d   :  { %v803_v11 = vsel %vm802_vm14, %v3090_v61, %v799_v23  ;;  %v816_v41 = vmul.f32 %v3092_v52, %v815_v18  ;;  %v883_v6 = vmul.f32 %v813_v62, %v691_v3 }
 0x18e   :  { %1061 = vmatmul.bf16.gmra.mxu0 %v931_v8  ;;  %1110 = vmatmul.bf16.gmra.mxu1 %v931_v8  ;;  %v882_v16 = vmul.f32 %v803_v11, %v690_v13 }
 0x18f   :  { %v3094_v48 = vpop.eup %3093  ;;  %v817_v28 = vmul.f32 0.5, %v816_v41  ;;  %v902_v35 = vmul.f32 %v3923_v29, %v883_v6 }
 0x190   :  { %v825_v24 = vmul.f32 %v3094_v48, %v709_v31  ;;  %v901_v50 = vmul.f32 %v3923_v29, %v882_v16  ;;  %vm831_vm0 = vweird.f32 %v3094_v48 }
 0x191   :  { %v818_v39 = vsub.f32 1.5, %v817_v28  ;;  %v921_v42 = vadd.f32 %v3943_v57, %v902_v35  ;;  %vm832_vm3 = vmor %vm830_vm15, %vm831_vm0  ;;  %v3019_v28 = vld [vmem:[#allocation11 + $0x78] sm:$0xff] }
 0x192   :  { %v826_v34 = vmul.f32 %v3094_v48, %v825_v24  ;;  %v920_v43 = vadd.f32 %v3943_v57, %v901_v50  ;;  %2741 = vmatpush.bf16.msra.mxu3 %v3019_v28 }
 0x193   :  { %v819_v9 = vmul.f32 %v3092_v52, %v818_v39 }
 0x194   :  { %v827_v63 = vmul.f32 0.5, %v826_v34  ;;  %v932_v61 = vpack.c.bf16 %v921_v42, %v920_v43 }
 0x195   :  { %v823_v14 = vsel %vm822_vm4, %v3092_v52, %v819_v9 }
 0x196   :  { %v828_v53 = vsub.f32 1.5, %v827_v63  ;;  %v884_v1 = vmul.f32 %v823_v14, %v692_v54  ;;  %v3011_v63 = vld [vmem:[#allocation11 + $0x38] sm:$0xff] }
 0x197   :  { %2692 = vmatpush.bf16.msra.mxu2 %v3011_v63 }
 0x198   :  { %v829_v60 = vmul.f32 %v3094_v48, %v828_v53  ;;  %v903_v49 = vmul.f32 %v3923_v29, %v884_v1 }
 0x19a   :  { %v833_v17 = vsel %vm832_vm3, %v3094_v48, %v829_v60  ;;  %v922_v45 = vadd.f32 %v3943_v57, %v903_v49 }
 0x19b   :  { %v885_v15 = vmul.f32 %v833_v17, %v693_v59  ;;  %v3010_v17 = vld [vmem:[#allocation11 + $0x30] sm:$0xff] }
 0x19c   :  { %v3018_v59 = vld [vmem:[#allocation11 + $0x70] sm:$0xff]  ;;  %2693 = vmatpush.bf16.msra.mxu2 %v3010_v17 }
 0x19d   :  { %v904_v27 = vmul.f32 %v3923_v29, %v885_v15  ;;  %2742 = vmatpush.bf16.msra.mxu3 %v3018_v59 }
 0x19e   :  { %1066 = vmatmul.bf16.gmra.mxu0 %v932_v61  ;;  %1115 = vmatmul.bf16.gmra.mxu1 %v932_v61 }
 0x19f   :  { %v923_v37 = vadd.f32 %v3943_v57, %v904_v27 }
 0x1a1   :  { %v933_v19 = vpack.c.bf16 %v923_v37, %v922_v45 }
 0x1ae   :  { %1071 = vmatmul.bf16.gmra.mxu0 %v933_v19  ;;  %1120 = vmatmul.bf16.gmra.mxu1 %v933_v19 }
 0x1d8   :  { %v563_v22 = vpop.xlane.xlu2 %562 }
 0x1d9   :  { %v4220_v26 = vmul.f32 %v563_v22, %v3495_v30 }
 0x1da   :  { %v627_v4 = vpop.xlane.xlu1 %626 }
 0x1db   :  { %v662_v21 = vmul.f32 %v4220_v26, %v4220_v26  ;;  %v1047_v7 = vpop.f32.mrf.mxu0  ;;  %v1096_v33 = vpop.f32.mrf.mxu1  ;;  %v646_v38 = vmul.f32 %v627_v4, %v3495_v30 }
 0x1dc   :  { %v4230_v2 = vadd.f32 %v1047_v7, %v4222_v51  ;;  %v4233_v55 = vadd.f32 %v1096_v33, %v4224_v32 }
 0x1dd   :  { %v678_v56 = vsub.f32 %v646_v38, %v662_v21 }
 0x1de   :  { %v565_v25 = vpop.xlane.xlu0 %564  ;;  %v4239_v47 = vmul.f32 0.70710677, %v4230_v2  ;;  %v4242_v44 = vmul.f32 0.70710677, %v4233_v55 }
 0x1df   :  { %v4236_v31 = vmul.f32 %v565_v25, %v3495_v30  ;;  %v4255_v48 = vadd.f32 1e-05, %v678_v56 }
 0x1e0   :  { %v629_v0 = vpop.xlane.xlu2 %628  ;;  %v1200_v5 = vmul.f32 %v4239_v47, %v4239_v47  ;;  %v1240_v52 = vmul.f32 %v4242_v44, %v4242_v44 }
 0x1e1   :  { %v663_v20 = vmul.f32 %v4236_v31, %v4236_v31  ;;  %v647_v23 = vmul.f32 %v629_v0, %v3495_v30  ;;  %3095 = vrsqrt.f32 %v4255_v48  ;;  %vm840_vm6 = vweird.f32 %v4255_v48 }
 0x1e2   :  { %v4251_v12 = vmin.f32 %v1200_v5, 16.0  ;;  %v4253_v8 = vmin.f32 %v1240_v52, 16.0 }
 0x1e3   :  { %v1049_v18 = vpop.f32.mrf.mxu0  ;;  %v1098_v24 = vpop.f32.mrf.mxu1  ;;  %v679_v13 = vsub.f32 %v647_v23, %v663_v20 }
 0x1e4   :  { %v1202_v11 = vmul.f32 2.1237322e-06, %v4251_v12  ;;  %v1242_v62 = vmul.f32 2.1237322e-06, %v4253_v8  ;;  %v4260_v3 = vadd.f32 %v1049_v18, %v4222_v51  ;;  %v4263_v34 = vadd.f32 %v1098_v24, %v4224_v32 }
 0x1e5   :  { %v4270_v35 = vadd.f32 1e-05, %v679_v13 }
 0x1e6   :  { %v1203_v41 = vadd.f32 0.00028619796, %v1202_v11  ;;  %v1243_v16 = vadd.f32 0.00028619796, %v1242_v62  ;;  %v4267_v6 = vmul.f32 0.70710677, %v4260_v3 }
 0x1e7   :  { %v4276_v43 = vmul.f32 0.70710677, %v4263_v34  ;;  %3097 = vrsqrt.f32 %v4270_v35  ;;  %v4286_v15 = vpop.eup %3095  ;;  %vm850_vm7 = vweird.f32 %v4270_v35 }
 0x1e8   :  { %v1204_v50 = vmul.f32 %v1203_v41, %v4251_v12  ;;  %v1244_v53 = vmul.f32 %v1243_v16, %v4253_v8  ;;  %v1280_v39 = vmul.f32 %v4267_v6, %v4267_v6  ;;  %v835_v36 = vmul.f32 %v4286_v15, %v4255_v48 }
 0x1e9   :  { %v1320_v60 = vmul.f32 %v4276_v43, %v4276_v43  ;;  %vm841_vm5 = vweird.f32 %v4286_v15 }
 0x1ea   :  { %v4278_v42 = vmin.f32 %v1280_v39, 16.0  ;;  %v1205_v14 = vadd.f32 0.0036580483, %v1204_v50  ;;  %v1245_v1 = vadd.f32 0.0036580483, %v1244_v53  ;;  %v836_v24 = vmul.f32 %v4286_v15, %v835_v36  ;;  %vm4418_vm9 = vmor %vm840_vm6, %vm841_vm5 }
 0x1eb   :  { %v1052_v9 = vpop.f32.mrf.mxu0  ;;  %v1101_v61 = vpop.f32.mrf.mxu1  ;;  %v4289_v49 = vmin.f32 %v1320_v60, 16.0  ;;  %v1213_v39 = vmul.f32 3.8918573e-05, %v4251_v12 }
 0x1ec   :  { %v4284_v54 = vadd.f32 %v1052_v9, %v4222_v51  ;;  %v1282_v27 = vmul.f32 2.1237322e-06, %v4278_v42  ;;  %v4292_v37 = vadd.f32 %v1101_v61, %v4224_v32  ;;  %v1206_v22 = vmul.f32 %v1205_v14, %v4251_v12 }
 0x1ed   :  { %5767 = vst [vmem:[#allocation21_spill] sm:$0xff] %v4289_v49  ;;  %v1322_v19 = vmul.f32 2.1237322e-06, %v4289_v49  ;;  %v1246_v21 = vmul.f32 %v1245_v1, %v4253_v8  ;;  %v4306_v0 = vpop.eup %3097  ;;  %v837_v9 = vmul.f32 0.5, %v836_v24 }
 0x1ee   :  { %v1283_v45 = vadd.f32 0.00028619796, %v1282_v27  ;;  %v4299_v4 = vmul.f32 0.70710677, %v4284_v54  ;;  %v4304_v38 = vmul.f32 0.70710677, %v4292_v37  ;;  %v567_v25 = vpop.xlane.xlu0 %566  ;;  %v845_v16 = vmul.f32 %v4306_v0, %v4270_v35 }
 0x1ef   :  { %v1323_v33 = vadd.f32 0.00028619796, %v1322_v19  ;;  %v1207_v18 = vadd.f32 0.05243302, %v1206_v22  ;;  %v4314_v11 = vmul.f32 %v567_v25, %v3495_v30  ;;  %v1247_v62 = vadd.f32 0.05243302, %v1246_v21 }
 0x1f0   :  { %v1284_v7 = vmul.f32 %v1283_v45, %v4278_v42  ;;  %v1360_v56 = vmul.f32 %v4299_v4, %v4299_v4  ;;  %v1400_v52 = vmul.f32 %v4304_v38, %v4304_v38  ;;  %v631_v28 = vpop.xlane.xlu2 %630  ;;  %v846_v45 = vmul.f32 %v4306_v0, %v845_v16 }
 0x1f1   :  { %v1324_v13 = vmul.f32 %v1323_v33, %v4289_v49  ;;  %v1208_v60 = vmul.f32 %v1207_v18, %v4251_v12  ;;  %v664_v61 = vmul.f32 %v4314_v11, %v4314_v11  ;;  %v1248_v59 = vmul.f32 %v1247_v62, %v4253_v8 }
 0x1f2   :  { %v1285_v5 = vadd.f32 0.0036580483, %v1284_v7  ;;  %v4317_v41 = vmin.f32 %v1360_v56, 16.0  ;;  %v4324_v53 = vmin.f32 %v1400_v52, 16.0  ;;  %v648_v27 = vmul.f32 %v631_v28, %v3495_v30  ;;  %v3009_v52 = vld [vmem:[#allocation11 + $0x28] sm:$0xff] }
 0x1f3   :  { %v1054_v20 = vpop.f32.mrf.mxu0  ;;  %v1103_v23 = vpop.f32.mrf.mxu1  ;;  %v1325_v14 = vadd.f32 0.0036580483, %v1324_v13  ;;  %v4344_v21 = vmul.f32 0.5, %v4230_v2  ;;  %v4347_v7 = vmul.f32 0.5, %v4233_v55  ;;  %v1209_v18 = vadd.f32 0.18741608, %v1208_v60  ;;  %2694 = vmatpush.bf16.msra.mxu2 %v3009_v52 }
 0x1f4   :  { %v1286_v63 = vmul.f32 %v1285_v5, %v4278_v42  ;;  %v4331_v17 = vadd.f32 %v1054_v20, %v4222_v51  ;;  %v1362_v1 = vmul.f32 2.1237322e-06, %v4317_v41  ;;  %v4341_v36 = vadd.f32 %v1103_v23, %v4224_v32  ;;  %v3017_v20 = vld [vmem:[#allocation11 + $0x68] sm:$0xff] }
 0x1f5   :  { %5768 = vst [vmem:[#allocation22_spill] sm:$0xff] %v4344_v21  ;;  %v1402_v25 = vmul.f32 2.1237322e-06, %v4324_v53  ;;  %v838_v24 = vsub.f32 1.5, %v837_v9  ;;  %v1214_v2 = vadd.f32 0.001143296, %v1213_v39  ;;  %v1326_v55 = vmul.f32 %v1325_v14, %v4289_v49  ;;  %2743 = vmatpush.bf16.msra.mxu3 %v3017_v20 }
 0x1f6   :  { %v1287_v19 = vadd.f32 0.05243302, %v1286_v63  ;;  %v4338_v22 = vmul.f32 0.70710677, %v4331_v17  ;;  %5769 = vst [vmem:[#allocation23_spill] sm:$0xff] %v4347_v7  ;;  %v569_v56 = vpop.xlane.xlu1 %568  ;;  %v680_v16 = vsub.f32 %v648_v27, %v664_v61  ;;  %v847_v60 = vmul.f32 0.5, %v846_v45 }
 0x1f7   :  { %v1363_v13 = vadd.f32 0.00028619796, %v1362_v1  ;;  %v4357_v63 = vmul.f32 0.70710677, %v4341_v36  ;;  %v1249_v33 = vadd.f32 0.18741608, %v1248_v59  ;;  %v4361_v50 = vmul.f32 %v569_v56, %v3495_v30 }
 0x1f8   :  { %v1440_v23 = vmul.f32 %v4338_v22, %v4338_v22  ;;  %v633_v62 = vpop.xlane.xlu0 %632  ;;  %v1288_v9 = vmul.f32 %v1287_v19, %v4278_v42  ;;  %v1403_v39 = vadd.f32 0.00028619796, %v1402_v25  ;;  %v3008_v1 = vld [vmem:[#allocation11 + $0x20] sm:$0xff]  ;;  %v1210_v59 = vmul.f32 %v1209_v18, %v4251_v12 }
 0x1f9   :  { %v1480_v61 = vmul.f32 %v4357_v63, %v4357_v63  ;;  %v649_v14 = vmul.f32 %v633_v62, %v3495_v30  ;;  %v3016_v27 = vld [vmem:[#allocation11 + $0x60] sm:$0xff]  ;;  %v4371_v45 = vmul.f32 0.5, %v4260_v3  ;;  %v4374_v19 = vmul.f32 0.5, %v4263_v34  ;;  %2695 = vmatpush.bf16.msra.mxu2 %v3008_v1 }
 0x1fa   :  { %v4364_v7 = vmin.f32 %v1440_v23, 16.0  ;;  %v665_v25 = vmul.f32 %v4361_v50, %v4361_v50  ;;  %v1327_v56 = vadd.f32 0.05243302, %v1326_v55  ;;  %v1364_v52 = vmul.f32 %v1363_v13, %v4317_v41  ;;  %2744 = vmatpush.bf16.msra.mxu3 %v3016_v27 }
 0x1fb   :  { %v1057_v5 = vpop.f32.mrf.mxu0  ;;  %v1106_v28 = vpop.f32.mrf.mxu1  ;;  %5770 = vst [vmem:[#allocation24_spill] sm:$0xff] %v4371_v45  ;;  %v4380_v20 = vadd.f32 1e-05, %v680_v16  ;;  %v4382_v30 = vmin.f32 %v1480_v61, 16.0  ;;  %v1250_v3 = vmul.f32 %v1249_v33, %v4253_v8  ;;  %v839_v18 = vmul.f32 %v4286_v15, %v838_v24  ;;  %v3007_v45 = vld [vmem:[#allocation11 + $0x18] sm:$0xff] }
 0x1fc   :  { %5771 = vst [vmem:[#allocation25_spill] sm:$0xff] %v4374_v19  ;;  %v1289_v34 = vadd.f32 0.18741608, %v1288_v9  ;;  %v4387_v23 = vmul.f32 %v1214_v2, %v4251_v12  ;;  %v848_v62 = vsub.f32 1.5, %v847_v60  ;;  %v1404_v19 = vmul.f32 %v1403_v39, %v4324_v53  ;;  %v3015_v61 = vld [vmem:[#allocation11 + $0x58] sm:$0xff] }
 0x1fd   :  { %v1442_v55 = vmul.f32 2.1237322e-06, %v4364_v7  ;;  %v681_v13 = vsub.f32 %v649_v14, %v665_v25  ;;  %v1211_v21 = vadd.f32 1.1283791, %v1210_v59  ;;  %vm851_vm8 = vweird.f32 %v4306_v0  ;;  %2696 = vmatpush.bf16.msra.mxu2 %v3007_v45  ;;  %v3014_v45 = vld [vmem:[#allocation11 + $0x50] sm:$0xff] }
 0x1fe   :  { %v1482_v33 = vmul.f32 2.1237322e-06, %v4382_v30  ;;  %v4394_v24 = vadd.f32 %v1057_v5, %v4222_v51  ;;  %v1328_v2 = vmul.f32 %v1327_v56, %v4289_v49  ;;  %v1365_v9 = vadd.f32 0.0036580483, %v1364_v52  ;;  %2745 = vmatpush.bf16.msra.mxu3 %v3015_v61  ;;  %vm852_vm10 = vmor %vm850_vm7, %vm851_vm8 }
 0x1ff   :  { %3099 = vrsqrt.f32 %v4380_v20  ;;  %v4398_v60 = vadd.f32 1e-05, %v681_v13  ;;  %v1251_v39 = vadd.f32 1.1283791, %v1250_v3  ;;  %v1290_v14 = vmul.f32 %v1289_v34, %v4278_v42  ;;  %v3006_v13 = vld [vmem:[#allocation11 + $0x10] sm:$0xff] }
 0x200   :  { %v4402_v1 = vmul.f32 0.5, %v4284_v54  ;;  %v4405_v27 = vmul.f32 0.5, %v4292_v37  ;;  %v849_v5 = vmul.f32 %v4306_v0, %v848_v62  ;;  %v1405_v59 = vadd.f32 0.0036580483, %v1404_v19 }
 0x201   :  { %v1443_v25 = vadd.f32 0.00028619796, %v1442_v55  ;;  %v4409_v56 = vadd.f32 %v1106_v28, %v4224_v32  ;;  %v4412_v3 = vmul.f32 %v1211_v21, %v4239_v47  ;;  %v1483_v19 = vadd.f32 0.00028619796, %v1482_v33  ;;  %2697 = vmatpush.bf16.msra.mxu2 %v3006_v13 }
 0x202   :  { %5772 = vst [vmem:[#allocation26_spill] sm:$0xff] %v4402_v1  ;;  %v4425_v28 = vmul.f32 0.70710677, %v4394_v24  ;;  %v1329_v34 = vadd.f32 0.18741608, %v1328_v2  ;;  %v1366_v62 = vmul.f32 %v1365_v9, %v4317_v41  ;;  %3101 = vrsqrt.f32 %v4398_v60  ;;  %2746 = vmatpush.bf16.msra.mxu3 %v3014_v45  ;;  %v3005_v9 = vld [vmem:[#allocation11 + $0x8] sm:$0xff] }
 0x203   :  { %v1059_v16 = vpop.f32.mrf.mxu0  ;;  %5773 = vst [vmem:[#allocation27_spill] sm:$0xff] %v4405_v27  ;;  %v1108_v52 = vpop.f32.mrf.mxu1  ;;  %v843_v47 = vsel %vm4418_vm9, %v4286_v15, %v839_v18  ;;  %v4433_v48 = vmul.f32 %v1251_v39, %v4242_v44  ;;  %v1291_v21 = vadd.f32 1.1283791, %v1290_v14  ;;  %v4440_v55 = vmul.f32 0.5, %v4331_v17  ;;  %v3013_v39 = vld [vmem:[#allocation11 + $0x48] sm:$0xff] }
 0x204   :  { %5774 = vst [vmem:[#allocation28_spill] sm:$0xff] %v4412_v3  ;;  %v1520_v61 = vmul.f32 %v4425_v28, %v4425_v28  ;;  %v1406_v15 = vmul.f32 %v1405_v59, %v4324_v53  ;;  %v1444_v18 = vmul.f32 %v1443_v25, %v4364_v7  ;;  %v4449_v44 = vmul.f32 0.70710677, %v4409_v56 }
 0x205   :  { %5777 = vst [vmem:[#allocation29_spill] sm:$0xff] %v4433_v48  ;;  %v4444_v33 = vpop.eup %3099  ;;  %v853_v2 = vsel %vm852_vm10, %v4306_v0, %v849_v5  ;;  %v1484_v17 = vmul.f32 %v1483_v19, %v4382_v30  ;;  %v5779_v13 = vsub.f32 %v4009_v58, %v4220_v26  ;;  %v5780_v59 = vsub.f32 %v4052_v10, %v4236_v31 }
 0x206   :  { %5778 = vst [vmem:[#allocation30_spill] sm:$0xff] %v4440_v55  ;;  %v4453_v14 = vmin.f32 %v1520_v61, 16.0  ;;  %v1330_v54 = vmul.f32 %v1329_v34, %v4289_v49  ;;  %v1367_v37 = vadd.f32 0.05243302, %v1366_v62  ;;  %v4463_v0 = vmul.f32 0.5, %v4341_v36  ;;  %2698 = vmatpush.bf16.msra.mxu2 %v3005_v9  ;;  %2747 = vmatpush.bf16.msra.mxu3 %v3013_v39 }
 0x207   :  { %v886_v45 = vmul.f32 %v843_v47, %v5779_v13  ;;  %v887_v25 = vmul.f32 %v853_v2, %v5780_v59  ;;  %v1560_v5 = vmul.f32 %v4449_v44, %v4449_v44  ;;  %v855_v19 = vmul.f32 %v4444_v33, %v4380_v20  ;;  %v4480_v47 = vld [vmem:[#allocation7] ss:$0 sm:$0xff] }
 0x208   :  { %5781 = vst [vmem:[#allocation31_spill] sm:$0xff] %v4463_v0  ;;  %v1522_v10 = vmul.f32 2.1237322e-06, %v4453_v14  ;;  %v4473_v26 = vadd.f32 %v1059_v16, %v4222_v51  ;;  %v4475_v31 = vpop.eup %3101  ;;  %v1445_v36 = vadd.f32 0.0036580483, %v1444_v18  ;;  %v4484_v2 = vmul.f32 %v1291_v21, %v4267_v6 }
 0x209   :  { %v4477_v34 = vmin.f32 %v1560_v5, 16.0  ;;  %v905_v62 = vmul.f32 %v3923_v29, %v886_v45  ;;  %v906_v61 = vmul.f32 %v4480_v47, %v887_v25  ;;  %v1407_v9 = vadd.f32 0.05243302, %v1406_v15 }
 0x20a   :  { %5782 = vst [vmem:[#allocation32_spill] sm:$0xff] %v4484_v2  ;;  %v1485_v39 = vadd.f32 0.0036580483, %v1484_v17  ;;  %v1523_v13 = vadd.f32 0.00028619796, %v1522_v10  ;;  %v4490_v5 = vadd.f32 %v1108_v52, %v4224_v32  ;;  %v1368_v45 = vmul.f32 %v1367_v37, %v4317_v41  ;;  %v3012_v52 = vld [vmem:[#allocation11 + $0x40] sm:$0xff] }
 0x20b   :  { %v1062_v35 = vpop.f32.mrf.mxu0  ;;  %v1562_v16 = vmul.f32 2.1237322e-06, %v4477_v34  ;;  %v924_v59 = vadd.f32 %v3943_v57, %v905_v62  ;;  %v925_v18 = vadd.f32 %v3943_v57, %v906_v61  ;;  %v1111_v29 = vpop.f32.mrf.mxu1  ;;  %v865_v25 = vmul.f32 %v4475_v31, %v4398_v60  ;;  %v3004_v62 = vld [vmem:[#allocation11] sm:$0xff]  ;;  %2748 = vmatpush.bf16.msra.mxu3 %v3012_v52 }
 0x20c   :  { %v1524_v6 = vmul.f32 %v1523_v13, %v4453_v14  ;;  %v4497_v21 = vmul.f32 0.70710677, %v4473_v26  ;;  %v856_v15 = vmul.f32 %v4444_v33, %v855_v19  ;;  %v1446_v17 = vmul.f32 %v1445_v36, %v4364_v7  ;;  %2699 = vmatpush.bf16.msra.mxu2 %v3004_v62 }
 0x20d   :  { %v1563_v10 = vadd.f32 0.00028619796, %v1562_v16  ;;  %v934_v57 = vpack.c.bf16 %v925_v18, %v924_v59  ;;  %v1331_v61 = vadd.f32 1.1283791, %v1330_v54  ;;  %v1408_v58 = vmul.f32 %v1407_v9, %v4324_v53 }
 0x20e   :  { %5783 = vst [vmem:[#allocation33_spill] sm:$0xff] %v4497_v21  ;;  %v1486_v37 = vmul.f32 %v1485_v39, %v4382_v30  ;;  %v1600_v0 = vmul.f32 %v4497_v21, %v4497_v21  ;;  %v1525_v13 = vadd.f32 0.0036580483, %v1524_v6  ;;  %v4507_v19 = vmul.f32 0.70710677, %v4490_v5 }
 0x20f   :  { %v1564_v27 = vmul.f32 %v1563_v10, %v4477_v34  ;;  %1076 = vmatmul.bf16.gmra.mxu0 %v934_v57  ;;  %1125 = vmatmul.bf16.gmra.mxu1 %v934_v57  ;;  %v4510_v36 = vadd.f32 %v1062_v35, %v4222_v51  ;;  %v1369_v54 = vadd.f32 0.18741608, %v1368_v45  ;;  %v866_v9 = vmul.f32 %v4475_v31, %v865_v25 }
 0x210   :  { %5784 = vst [vmem:[#allocation34_spill] sm:$0xff] %v4507_v19  ;;  %v4513_v59 = vmin.f32 %v1600_v0, 16.0  ;;  %v4516_v39 = vadd.f32 %v1111_v29, %v4224_v32  ;;  %v857_v18 = vmul.f32 0.5, %v856_v15  ;;  %v1447_v6 = vadd.f32 0.05243302, %v1446_v17 }
 0x211   :  { %v1565_v10 = vadd.f32 0.0036580483, %v1564_v27  ;;  %v1640_v57 = vmul.f32 %v4507_v19, %v4507_v19  ;;  %v1487_v55 = vadd.f32 0.05243302, %v1486_v37  ;;  %v4522_v45 = vmul.f32 0.70710677, %v4510_v36 }
 0x212   :  { %v1602_v35 = vmul.f32 2.1237322e-06, %v4513_v59  ;;  %v1526_v29 = vmul.f32 %v1525_v13, %v4453_v14  ;;  %v4532_v27 = vmul.f32 0.70710677, %v4516_v39  ;;  %vm860_vm11 = vweird.f32 %v4380_v20 }
 0x213   :  { %v1064_v16 = vpop.f32.mrf.mxu0  ;;  %5785 = vst [vmem:[#allocation35_spill] sm:$0xff] %v4522_v45  ;;  %v1566_v25 = vmul.f32 %v1565_v10, %v4477_v34  ;;  %v4529_v62 = vmin.f32 %v1640_v57, 16.0  ;;  %vm861_vm12 = vweird.f32 %v4444_v33  ;;  %v867_v15 = vmul.f32 0.5, %v866_v9  ;;  %v1113_v57 = vpop.f32.mrf.mxu1 }
 0x214   :  { %v4525_v0 = vadd.f32 %v1064_v16, %v4222_v51  ;;  %5787 = vst [vmem:[#allocation37_spill] sm:$0xff] %v4532_v27  ;;  %v1603_v17 = vadd.f32 0.00028619796, %v1602_v35  ;;  %v1680_v52 = vmul.f32 %v4522_v45, %v4522_v45  ;;  %v1448_v37 = vmul.f32 %v1447_v6, %v4364_v7  ;;  %vm4578_vm14 = vmor %vm860_vm11, %vm861_vm12 }
 0x215   :  { %5786 = vst [vmem:[#allocation36_spill] sm:$0xff] %v4529_v62  ;;  %v1642_v13 = vmul.f32 2.1237322e-06, %v4529_v62  ;;  %v1720_v16 = vmul.f32 %v4532_v27, %v4532_v27  ;;  %v1409_v1 = vadd.f32 0.18741608, %v1408_v58  ;;  %v858_v19 = vsub.f32 1.5, %v857_v18 }
 0x216   :  { %v4543_v10 = vmul.f32 0.70710677, %v4525_v0  ;;  %v1488_v48 = vmul.f32 %v1487_v55, %v4382_v30  ;;  %v4546_v9 = vmin.f32 %v1680_v52, 16.0  ;;  %v1370_v35 = vmul.f32 %v1369_v54, %v4317_v41 }
 0x217   :  { %v1527_v45 = vadd.f32 0.05243302, %v1526_v29  ;;  %v1567_v2 = vadd.f32 0.05243302, %v1566_v25  ;;  %v1604_v6 = vmul.f32 %v1603_v17, %v4513_v59  ;;  %v4551_v3 = vmul.f32 %v1331_v61, %v4276_v43 }
 0x218   :  { %5788 = vst [vmem:[#allocation38_spill] sm:$0xff] %v4546_v9  ;;  %v868_v27 = vsub.f32 1.5, %v867_v15  ;;  %v1643_v21 = vadd.f32 0.00028619796, %v1642_v13  ;;  %v4554_v49 = vadd.f32 %v1113_v57, %v4224_v32  ;;  %v1449_v58 = vadd.f32 0.18741608, %v1448_v37 }
 0x219   :  { %v4557_v18 = vmul.f32 0.5, %v4394_v24  ;;  %v4559_v55 = vmin.f32 %v1720_v16, 16.0  ;;  %v1760_v54 = vmul.f32 %v4543_v10, %v4543_v10  ;;  %v1410_v29 = vmul.f32 %v1409_v1, %v4324_v53 }
 0x21a   :  { %v859_v25 = vmul.f32 %v4444_v33, %v858_v19  ;;  %v1489_v43 = vadd.f32 0.18741608, %v1488_v48  ;;  %v1682_v61 = vmul.f32 2.1237322e-06, %v4546_v9  ;;  %v1371_v15 = vadd.f32 1.1283791, %v1370_v35 }
 0x21b   :  { %5789 = vst [vmem:[#allocation39_spill] sm:$0xff] %v4557_v18  ;;  %v1528_v17 = vmul.f32 %v1527_v45, %v4453_v14  ;;  %v1568_v52 = vmul.f32 %v1567_v2, %v4477_v34  ;;  %v1605_v37 = vadd.f32 0.0036580483, %v1604_v6  ;;  %v869_v24 = vmul.f32 %v4475_v31, %v868_v27  ;;  %v1116_v57 = vpop.f32.mrf.mxu1 }
 0x21c   :  { %5790 = vst [vmem:[#allocation40_spill] sm:$0xff] %v4559_v55  ;;  %vm871_vm13 = vweird.f32 %v4475_v31  ;;  %v1644_v13 = vmul.f32 %v1643_v21, %v4529_v62  ;;  %v4572_v16 = vmul.f32 0.70710677, %v4554_v49  ;;  %v1450_v48 = vmul.f32 %v1449_v58, %v4364_v7 }
 0x21d   :  { %vm870_vm15 = vweird.f32 %v4398_v60  ;;  %v1722_v2 = vmul.f32 2.1237322e-06, %v4559_v55  ;;  %v4585_v19 = vmin.f32 %v1760_v54, 16.0  ;;  %v1411_v21 = vadd.f32 1.1283791, %v1410_v29 }
 0x21e   :  { %v1490_v45 = vmul.f32 %v1489_v43, %v4382_v30  ;;  %v1683_v27 = vadd.f32 0.00028619796, %v1682_v61  ;;  %v863_v20 = vsel %vm4578_vm14, %v4444_v33, %v859_v25  ;;  %vm4591_vm0 = vmor %vm870_vm15, %vm871_vm13  ;;  %v1529_v35 = vadd.f32 0.18741608, %v1528_v17 }
 0x21f   :  { %v4596_v6 = vmul.f32 0.5, %v4409_v56  ;;  %v1569_v60 = vadd.f32 0.18741608, %v1568_v52  ;;  %v1606_v58 = vmul.f32 %v1605_v37, %v4513_v59  ;;  %v4600_v54 = vmul.f32 %v1371_v15, %v4299_v4 }
 0x220   :  { %v1645_v29 = vadd.f32 0.0036580483, %v1644_v13  ;;  %v1800_v43 = vmul.f32 %v4572_v16, %v4572_v16  ;;  %v873_v33 = vsel %vm4591_vm0, %v4475_v31, %v869_v24  ;;  %v1451_v25 = vadd.f32 1.1283791, %v1450_v48 }
 0x221   :  { %5795 = vst [vmem:[#allocation41_spill] sm:$0xff] %v4596_v6  ;;  %v1723_v61 = vadd.f32 0.00028619796, %v1722_v2  ;;  %v1762_v17 = vmul.f32 2.1237322e-06, %v4585_v19  ;;  %v5796_v56 = vsub.f32 %v4121_v46, %v4314_v11  ;;  %v4612_v37 = vmul.f32 %v1411_v21, %v4304_v38 }
 0x222   :  { %v1491_v4 = vadd.f32 1.1283791, %v1490_v45  ;;  %v1684_v15 = vmul.f32 %v1683_v27, %v4546_v9  ;;  %v5798_v13 = vsub.f32 %v4181_v40, %v4361_v50  ;;  %v1530_v31 = vmul.f32 %v1529_v35, %v4453_v14  ;;  %v1067_v45 = vpop.f32.mrf.mxu0 }
 0x223   :  { %v888_v52 = vmul.f32 %v863_v20, %v5796_v56  ;;  %5797 = vst [vmem:[#allocation42_spill] sm:$0xff] %v4612_v37  ;;  %v1570_v24 = vmul.f32 %v1569_v60, %v4477_v34  ;;  %v1607_v48 = vadd.f32 0.05243302, %v1606_v58  ;;  %v4622_v46 = vmul.f32 0.5, %v4473_v26  ;;  %v3170_v60 = vld [vmem:[#allocation8] ss:$0 sm:$0xff] }
 0x224   :  { %v889_v1 = vmul.f32 %v873_v33, %v5798_v13  ;;  %v1646_v38 = vmul.f32 %v1645_v29, %v4529_v62  ;;  %v4625_v11 = vmin.f32 %v1800_v43, 16.0  ;;  %v4629_v40 = vmul.f32 %v1451_v25, %v4338_v22  ;;  %v5823_v37 = vld [vmem:[#allocation32_spill] sm:$0xff] }
 0x225   :  { %v907_v2 = vmul.f32 %v4480_v47, %v888_v52  ;;  %5799 = vst [vmem:[#allocation43_spill] sm:$0xff] %v4622_v46  ;;  %v4632_v50 = vmul.f32 0.5, %v4490_v5  ;;  %v1724_v27 = vmul.f32 %v1723_v61, %v4559_v55  ;;  %v1763_v20 = vadd.f32 0.00028619796, %v1762_v17  ;;  %v5817_v46 = vld [vmem:[#allocation28_spill] sm:$0xff] }
 0x226   :  { %v908_v21 = vmul.f32 %v4480_v47, %v889_v1  ;;  %5800 = vst [vmem:[#allocation44_spill] sm:$0xff] %v4629_v40  ;;  %v4636_v26 = vmul.f32 %v1491_v4, %v4357_v63  ;;  %v1685_v35 = vadd.f32 0.0036580483, %v1684_v15  ;;  %v1531_v43 = vadd.f32 1.1283791, %v1530_v31 }
 0x227   :  { %5801 = vst [vmem:[#allocation45_spill] sm:$0xff] %v4632_v50  ;;  %v926_v58 = vadd.f32 %v3170_v60, %v907_v2  ;;  %v1571_v47 = vadd.f32 1.1283791, %v1570_v24  ;;  %v1608_v33 = vmul.f32 %v1607_v48, %v4513_v59  ;;  %v4640_v22 = vadd.f32 %v1067_v45, %v4222_v51 }
 0x228   :  { %5802 = vst [vmem:[#allocation46_spill] sm:$0xff] %v4636_v26  ;;  %v927_v29 = vadd.f32 %v3170_v60, %v908_v21  ;;  %v1647_v5 = vadd.f32 0.05243302, %v1646_v38  ;;  %v1802_v25 = vmul.f32 2.1237322e-06, %v4625_v11  ;;  %v4644_v17 = vadd.f32 %v1116_v57, %v4224_v32 }
 0x229   :  { %v4647_v63 = vmul.f32 0.5, %v4510_v36  ;;  %v4650_v56 = vmul.f32 0.5, %v4516_v39  ;;  %v1725_v52 = vadd.f32 0.0036580483, %v1724_v27  ;;  %v1764_v4 = vmul.f32 %v1763_v20, %v4585_v19 }
 0x22a   :  { %v935_v61 = vpack.c.bf16 %v927_v29, %v926_v58  ;;  %v1686_v15 = vmul.f32 %v1685_v35, %v4546_v9  ;;  %v4655_v13 = vmul.f32 0.5, %v4525_v0  ;;  %v4658_v1 = vmul.f32 0.5, %v4554_v49  ;;  %v5809_v29 = vld [vmem:[#allocation21_spill] sm:$0xff] }
 0x22b   :  { %5803 = vst [vmem:[#allocation47_spill] sm:$0xff] %v4647_v63  ;;  %v4661_v31 = vmul.f32 0.70710677, %v4640_v22  ;;  %v4664_v36 = vmul.f32 %v1531_v43, %v4425_v28  ;;  %v4667_v39 = vmul.f32 %v1571_v47, %v4449_v44  ;;  %v1609_v24 = vadd.f32 0.18741608, %v1608_v33 }
 0x22c   :  { %5804 = vst [vmem:[#allocation48_spill] sm:$0xff] %v4650_v56  ;;  %1081 = vmatmul.bf16.gmra.mxu0 %v935_v61  ;;  %1130 = vmatmul.bf16.gmra.mxu1 %v935_v61  ;;  %v4670_v48 = vmul.f32 0.70710677, %v4644_v17  ;;  %v1648_v0 = vmul.f32 %v1647_v5, %v4529_v62  ;;  %v1803_v2 = vadd.f32 0.00028619796, %v1802_v25  ;;  %v1726_v21 = vmul.f32 %v1725_v52, %v4559_v55 }
 0x22d   :  { %5805 = vst [vmem:[#allocation49_spill] sm:$0xff] %v4655_v13  ;;  %v1840_v49 = vmul.f32 %v4661_v31, %v4661_v31  ;;  %v1216_v38 = vadd.f32 0.014752088, %v4387_v23  ;;  %v1765_v45 = vadd.f32 0.0036580483, %v1764_v4  ;;  %v1610_v60 = vmul.f32 %v1609_v24, %v4513_v59 }
 0x22e   :  { %5806 = vst [vmem:[#allocation50_spill] sm:$0xff] %v4658_v1  ;;  %v1880_v28 = vmul.f32 %v4670_v48, %v4670_v48  ;;  %v1293_v44 = vmul.f32 3.8918573e-05, %v4278_v42  ;;  %v1687_v27 = vadd.f32 0.05243302, %v1686_v15  ;;  %v1804_v47 = vmul.f32 %v1803_v2, %v4625_v11 }
 0x22f   :  { %5807 = vst [vmem:[#allocation51_spill] sm:$0xff] %v4664_v36  ;;  %v4680_v20 = vmin.f32 %v1840_v49, 16.0  ;;  %v1217_v57 = vmul.f32 %v1216_v38, %v4251_v12  ;;  %v1253_v35 = vmul.f32 3.8918573e-05, %v4253_v8  ;;  %v1333_v43 = vmul.f32 3.8918573e-05, %v5809_v29 }
 0x230   :  { %5808 = vst [vmem:[#allocation52_spill] sm:$0xff] %v4667_v39  ;;  %v4685_v58 = vmin.f32 %v1880_v28, 16.0  ;;  %v1294_v23 = vadd.f32 0.001143296, %v1293_v44  ;;  %v1373_v15 = vmul.f32 3.8918573e-05, %v4317_v41  ;;  %v1766_v44 = vmul.f32 %v1765_v45, %v4585_v19 }
 0x231   :  { %v1842_v33 = vmul.f32 2.1237322e-06, %v4680_v20  ;;  %v1218_v5 = vadd.f32 0.112945676, %v1217_v57  ;;  %v1254_v25 = vadd.f32 0.001143296, %v1253_v35  ;;  %v1688_v35 = vmul.f32 %v1687_v27, %v4546_v9 }
 0x232   :  { %v1882_v61 = vmul.f32 2.1237322e-06, %v4685_v58  ;;  %v1295_v52 = vmul.f32 %v1294_v23, %v4278_v42  ;;  %v1334_v4 = vadd.f32 0.001143296, %v1333_v43  ;;  %v1727_v49 = vadd.f32 0.05243302, %v1726_v21 }
 0x233   :  { %v1843_v24 = vadd.f32 0.00028619796, %v1842_v33  ;;  %v1219_v38 = vmul.f32 %v1218_v5, %v4251_v12  ;;  %v1255_v28 = vmul.f32 %v1254_v25, %v4253_v8  ;;  %v1374_v57 = vadd.f32 0.001143296, %v1373_v15 }
 0x234   :  { %v1296_v2 = vadd.f32 0.014752088, %v1295_v52  ;;  %v1335_v1 = vmul.f32 %v1334_v4, %v5809_v29  ;;  %v1883_v56 = vadd.f32 0.00028619796, %v1882_v61  ;;  %v1805_v43 = vadd.f32 0.0036580483, %v1804_v47 }
 0x235   :  { %v1220_v13 = vadd.f32 0.4994258, %v1219_v38  ;;  %v1256_v23 = vadd.f32 0.014752088, %v1255_v28  ;;  %v1375_v33 = vmul.f32 %v1374_v57, %v4317_v41  ;;  %v1649_v5 = vadd.f32 0.18741608, %v1648_v0 }
 0x236   :  { %v1297_v63 = vmul.f32 %v1296_v2, %v4278_v42  ;;  %v1336_v21 = vadd.f32 0.014752088, %v1335_v1  ;;  %v1844_v25 = vmul.f32 %v1843_v24, %v4680_v20  ;;  %v1728_v4 = vmul.f32 %v1727_v49, %v4559_v55 }
 0x237   :  { %v1221_v45 = vmul.f32 %v1220_v13, %v4251_v12  ;;  %v1257_v52 = vmul.f32 %v1256_v23, %v4253_v8  ;;  %v1376_v61 = vadd.f32 0.014752088, %v1375_v33  ;;  %v1767_v38 = vadd.f32 0.05243302, %v1766_v44 }
 0x238   :  { %v1298_v15 = vadd.f32 0.112945676, %v1297_v63  ;;  %v1337_v27 = vmul.f32 %v1336_v21, %v5809_v29  ;;  %v1884_v47 = vmul.f32 %v1883_v56, %v4685_v58  ;;  %v1689_v2 = vadd.f32 0.18741608, %v1688_v35 }
 0x239   :  { %v4706_v28 = vadd.f32 1.0, %v1221_v45  ;;  %v1258_v1 = vadd.f32 0.112945676, %v1257_v52  ;;  %v1806_v0 = vmul.f32 %v1805_v43, %v4625_v11  ;;  %v1611_v13 = vadd.f32 1.1283791, %v1610_v60 }
 0x23a   :  { %v1299_v24 = vmul.f32 %v1298_v15, %v4278_v42  ;;  %v1338_v12 = vadd.f32 0.112945676, %v1337_v27  ;;  %v1845_v57 = vadd.f32 0.0036580483, %v1844_v25  ;;  %v1377_v63 = vmul.f32 %v1376_v61, %v4317_v41  ;;  %v5810_v15 = vld [vmem:[#allocation33_spill] sm:$0xff] }
 0x23b   :  { %3103 = vrcp.f32 %v4706_v28  ;;  %v1650_v49 = vmul.f32 %v1649_v5, %v4529_v62  ;;  %v1259_v56 = vmul.f32 %v1258_v1, %v4253_v8  ;;  %v1453_v23 = vmul.f32 3.8918573e-05, %v4364_v7 }
 0x23c   :  { %v1300_v44 = vadd.f32 0.4994258, %v1299_v24  ;;  %v1729_v21 = vadd.f32 0.18741608, %v1728_v4  ;;  %v1768_v35 = vmul.f32 %v1767_v38, %v4585_v19  ;;  %v1885_v43 = vadd.f32 0.0036580483, %v1884_v47 }
 0x23d   :  { %v1339_v33 = vmul.f32 %v1338_v12, %v5809_v29  ;;  %v1690_v60 = vmul.f32 %v1689_v2, %v4546_v9  ;;  %v1807_v25 = vadd.f32 0.05243302, %v1806_v0  ;;  %v1260_v52 = vadd.f32 0.4994258, %v1259_v56 }
 0x23e   :  { %v1301_v45 = vmul.f32 %v1300_v44, %v4278_v42  ;;  %v4720_v27 = vmul.f32 %v1611_v13, %v5810_v15  ;;  %v1846_v5 = vmul.f32 %v1845_v57, %v4680_v20  ;;  %v1378_v1 = vadd.f32 0.112945676, %v1377_v63 }
 0x23f   :  { %v1340_v61 = vadd.f32 0.4994258, %v1339_v33  ;;  %v4723_v24 = vadd.f32 1.1283791, %v1650_v49  ;;  %v1261_v38 = vmul.f32 %v1260_v52, %v4253_v8  ;;  %v1454_v47 = vadd.f32 0.001143296, %v1453_v23  ;;  %v1069_v8 = vpop.f32.mrf.mxu0  ;;  %v1118_v33 = vpop.f32.mrf.mxu1 }
 0x240   :  { %5811 = vst [vmem:[#allocation21_spill] sm:$0xff] %v4720_v27  ;;  %v4725_v4 = vadd.f32 1.0, %v1301_v45  ;;  %v4729_v2 = vmul.f32 %v1729_v21, %v4559_v55  ;;  %v4731_v42 = vadd.f32 0.18741608, %v1768_v35  ;;  %v1886_v0 = vmul.f32 %v1885_v43, %v4685_v58 }
 0x241   :  { %v3104_v12 = vpop.eup %3103  ;;  %v1341_v13 = vmul.f32 %v1340_v61, %v5809_v29  ;;  %v4735_v57 = vadd.f32 1.1283791, %v1690_v60  ;;  %v4738_v63 = vmul.f32 %v1807_v25, %v4625_v11  ;;  %v1847_v44 = vadd.f32 0.05243302, %v1846_v5 }
 0x242   :  { %v1224_v49 = vmul.f32 %v3104_v12, %v4706_v28  ;;  %3105 = vrcp.f32 %v4725_v4  ;;  %v1232_v56 = vand.u32 2147483647, %v4706_v28  ;;  %v1234_v23 = vand.u32 2147483648, %v4706_v28 }
 0x243   :  { %v1379_v21 = vmul.f32 %v1378_v1, %v4317_v41  ;;  %v4745_v43 = vadd.f32 1.0, %v1261_v38  ;;  %v4747_v29 = vadd.f32 1.0, %v1341_v13  ;;  %v1455_v60 = vmul.f32 %v1454_v47, %v4364_v7 }
 0x244   :  { %v1225_v35 = vsub.f32 1.0, %v1224_v49  ;;  %v4750_v25 = vadd.f32 0.05243302, %v1886_v0  ;;  %vm1228_vm1 = vweird.f32 %v4706_v28  ;;  %v1312_v45 = vand.u32 2147483647, %v4725_v4 }
 0x245   :  { %v1314_v52 = vand.u32 2147483648, %v4725_v4  ;;  %vm1229_vm2 = vweird.f32 %v3104_v12  ;;  %3107 = vrcp.f32 %v4745_v43  ;;  %v4757_v5 = vadd.f32 %v1069_v8, %v4222_v51 }
 0x246   :  { %v1226_v15 = vmul.f32 %v3104_v12, %v1225_v35  ;;  %v4760_v61 = vmul.f32 %v1847_v44, %v4680_v20  ;;  %vm4762_vm3 = vcmp.eq.f32.partialorder %v1232_v56, 8.507059e+37  ;;  %v1235_v38 = vor.u32 1.1754944e-38, %v1234_v23  ;;  %vm1230_vm5 = vmor %vm1228_vm1, %vm1229_vm2 }
 0x247   :  { %3109 = vrcp.f32 %v4747_v29  ;;  %vm1308_vm4 = vweird.f32 %v4725_v4  ;;  %v1380_v13 = vadd.f32 0.4994258, %v1379_v21  ;;  %v4768_v49 = vadd.f32 0.014752088, %v1455_v60  ;;  %v1072_v28 = vpop.f32.mrf.mxu0 }
 0x248   :  { %v3106_v47 = vpop.eup %3105  ;;  %v1227_v0 = vadd.f32 %v3104_v12, %v1226_v15  ;;  %vm4773_vm6 = vcmp.eq.f32.partialorder %v1312_v45, 8.507059e+37  ;;  %v1315_v56 = vor.u32 1.1754944e-38, %v1314_v52  ;;  %v1272_v23 = vand.u32 2147483647, %v4745_v43 }
 0x249   :  { %v1304_v8 = vmul.f32 %v3106_v47, %v4725_v4  ;;  %v1274_v35 = vand.u32 2147483648, %v4745_v43  ;;  %v1352_v50 = vand.u32 2147483647, %v4747_v29  ;;  %v1354_v21 = vand.u32 2147483648, %v4747_v29 }
 0x24a   :  { %v1231_v15 = vsel %vm1230_vm5, %v3104_v12, %v1227_v0  ;;  %v4782_v60 = vmul.f32 0.70710677, %v4757_v5  ;;  %vm1268_vm7 = vweird.f32 %v4745_v43  ;;  %v4788_v52 = vadd.f32 %v1118_v33, %v4224_v32 }
 0x24b   :  { %v1236_v45 = vsel %vm4762_vm3, %v1235_v38, %v1231_v15  ;;  %v1305_v6 = vsub.f32 1.0, %v1304_v8  ;;  %v3108_v39 = vpop.eup %3107  ;;  %vm1309_vm8 = vweird.f32 %v3106_v47  ;;  %vm1348_vm9 = vweird.f32 %v4747_v29 }
 0x24c   :  { %5816 = vst [vmem:[#allocation33_spill] sm:$0xff] %v4782_v60  ;;  %v1237_v12 = vmul.f32 %v1236_v45, %v5817_v46  ;;  %v1920_v0 = vmul.f32 %v4782_v60, %v4782_v60  ;;  %v4795_v18 = vadd.f32 %v1072_v28, %v4222_v51  ;;  %v1264_v8 = vmul.f32 %v3108_v39, %v4745_v43  ;;  %v1121_v28 = vpop.f32.mrf.mxu1  ;;  %vm1310_vm13 = vmor %vm1308_vm4, %vm1309_vm8 }
 0x24d   :  { %v3110_v1 = vpop.eup %3109  ;;  %v1306_v38 = vmul.f32 %v3106_v47, %v1305_v6  ;;  %vm4798_vm10 = vcmp.eq.f32.partialorder %v1272_v23, 8.507059e+37  ;;  %v1275_v33 = vor.u32 1.1754944e-38, %v1274_v35  ;;  %vm4803_vm11 = vcmp.eq.f32.partialorder %v1352_v50, 8.507059e+37 }
 0x24e   :  { %v2892_v27 = vclamps-f32 %v1237_v12, 1.0  ;;  %v1344_v46 = vmul.f32 %v3110_v1, %v4747_v29  ;;  %v1355_v55 = vor.u32 1.1754944e-38, %v1354_v21  ;;  %v4807_v9 = vmin.f32 %v1920_v0, 16.0 }
 0x24f   :  { %v1307_v36 = vadd.f32 %v3106_v47, %v1306_v38  ;;  %v1265_v6 = vsub.f32 1.0, %v1264_v8  ;;  %vm1269_vm12 = vweird.f32 %v3108_v39  ;;  %v4810_v23 = vmul.f32 0.70710677, %v4788_v52 }
 0x250   :  { %v1345_v35 = vsub.f32 1.0, %v1344_v46  ;;  %vm1349_vm14 = vweird.f32 %v3110_v1  ;;  %v1922_v50 = vmul.f32 2.1237322e-06, %v4807_v9  ;;  %v4817_v12 = vmul.f32 0.70710677, %v4795_v18  ;;  %vm1270_vm15 = vmor %vm1268_vm7, %vm1269_vm12 }
 0x251   :  { %v1311_v21 = vsel %vm1310_vm13, %v3106_v47, %v1307_v36  ;;  %v1266_v0 = vmul.f32 %v3108_v39, %v1265_v6  ;;  %v1960_v38 = vmul.f32 %v4810_v23, %v4810_v23  ;;  %v4822_v8 = vadd.f32 %v1121_v28, %v4224_v32  ;;  %vm1350_vm0 = vmor %vm1348_vm9, %vm1349_vm14 }
 0x252   :  { %v1316_v60 = vsel %vm4773_vm6, %v1315_v56, %v1311_v21  ;;  %v2480_v4 = vadd.f32 1.0, %v2892_v27  ;;  %v1346_v26 = vmul.f32 %v3110_v1, %v1345_v35  ;;  %v1923_v46 = vadd.f32 0.00028619796, %v1922_v50 }
 0x253   :  { %5822 = vst [vmem:[#allocation28_spill] sm:$0xff] %v4822_v8  ;;  %v1317_v40 = vmul.f32 %v1316_v60, %v5823_v37  ;;  %v1267_v62 = vadd.f32 %v3108_v39, %v1266_v0  ;;  %v4827_v51 = vmin.f32 %v1960_v38, 16.0  ;;  %v2000_v36 = vmul.f32 %v4817_v12, %v4817_v12 }
 0x254   :  { %v1347_v47 = vadd.f32 %v3110_v1, %v1346_v26  ;;  %v1924_v28 = vmul.f32 %v1923_v46, %v4807_v9  ;;  %v4836_v44 = vmul.f32 0.70710677, %v4822_v8  ;;  %v1381_v27 = vmul.f32 %v1380_v13, %v4317_v41  ;;  %v5824_v41 = vld [vmem:[#allocation22_spill] sm:$0xff] }
 0x255   :  { %v2894_v56 = vclamps-f32 %v1317_v40, 1.0  ;;  %v1271_v37 = vsel %vm1270_vm15, %v3108_v39, %v1267_v62  ;;  %v1962_v60 = vmul.f32 2.1237322e-06, %v4827_v51  ;;  %v4843_v6 = vmin.f32 %v2000_v36, 16.0  ;;  %v5825_v62 = vld [vmem:[#allocation29_spill] sm:$0xff] }
 0x256   :  { %v1276_v26 = vsel %vm4798_vm10, %v1275_v33, %v1271_v37  ;;  %v1351_v43 = vsel %vm1350_vm0, %v3110_v1, %v1347_v47  ;;  %v1925_v35 = vadd.f32 0.0036580483, %v1924_v28  ;;  %v2040_v50 = vmul.f32 %v4836_v44, %v4836_v44  ;;  %v5826_v1 = vld [vmem:[#allocation24_spill] sm:$0xff] }
 0x257   :  { %v2482_v21 = vadd.f32 1.0, %v2894_v56  ;;  %v2512_v40 = vmul.f32 %v2480_v4, %v5824_v41  ;;  %v1277_v39 = vmul.f32 %v1276_v26, %v5825_v62  ;;  %v1356_v29 = vsel %vm4803_vm11, %v1355_v55, %v1351_v43 }
 0x258   :  { %v1357_v13 = vmul.f32 %v1356_v29, %v4551_v3  ;;  %v1926_v0 = vmul.f32 %v1925_v35, %v4807_v9  ;;  %v1963_v38 = vadd.f32 0.00028619796, %v1962_v60  ;;  %v2002_v15 = vmul.f32 2.1237322e-06, %v4843_v6 }
 0x259   :  { %v2514_v33 = vmul.f32 %v2482_v21, %v5826_v1  ;;  %v2893_v46 = vclamps-f32 %v1277_v39, 1.0  ;;  %v4857_v36 = vmin.f32 %v2040_v50, 16.0  ;;  %v4859_v47 = vadd.f32 1.0, %v1381_v27  ;;  %v5828_v21 = vld [vmem:[#allocation23_spill] sm:$0xff] }
 0x25a   :  { %v1770_v4 = vmul.f32 %v4731_v42, %v4585_v19  ;;  %v1809_v45 = vadd.f32 0.18741608, %v4738_v63  ;;  %v1888_v3 = vmul.f32 %v4750_v25, %v4685_v58  ;;  %v2895_v55 = vclamps-f32 %v1357_v13, 1.0  ;;  %v5827_v42 = vld [vmem:[#allocation34_spill] sm:$0xff] }
 0x25b   :  { %v1849_v28 = vadd.f32 0.18741608, %v4760_v61  ;;  %v2544_v56 = vpack.c.bf16 %v2514_v33, %v2512_v40  ;;  %v2481_v37 = vadd.f32 1.0, %v2893_v46  ;;  %v1457_v60 = vmul.f32 %v4768_v49, %v4364_v7  ;;  %v5829_v49 = vld [vmem:[#allocation25_spill] sm:$0xff] }
 0x25c   :  { %v2483_v26 = vadd.f32 1.0, %v2895_v55  ;;  %v1927_v43 = vadd.f32 0.05243302, %v1926_v0  ;;  %v1964_v27 = vmul.f32 %v1963_v38, %v4827_v51  ;;  %3111 = vrcp.f32 %v4859_v47  ;;  %v5830_v55 = vld [vmem:[#allocation35_spill] sm:$0xff] }
 0x25d   :  { %v4873_v63 = vmul.f32 %v4723_v24, %v5827_v42  ;;  %v1731_v25 = vadd.f32 1.1283791, %v4729_v2  ;;  %2700 = vmatmul.bf16.vlgmr.msra.gmra.mxu2 %v2544_v56  ;;  %v2003_v35 = vadd.f32 0.00028619796, %v2002_v15  ;;  %v2042_v61 = vmul.f32 2.1237322e-06, %v4857_v36 }
 0x25e   :  { %v1771_v50 = vadd.f32 1.1283791, %v1770_v4  ;;  %v2513_v41 = vmul.f32 %v2481_v37, %v5828_v21  ;;  %v2515_v40 = vmul.f32 %v2483_v26, %v5829_v49  ;;  %v1413_v62 = vmul.f32 3.8918573e-05, %v4324_v53 }
 0x25f   :  { %v1810_v39 = vmul.f32 %v1809_v45, %v4625_v11  ;;  %v1850_v29 = vmul.f32 %v1849_v28, %v4680_v20  ;;  %v1889_v13 = vadd.f32 0.18741608, %v1888_v3  ;;  %v1458_v24 = vadd.f32 0.112945676, %v1457_v60  ;;  %v5831_v28 = vld [vmem:[#allocation37_spill] sm:$0xff] }
 0x260   :  { %v4883_v0 = vmul.f32 0.5, %v4640_v22  ;;  %v2545_v2 = vpack.c.bf16 %v2515_v40, %v2513_v41  ;;  %v1928_v38 = vmul.f32 %v1927_v43, %v4807_v9  ;;  %v1965_v15 = vadd.f32 0.0036580483, %v1964_v27 }
 0x261   :  { %v4887_v1 = vmul.f32 0.5, %v4644_v17  ;;  %v2004_v33 = vmul.f32 %v2003_v35, %v4843_v6  ;;  %v2043_v46 = vadd.f32 0.00028619796, %v2042_v61  ;;  %v1459_v4 = vmul.f32 %v1458_v24, %v4364_v7 }
 0x262   :  { %v3112_v45 = vpop.eup %3111  ;;  %v4893_v3 = vmul.f32 %v4735_v57, %v5830_v55  ;;  %v4896_v22 = vmul.f32 %v1731_v25, %v5831_v28  ;;  %v4899_v56 = vmul.f32 %v1771_v50, %v4543_v10  ;;  %2749 = vmatmul.bf16.vlgmr.msra.gmra.mxu3 %v2545_v2  ;;  %v1414_v37 = vadd.f32 0.001143296, %v1413_v62 }
 0x263   :  { %v1811_v17 = vadd.f32 1.1283791, %v1810_v39  ;;  %v1851_v60 = vadd.f32 1.1283791, %v1850_v29  ;;  %v1890_v26 = vmul.f32 %v1889_v13, %v4685_v58  ;;  %v1384_v43 = vmul.f32 %v3112_v45, %v4859_v47 }
 0x264   :  { %v1929_v27 = vadd.f32 0.18741608, %v1928_v38  ;;  %v1966_v42 = vmul.f32 %v1965_v15, %v4827_v51  ;;  %v1460_v35 = vadd.f32 0.4994258, %v1459_v4  ;;  %v1415_v57 = vmul.f32 %v1414_v37, %v4324_v53 }
 0x265   :  { %v2005_v61 = vadd.f32 0.0036580483, %v2004_v33  ;;  %v2044_v25 = vmul.f32 %v2043_v46, %v4857_v36  ;;  %v1385_v21 = vsub.f32 1.0, %v1384_v43  ;;  %v1493_v10 = vmul.f32 3.8918573e-05, %v4382_v30 }
 0x266   :  { %v1394_v50 = vand.u32 2147483648, %v4859_v47  ;;  %v1461_v41 = vmul.f32 %v1460_v35, %v4364_v7  ;;  %v1416_v49 = vadd.f32 0.014752088, %v1415_v57  ;;  %v1533_v40 = vmul.f32 3.8918573e-05, %v4453_v14 }
 0x267   :  { %v1386_v62 = vmul.f32 %v3112_v45, %v1385_v21  ;;  %vm1389_vm1 = vweird.f32 %v3112_v45  ;;  %v1392_v39 = vand.u32 2147483647, %v4859_v47  ;;  %v1494_v29 = vadd.f32 0.001143296, %v1493_v10 }
 0x268   :  { %v1967_v13 = vadd.f32 0.05243302, %v1966_v42  ;;  %vm1388_vm2 = vweird.f32 %v4859_v47  ;;  %v4912_v24 = vadd.f32 1.0, %v1461_v41  ;;  %v1417_v2 = vmul.f32 %v1416_v49, %v4324_v53 }
 0x269   :  { %v2006_v38 = vmul.f32 %v2005_v61, %v4843_v6  ;;  %v2045_v15 = vadd.f32 0.0036580483, %v2044_v25  ;;  %v1387_v33 = vadd.f32 %v3112_v45, %v1386_v62  ;;  %v1495_v7 = vmul.f32 %v1494_v29, %v4382_v30  ;;  %vm1390_vm3 = vmor %vm1388_vm2, %vm1389_vm1 }
 0x26a   :  { %v4918_v46 = vmul.f32 %v1811_v17, %v4572_v16  ;;  %v1395_v4 = vor.u32 1.1754944e-38, %v1394_v50  ;;  %3113 = vrcp.f32 %v4912_v24  ;;  %v1534_v55 = vadd.f32 0.001143296, %v1533_v40 }
 0x26b   :  { %v1930_v47 = vmul.f32 %v1929_v27, %v4807_v9  ;;  %v1391_v28 = vsel %vm1390_vm3, %v3112_v45, %v1387_v33  ;;  %vm1393_vm4 = vcmp.eq.f32.partialorder %v1392_v39, 8.507059e+37  ;;  %v1418_v37 = vadd.f32 0.112945676, %v1417_v2 }
 0x26c   :  { %v4923_v43 = vmul.f32 %v1851_v60, %v4661_v31  ;;  %v1891_v42 = vadd.f32 1.1283791, %v1890_v26  ;;  %v1396_v35 = vsel %vm1393_vm4, %v1395_v4, %v1391_v28  ;;  %v1496_v57 = vadd.f32 0.014752088, %v1495_v7 }
 0x26d   :  { %v1968_v61 = vmul.f32 %v1967_v13, %v4827_v51  ;;  %v2007_v16 = vadd.f32 0.05243302, %v2006_v38  ;;  %v2046_v17 = vmul.f32 %v2045_v15, %v4857_v36  ;;  %v1419_v25 = vmul.f32 %v1418_v37, %v4324_v53 }
 0x26e   :  { %v1397_v21 = vmul.f32 %v1396_v35, %v4600_v54  ;;  %v1497_v27 = vmul.f32 %v1496_v57, %v4382_v30  ;;  %v1535_v45 = vmul.f32 %v1534_v55, %v4453_v14  ;;  %v1613_v10 = vmul.f32 3.8918573e-05, %v4513_v59  ;;  %v1123_v35 = vpop.f32.mrf.mxu1 }
 0x26f   :  { %v4933_v31 = vmul.f32 0.5, %v4757_v5  ;;  %v4935_v60 = vadd.f32 1.1283791, %v1930_v47  ;;  %v4938_v26 = vmul.f32 0.5, %v4788_v52  ;;  %v1420_v50 = vadd.f32 0.4994258, %v1419_v25 }
 0x270   :  { %v3114_v41 = vpop.eup %3113  ;;  %v4941_v49 = vmul.f32 %v1891_v42, %v4670_v48  ;;  %v1498_v54 = vadd.f32 0.112945676, %v1497_v27  ;;  %v1536_v40 = vadd.f32 0.014752088, %v1535_v45  ;;  %v1614_v62 = vadd.f32 0.001143296, %v1613_v10  ;;  %v1074_v42 = vpop.f32.mrf.mxu0 }
 0x271   :  { %5832 = vst [vmem:[#allocation32_spill] sm:$0xff] %v4938_v26  ;;  %v4943_v39 = vadd.f32 0.18741608, %v1968_v61  ;;  %v4946_v29 = vmul.f32 %v2007_v16, %v4843_v6  ;;  %v1464_v5 = vmul.f32 %v3114_v41, %v4912_v24  ;;  %v1421_v13 = vmul.f32 %v1420_v50, %v4324_v53  ;;  %v5833_v16 = vld [vmem:[#allocation19_spill] sm:$0xff]  ;;  %v5836_v10 = vld [vmem:[#allocation36_spill] sm:$0xff] }
 0x272   :  { %v2047_v2 = vadd.f32 0.05243302, %v2046_v17  ;;  %v2896_v52 = vclamps-f32 %v1397_v21, 1.0  ;;  %v1499_v38 = vmul.f32 %v1498_v54, %v4382_v30  ;;  %v1537_v15 = vmul.f32 %v1536_v40, %v4453_v14 }
 0x273   :  { %v1465_v48 = vsub.f32 1.0, %v1464_v5  ;;  %v1474_v33 = vand.u32 2147483648, %v4912_v24  ;;  %v4953_v7 = vadd.f32 1.0, %v1421_v13  ;;  %v1615_v4 = vmul.f32 %v1614_v62, %v4513_v59 }
 0x274   :  { %vm1468_vm5 = vweird.f32 %v4912_v24  ;;  %v1500_v55 = vadd.f32 0.4994258, %v1499_v38  ;;  %v1538_v47 = vadd.f32 0.112945676, %v1537_v15  ;;  %v1573_v28 = vmul.f32 3.8918573e-05, %v4477_v34 }
 0x275   :  { %v1466_v53 = vmul.f32 %v3114_v41, %v1465_v48  ;;  %vm1469_vm6 = vweird.f32 %v3114_v41  ;;  %v1472_v37 = vand.u32 2147483647, %v4912_v24  ;;  %3115 = vrcp.f32 %v4953_v7  ;;  %v5837_v48 = vld [vmem:[#allocation26_spill] sm:$0xff] }
 0x276   :  { %v2484_v57 = vadd.f32 1.0, %v2896_v52  ;;  %v1501_v61 = vmul.f32 %v1500_v55, %v4382_v30  ;;  %v4962_v17 = vadd.f32 %v1074_v42, %v5833_v16  ;;  %v4965_v25 = vadd.f32 %v1123_v35, %v4224_v32  ;;  %vm1470_vm7 = vmor %vm1468_vm5, %vm1469_vm6 }
 0x277   :  { %v1467_v21 = vadd.f32 %v3114_v41, %v1466_v53  ;;  %v1539_v27 = vmul.f32 %v1538_v47, %v4453_v14  ;;  %v1616_v45 = vadd.f32 0.014752088, %v1615_v4  ;;  %v1653_v50 = vmul.f32 3.8918573e-05, %v5836_v10  ;;  %v5838_v4 = vld [vmem:[#allocation44_spill] sm:$0xff] }
 0x278   :  { %5834 = vst [vmem:[#allocation22_spill] sm:$0xff] %v4962_v17  ;;  %v1475_v54 = vor.u32 1.1754944e-38, %v1474_v33  ;;  %v4971_v40 = vadd.f32 1.0, %v1501_v61  ;;  %v4974_v30 = vmul.f32 0.70710677, %v4962_v17  ;;  %vm1473_vm8 = vcmp.eq.f32.partialorder %v1472_v37, 8.507059e+37 }
 0x279   :  { %5835 = vst [vmem:[#allocation29_spill] sm:$0xff] %v4965_v25  ;;  %v1574_v62 = vadd.f32 0.001143296, %v1573_v28  ;;  %v1471_v5 = vsel %vm1470_vm7, %v3114_v41, %v1467_v21  ;;  %v4977_v13 = vmul.f32 0.70710677, %v4965_v25  ;;  %v4980_v38 = vmul.f32 %v2047_v2, %v4857_v36 }
 0x27a   :  { %v1540_v52 = vadd.f32 0.4994258, %v1539_v27  ;;  %v1476_v15 = vsel %vm1473_vm8, %v1475_v54, %v1471_v5  ;;  %v2516_v24 = vmul.f32 %v2484_v57, %v5837_v48  ;;  %3117 = vrcp.f32 %v4971_v40 }
 0x27b   :  { %v3116_v33 = vpop.eup %3115  ;;  %v1477_v55 = vmul.f32 %v1476_v15, %v5838_v4  ;;  %v2080_v47 = vmul.f32 %v4974_v30, %v4974_v30  ;;  %v2120_v41 = vmul.f32 %v4977_v13, %v4977_v13  ;;  %v1617_v28 = vmul.f32 %v1616_v45, %v4513_v59  ;;  %v5839_v4 = vld [vmem:[#allocation30_spill] sm:$0xff] }
 0x27c   :  { %v1424_v53 = vmul.f32 %v3116_v33, %v4953_v7  ;;  %v1541_v2 = vmul.f32 %v1540_v52, %v4453_v14  ;;  %v1575_v37 = vmul.f32 %v1574_v62, %v4477_v34  ;;  %v1654_v42 = vadd.f32 0.001143296, %v1653_v50 }
 0x27d   :  { %v2898_v35 = vclamps-f32 %v1477_v55, 1.0  ;;  %v1432_v57 = vand.u32 2147483647, %v4953_v7  ;;  %v4994_v61 = vmin.f32 %v2080_v47, 16.0  ;;  %v4996_v21 = vmin.f32 %v2120_v41, 16.0 }
 0x27e   :  { %v1425_v27 = vsub.f32 1.0, %v1424_v53  ;;  %vm1428_vm9 = vweird.f32 %v4953_v7  ;;  %v1434_v54 = vand.u32 2147483648, %v4953_v7  ;;  %v5000_v45 = vadd.f32 1.0, %v1541_v2 }
 0x27f   :  { %v2486_v5 = vadd.f32 1.0, %v2898_v35  ;;  %vm1429_vm10 = vweird.f32 %v3116_v33  ;;  %v2082_v14 = vmul.f32 2.1237322e-06, %v4994_v61  ;;  %v1618_v62 = vadd.f32 0.112945676, %v1617_v28 }
 0x280   :  { %v3118_v50 = vpop.eup %3117  ;;  %v1426_v52 = vmul.f32 %v3116_v33, %v1425_v27  ;;  %v2122_v15 = vmul.f32 2.1237322e-06, %v4996_v21  ;;  %3119 = vrcp.f32 %v5000_v45  ;;  %v1576_v48 = vadd.f32 0.014752088, %v1575_v37  ;;  %vm1430_vm12 = vmor %vm1428_vm9, %vm1429_vm10 }
 0x281   :  { %v2518_v55 = vmul.f32 %v2486_v5, %v5839_v4  ;;  %vm5006_vm11 = vcmp.eq.f32.partialorder %v1432_v57, 8.507059e+37  ;;  %v1504_v41 = vmul.f32 %v3118_v50, %v4971_v40  ;;  %v2083_v53 = vadd.f32 0.00028619796, %v2082_v14 }
 0x282   :  { %v1427_v2 = vadd.f32 %v3116_v33, %v1426_v52  ;;  %v1435_v35 = vor.u32 1.1754944e-38, %v1434_v54  ;;  %v1512_v28 = vand.u32 2147483647, %v4971_v40  ;;  %v1655_v27 = vmul.f32 %v1654_v42, %v5836_v10 }
 0x283   :  { %v2546_v25 = vpack.c.bf16 %v2518_v55, %v2516_v24  ;;  %v1505_v37 = vsub.f32 1.0, %v1504_v41  ;;  %v1514_v57 = vand.u32 2147483648, %v4971_v40  ;;  %v1619_v5 = vmul.f32 %v1618_v62, %v4513_v59  ;;  %v5842_v55 = vld [vmem:[#allocation42_spill] sm:$0xff] }
 0x284   :  { %v1431_v4 = vsel %vm1430_vm12, %v3116_v33, %v1427_v2  ;;  %v2084_v8 = vmul.f32 %v2083_v53, %v4994_v61  ;;  %v2123_v14 = vadd.f32 0.00028619796, %v2122_v15  ;;  %v1577_v54 = vmul.f32 %v1576_v48, %v4477_v34 }
 0x285   :  { %2705 = vmatmul.bf16.gmra.mxu2 %v2546_v25  ;;  %v1436_v42 = vsel %vm5006_vm11, %v1435_v35, %v1431_v4  ;;  %v1506_v24 = vmul.f32 %v3118_v50, %v1505_v37  ;;  %vm1509_vm13 = vweird.f32 %v3118_v50  ;;  %v1620_v52 = vadd.f32 0.4994258, %v1619_v5 }
 0x286   :  { %v3120_v7 = vpop.eup %3119  ;;  %v1437_v41 = vmul.f32 %v1436_v42, %v5842_v55  ;;  %vm1508_vm14 = vweird.f32 %v4971_v40  ;;  %v1578_v17 = vadd.f32 0.112945676, %v1577_v54  ;;  %v1656_v62 = vadd.f32 0.014752088, %v1655_v27  ;;  %v5843_v54 = vld [vmem:[#allocation46_spill] sm:$0xff] }
 0x287   :  { %v1507_v33 = vadd.f32 %v3118_v50, %v1506_v24  ;;  %vm1513_vm15 = vcmp.eq.f32.partialorder %v1512_v28, 8.507059e+37  ;;  %v1515_v53 = vor.u32 1.1754944e-38, %v1514_v57  ;;  %v1544_v15 = vmul.f32 %v3120_v7, %v5000_v45  ;;  %vm1510_vm0 = vmor %vm1508_vm14, %vm1509_vm13 }
 0x288   :  { %v2085_v25 = vadd.f32 0.0036580483, %v2084_v8  ;;  %v2124_v48 = vmul.f32 %v2123_v14, %v4996_v21  ;;  %v1621_v47 = vmul.f32 %v1620_v52, %v4513_v59  ;;  %v1579_v2 = vmul.f32 %v1578_v17, %v4477_v34  ;;  %v5844_v59 = vld [vmem:[#allocation33_spill] sm:$0xff] }
 0x289   :  { %v2897_v35 = vclamps-f32 %v1437_v41, 1.0  ;;  %v1511_v37 = vsel %vm1510_vm0, %v3118_v50, %v1507_v33  ;;  %v1545_v5 = vsub.f32 1.0, %v1544_v15  ;;  %v1552_v40 = vand.u32 2147483647, %v5000_v45 }
 0x28a   :  { %v1516_v4 = vsel %vm1513_vm15, %v1515_v53, %v1511_v37  ;;  %v1554_v27 = vand.u32 2147483648, %v5000_v45  ;;  %v5030_v28 = vadd.f32 1.0, %v1621_v47  ;;  %v1657_v57 = vmul.f32 %v1656_v62, %v5836_v10 }
 0x28b   :  { %v1517_v8 = vmul.f32 %v1516_v4, %v5843_v54  ;;  %v1546_v42 = vmul.f32 %v3120_v7, %v1545_v5  ;;  %vm1549_vm1 = vweird.f32 %v3120_v7  ;;  %v1580_v14 = vadd.f32 0.4994258, %v1579_v2  ;;  %v5845_v5 = vld [vmem:[#allocation27_spill] sm:$0xff] }
 0x28c   :  { %v5036_v17 = vmul.f32 %v4935_v60, %v5844_v59  ;;  %v2086_v50 = vmul.f32 %v2085_v25, %v4994_v61  ;;  %v2125_v24 = vadd.f32 0.0036580483, %v2124_v48  ;;  %3121 = vrcp.f32 %v5030_v28  ;;  %v5846_v4 = vld [vmem:[#allocation31_spill] sm:$0xff] }
 0x28d   :  { %v2899_v52 = vclamps-f32 %v1517_v8, 1.0  ;;  %v2485_v55 = vadd.f32 1.0, %v2897_v35  ;;  %v1547_v41 = vadd.f32 %v3120_v7, %v1546_v42  ;;  %vm1548_vm2 = vweird.f32 %v5000_v45 }
 0x28e   :  { %v2009_v62 = vadd.f32 0.18741608, %v4946_v29  ;;  %vm1550_vm3 = vmor %vm1548_vm2, %vm1549_vm1  ;;  %v1555_v33 = vor.u32 1.1754944e-38, %v1554_v27  ;;  %v1581_v53 = vmul.f32 %v1580_v14, %v4477_v34  ;;  %v1658_v15 = vadd.f32 0.112945676, %v1657_v57 }
 0x28f   :  { %v2049_v60 = vadd.f32 0.18741608, %v4980_v38  ;;  %v2487_v47 = vadd.f32 1.0, %v2899_v52  ;;  %v1551_v2 = vsel %vm1550_vm3, %v3120_v7, %v1547_v41  ;;  %vm1553_vm4 = vcmp.eq.f32.partialorder %v1552_v40, 8.507059e+37  ;;  %v5847_v7 = vld [vmem:[#allocation51_spill] sm:$0xff] }
 0x290   :  { %v2087_v25 = vadd.f32 0.05243302, %v2086_v50  ;;  %v2126_v48 = vmul.f32 %v2125_v24, %v4996_v21  ;;  %v1556_v37 = vsel %vm1553_vm4, %v1555_v33, %v1551_v2  ;;  %v5045_v35 = vadd.f32 1.0, %v1581_v53 }
 0x291   :  { %v2517_v45 = vmul.f32 %v2485_v55, %v5845_v5  ;;  %v2519_v29 = vmul.f32 %v2487_v47, %v5846_v4  ;;  %v1632_v27 = vand.u32 2147483647, %v5030_v28  ;;  %v1659_v34 = vmul.f32 %v1658_v15, %v5836_v10  ;;  %v5851_v47 = vld [vmem:[#allocation40_spill] sm:$0xff] }
 0x292   :  { %v3122_v57 = vpop.eup %3121  ;;  %v5053_v38 = vmul.f32 %v4943_v39, %v4827_v51  ;;  %v1557_v40 = vmul.f32 %v1556_v37, %v5847_v7  ;;  %v1634_v54 = vand.u32 2147483648, %v5030_v28  ;;  %3123 = vrcp.f32 %v5045_v35 }
 0x293   :  { %v5059_v8 = vmul.f32 %v2009_v62, %v4843_v6  ;;  %v5062_v42 = vmul.f32 %v2049_v60, %v4857_v36  ;;  %v2547_v14 = vpack.c.bf16 %v2519_v29, %v2517_v45  ;;  %v1624_v59 = vmul.f32 %v3122_v57, %v5030_v28  ;;  %v5850_v62 = vld [vmem:[#allocation38_spill] sm:$0xff] }
 0x294   :  { %v5066_v50 = vmul.f32 %v2087_v25, %v4994_v61  ;;  %v5068_v39 = vadd.f32 0.05243302, %v2126_v48  ;;  %vm1628_vm5 = vweird.f32 %v5030_v28  ;;  %v1592_v24 = vand.u32 2147483647, %v5045_v35 }
 0x295   :  { %2754 = vmatmul.bf16.gmra.mxu3 %v2547_v14  ;;  %v1625_v52 = vsub.f32 1.0, %v1624_v59  ;;  %vm5072_vm6 = vcmp.eq.f32.partialorder %v1632_v27, 8.507059e+37  ;;  %v1660_v41 = vadd.f32 0.4994258, %v1659_v34  ;;  %v1693_v33 = vmul.f32 3.8918573e-05, %v5850_v62 }
 0x296   :  { %v2900_v53 = vclamps-f32 %v1557_v40, 1.0  ;;  %v1635_v15 = vor.u32 1.1754944e-38, %v1634_v54  ;;  %v1773_v60 = vmul.f32 3.8918573e-05, %v4585_v19  ;;  %v1733_v2 = vmul.f32 3.8918573e-05, %v5851_v47 }
 0x297   :  { %v1626_v25 = vmul.f32 %v3122_v57, %v1625_v52  ;;  %vm1629_vm7 = vweird.f32 %v3122_v57  ;;  %v1661_v48 = vmul.f32 %v1660_v41, %v5836_v10  ;;  %v1694_v37 = vadd.f32 0.001143296, %v1693_v33 }
 0x298   :  { %v3124_v5 = vpop.eup %3123  ;;  %vm1588_vm8 = vweird.f32 %v5045_v35  ;;  %v1774_v45 = vadd.f32 0.001143296, %v1773_v60  ;;  %v1734_v4 = vadd.f32 0.001143296, %v1733_v2  ;;  %v1813_v29 = vmul.f32 3.8918573e-05, %v4625_v11  ;;  %vm1630_vm9 = vmor %vm1628_vm5, %vm1629_vm7 }
 0x299   :  { %v1627_v27 = vadd.f32 %v3122_v57, %v1626_v25  ;;  %v1584_v34 = vmul.f32 %v3124_v5, %v5045_v35  ;;  %v1594_v7 = vand.u32 2147483648, %v5045_v35  ;;  %v5084_v40 = vadd.f32 1.0, %v1661_v48  ;;  %v5854_v25 = vld [vmem:[#allocation21_spill] sm:$0xff]  ;;  %v5856_v35 = vld [vmem:[#allocation43_spill] sm:$0xff] }
 0x29a   :  { %v1695_v10 = vmul.f32 %v1694_v37, %v5850_v62  ;;  %v1775_v54 = vmul.f32 %v1774_v45, %v4585_v19  ;;  %v1735_v14 = vmul.f32 %v1734_v4, %v5851_v47  ;;  %v1814_v59 = vadd.f32 0.001143296, %v1813_v29 }
 0x29b   :  { %v1631_v52 = vsel %vm1630_vm9, %v3122_v57, %v1627_v27  ;;  %v1585_v41 = vsub.f32 1.0, %v1584_v34  ;;  %vm5091_vm10 = vcmp.eq.f32.partialorder %v1592_v24, 8.507059e+37  ;;  %3125 = vrcp.f32 %v5084_v40 }
 0x29c   :  { %v1636_v60 = vsel %vm5072_vm6, %v1635_v15, %v1631_v52  ;;  %v2488_v28 = vadd.f32 1.0, %v2900_v53  ;;  %vm1589_vm11 = vweird.f32 %v3124_v5  ;;  %v1696_v2 = vadd.f32 0.014752088, %v1695_v10  ;;  %v5855_v15 = vld [vmem:[#allocation39_spill] sm:$0xff] }
 0x29d   :  { %v1637_v48 = vmul.f32 %v1636_v60, %v5854_v25  ;;  %v1586_v37 = vmul.f32 %v3124_v5, %v1585_v41  ;;  %v1776_v45 = vadd.f32 0.014752088, %v1775_v54  ;;  %v1736_v4 = vadd.f32 0.014752088, %v1735_v14  ;;  %vm1590_vm12 = vmor %vm1588_vm8, %vm1589_vm11 }
 0x29e   :  { %v1595_v29 = vor.u32 1.1754944e-38, %v1594_v7  ;;  %v1672_v57 = vand.u32 2147483647, %v5084_v40  ;;  %v1697_v24 = vmul.f32 %v1696_v2, %v5850_v62  ;;  %v1815_v27 = vmul.f32 %v1814_v59, %v4625_v11 }
 0x29f   :  { %v2902_v34 = vclamps-f32 %v1637_v48, 1.0  ;;  %v1587_v26 = vadd.f32 %v3124_v5, %v1586_v37  ;;  %v1777_v55 = vmul.f32 %v1776_v45, %v4585_v19  ;;  %v1737_v53 = vmul.f32 %v1736_v4, %v5851_v47  ;;  %v5857_v4 = vld [vmem:[#allocation52_spill] sm:$0xff] }
 0x2a0   :  { %v2520_v10 = vmul.f32 %v2488_v28, %v5855_v15  ;;  %v1698_v54 = vadd.f32 0.112945676, %v1697_v24  ;;  %v1816_v7 = vadd.f32 0.014752088, %v1815_v27  ;;  %v1853_v14 = vmul.f32 3.8918573e-05, %v4680_v20 }
 0x2a1   :  { %v3126_v52 = vpop.eup %3125  ;;  %v2490_v41 = vadd.f32 1.0, %v2902_v34  ;;  %v1591_v60 = vsel %vm1590_vm12, %v3124_v5, %v1587_v26  ;;  %v1778_v59 = vadd.f32 0.112945676, %v1777_v55  ;;  %v1738_v2 = vadd.f32 0.112945676, %v1737_v53 }
 0x2a2   :  { %v1596_v25 = vsel %vm5091_vm10, %v1595_v29, %v1591_v60  ;;  %v1664_v48 = vmul.f32 %v3126_v52, %v5084_v40  ;;  %v1674_v28 = vand.u32 2147483648, %v5084_v40  ;;  %v1699_v37 = vmul.f32 %v1698_v54, %v5850_v62 }
 0x2a3   :  { %v2522_v45 = vmul.f32 %v2490_v41, %v5856_v35  ;;  %v1597_v24 = vmul.f32 %v1596_v25, %v5857_v4  ;;  %v1779_v27 = vmul.f32 %v1778_v59, %v4585_v19  ;;  %v1739_v34 = vmul.f32 %v1738_v2, %v5851_v47 }
 0x2a4   :  { %v1665_v26 = vsub.f32 1.0, %v1664_v48  ;;  %v1700_v5 = vadd.f32 0.4994258, %v1699_v37  ;;  %v1817_v55 = vmul.f32 %v1816_v7, %v4625_v11  ;;  %v1854_v33 = vadd.f32 0.001143296, %v1853_v14 }
 0x2a5   :  { %v2548_v29 = vpack.c.bf16 %v2522_v45, %v2520_v10  ;;  %vm1669_vm13 = vweird.f32 %v3126_v52  ;;  %v1780_v53 = vadd.f32 0.4994258, %v1779_v27  ;;  %v1740_v15 = vadd.f32 0.4994258, %v1739_v34 }
 0x2a6   :  { %v2901_v60 = vclamps-f32 %v1597_v24, 1.0  ;;  %v1666_v32 = vmul.f32 %v3126_v52, %v1665_v26  ;;  %v1701_v54 = vmul.f32 %v1700_v5, %v5850_v62  ;;  %v1818_v41 = vadd.f32 0.112945676, %v1817_v55  ;;  %v5858_v5 = vld [vmem:[#allocation41_spill] sm:$0xff] }
 0x2a7   :  { %2710 = vmatmul.bf16.gmra.mxu2 %v2548_v29  ;;  %v1781_v25 = vmul.f32 %v1780_v53, %v4585_v19  ;;  %v1741_v59 = vmul.f32 %v1740_v15, %v5851_v47  ;;  %v1855_v2 = vmul.f32 %v1854_v33, %v4680_v20  ;;  %v1933_v48 = vmul.f32 3.8918573e-05, %v4807_v9 }
 0x2a8   :  { %v2128_v10 = vmul.f32 %v5068_v39, %v4996_v21  ;;  %v1667_v7 = vadd.f32 %v3126_v52, %v1666_v32  ;;  %vm1668_vm14 = vweird.f32 %v5084_v40  ;;  %v5127_v14 = vadd.f32 1.0, %v1701_v54 }
 0x2a9   :  { %vm1670_vm15 = vmor %vm1668_vm14, %vm1669_vm13  ;;  %vm1673_vm0 = vcmp.eq.f32.partialorder %v1672_v57, 8.507059e+37  ;;  %v1675_v62 = vor.u32 1.1754944e-38, %v1674_v28  ;;  %v5130_v37 = vadd.f32 1.0, %v1781_v25  ;;  %v5132_v19 = vadd.f32 1.0, %v1741_v59 }
 0x2aa   :  { %v1671_v47 = vsel %vm1670_vm15, %v3126_v52, %v1667_v7  ;;  %v2489_v35 = vadd.f32 1.0, %v2901_v60  ;;  %3127 = vrcp.f32 %v5127_v14  ;;  %v1819_v45 = vmul.f32 %v1818_v41, %v4625_v11 }
 0x2ab   :  { %v1676_v39 = vsel %vm1673_vm0, %v1675_v62, %v1671_v47  ;;  %3129 = vrcp.f32 %v5130_v37  ;;  %v1856_v32 = vadd.f32 0.014752088, %v1855_v2  ;;  %v1934_v40 = vadd.f32 0.001143296, %v1933_v48 }
 0x2ac   :  { %v5138_v4 = vadd.f32 1.1283791, %v5053_v38  ;;  %v5141_v57 = vadd.f32 1.1283791, %v5059_v8  ;;  %v1677_v28 = vmul.f32 %v1676_v39, %v4873_v63  ;;  %v1714_v52 = vand.u32 2147483648, %v5127_v14 }
 0x2ad   :  { %v5146_v24 = vadd.f32 1.1283791, %v5062_v42  ;;  %v5149_v27 = vadd.f32 0.18741608, %v5066_v50  ;;  %v1712_v34 = vand.u32 2147483647, %v5127_v14  ;;  %3131 = vrcp.f32 %v5132_v19 }
 0x2ae   :  { %v5153_v26 = vadd.f32 0.18741608, %v2128_v10  ;;  %v2903_v38 = vclamps-f32 %v1677_v28, 1.0  ;;  %v2521_v8 = vmul.f32 %v2489_v35, %v5858_v5  ;;  %v1792_v55 = vand.u32 2147483647, %v5130_v37  ;;  %v5861_v10 = vld [vmem:[#allocation45_spill] sm:$0xff] }
 0x2af   :  { %vm1708_vm1 = vweird.f32 %v5127_v14  ;;  %v1820_v63 = vadd.f32 0.4994258, %v1819_v45  ;;  %v1857_v42 = vmul.f32 %v1856_v32, %v4680_v20  ;;  %v1935_v33 = vmul.f32 %v1934_v40, %v4807_v9 }
 0x2b0   :  { %v3128_v50 = vpop.eup %3127  ;;  %v2491_v29 = vadd.f32 1.0, %v2903_v38  ;;  %v1715_v53 = vor.u32 1.1754944e-38, %v1714_v52  ;;  %vm1788_vm2 = vweird.f32 %v5130_v37  ;;  %v1794_v15 = vand.u32 2147483648, %v5130_v37 }
 0x2b1   :  { %v1893_v60 = vmul.f32 3.8918573e-05, %v4685_v58  ;;  %v3130_v54 = vpop.eup %3129  ;;  %v1704_v41 = vmul.f32 %v3128_v50, %v5127_v14  ;;  %vm5164_vm3 = vcmp.eq.f32.partialorder %v1712_v34, 8.507059e+37  ;;  %v1752_v59 = vand.u32 2147483647, %v5132_v19 }
 0x2b2   :  { %v1821_v2 = vmul.f32 %v1820_v63, %v4625_v11  ;;  %v1858_v48 = vadd.f32 0.112945676, %v1857_v42  ;;  %v2523_v7 = vmul.f32 %v2491_v29, %v5861_v10  ;;  %v1784_v62 = vmul.f32 %v3130_v54, %v5130_v37 }
 0x2b3   :  { %vm5172_vm4 = vcmp.eq.f32.partialorder %v1792_v55, 8.507059e+37  ;;  %vm1748_vm5 = vweird.f32 %v5132_v19  ;;  %v1754_v35 = vand.u32 2147483648, %v5132_v19  ;;  %v1936_v45 = vadd.f32 0.014752088, %v1935_v33  ;;  %v3132_v39 = vpop.eup %3131 }
 0x2b4   :  { %v1705_v32 = vsub.f32 1.0, %v1704_v41  ;;  %v5178_v40 = vadd.f32 1.0, %v1821_v2  ;;  %v1859_v11 = vmul.f32 %v1858_v48, %v4680_v20  ;;  %v1894_v28 = vadd.f32 0.001143296, %v1893_v60 }
 0x2b5   :  { %v2549_v52 = vpack.c.bf16 %v2523_v7, %v2521_v8  ;;  %v1785_v34 = vsub.f32 1.0, %v1784_v62  ;;  %v1795_v38 = vor.u32 1.1754944e-38, %v1794_v15  ;;  %v1744_v5 = vmul.f32 %v3132_v39, %v5132_v19 }
 0x2b6   :  { %v1706_v55 = vmul.f32 %v3128_v50, %v1705_v32  ;;  %vm1709_vm6 = vweird.f32 %v3128_v50  ;;  %vm5182_vm7 = vcmp.eq.f32.partialorder %v1752_v59, 8.507059e+37  ;;  %3133 = vrcp.f32 %v5178_v40 }
 0x2b7   :  { %2759 = vmatmul.bf16.gmra.mxu3 %v2549_v52  ;;  %v1786_v42 = vmul.f32 %v3130_v54, %v1785_v34  ;;  %vm1789_vm8 = vweird.f32 %v3130_v54  ;;  %v1745_v33 = vsub.f32 1.0, %v1744_v5  ;;  %v1860_v29 = vadd.f32 0.4994258, %v1859_v11  ;;  %vm1710_vm9 = vmor %vm1708_vm1, %vm1709_vm6 }
 0x2b8   :  { %v1707_v41 = vadd.f32 %v3128_v50, %v1706_v55  ;;  %v1755_v60 = vor.u32 1.1754944e-38, %v1754_v35  ;;  %v1937_v8 = vmul.f32 %v1936_v45, %v4807_v9  ;;  %v1895_v15 = vmul.f32 %v1894_v28, %v4685_v58  ;;  %vm1790_vm11 = vmor %vm1788_vm2, %vm1789_vm8 }
 0x2b9   :  { %v1787_v59 = vadd.f32 %v3130_v54, %v1786_v42  ;;  %v1746_v2 = vmul.f32 %v3132_v39, %v1745_v33  ;;  %vm1749_vm10 = vweird.f32 %v3132_v39  ;;  %v1861_v48 = vmul.f32 %v1860_v29, %v4680_v20 }
 0x2ba   :  { %v1711_v10 = vsel %vm1710_vm9, %v3128_v50, %v1707_v41  ;;  %v1938_v7 = vadd.f32 0.112945676, %v1937_v8  ;;  %v1896_v62 = vadd.f32 0.014752088, %v1895_v15  ;;  %v1973_v35 = vmul.f32 3.8918573e-05, %v4827_v51  ;;  %vm1750_vm12 = vmor %vm1748_vm5, %vm1749_vm10 }
 0x2bb   :  { %v1716_v45 = vsel %vm5164_vm3, %v1715_v53, %v1711_v10  ;;  %v1791_v32 = vsel %vm1790_vm11, %v3130_v54, %v1787_v59  ;;  %v1747_v11 = vadd.f32 %v3132_v39, %v1746_v2  ;;  %v5197_v14 = vadd.f32 1.0, %v1861_v48  ;;  %v5868_v59 = vld [vmem:[#allocation47_spill] sm:$0xff]  ;;  %v5869_v48 = vld [vmem:[#allocation49_spill] sm:$0xff] }
 0x2bc   :  { %v3134_v28 = vpop.eup %3133  ;;  %v1717_v52 = vmul.f32 %v1716_v45, %v4893_v3  ;;  %v1796_v20 = vsel %vm5172_vm4, %v1795_v38, %v1791_v32  ;;  %v1939_v37 = vmul.f32 %v1938_v7, %v4807_v9  ;;  %v1897_v50 = vmul.f32 %v1896_v62, %v4685_v58 }
 0x2bd   :  { %v1797_v25 = vmul.f32 %v1796_v20, %v4899_v56  ;;  %v1751_v53 = vsel %vm1750_vm12, %v3132_v39, %v1747_v11  ;;  %v1824_v54 = vmul.f32 %v3134_v28, %v5178_v40  ;;  %v1832_v34 = vand.u32 2147483647, %v5178_v40 }
 0x2be   :  { %v2904_v5 = vclamps-f32 %v1717_v52, 1.0  ;;  %v1756_v3 = vsel %vm5182_vm7, %v1755_v60, %v1751_v53  ;;  %v1834_v47 = vand.u32 2147483648, %v5178_v40  ;;  %3135 = vrcp.f32 %v5197_v14 }
 0x2bf   :  { %v2906_v19 = vclamps-f32 %v1797_v25, 1.0  ;;  %v1757_v38 = vmul.f32 %v1756_v3, %v4896_v22  ;;  %v1825_v55 = vsub.f32 1.0, %v1824_v54  ;;  %v1974_v42 = vadd.f32 0.001143296, %v1973_v35 }
 0x2c0   :  { %v2492_v33 = vadd.f32 1.0, %v2904_v5  ;;  %vm1828_vm13 = vweird.f32 %v5178_v40  ;;  %v1940_v56 = vadd.f32 0.4994258, %v1939_v37  ;;  %v1898_v39 = vadd.f32 0.112945676, %v1897_v50 }
 0x2c1   :  { %v2494_v29 = vadd.f32 1.0, %v2906_v19  ;;  %v1826_v41 = vmul.f32 %v3134_v28, %v1825_v55  ;;  %vm1829_vm14 = vweird.f32 %v3134_v28  ;;  %vm5215_vm15 = vcmp.eq.f32.partialorder %v1832_v34, 8.507059e+37 }
 0x2c2   :  { %v1835_v60 = vor.u32 1.1754944e-38, %v1834_v47  ;;  %v1872_v8 = vand.u32 2147483647, %v5197_v14  ;;  %v1941_v15 = vmul.f32 %v1940_v56, %v4807_v9  ;;  %v1899_v22 = vmul.f32 %v1898_v39, %v4685_v58  ;;  %vm1830_vm0 = vmor %vm1828_vm13, %vm1829_vm14 }
 0x2c3   :  { %v2524_v2 = vmul.f32 %v2492_v33, %v5868_v59  ;;  %v2526_v10 = vmul.f32 %v2494_v29, %v5869_v48  ;;  %v2905_v7 = vclamps-f32 %v1757_v38, 1.0  ;;  %v1827_v62 = vadd.f32 %v3134_v28, %v1826_v41  ;;  %v5872_v29 = vld [vmem:[#allocation48_spill] sm:$0xff]  ;;  %v5873_v59 = vld [vmem:[#allocation50_spill] sm:$0xff] }
 0x2c4   :  { %v3136_v35 = vpop.eup %3135  ;;  %v5226_v45 = vadd.f32 1.0, %v1941_v15  ;;  %v1900_v32 = vadd.f32 0.4994258, %v1899_v22  ;;  %v1975_v11 = vmul.f32 %v1974_v42, %v4827_v51  ;;  %v2013_v52 = vmul.f32 3.8918573e-05, %v4843_v6 }
 0x2c5   :  { %v2550_v9 = vpack.c.bf16 %v2526_v10, %v2524_v2  ;;  %v1831_v20 = vsel %vm1830_vm0, %v3134_v28, %v1827_v62  ;;  %v1864_v37 = vmul.f32 %v3136_v35, %v5197_v14  ;;  %v1874_v50 = vand.u32 2147483648, %v5197_v14 }
 0x2c6   :  { %v5234_v25 = vmul.f32 %v5149_v27, %v4994_v61  ;;  %v1836_v40 = vsel %vm5215_vm15, %v1835_v60, %v1831_v20  ;;  %vm1868_vm1 = vweird.f32 %v5197_v14  ;;  %3137 = vrcp.f32 %v5226_v45 }
 0x2c7   :  { %2715 = vmatmul.bf16.gmra.mxu2 %v2550_v9  ;;  %v1837_v53 = vmul.f32 %v1836_v40, %v4918_v46  ;;  %v2493_v54 = vadd.f32 1.0, %v2905_v7  ;;  %v1865_v28 = vsub.f32 1.0, %v1864_v37  ;;  %vm5241_vm2 = vcmp.eq.f32.partialorder %v1872_v8, 8.507059e+37 }
 0x2c8   :  { %v1901_v5 = vmul.f32 %v1900_v32, %v4685_v58  ;;  %v1976_v27 = vadd.f32 0.014752088, %v1975_v11  ;;  %v2014_v3 = vadd.f32 0.001143296, %v2013_v52  ;;  %v2093_v47 = vmul.f32 3.8918573e-05, %v4994_v61 }
 0x2c9   :  { %v2907_v19 = vclamps-f32 %v1837_v53, 1.0  ;;  %v1866_v38 = vmul.f32 %v3136_v35, %v1865_v28  ;;  %vm1869_vm3 = vweird.f32 %v3136_v35  ;;  %v1875_v55 = vor.u32 1.1754944e-38, %v1874_v50 }
 0x2ca   :  { %v1952_v42 = vand.u32 2147483647, %v5226_v45  ;;  %v1954_v46 = vand.u32 2147483648, %v5226_v45  ;;  %v5249_v33 = vadd.f32 1.0, %v1901_v5  ;;  %v1977_v56 = vmul.f32 %v1976_v27, %v4827_v51  ;;  %vm1870_vm4 = vmor %vm1868_vm1, %vm1869_vm3 }
 0x2cb   :  { %v2495_v39 = vadd.f32 1.0, %v2907_v19  ;;  %v2525_v41 = vmul.f32 %v2493_v54, %v5872_v29  ;;  %v1867_v58 = vadd.f32 %v3136_v35, %v1866_v38  ;;  %v2015_v63 = vmul.f32 %v2014_v3, %v4843_v6 }
 0x2cc   :  { %v3138_v60 = vpop.eup %3137  ;;  %3139 = vrcp.f32 %v5249_v33  ;;  %v2094_v8 = vadd.f32 0.001143296, %v2093_v47  ;;  %v2053_v15 = vmul.f32 3.8918573e-05, %v4857_v36  ;;  %v2133_v22 = vmul.f32 3.8918573e-05, %v4996_v21 }
 0x2cd   :  { %v2527_v2 = vmul.f32 %v2495_v39, %v5873_v59  ;;  %v1871_v48 = vsel %vm1870_vm4, %v3136_v35, %v1867_v58  ;;  %v1944_v10 = vmul.f32 %v3138_v60, %v5226_v45  ;;  %vm1948_vm5 = vweird.f32 %v5226_v45 }
 0x2ce   :  { %v1876_v7 = vsel %vm5241_vm2, %v1875_v55, %v1871_v48  ;;  %vm5264_vm6 = vcmp.eq.f32.partialorder %v1952_v42, 8.507059e+37  ;;  %v1955_v62 = vor.u32 1.1754944e-38, %v1954_v46  ;;  %v1978_v32 = vadd.f32 0.112945676, %v1977_v56 }
 0x2cf   :  { %v2551_v11 = vpack.c.bf16 %v2527_v2, %v2525_v41  ;;  %v1877_v52 = vmul.f32 %v1876_v7, %v4923_v43  ;;  %v1945_v9 = vsub.f32 1.0, %v1944_v10  ;;  %v2016_v20 = vadd.f32 0.014752088, %v2015_v63 }
 0x2d0   :  { %v1979_v35 = vmul.f32 %v1978_v32, %v4827_v51  ;;  %v2095_v37 = vmul.f32 %v2094_v8, %v4994_v61  ;;  %v2054_v50 = vadd.f32 0.001143296, %v2053_v15  ;;  %v2134_v40 = vadd.f32 0.001143296, %v2133_v22 }
 0x2d1   :  { %2764 = vmatmul.bf16.gmra.mxu3 %v2551_v11  ;;  %v1946_v53 = vmul.f32 %v3138_v60, %v1945_v9  ;;  %vm1949_vm7 = vweird.f32 %v3138_v60  ;;  %v1912_v54 = vand.u32 2147483647, %v5249_v33  ;;  %v2017_v28 = vmul.f32 %v2016_v20, %v4843_v6 }
 0x2d2   :  { %v3140_v34 = vpop.eup %3139  ;;  %v1980_v5 = vadd.f32 0.4994258, %v1979_v35  ;;  %v2096_v27 = vadd.f32 0.014752088, %v2095_v37  ;;  %v2055_v43 = vmul.f32 %v2054_v50, %v4857_v36  ;;  %v2135_v3 = vmul.f32 %v2134_v40, %v4996_v21  ;;  %vm1950_vm8 = vmor %vm1948_vm5, %vm1949_vm7 }
 0x2d3   :  { %v2908_v47 = vclamps-f32 %v1877_v52, 1.0  ;;  %v1947_v19 = vadd.f32 %v3138_v60, %v1946_v53  ;;  %v1904_v38 = vmul.f32 %v3140_v34, %v5249_v33  ;;  %v1914_v55 = vand.u32 2147483648, %v5249_v33 }
 0x2d4   :  { %v1981_v42 = vmul.f32 %v1980_v5, %v4827_v51  ;;  %v2018_v46 = vadd.f32 0.112945676, %v2017_v28  ;;  %v2097_v56 = vmul.f32 %v2096_v27, %v4994_v61  ;;  %v2056_v39 = vadd.f32 0.014752088, %v2055_v43 }
 0x2d5   :  { %v1951_v29 = vsel %vm1950_vm8, %v3138_v60, %v1947_v19  ;;  %v1905_v41 = vsub.f32 1.0, %v1904_v38  ;;  %vm1909_vm9 = vweird.f32 %v3140_v34  ;;  %v2136_v58 = vadd.f32 0.014752088, %v2135_v3 }
 0x2d6   :  { %v1956_v63 = vsel %vm5264_vm6, %v1955_v62, %v1951_v29  ;;  %v5283_v8 = vadd.f32 1.0, %v1981_v42  ;;  %v2019_v15 = vmul.f32 %v2018_v46, %v4843_v6  ;;  %v2098_v22 = vadd.f32 0.112945676, %v2097_v56 }
 0x2d7   :  { %v1957_v45 = vmul.f32 %v1956_v63, %v5036_v17  ;;  %v1906_v59 = vmul.f32 %v3140_v34, %v1905_v41  ;;  %v2057_v51 = vmul.f32 %v2056_v39, %v4857_v36  ;;  %v2137_v2 = vmul.f32 %v2136_v58, %v4996_v21 }
 0x2d8   :  { %v2130_v60 = vmul.f32 %v5153_v26, %v4996_v21  ;;  %v2496_v48 = vadd.f32 1.0, %v2908_v47  ;;  %vm1908_vm10 = vweird.f32 %v5249_v33  ;;  %3141 = vrcp.f32 %v5283_v8 }
 0x2d9   :  { %v2910_v10 = vclamps-f32 %v1957_v45, 1.0  ;;  %v1907_v7 = vadd.f32 %v3140_v34, %v1906_v59  ;;  %v2020_v14 = vadd.f32 0.4994258, %v2019_v15  ;;  %v2099_v62 = vmul.f32 %v2098_v22, %v4994_v61  ;;  %vm1910_vm11 = vmor %vm1908_vm10, %vm1909_vm9 }
 0x2da   :  { %vm1913_vm12 = vcmp.eq.f32.partialorder %v1912_v54, 8.507059e+37  ;;  %v1915_v17 = vor.u32 1.1754944e-38, %v1914_v55  ;;  %v2058_v32 = vadd.f32 0.112945676, %v2057_v51  ;;  %v2138_v11 = vadd.f32 0.112945676, %v2137_v2 }
 0x2db   :  { %v2498_v52 = vadd.f32 1.0, %v2910_v10  ;;  %v1911_v9 = vsel %vm1910_vm11, %v3140_v34, %v1907_v7  ;;  %v2021_v26 = vmul.f32 %v2020_v14, %v4843_v6  ;;  %v2100_v20 = vadd.f32 0.4994258, %v2099_v62  ;;  %v1126_v10 = vpop.f32.mrf.mxu1 }
 0x2dc   :  { %v2528_v33 = vmul.f32 %v2496_v48, %v4883_v0  ;;  %v1916_v35 = vsel %vm1913_vm12, %v1915_v17, %v1911_v9  ;;  %v2059_v37 = vmul.f32 %v2058_v32, %v4857_v36  ;;  %v2139_v50 = vmul.f32 %v2138_v11, %v4996_v21 }
 0x2dd   :  { %v2530_v40 = vmul.f32 %v2498_v52, %v4933_v31  ;;  %v1917_v53 = vmul.f32 %v1916_v35, %v4941_v49  ;;  %v5301_v54 = vadd.f32 1.0, %v2021_v26  ;;  %v2101_v28 = vmul.f32 %v2100_v20, %v4994_v61  ;;  %v5880_v20 = vld [vmem:[#allocation20_spill] sm:$0xff] }
 0x2de   :  { %v3142_v5 = vpop.eup %3141  ;;  %v2091_v34 = vadd.f32 1.1283791, %v5234_v25  ;;  %v2060_v6 = vadd.f32 0.4994258, %v2059_v37  ;;  %v2140_v27 = vadd.f32 0.4994258, %v2139_v50  ;;  %v1972_v0 = vmul.f32 %v5138_v4, %v4810_v23 }
 0x2df   :  { %v5308_v43 = vmul.f32 0.5, %v4795_v18  ;;  %v2552_v3 = vpack.c.bf16 %v2530_v40, %v2528_v33  ;;  %v1984_v31 = vmul.f32 %v3142_v5, %v5283_v8  ;;  %v5313_v49 = vmul.f32 %v5141_v57, %v4817_v12 }
 0x2e0   :  { %v2131_v47 = vadd.f32 1.1283791, %v2130_v60  ;;  %v1992_v61 = vand.u32 2147483647, %v5283_v8  ;;  %3143 = vrcp.f32 %v5301_v54  ;;  %v2909_v25 = vclamps-f32 %v1917_v53, 1.0 }
 0x2e1   :  { %2720 = vmatmul.bf16.gmra.mxu2 %v2552_v3  ;;  %v1985_v19 = vsub.f32 1.0, %v1984_v31  ;;  %v5317_v38 = vadd.f32 1.0, %v2101_v28  ;;  %v2061_v18 = vmul.f32 %v2060_v6, %v4857_v36  ;;  %v5322_v23 = vmul.f32 %v5146_v24, %v4836_v44 }
 0x2e2   :  { %v5325_v4 = vmul.f32 %v2091_v34, %v4974_v30  ;;  %v1994_v12 = vand.u32 2147483648, %v5283_v8  ;;  %v2141_v57 = vmul.f32 %v2140_v27, %v4996_v21  ;;  %vm1989_vm13 = vweird.f32 %v3142_v5  ;;  %v1077_v30 = vpop.f32.mrf.mxu0 }
 0x2e3   :  { %v1986_v55 = vmul.f32 %v3142_v5, %v1985_v19  ;;  %v2032_v42 = vand.u32 2147483647, %v5301_v54  ;;  %3145 = vrcp.f32 %v5317_v38  ;;  %v5332_v46 = vmul.f32 %v2131_v47, %v4977_v13 }
 0x2e4   :  { %v2034_v36 = vand.u32 2147483648, %v5301_v54  ;;  %v5335_v44 = vadd.f32 1.0, %v2061_v18  ;;  %v5337_v24 = vadd.f32 1.0, %v2141_v57  ;;  %vm1988_vm14 = vweird.f32 %v5283_v8 }
 0x2e5   :  { %v1987_v56 = vadd.f32 %v3142_v5, %v1986_v55  ;;  %vm1993_vm15 = vcmp.eq.f32.partialorder %v1992_v61, 8.507059e+37  ;;  %v2497_v21 = vadd.f32 1.0, %v2909_v25  ;;  %vm1990_vm0 = vmor %vm1988_vm14, %vm1989_vm13  ;;  %v1995_v29 = vor.u32 1.1754944e-38, %v1994_v12 }
 0x2e6   :  { %v3144_v39 = vpop.eup %3143  ;;  %v2112_v41 = vand.u32 2147483647, %v5317_v38  ;;  %v2114_v13 = vand.u32 2147483648, %v5317_v38  ;;  %3147 = vrcp.f32 %v5335_v44  ;;  %vm2028_vm1 = vweird.f32 %v5301_v54 }
 0x2e7   :  { %v1991_v58 = vsel %vm1990_vm0, %v3142_v5, %v1987_v56  ;;  %v2024_v63 = vmul.f32 %v3144_v39, %v5301_v54  ;;  %vm5345_vm2 = vcmp.eq.f32.partialorder %v2032_v42, 8.507059e+37  ;;  %v2035_v22 = vor.u32 1.1754944e-38, %v2034_v36 }
 0x2e8   :  { %v1996_v8 = vsel %vm1993_vm15, %v1995_v29, %v1991_v58  ;;  %3149 = vrcp.f32 %v5337_v24  ;;  %v5351_v45 = vadd.f32 %v1077_v30, %v5833_v16  ;;  %v2529_v2 = vmul.f32 %v2497_v21, %v4887_v1 }
 0x2e9   :  { %v3146_v59 = vpop.eup %3145  ;;  %v1997_v51 = vmul.f32 %v1996_v8, %v1972_v0  ;;  %v2025_v60 = vsub.f32 1.0, %v2024_v63  ;;  %v2072_v48 = vand.u32 2147483647, %v5335_v44  ;;  %vm2108_vm3 = vweird.f32 %v5317_v38  ;;  %v5883_v0 = vld [vmem:[#allocation32_spill] sm:$0xff] }
 0x2ea   :  { %v2104_v7 = vmul.f32 %v3146_v59, %v5317_v38  ;;  %vm5357_vm4 = vcmp.eq.f32.partialorder %v2112_v41, 8.507059e+37  ;;  %v2115_v62 = vor.u32 1.1754944e-38, %v2114_v13  ;;  %vm2029_vm5 = vweird.f32 %v3144_v39  ;;  %v1079_v27 = vpop.f32.mrf.mxu0 }
 0x2eb   :  { %v2911_v17 = vclamps-f32 %v1997_v51, 1.0  ;;  %v2026_v32 = vmul.f32 %v3144_v39, %v2025_v60  ;;  %vm2068_vm6 = vweird.f32 %v5335_v44  ;;  %v2074_v1 = vand.u32 2147483648, %v5335_v44  ;;  %vm2030_vm10 = vmor %vm2028_vm1, %vm2029_vm5 }
 0x2ec   :  { %v3148_v11 = vpop.eup %3147  ;;  %v2105_v52 = vsub.f32 1.0, %v2104_v7  ;;  %v2152_v9 = vand.u32 2147483647, %v5337_v24  ;;  %v5365_v26 = vmul.f32 0.70710677, %v5351_v45  ;;  %v5368_v33 = vadd.f32 %v1126_v10, %v5880_v20  ;;  %v5884_v7 = vld [vmem:[#allocation22_spill] sm:$0xff] }
 0x2ed   :  { %v2499_v35 = vadd.f32 1.0, %v2911_v17  ;;  %v2027_v37 = vadd.f32 %v3144_v39, %v2026_v32  ;;  %vm2109_vm7 = vweird.f32 %v3146_v59  ;;  %v2064_v50 = vmul.f32 %v3148_v11, %v5335_v44 }
 0x2ee   :  { %vm5371_vm8 = vcmp.eq.f32.partialorder %v2072_v48, 8.507059e+37  ;;  %vm2148_vm9 = vweird.f32 %v5337_v24  ;;  %v3150_v53 = vpop.eup %3149  ;;  %v2106_v28 = vmul.f32 %v3146_v59, %v2105_v52  ;;  %v2154_v5 = vand.u32 2147483648, %v5337_v24  ;;  %vm2110_vm12 = vmor %vm2108_vm3, %vm2109_vm7 }
 0x2ef   :  { %v2160_v34 = vmul.f32 %v5365_v26, %v5365_v26  ;;  %v5383_v6 = vmul.f32 0.70710677, %v5368_v33  ;;  %v2531_v3 = vmul.f32 %v2499_v35, %v5883_v0  ;;  %v2031_v31 = vsel %vm2030_vm10, %v3144_v39, %v2027_v37 }
 0x2f0   :  { %v2065_v47 = vsub.f32 1.0, %v2064_v50  ;;  %v2144_v61 = vmul.f32 %v3150_v53, %v5337_v24  ;;  %v2036_v54 = vsel %vm5345_vm2, %v2035_v22, %v2031_v31  ;;  %v2107_v25 = vadd.f32 %v3146_v59, %v2106_v28  ;;  %v5885_v28 = vld [vmem:[#allocation28_spill] sm:$0xff] }
 0x2f1   :  { %vm2069_vm11 = vweird.f32 %v3148_v11  ;;  %v5389_v19 = vmin.f32 %v2160_v34, 16.0  ;;  %v2553_v18 = vpack.c.bf16 %v2531_v3, %v2529_v2  ;;  %v2037_v12 = vmul.f32 %v2036_v54, %v5313_v49 }
 0x2f2   :  { %v2066_v57 = vmul.f32 %v3148_v11, %v2065_v47  ;;  %v2145_v55 = vsub.f32 1.0, %v2144_v61  ;;  %v2111_v42 = vsel %vm2110_vm12, %v3146_v59, %v2107_v25  ;;  %vm2149_vm13 = vweird.f32 %v3150_v53  ;;  %vm2070_vm14 = vmor %vm2068_vm6, %vm2069_vm11  ;;  %v1128_v59 = vpop.f32.mrf.mxu1  ;;  %v1082_v51 = vpop.f32.mrf.mxu0 }
 0x2f3   :  { %v2200_v36 = vmul.f32 %v5383_v6, %v5383_v6  ;;  %v5398_v30 = vadd.f32 %v1079_v27, %v5833_v16  ;;  %2769 = vmatmul.bf16.gmra.mxu3 %v2553_v18  ;;  %v2912_v56 = vclamps-f32 %v2037_v12, 1.0  ;;  %v2116_v21 = vsel %vm5357_vm4, %v2115_v62, %v2111_v42  ;;  %vm2150_vm0 = vmor %vm2148_vm9, %vm2149_vm13  ;;  %v5886_v27 = vld [vmem:[#allocation29_spill] sm:$0xff] }
 0x2f4   :  { %v2067_v49 = vadd.f32 %v3148_v11, %v2066_v57  ;;  %v2146_v39 = vmul.f32 %v3150_v53, %v2145_v55  ;;  %v2117_v38 = vmul.f32 %v2116_v21, %v5325_v4  ;;  %v2075_v29 = vor.u32 1.1754944e-38, %v2074_v1 }
 0x2f5   :  { %v2162_v41 = vmul.f32 2.1237322e-06, %v5389_v19  ;;  %v5407_v13 = vmin.f32 %v2200_v36, 16.0  ;;  %vm2153_vm15 = vcmp.eq.f32.partialorder %v2152_v9, 8.507059e+37  ;;  %v5410_v15 = vmul.f32 0.70710677, %v5398_v30 }
 0x2f6   :  { %v2071_v58 = vsel %vm2070_vm14, %v3148_v11, %v2067_v49  ;;  %v2147_v63 = vadd.f32 %v3150_v53, %v2146_v39  ;;  %v2914_v8 = vclamps-f32 %v2117_v38, 1.0  ;;  %v2500_v22 = vadd.f32 1.0, %v2912_v56  ;;  %v2701_v39 = vpop.f32.mrf.mxu2 }
 0x2f7   :  { %v2076_v4 = vsel %vm5371_vm8, %v2075_v29, %v2071_v58  ;;  %v2155_v44 = vor.u32 1.1754944e-38, %v2154_v5  ;;  %v2202_v48 = vmul.f32 2.1237322e-06, %v5407_v13  ;;  %v2240_v10 = vmul.f32 %v5410_v15, %v5410_v15  ;;  %v2750_v58 = vpop.f32.mrf.mxu3 }
 0x2f8   :  { %v2077_v2 = vmul.f32 %v2076_v4, %v5322_v23  ;;  %v2151_v60 = vsel %vm2150_vm0, %v3150_v53, %v2147_v63  ;;  %v1158_v14 = vmul.f32 0.5, %v5884_v7  ;;  %v2502_v62 = vadd.f32 1.0, %v2914_v8  ;;  %v5460_v8 = vld [vmem:[%s5715_s8] ss:$0 sm:$0xff]  ;;  %s3360_s8 = smov [#allocation13]  }
 0x2f9   :  { %v2156_v17 = vsel %vm2153_vm15, %v2155_v44, %v2151_v60  ;;  %v2163_v32 = vadd.f32 0.00028619796, %v2162_v41  ;;  %v5423_v11 = vmin.f32 %v2240_v10, 16.0  ;;  %v5426_v52 = vadd.f32 %v1128_v59, %v5880_v20  ;;  %s2810_s1 = sshll.u32 %s3360_s8, 4  ;;  %s2811_s1 = int_to_ptr.vmem [resolvable:$true] %s2810_s1 }
 0x2fa   :  { %v2913_v1 = vclamps-f32 %v2077_v2, 1.0  ;;  %v2157_v24 = vmul.f32 %v2156_v17, %v5332_v46  ;;  %v2532_v23 = vmul.f32 %v2500_v22, %v5308_v43  ;;  %v2534_v9 = vmul.f32 %v2502_v62, %v1158_v14  ;;  %v1131_v57 = vpop.f32.mrf.mxu1  ;;  %v1084_v42 = vpop.f32.mrf.mxu0 }
 0x2fb   :  { %v5430_v35 = vadd.f32 %v1082_v51, %v5833_v16  ;;  %v2203_v40 = vadd.f32 0.00028619796, %v2202_v48  ;;  %v2242_v53 = vmul.f32 2.1237322e-06, %v5423_v11  ;;  %v1157_v5 = vmul.f32 0.5, %v5885_v28 }
 0x2fc   :  { %v2915_v37 = vclamps-f32 %v2157_v24, 1.0  ;;  %v2501_v50 = vadd.f32 1.0, %v2913_v1  ;;  %v2554_v34 = vpack.c.bf16 %v2534_v9, %v2532_v23  ;;  %v5435_v46 = vmul.f32 0.70710677, %v5426_v52 }
 0x2fd   :  { %v1159_v0 = vmul.f32 0.5, %v5886_v27  ;;  %v2164_v43 = vmul.f32 %v2163_v32, %v5389_v19  ;;  %v2243_v31 = vadd.f32 0.00028619796, %v2242_v53  ;;  %v5442_v61 = vmul.f32 0.70710677, %v5430_v35 }
 0x2fe   :  { %v2503_v3 = vadd.f32 1.0, %v2915_v37  ;;  %2725 = vmatmul.bf16.gmra.mxu2 %v2554_v34  ;;  %v2280_v47 = vmul.f32 %v5435_v46, %v5435_v46  ;;  %v2533_v54 = vmul.f32 %v2501_v50, %v1157_v5  ;;  %v2204_v18 = vmul.f32 %v2203_v40, %v5407_v13  ;;  %v2703_v17 = vpop.f32.mrf.mxu2 }
 0x2ff   :  { %v2244_v12 = vmul.f32 %v2243_v31, %v5423_v11  ;;  %v2165_v56 = vadd.f32 0.0036580483, %v2164_v43  ;;  %v2320_v21 = vmul.f32 %v5442_v61, %v5442_v61  ;;  %v5451_v49 = vadd.f32 %v1131_v57, %v5880_v20  ;;  %v2752_v28 = vpop.f32.mrf.mxu3 }
 0x300   :  { %v2535_v25 = vmul.f32 %v2503_v3, %v1159_v0  ;;  %v5446_v55 = vmin.f32 %v2280_v47, 16.0  ;;  %v2205_v38 = vadd.f32 0.0036580483, %v2204_v18  ;;  %v5454_v41 = vadd.f32 %v1084_v42, %v5833_v16 }
 0x301   :  { %v2245_v29 = vadd.f32 0.0036580483, %v2244_v12  ;;  %v2166_v22 = vmul.f32 %v2165_v56, %v5389_v19  ;;  %v5463_v4 = vmin.f32 %v2320_v21, 16.0  ;;  %v5466_v44 = vmul.f32 0.70710677, %v5451_v49 }
 0x302   :  { %v2555_v36 = vpack.c.bf16 %v2535_v25, %v2533_v54  ;;  %v2282_v63 = vmul.f32 2.1237322e-06, %v5446_v55  ;;  %v2206_v59 = vmul.f32 %v2205_v38, %v5407_v13  ;;  %v5471_v51 = vmul.f32 0.70710677, %v5454_v41  ;;  %v1133_v7 = vpop.f32.mrf.mxu1 }
 0x303   :  { %v2246_v16 = vmul.f32 %v2245_v29, %v5423_v11  ;;  %v2702_v60 = vadd.f32 %v5460_v8, %v2701_v39  ;;  %v2167_v48 = vadd.f32 0.05243302, %v2166_v22  ;;  %v2322_v10 = vmul.f32 2.1237322e-06, %v5463_v4 }
 0x304   :  { %2774 = vmatmul.bf16.gmra.mxu3 %v2555_v36  ;;  %v2283_v2 = vadd.f32 0.00028619796, %v2282_v63  ;;  %v2360_v14 = vmul.f32 %v5466_v44, %v5466_v44  ;;  %v2207_v32 = vadd.f32 0.05243302, %v2206_v59  ;;  %v2400_v24 = vmul.f32 %v5471_v51, %v5471_v51 }
 0x305   :  { %v2751_v62 = vadd.f32 %v2750_v58, %v2702_v60  ;;  %v2247_v1 = vadd.f32 0.05243302, %v2246_v16  ;;  %v5481_v9 = vadd.f32 %v1133_v7, %v5880_v20  ;;  %v2704_v37 = vadd.f32 %v5460_v8, %v2703_v17 }
 0x306   :  { %v2284_v23 = vmul.f32 %v2283_v2, %v5446_v55  ;;  %v2173_v50 = vmul.f32 3.8918573e-05, %v5389_v19  ;;  %v2168_v40 = vmul.f32 %v2167_v48, %v5389_v19  ;;  %v2323_v53 = vadd.f32 0.00028619796, %v2322_v10 }
 0x307   :  { %2790 = vst [vmem:[#allocation13] sm:$0xff] %v2751_v62  ;;  %v5486_v5 = vmin.f32 %v2360_v14, 16.0  ;;  %v2753_v34 = vadd.f32 %v2752_v28, %v2704_v37  ;;  %v2208_v0 = vmul.f32 %v2207_v32, %v5407_v13  ;;  %v2248_v3 = vmul.f32 %v2247_v1, %v5423_v11 }
 0x308   :  { %v2174_v27 = vadd.f32 0.001143296, %v2173_v50  ;;  %v5490_v43 = vmin.f32 %v2400_v24, 16.0  ;;  %v5493_v20 = vmul.f32 0.5, %v5351_v45  ;;  %v2285_v31 = vadd.f32 0.0036580483, %v2284_v23  ;;  %v2706_v36 = vpop.f32.mrf.mxu2 }
 0x309   :  { %v5496_v47 = vmul.f32 0.70710677, %v5481_v9  ;;  %2791 = vst [vmem:[#allocation13 + $0x8] sm:$0xff] %v2753_v34  ;;  %v2169_v25 = vadd.f32 0.18741608, %v2168_v40  ;;  %v5500_v18 = vmul.f32 0.5, %v5368_v33  ;;  %v2324_v12 = vmul.f32 %v2323_v53, %v5463_v4 }
 0x30a   :  { %v2175_v54 = vmul.f32 %v2174_v27, %v5389_v19  ;;  %v2253_v57 = vmul.f32 3.8918573e-05, %v5423_v11  ;;  %v2362_v42 = vmul.f32 2.1237322e-06, %v5486_v5  ;;  %v2213_v56 = vmul.f32 3.8918573e-05, %v5407_v13 }
 0x30b   :  { %v2209_v21 = vadd.f32 0.18741608, %v2208_v0  ;;  %v2249_v39 = vadd.f32 0.18741608, %v2248_v3  ;;  %v2402_v38 = vmul.f32 2.1237322e-06, %v5490_v43  ;;  %v2286_v29 = vmul.f32 %v2285_v31, %v5446_v55 }
 0x30c   :  { %v2176_v45 = vadd.f32 0.014752088, %v2175_v54  ;;  %v2440_v33 = vmul.f32 %v5496_v47, %v5496_v47  ;;  %v2254_v63 = vadd.f32 0.001143296, %v2253_v57  ;;  %v2170_v22 = vmul.f32 %v2169_v25, %v5389_v19 }
 0x30d   :  { %v5513_v59 = vmul.f32 0.5, %v5398_v30  ;;  %v2325_v16 = vadd.f32 0.0036580483, %v2324_v12  ;;  %v2214_v2 = vadd.f32 0.001143296, %v2213_v56  ;;  %v2707_v48 = vadd.f32 %v5460_v8, %v2706_v36 }
 0x30e   :  { %v2177_v58 = vmul.f32 %v2176_v45, %v5389_v19  ;;  %v2363_v60 = vadd.f32 0.00028619796, %v2362_v42  ;;  %v2255_v7 = vmul.f32 %v2254_v63, %v5423_v11  ;;  %v2210_v14 = vmul.f32 %v2209_v21, %v5407_v13 }
 0x30f   :  { %v2250_v62 = vmul.f32 %v2249_v39, %v5423_v11  ;;  %v2403_v17 = vadd.f32 0.00028619796, %v2402_v38  ;;  %v2215_v32 = vmul.f32 %v2214_v2, %v5407_v13  ;;  %v2287_v1 = vadd.f32 0.05243302, %v2286_v29 }
 0x310   :  { %v2178_v10 = vadd.f32 0.112945676, %v2177_v58  ;;  %v5520_v24 = vmin.f32 %v2440_v33, 16.0  ;;  %v2256_v23 = vadd.f32 0.014752088, %v2255_v7  ;;  %v2326_v50 = vmul.f32 %v2325_v16, %v5463_v4  ;;  %v2708_v12 = vpop.f32.mrf.mxu2 }
 0x311   :  { %v2171_v37 = vadd.f32 1.1283791, %v2170_v22  ;;  %v2216_v53 = vadd.f32 0.014752088, %v2215_v32  ;;  %v2293_v28 = vmul.f32 3.8918573e-05, %v5446_v55  ;;  %v2364_v34 = vmul.f32 %v2363_v60, %v5486_v5 }
 0x312   :  { %v2179_v30 = vmul.f32 %v2178_v10, %v5389_v19  ;;  %v2257_v3 = vmul.f32 %v2256_v23, %v5423_v11  ;;  %v2211_v31 = vadd.f32 1.1283791, %v2210_v14  ;;  %v2251_v54 = vadd.f32 1.1283791, %v2250_v62 }
 0x313   :  { %v2404_v25 = vmul.f32 %v2403_v17, %v5490_v43  ;;  %v2217_v57 = vmul.f32 %v2216_v53, %v5407_v13  ;;  %v2288_v42 = vmul.f32 %v2287_v1, %v5446_v55  ;;  %v2442_v36 = vmul.f32 2.1237322e-06, %v5520_v24 }
 0x314   :  { %v2180_v0 = vadd.f32 0.4994258, %v2179_v30  ;;  %v2258_v56 = vadd.f32 0.112945676, %v2257_v3  ;;  %v2327_v21 = vadd.f32 0.05243302, %v2326_v50  ;;  %v2709_v33 = vadd.f32 %v5460_v8, %v2708_v12 }
 0x315   :  { %v2218_v39 = vadd.f32 0.112945676, %v2217_v57  ;;  %v2294_v38 = vadd.f32 0.001143296, %v2293_v28  ;;  %v2365_v29 = vadd.f32 0.0036580483, %v2364_v34  ;;  %v5537_v22 = vmul.f32 %v2171_v37, %v5365_v26 }
 0x316   :  { %v2181_v45 = vmul.f32 %v2180_v0, %v5389_v19  ;;  %v2259_v63 = vmul.f32 %v2258_v56, %v5423_v11  ;;  %v2333_v19 = vmul.f32 3.8918573e-05, %v5463_v4  ;;  %v2289_v60 = vadd.f32 0.18741608, %v2288_v42 }
 0x317   :  { %v2219_v16 = vmul.f32 %v2218_v39, %v5407_v13  ;;  %v2295_v2 = vmul.f32 %v2294_v38, %v5446_v55  ;;  %v2443_v10 = vadd.f32 0.00028619796, %v2442_v36  ;;  %v5544_v7 = vmul.f32 %v2211_v31, %v5383_v6 }
 0x318   :  { %v2755_v40 = vpop.f32.mrf.mxu3  ;;  %v5533_v58 = vadd.f32 1.0, %v2181_v45  ;;  %v2328_v14 = vmul.f32 %v2327_v21, %v5463_v4  ;;  %v2260_v17 = vadd.f32 0.4994258, %v2259_v63  ;;  %v5548_v32 = vmul.f32 %v2251_v54, %v5410_v15 }
 0x319   :  { %v2756_v27 = vadd.f32 %v2755_v40, %v2707_v48  ;;  %v2405_v48 = vadd.f32 0.0036580483, %v2404_v25  ;;  %v2220_v26 = vadd.f32 0.4994258, %v2219_v16  ;;  %v2366_v1 = vmul.f32 %v2365_v29, %v5486_v5 }
 0x31a   :  { %3151 = vrcp.f32 %v5533_v58  ;;  %v2296_v23 = vadd.f32 0.014752088, %v2295_v2  ;;  %v2261_v37 = vmul.f32 %v2260_v17, %v5423_v11  ;;  %v2334_v40 = vadd.f32 0.001143296, %v2333_v19 }
 0x31b   :  { %2792 = vst [vmem:[#allocation13 + $0x10] sm:$0xff] %v2756_v27  ;;  %v2221_v50 = vmul.f32 %v2220_v26, %v5407_v13  ;;  %v2373_v6 = vmul.f32 3.8918573e-05, %v5486_v5  ;;  %v2290_v53 = vmul.f32 %v2289_v60, %v5446_v55  ;;  %v2406_v28 = vmul.f32 %v2405_v48, %v5490_v43 }
 0x31c   :  { %v2444_v34 = vmul.f32 %v2443_v10, %v5520_v24  ;;  %v2297_v15 = vmul.f32 %v2296_v23, %v5446_v55  ;;  %v2329_v27 = vadd.f32 0.18741608, %v2328_v14  ;;  %v2192_v0 = vand.u32 2147483647, %v5533_v58 }
 0x31d   :  { %v5559_v3 = vadd.f32 1.0, %v2261_v37  ;;  %v5561_v11 = vadd.f32 1.0, %v2221_v50  ;;  %v2194_v31 = vand.u32 2147483648, %v5533_v58  ;;  %v2335_v25 = vmul.f32 %v2334_v40, %v5463_v4 }
 0x31e   :  { %v2298_v54 = vadd.f32 0.112945676, %v2297_v15  ;;  %v2413_v12 = vmul.f32 3.8918573e-05, %v5490_v43  ;;  %v5566_v57 = vadd.f32 0.05243302, %v2366_v1  ;;  %v5578_v39 = vmul.f32 %v2329_v27, %v5463_v4 }
 0x31f   :  { %3153 = vrcp.f32 %v5559_v3  ;;  %v2374_v36 = vadd.f32 0.001143296, %v2373_v6  ;;  %v5570_v45 = vadd.f32 1.1283791, %v2290_v53  ;;  %v5572_v56 = vadd.f32 0.05243302, %v2406_v28 }
 0x320   :  { %v2757_v62 = vpop.f32.mrf.mxu3  ;;  %v3152_v13 = vpop.eup %3151  ;;  %v5574_v21 = vadd.f32 0.0036580483, %v2444_v34  ;;  %3155 = vrcp.f32 %v5561_v11  ;;  %vm2188_vm1 = vweird.f32 %v5533_v58  ;;  %v2299_v29 = vmul.f32 %v2298_v54, %v5446_v55 }
 0x321   :  { %v2758_v30 = vadd.f32 %v2757_v62, %v2709_v33  ;;  %v2184_v42 = vmul.f32 %v3152_v13, %v5533_v58  ;;  %vm5582_vm2 = vcmp.eq.f32.partialorder %v2192_v0, 8.507059e+37  ;;  %v2195_v63 = vor.u32 1.1754944e-38, %v2194_v31 }
 0x322   :  { %v2336_v16 = vadd.f32 0.014752088, %v2335_v25  ;;  %v2414_v2 = vadd.f32 0.001143296, %v2413_v12  ;;  %vm2189_vm3 = vweird.f32 %v3152_v13  ;;  %v2300_v60 = vadd.f32 0.4994258, %v2299_v29 }
 0x323   :  { %2793 = vst [vmem:[#allocation13 + $0x18] sm:$0xff] %v2758_v30  ;;  %v2185_v38 = vsub.f32 1.0, %v2184_v42  ;;  %v2375_v48 = vmul.f32 %v2374_v36, %v5486_v5  ;;  %vm2268_vm4 = vweird.f32 %v5559_v3  ;;  %v2453_v62 = vmul.f32 3.8918573e-05, %v5520_v24  ;;  %vm2190_vm5 = vmor %vm2188_vm1, %vm2189_vm3 }
 0x324   :  { %v2337_v10 = vmul.f32 %v2336_v16, %v5463_v4  ;;  %v2415_v14 = vmul.f32 %v2414_v2, %v5490_v43  ;;  %v2272_v1 = vand.u32 2147483647, %v5559_v3  ;;  %v2274_v30 = vand.u32 2147483648, %v5559_v3 }
 0x325   :  { %v2186_v19 = vmul.f32 %v3152_v13, %v2185_v38  ;;  %v3154_v17 = vpop.eup %3153  ;;  %v2301_v23 = vmul.f32 %v2300_v60, %v5446_v55  ;;  %v2232_v40 = vand.u32 2147483647, %v5561_v11  ;;  %v2376_v27 = vadd.f32 0.014752088, %v2375_v48 }
 0x326   :  { %v3156_v37 = vpop.eup %3155  ;;  %v2264_v50 = vmul.f32 %v3154_v17, %v5559_v3  ;;  %v2338_v6 = vadd.f32 0.112945676, %v2337_v10  ;;  %v2416_v53 = vadd.f32 0.014752088, %v2415_v14  ;;  %vm2228_vm6 = vweird.f32 %v5561_v11 }
 0x327   :  { %v2187_v26 = vadd.f32 %v3152_v13, %v2186_v19  ;;  %v2224_v34 = vmul.f32 %v3156_v37, %v5561_v11  ;;  %v5599_v15 = vadd.f32 1.0, %v2301_v23  ;;  %v2234_v25 = vand.u32 2147483648, %v5561_v11 }
 0x328   :  { %v2265_v55 = vsub.f32 1.0, %v2264_v50  ;;  %v2339_v31 = vmul.f32 %v2338_v6, %v5463_v4  ;;  %v2417_v58 = vmul.f32 %v2416_v53, %v5490_v43  ;;  %vm2269_vm7 = vweird.f32 %v3154_v17 }
 0x329   :  { %v2191_v28 = vsel %vm2190_vm5, %v3152_v13, %v2187_v26  ;;  %v2225_v54 = vsub.f32 1.0, %v2224_v34  ;;  %3157 = vrcp.f32 %v5599_v15  ;;  %vm2229_vm8 = vweird.f32 %v3156_v37  ;;  %vm2270_vm11 = vmor %vm2268_vm4, %vm2269_vm7 }
 0x32a   :  { %v2196_v0 = vsel %vm5582_vm2, %v2195_v63, %v2191_v28  ;;  %v2711_v13 = vpop.f32.mrf.mxu2  ;;  %v2266_v42 = vmul.f32 %v3154_v17, %v2265_v55  ;;  %v2340_v36 = vadd.f32 0.4994258, %v2339_v31  ;;  %v2418_v29 = vadd.f32 0.112945676, %v2417_v58  ;;  %vm2230_vm12 = vmor %vm2228_vm6, %vm2229_vm8 }
 0x32b   :  { %v2197_v12 = vmul.f32 %v2196_v0, %v5537_v22  ;;  %v2226_v38 = vmul.f32 %v3156_v37, %v2225_v54  ;;  %v2377_v33 = vmul.f32 %v2376_v27, %v5486_v5  ;;  %vm2273_vm9 = vcmp.eq.f32.partialorder %v2272_v1, 8.507059e+37 }
 0x32c   :  { %v2267_v63 = vadd.f32 %v3154_v17, %v2266_v42  ;;  %v2275_v16 = vor.u32 1.1754944e-38, %v2274_v30  ;;  %vm5610_vm10 = vcmp.eq.f32.partialorder %v2232_v40, 8.507059e+37  ;;  %v2235_v22 = vor.u32 1.1754944e-38, %v2234_v25 }
 0x32d   :  { %v2227_v19 = vadd.f32 %v3156_v37, %v2226_v38  ;;  %v2341_v60 = vmul.f32 %v2340_v36, %v5463_v4  ;;  %v2454_v48 = vadd.f32 0.001143296, %v2453_v62  ;;  %v2712_v10 = vadd.f32 %v5460_v8, %v2711_v13 }
 0x32e   :  { %v2916_v14 = vclamps-f32 %v2197_v12, 1.0  ;;  %v2271_v26 = vsel %vm2270_vm11, %v3154_v17, %v2267_v63  ;;  %v2419_v1 = vmul.f32 %v2418_v29, %v5490_v43  ;;  %v2378_v40 = vadd.f32 0.112945676, %v2377_v33 }
 0x32f   :  { %v3158_v30 = vpop.eup %3157  ;;  %v2276_v23 = vsel %vm2273_vm9, %v2275_v16, %v2271_v26  ;;  %v2231_v50 = vsel %vm2230_vm12, %v3156_v37, %v2227_v19  ;;  %v5622_v3 = vadd.f32 1.0, %v2341_v60  ;;  %v2408_v4 = vmul.f32 %v5572_v56, %v5490_v43 }
 0x330   :  { %v2277_v62 = vmul.f32 %v2276_v23, %v5548_v32  ;;  %v2236_v17 = vsel %vm5610_vm10, %v2235_v22, %v2231_v50  ;;  %v2304_v6 = vmul.f32 %v3158_v30, %v5599_v15  ;;  %v2292_v11 = vmul.f32 %v5570_v45, %v5435_v46 }
 0x331   :  { %v2314_v53 = vand.u32 2147483648, %v5599_v15  ;;  %3159 = vrcp.f32 %v5622_v3  ;;  %v2455_v37 = vmul.f32 %v2454_v48, %v5520_v24  ;;  %v2504_v27 = vadd.f32 1.0, %v2916_v14 }
 0x332   :  { %v2918_v34 = vclamps-f32 %v2277_v62, 1.0  ;;  %v2305_v56 = vsub.f32 1.0, %v2304_v6  ;;  %v2420_v0 = vadd.f32 0.4994258, %v2419_v1  ;;  %v2237_v55 = vmul.f32 %v2236_v17, %v5544_v7  ;;  %v2713_v45 = vpop.f32.mrf.mxu2 }
 0x333   :  { %v2312_v31 = vand.u32 2147483647, %v5599_v15  ;;  %v2379_v58 = vmul.f32 %v2378_v40, %v5486_v5  ;;  %vm2309_vm13 = vweird.f32 %v3158_v30  ;;  %vm2308_vm14 = vweird.f32 %v5599_v15 }
 0x334   :  { %v2506_v54 = vadd.f32 1.0, %v2918_v34  ;;  %v2306_v46 = vmul.f32 %v3158_v30, %v2305_v56  ;;  %v2421_v25 = vmul.f32 %v2420_v0, %v5490_v43  ;;  %v2315_v13 = vor.u32 1.1754944e-38, %v2314_v53  ;;  %vm2310_vm15 = vmor %vm2308_vm14, %vm2309_vm13 }
 0x335   :  { %v2380_v12 = vadd.f32 0.4994258, %v2379_v58  ;;  %v2456_v42 = vadd.f32 0.014752088, %v2455_v37  ;;  %v2536_v36 = vmul.f32 %v2504_v27, %v5493_v20  ;;  %v2917_v63 = vclamps-f32 %v2237_v55, 1.0 }
 0x336   :  { %v2538_v7 = vmul.f32 %v2506_v54, %v5513_v59  ;;  %v2307_v38 = vadd.f32 %v3158_v30, %v2306_v46  ;;  %v5642_v29 = vadd.f32 1.0, %v2421_v25  ;;  %v2714_v16 = vadd.f32 %v5460_v8, %v2713_v45 }
 0x337   :  { %v3160_v33 = vpop.eup %3159  ;;  %v2381_v2 = vmul.f32 %v2380_v12, %v5486_v5  ;;  %v2457_v19 = vmul.f32 %v2456_v42, %v5520_v24  ;;  %vm2313_vm0 = vcmp.eq.f32.partialorder %v2312_v31, 8.507059e+37  ;;  %v2409_v20 = vadd.f32 0.18741608, %v2408_v4 }
 0x338   :  { %v2556_v15 = vpack.c.bf16 %v2538_v7, %v2536_v36  ;;  %v2311_v22 = vsel %vm2310_vm15, %v3158_v30, %v2307_v38  ;;  %v2344_v60 = vmul.f32 %v3160_v33, %v5622_v3  ;;  %v2446_v59 = vmul.f32 %v5574_v21, %v5520_v24 }
 0x339   :  { %v2316_v48 = vsel %vm2313_vm0, %v2315_v13, %v2311_v22  ;;  %3161 = vrcp.f32 %v5642_v29  ;;  %v2352_v1 = vand.u32 2147483647, %v5622_v3  ;;  %v5652_v23 = vadd.f32 1.0, %v2381_v2 }
 0x33a   :  { %v2760_v28 = vpop.f32.mrf.mxu3  ;;  %2730 = vmatmul.bf16.gmra.mxu2 %v2556_v15  ;;  %v2345_v26 = vsub.f32 1.0, %v2344_v60  ;;  %v2505_v50 = vadd.f32 1.0, %v2917_v63  ;;  %v2354_v40 = vand.u32 2147483648, %v5622_v3  ;;  %v2458_v62 = vadd.f32 0.112945676, %v2457_v19 }
 0x33b   :  { %v2761_v32 = vadd.f32 %v2760_v28, %v2712_v10  ;;  %v2317_v10 = vmul.f32 %v2316_v48, %v2292_v11  ;;  %vm2349_vm1 = vweird.f32 %v3160_v33  ;;  %3163 = vrcp.f32 %v5652_v23 }
 0x33c   :  { %v2346_v17 = vmul.f32 %v3160_v33, %v2345_v26  ;;  %v1163_v21 = vmul.f32 0.5, %v5426_v52  ;;  %v2331_v6 = vadd.f32 1.1283791, %v5578_v39  ;;  %v2368_v11 = vmul.f32 %v5566_v57, %v5486_v5 }
 0x33d   :  { %2794 = vst [vmem:[#allocation13 + $0x20] sm:$0xff] %v2761_v32  ;;  %v2919_v4 = vclamps-f32 %v2317_v10, 1.0  ;;  %v2459_v53 = vmul.f32 %v2458_v62, %v5520_v24  ;;  %v2447_v37 = vadd.f32 0.05243302, %v2446_v59  ;;  %vm2348_vm2 = vweird.f32 %v5622_v3 }
 0x33e   :  { %v2347_v34 = vadd.f32 %v3160_v33, %v2346_v17  ;;  %v2410_v56 = vmul.f32 %v2409_v20, %v5490_v43  ;;  %vm2350_vm3 = vmor %vm2348_vm2, %vm2349_vm1  ;;  %vm2353_vm4 = vcmp.eq.f32.partialorder %v2352_v1, 8.507059e+37  ;;  %v2355_v0 = vor.u32 1.1754944e-38, %v2354_v40 }
 0x33f   :  { %v2507_v28 = vadd.f32 1.0, %v2919_v4  ;;  %v3162_v27 = vpop.eup %3161  ;;  %v2460_v52 = vadd.f32 0.4994258, %v2459_v53  ;;  %v2537_v39 = vmul.f32 %v2505_v50, %v5500_v18  ;;  %v2332_v31 = vmul.f32 %v2331_v6, %v5442_v61 }
 0x340   :  { %v2351_v55 = vsel %vm2350_vm3, %v3160_v33, %v2347_v34  ;;  %v2424_v57 = vmul.f32 %v3162_v27, %v5642_v29  ;;  %v2369_v58 = vadd.f32 0.18741608, %v2368_v11  ;;  %v2448_v45 = vmul.f32 %v2447_v37, %v5520_v24 }
 0x341   :  { %v2539_v32 = vmul.f32 %v2507_v28, %v1163_v21  ;;  %v2356_v54 = vsel %vm2353_vm4, %v2355_v0, %v2351_v55  ;;  %v2461_v46 = vmul.f32 %v2460_v52, %v5520_v24  ;;  %v3164_v3 = vpop.eup %3163  ;;  %v2434_v13 = vand.u32 2147483648, %v5642_v29 }
 0x342   :  { %v2762_v14 = vpop.f32.mrf.mxu3  ;;  %v2425_v25 = vsub.f32 1.0, %v2424_v57  ;;  %v2357_v12 = vmul.f32 %v2356_v54, %v2332_v31  ;;  %v2384_v18 = vmul.f32 %v3164_v3, %v5652_v23  ;;  %v2411_v36 = vadd.f32 1.1283791, %v2410_v56 }
 0x343   :  { %v2763_v30 = vadd.f32 %v2762_v14, %v2714_v16  ;;  %v2557_v43 = vpack.c.bf16 %v2539_v32, %v2537_v39  ;;  %v5670_v42 = vadd.f32 1.0, %v2461_v46  ;;  %vm2429_vm5 = vweird.f32 %v3162_v27 }
 0x344   :  { %v2426_v61 = vmul.f32 %v3162_v27, %v2425_v25  ;;  %v2432_v38 = vand.u32 2147483647, %v5642_v29  ;;  %v2370_v33 = vmul.f32 %v2369_v58, %v5486_v5  ;;  %v2385_v63 = vsub.f32 1.0, %v2384_v18 }
 0x345   :  { %2795 = vst [vmem:[#allocation13 + $0x28] sm:$0xff] %v2763_v30  ;;  %2779 = vmatmul.bf16.gmra.mxu3 %v2557_v43  ;;  %3165 = vrcp.f32 %v5670_v42  ;;  %v2449_v16 = vadd.f32 0.18741608, %v2448_v45  ;;  %vm2428_vm6 = vweird.f32 %v5642_v29  ;;  %v2435_v19 = vor.u32 1.1754944e-38, %v2434_v13 }
 0x346   :  { %v2427_v2 = vadd.f32 %v3162_v27, %v2426_v61  ;;  %v2920_v15 = vclamps-f32 %v2357_v12, 1.0  ;;  %vm2430_vm7 = vmor %vm2428_vm6, %vm2429_vm5  ;;  %v2386_v22 = vmul.f32 %v3164_v3, %v2385_v63  ;;  %vm2389_vm8 = vweird.f32 %v3164_v3 }
 0x347   :  { %v2394_v60 = vand.u32 2147483648, %v5652_v23  ;;  %v2412_v20 = vmul.f32 %v2411_v36, %v5471_v51  ;;  %vm2433_vm9 = vcmp.eq.f32.partialorder %v2432_v38, 8.507059e+37  ;;  %v2392_v5 = vand.u32 2147483647, %v5652_v23 }
 0x348   :  { %v2431_v59 = vsel %vm2430_vm7, %v3162_v27, %v2427_v2  ;;  %v2387_v14 = vadd.f32 %v3164_v3, %v2386_v22  ;;  %vm2388_vm10 = vweird.f32 %v5652_v23  ;;  %v2371_v29 = vadd.f32 1.1283791, %v2370_v33 }
 0x349   :  { %v2436_v10 = vsel %vm2433_vm9, %v2435_v19, %v2431_v59  ;;  %vm2390_vm11 = vmor %vm2388_vm10, %vm2389_vm8  ;;  %v2450_v50 = vmul.f32 %v2449_v16, %v5520_v24  ;;  %v2508_v30 = vadd.f32 1.0, %v2920_v15  ;;  %v2395_v62 = vor.u32 1.1754944e-38, %v2394_v60 }
 0x34a   :  { %v2716_v7 = vpop.f32.mrf.mxu2  ;;  %v2437_v26 = vmul.f32 %v2436_v10, %v2412_v20  ;;  %v2391_v40 = vsel %vm2390_vm11, %v3164_v3, %v2387_v14  ;;  %vm2393_vm12 = vcmp.eq.f32.partialorder %v2392_v5, 8.507059e+37  ;;  %v1164_v21 = vmul.f32 0.5, %v5430_v35 }
 0x34b   :  { %v2717_v48 = vadd.f32 %v5460_v8, %v2716_v7  ;;  %v3166_v1 = vpop.eup %3165  ;;  %v2396_v11 = vsel %vm2393_vm12, %v2395_v62, %v2391_v40  ;;  %v2372_v23 = vmul.f32 %v2371_v29, %v5466_v44  ;;  %v1166_v53 = vmul.f32 0.5, %v5454_v41 }
 0x34c   :  { %v2922_v4 = vclamps-f32 %v2437_v26, 1.0  ;;  %v2464_v17 = vmul.f32 %v3166_v1, %v5670_v42  ;;  %v2451_v24 = vadd.f32 1.1283791, %v2450_v50  ;;  %v2540_v27 = vmul.f32 %v2508_v30, %v1164_v21 }
 0x34d   :  { %v2472_v56 = vand.u32 2147483647, %v5670_v42  ;;  %v2474_v0 = vand.u32 2147483648, %v5670_v42  ;;  %v2397_v39 = vmul.f32 %v2396_v11, %v2372_v23  ;;  %vm2469_vm13 = vweird.f32 %v3166_v1 }
 0x34e   :  { %v2510_v37 = vadd.f32 1.0, %v2922_v4  ;;  %v2465_v28 = vsub.f32 1.0, %v2464_v17  ;;  %vm2468_vm14 = vweird.f32 %v5670_v42  ;;  %v2452_v57 = vmul.f32 %v2451_v24, %v5496_v47 }
 0x34f   :  { %vm2470_vm15 = vmor %vm2468_vm14, %vm2469_vm13  ;;  %v2475_v41 = vor.u32 1.1754944e-38, %v2474_v0  ;;  %v2921_v31 = vclamps-f32 %v2397_v39, 1.0  ;;  %vm2473_vm0 = vcmp.eq.f32.partialorder %v2472_v56, 8.507059e+37  ;;  %v1165_v13 = vmul.f32 0.5, %v5451_v49 }
 0x350   :  { %v2542_v52 = vmul.f32 %v2510_v37, %v1166_v53  ;;  %v2466_v32 = vmul.f32 %v3166_v1, %v2465_v28  ;;  %v1167_v12 = vmul.f32 0.5, %v5481_v9 }
 0x351   :  { %v2509_v25 = vadd.f32 1.0, %v2921_v31 }
 0x352   :  { %v2718_v34 = vpop.f32.mrf.mxu2  ;;  %v2558_v55 = vpack.c.bf16 %v2542_v52, %v2540_v27  ;;  %v2467_v44 = vadd.f32 %v3166_v1, %v2466_v32 }
 0x353   :  { %v2719_v35 = vadd.f32 %v5460_v8, %v2718_v34  ;;  %v2541_v42 = vmul.f32 %v2509_v25, %v1165_v13 }
 0x354   :  { %v2765_v51 = vpop.f32.mrf.mxu3  ;;  %2735 = vmatmul.bf16.gmra.mxu2 %v2558_v55  ;;  %v2471_v58 = vsel %vm2470_vm15, %v3166_v1, %v2467_v44 }
 0x355   :  { %v2766_v6 = vadd.f32 %v2765_v51, %v2717_v48  ;;  %v2476_v46 = vsel %vm2473_vm0, %v2475_v41, %v2471_v58 }
 0x356   :  { %v2477_v45 = vmul.f32 %v2476_v46, %v2452_v57 }
 0x357   :  { %2796 = vst [vmem:[#allocation13 + $0x30] sm:$0xff] %v2766_v6 }
 0x358   :  { %v2923_v43 = vclamps-f32 %v2477_v45, 1.0 }
 0x35a   :  { %v2511_v18 = vadd.f32 1.0, %v2923_v43 }
 0x35c   :  { %v2767_v54 = vpop.f32.mrf.mxu3  ;;  %v2543_v36 = vmul.f32 %v2511_v18, %v1167_v12 }
 0x35d   :  { %v2768_v3 = vadd.f32 %v2767_v54, %v2719_v35 }
 0x35e   :  { %v2559_v7 = vpack.c.bf16 %v2543_v36, %v2541_v42 }
 0x35f   :  { %2797 = vst [vmem:[#allocation13 + $0x38] sm:$0xff] %v2768_v3 }
 0x360   :  { %2784 = vmatmul.bf16.gmra.mxu3 %v2559_v7 }
 0x364   :  { %v2721_v47 = vpop.f32.mrf.mxu2 }
 0x365   :  { %v2722_v61 = vadd.f32 %v5460_v8, %v2721_v47 }
 0x36c   :  { %v2723_v63 = vpop.f32.mrf.mxu2 }
 0x36d   :  { %v2724_v16 = vadd.f32 %v5460_v8, %v2723_v63 }
 0x376   :  { %v2770_v38 = vpop.f32.mrf.mxu3 }
 0x377   :  { %v2771_v33 = vadd.f32 %v2770_v38, %v2722_v61 }
 0x379   :  { %2798 = vst [vmem:[#allocation13 + $0x40] sm:$0xff] %v2771_v33 }
 0x37e   :  { %v2772_v2 = vpop.f32.mrf.mxu3 }
 0x37f   :  { %v2773_v19 = vadd.f32 %v2772_v2, %v2724_v16 }
 0x381   :  { %2799 = vst [vmem:[#allocation13 + $0x48] sm:$0xff] %v2773_v19  ;;  %v2726_v49 = vpop.f32.mrf.mxu2 }
 0x382   :  { %v2727_v9 = vadd.f32 %v5460_v8, %v2726_v49 }
 0x387   :  { %v2775_v15 = vpop.f32.mrf.mxu3 }
 0x388   :  { %v2776_v22 = vadd.f32 %v2775_v15, %v2727_v9 }
 0x389   :  { %v2728_v60 = vpop.f32.mrf.mxu2 }
 0x38a   :  { %2800 = vst [vmem:[#allocation13 + $0x50] sm:$0xff] %v2776_v22  ;;  %v2729_v20 = vadd.f32 %v5460_v8, %v2728_v60 }
 0x38f   :  { %v2777_v59 = vpop.f32.mrf.mxu3 }
 0x390   :  { %v2778_v5 = vadd.f32 %v2777_v59, %v2729_v20 }
 0x392   :  { %2801 = vst [vmem:[#allocation13 + $0x58] sm:$0xff] %v2778_v5 }
 0x3bd   :  { %v2731_v48 = vpop.f32.mrf.mxu2 }
 0x3be   :  { %v2732_v10 = vadd.f32 %v5460_v8, %v2731_v48 }
 0x3c5   :  { %v2733_v26 = vpop.f32.mrf.mxu2 }
 0x3c6   :  { %v2734_v1 = vadd.f32 %v5460_v8, %v2733_v26 }
 0x3c8   :  { %v2780_v14 = vpop.f32.mrf.mxu3 }
 0x3c9   :  { %v2781_v29 = vadd.f32 %v2780_v14, %v2732_v10 }
 0x3cb   :  { %2802 = vst [vmem:[#allocation13 + $0x60] sm:$0xff] %v2781_v29 }
 0x3d0   :  { %v2782_v50 = vpop.f32.mrf.mxu3 }
 0x3d1   :  { %v2783_v30 = vadd.f32 %v2782_v50, %v2734_v1 }
 0x3d3   :  { %2803 = vst [vmem:[#allocation13 + $0x68] sm:$0xff] %v2783_v30 }
 0x3d7   :  { %v2736_v40 = vpop.f32.mrf.mxu2 }
 0x3d8   :  { %v2737_v62 = vadd.f32 %v5460_v8, %v2736_v40 }
 0x3df   :  { %v2738_v17 = vpop.f32.mrf.mxu2 }
 0x3e0   :  { %v2739_v21 = vadd.f32 %v5460_v8, %v2738_v17 }
 0x3e3   :  { %v2785_v51 = vpop.f32.mrf.mxu3 }
 0x3e4   :  { %v2786_v4 = vadd.f32 %v2785_v51, %v2737_v62 }
 0x3e6   :  { %2804 = vst [vmem:[#allocation13 + $0x70] sm:$0xff] %v2786_v4 }
 0x3eb   :  { %v2787_v6 = vpop.f32.mrf.mxu3 }
 0x3ec   :  { %v2788_v11 = vadd.f32 %v2787_v6, %v2739_v21 }
 0x3ee   :  { %2805 = vst [vmem:[#allocation13 + $0x78] sm:$0xff] %v2788_v11 }
 0x3ef   :  { %2818 = dma.vmem_to_hbm [thread:$0]  %s2811_s1, 2048, %s2813_s24, [#allocation4], %s3352_s26, %s3352_s26, %s3353_s4  }
 0x3f0   :  { %3347 = dma.done.wait [#allocation4], 2048  }
 0x3f1   :  { %3348 = vsyncadd [#allocation4], 4294965248 }
 0x3f2   :  { %2823 = vsyncpa [#allocation3], 1 }
 0x3f3   :  { %2824 = vsyncpa [#allocation6], 1 }
 0x3f4   :  { %2825 = vsyncpa [#allocation9], 1 }
 0x3f5   :  { %2826 = vsyncpa [#allocation12], 1 }
 0x3f6   :  { %2827 = vsyncpa [#allocation4], 1 }

// kernel: tpu_custom_call.1
= control target key start
LH: loop header
LB: loop body
LE: loop exit
PB: predicated region body
PF: predicated region fallthrough
CT: control target
= control target key end

     0   :  { %14 = vsyncpa [#allocation3], 0  ;;  %s5707_s0 = inlined_call_operand.hbm [shape: f32[128,128], index: 0, kind: input, shape index: {}]   ;;  %s5708_s1 = inlined_call_operand.hbm [shape: f32[1,128], index: 1, kind: input, shape index: {}]   ;;  %s5709_s2 = inlined_call_operand.vmem [shape: f32[1,128], index: 2, kind: input, shape index: {}]   ;;  %s5710_s3 = inlined_call_operand.hbm [shape: f32[1,128], index: 3, kind: input, shape index: {}]   ;;  %s5711_s4 = inlined_call_operand.hbm [shape: f32[1,128], index: 4, kind: input, shape index: {}]   ;;  %s5712_s5 = inlined_call_operand.hbm [shape: bf16[128,256], index: 5, kind: input, shape index: {}]   ;;  %s5713_s6 = inlined_call_operand.vmem [shape: f32[1,256], index: 6, kind: input, shape index: {}]   ;;  %s5714_s7 = inlined_call_operand.hbm [shape: bf16[256,128], index: 7, kind: input, shape index: {}]   ;;  %s5715_s8 = inlined_call_operand.vmem [shape: f32[1,128], index: 8, kind: input, shape index: {}]   ;;  %s5716_s9 = inlined_call_operand.hbm [shape: f32[128,128], index: 9, kind: output, shape index: {}]  }
   0x1   :  { %15 = vsyncpa [#allocation6], 0 }
   0x2   :  { %16 = vsyncpa [#allocation9], 0 }
   0x3   :  { %17 = vsyncpa [#allocation12], 0  ;;  %s37_s11 = sshll.u32 %s5708_s1, 4  ;;  %s38_s11 = int_to_ptr.hbm [resolvable:$true] %s37_s11 }
   0x4   :  { %18 = vsyncpa [#allocation4], 0  ;;  %s3349_s12 = smov [#allocation5]   ;;  %s61_s16 = sshll.u32 %s5711_s4, 4  ;;  %s62_s16 = int_to_ptr.hbm [resolvable:$true] %s61_s16 }
   0x5   :  { %s39_s13 = sshll.u32 %s3349_s12, 4  ;;  %s3350_s17 = smov [#allocation8]   ;;  %s40_s13 = int_to_ptr.vmem [resolvable:$true] %s39_s13 }
   0x6   :  { %42 = dma.hbm_to_vmem [thread:$0]  %s38_s11, 16, %s40_s13, [#allocation6]  }
   0x7   :  { %s63_s18 = sshll.u32 %s3350_s17, 4  ;;  %s23_s21 = sshll.u32 %s5707_s0, 4  ;;  %s64_s18 = int_to_ptr.vmem [resolvable:$true] %s63_s18  ;;  %s24_s21 = int_to_ptr.hbm [resolvable:$true] %s23_s21 }
   0x8   :  { %66 = dma.hbm_to_vmem [thread:$0]  %s62_s16, 16, %s64_s18, [#allocation9]  }
   0x9   :  { %s3351_s1 = smov [#allocation2]   ;;  %s50_s25 = sshll.u32 %s5710_s3, 4  ;;  %s51_s25 = int_to_ptr.hbm [resolvable:$true] %s50_s25 }
   0xa   :  { %s25_s22 = sshll.u32 %s3351_s1, 4  ;;  %s3352_s26 = smov 128   ;;  %s26_s22 = int_to_ptr.vmem [resolvable:$true] %s25_s22 }
   0xb   :  { %s3353_s4 = smov 8   ;;  %s3354_s27 = smov [#allocation7]  }
   0xc   :  { %31 = dma.hbm_to_vmem [thread:$0]  %s24_s21, 2048, %s26_s22, [#allocation3], %s3352_s26, %s3352_s26, %s3353_s4  }
   0xd   :  { %s52_s28 = sshll.u32 %s3354_s27, 4  ;;  %s71_s30 = sshll.u32 %s5712_s5, 4  ;;  %s53_s28 = int_to_ptr.vmem [resolvable:$true] %s52_s28  ;;  %s72_s30 = int_to_ptr.hbm [resolvable:$true] %s71_s30 }
   0xe   :  { %55 = dma.hbm_to_vmem [thread:$0]  %s51_s25, 16, %s53_s28, [#allocation6]  }
   0xf   :  { %s86_s3 = sshll.u32 %s5714_s7, 4  ;;  %s3355_s12 = smov [#allocation10]   ;;  %s87_s3 = int_to_ptr.hbm [resolvable:$true] %s86_s3 }
  0x10   :  { %s73_s13 = sshll.u32 %s3355_s12, 4  ;;  %s3356_s14 = smov [#allocation11]   ;;  %s74_s13 = int_to_ptr.vmem [resolvable:$true] %s73_s13 }
  0x11   :  { %79 = dma.hbm_to_vmem [thread:$0]  %s72_s30, 2048, %s74_s13, [#allocation9], %s3352_s26, %s3352_s26, %s3353_s4  }
  0x12   :  { %s88_s15 = sshll.u32 %s3356_s14, 4  ;;  %s3357_s16 = smov 64   ;;  %s89_s15 = int_to_ptr.vmem [resolvable:$true] %s88_s15 }
  0x13   :  { %s3358_s5 = smov 4  }
  0x14   :  { %94 = dma.hbm_to_vmem [thread:$0]  %s87_s3, 2048, %s89_s15, [#allocation12], %s3357_s16, %s3357_s16, %s3358_s5  }
  0x15   :  { %3339 = dma.done.wait [#allocation3], 2048  }
  0x16   :  { %3340 = vsyncadd [#allocation3], 4294965248 }
  0x17   :  { %3341 = dma.done.wait [#allocation6], 32  }
  0x18   :  { %3342 = vsyncadd [#allocation6], 4294967264 }
  0x19   :  { %3343 = dma.done.wait [#allocation9], 2064  }
  0x1a   :  { %3344 = vsyncadd [#allocation9], 4294965232 }
  0x1b   :  { %3345 = dma.done.wait [#allocation12], 2048  }
  0x1c   :  { %3346 = vsyncadd [#allocation12], 4294965248  ;;  %v3435_v0 = vld [vmem:[#allocation2] sm:$0xff]  ;;  %v3437_v1 = vld [vmem:[#allocation2 + $0x10] sm:$0xff]  ;;  %v3359_v24 = vmov 128.0   ;;  %s2812_s24 = sshll.u32 %s5716_s9, 4  ;;  %s2813_s24 = int_to_ptr.hbm [resolvable:$true] %s2812_s24 }
  0x1d   :  { %139 = vadd.xlane.f32.xlu0 %v3435_v0  ;;  %143 = vadd.xlane.f32.xlu2 %v3437_v1  ;;  %v194_v2 = vmul.f32 %v3435_v0, %v3435_v0  ;;  %v3443_v3 = vld [vmem:[#allocation2 + $0x8] sm:$0xff]  ;;  %v3445_v4 = vld [vmem:[#allocation2 + $0x18] sm:$0xff]  ;;  %v196_v6 = vmul.f32 %v3437_v1, %v3437_v1  ;;  %v3453_v7 = vld [vmem:[#allocation2 + $0x20] sm:$0xff]  ;;  %3037 = vrcp.f32 %v3359_v24 }
  0x1e   :  { %v195_v5 = vmul.f32 %v3443_v3, %v3443_v3  ;;  %v197_v8 = vmul.f32 %v3445_v4, %v3445_v4  ;;  %v3458_v9 = vld [vmem:[#allocation2 + $0x28] sm:$0xff]  ;;  %v198_v11 = vmul.f32 %v3453_v7, %v3453_v7  ;;  %v3465_v12 = vld [vmem:[#allocation2 + $0x30] sm:$0xff]  ;;  %v3469_v14 = vld [vmem:[#allocation2 + $0x38] sm:$0xff] }
  0x1f   :  { %210 = vadd.xlane.f32.xlu1 %v194_v2  ;;  %v199_v10 = vmul.f32 %v3458_v9, %v3458_v9  ;;  %v200_v13 = vmul.f32 %v3465_v12, %v3465_v12  ;;  %v201_v15 = vmul.f32 %v3469_v14, %v3469_v14  ;;  %v3475_v16 = vld [vmem:[#allocation2 + $0x48] sm:$0xff]  ;;  %v3477_v17 = vld [vmem:[#allocation2 + $0x40] sm:$0xff]  ;;  %v3481_v18 = vld [vmem:[#allocation2 + $0x50] sm:$0xff] }
  0x20   :  { %v202_v19 = vmul.f32 %v3477_v17, %v3477_v17  ;;  %v204_v20 = vmul.f32 %v3481_v18, %v3481_v18  ;;  %v203_v21 = vmul.f32 %v3475_v16, %v3475_v16  ;;  %v3489_v22 = vld [vmem:[#allocation2 + $0x58] sm:$0xff] }
  0x21   :  { %v205_v23 = vmul.f32 %v3489_v22, %v3489_v22 }
  0x23   :  { %v3038_v25 = vpop.eup %3037 }
  0x24   :  { %v172_v26 = vmul.f32 128.0, %v3038_v25  ;;  %vm176_vm0 = vweird.f32 %v3038_v25 }
  0x25   :  { %141 = vadd.xlane.f32.xlu0 %v3443_v3  ;;  %145 = vadd.xlane.f32.xlu2 %v3445_v4 }
  0x26   :  { %v173_v27 = vsub.f32 1.0, %v172_v26 }
  0x27   :  { %212 = vadd.xlane.f32.xlu1 %v195_v5 }
  0x28   :  { %v174_v28 = vmul.f32 %v3038_v25, %v173_v27  ;;  %v3536_v27 = vld [vmem:[#allocation5] ss:$0 sm:$0xff] }
  0x2a   :  { %v175_v29 = vadd.f32 %v3038_v25, %v174_v28 }
  0x2c   :  { %v3495_v30 = vsel %vm176_vm0, %v3038_v25, %v175_v29 }
  0x2d   :  { %214 = vadd.xlane.f32.xlu0 %v196_v6  ;;  %147 = vadd.xlane.f32.xlu2 %v3453_v7 }
  0x2f   :  { %216 = vadd.xlane.f32.xlu1 %v197_v8 }
  0x35   :  { %149 = vadd.xlane.f32.xlu0 %v3458_v9  ;;  %220 = vadd.xlane.f32.xlu2 %v199_v10 }
  0x37   :  { %218 = vadd.xlane.f32.xlu1 %v198_v11 }
  0x3d   :  { %151 = vadd.xlane.f32.xlu0 %v3465_v12  ;;  %222 = vadd.xlane.f32.xlu2 %v200_v13 }
  0x3f   :  { %153 = vadd.xlane.f32.xlu1 %v3469_v14 }
  0x45   :  { %224 = vadd.xlane.f32.xlu0 %v201_v15  ;;  %157 = vadd.xlane.f32.xlu2 %v3475_v16 }
  0x47   :  { %155 = vadd.xlane.f32.xlu1 %v3477_v17 }
  0x4d   :  { %226 = vadd.xlane.f32.xlu0 %v202_v19  ;;  %230 = vadd.xlane.f32.xlu2 %v204_v20 }
  0x4f   :  { %228 = vadd.xlane.f32.xlu1 %v203_v21 }
  0x55   :  { %159 = vadd.xlane.f32.xlu0 %v3481_v18 }
  0x57   :  { %161 = vadd.xlane.f32.xlu1 %v3489_v22 }
  0x5d   :  { %232 = vadd.xlane.f32.xlu0 %v205_v23 }
  0x90   :  { %v140_v31 = vpop.xlane.xlu0 %139  ;;  %v144_v32 = vpop.xlane.xlu2 %143 }
  0x91   :  { %v178_v33 = vmul.f32 %v3495_v30, %v140_v31  ;;  %v3503_v43 = vmul.f32 %v3495_v30, %v144_v32 }
  0x92   :  { %v211_v34 = vpop.xlane.xlu1 %210 }
  0x93   :  { %v258_v35 = vmul.f32 %v178_v33, %v178_v33  ;;  %v242_v36 = vmul.f32 %v211_v34, %v3495_v30  ;;  %v260_v48 = vmul.f32 %v3503_v43, %v3503_v43  ;;  %v290_v23 = vsub.f32 %v3435_v0, %v178_v33  ;;  %v3542_v0 = vld [vmem:[%s5709_s2] ss:$0 sm:$0xff] }
  0x95   :  { %v274_v37 = vsub.f32 %v242_v36, %v258_v35 }
  0x97   :  { %v306_v38 = vadd.f32 1e-05, %v274_v37 }
  0x98   :  { %v142_v39 = vpop.xlane.xlu0 %141  ;;  %v146_v40 = vpop.xlane.xlu2 %145 }
  0x99   :  { %v3500_v41 = vmul.f32 %v3495_v30, %v142_v39  ;;  %3039 = vrsqrt.f32 %v306_v38  ;;  %v3509_v46 = vmul.f32 %v3495_v30, %v146_v40  ;;  %vm328_vm2 = vweird.f32 %v306_v38 }
  0x9a   :  { %v213_v42 = vpop.xlane.xlu1 %212 }
  0x9b   :  { %v259_v44 = vmul.f32 %v3500_v41, %v3500_v41  ;;  %v243_v45 = vmul.f32 %v213_v42, %v3495_v30  ;;  %v261_v55 = vmul.f32 %v3509_v46, %v3509_v46 }
  0x9d   :  { %v275_v47 = vsub.f32 %v243_v45, %v259_v44 }
  0x9f   :  { %v3040_v49 = vpop.eup %3039  ;;  %v307_v50 = vadd.f32 1e-05, %v275_v47 }
  0xa0   :  { %v215_v51 = vpop.xlane.xlu0 %214  ;;  %v148_v52 = vpop.xlane.xlu2 %147  ;;  %v323_v53 = vmul.f32 %v3040_v49, %v306_v38  ;;  %vm329_vm1 = vweird.f32 %v3040_v49 }
  0xa1   :  { %v244_v54 = vmul.f32 %v215_v51, %v3495_v30  ;;  %3041 = vrsqrt.f32 %v307_v50  ;;  %v3520_v62 = vmul.f32 %v3495_v30, %v148_v52  ;;  %vm330_vm3 = vmor %vm328_vm2, %vm329_vm1  ;;  %vm338_vm5 = vweird.f32 %v307_v50 }
  0xa2   :  { %v217_v56 = vpop.xlane.xlu1 %216  ;;  %v324_v57 = vmul.f32 %v3040_v49, %v323_v53 }
  0xa3   :  { %v276_v58 = vsub.f32 %v244_v54, %v260_v48  ;;  %v245_v59 = vmul.f32 %v217_v56, %v3495_v30  ;;  %v262_v15 = vmul.f32 %v3520_v62, %v3520_v62  ;;  %v291_v48 = vsub.f32 %v3443_v3, %v3500_v41 }
  0xa4   :  { %v325_v60 = vmul.f32 0.5, %v324_v57  ;;  %v292_v41 = vsub.f32 %v3437_v1, %v3503_v43 }
  0xa5   :  { %v3517_v61 = vadd.f32 1e-05, %v276_v58  ;;  %v277_v63 = vsub.f32 %v245_v59, %v261_v55 }
  0xa6   :  { %v326_v2 = vsub.f32 1.5, %v325_v60 }
  0xa7   :  { %3043 = vrsqrt.f32 %v3517_v61  ;;  %v3042_v5 = vpop.eup %3041  ;;  %v3523_v6 = vadd.f32 1e-05, %v277_v63  ;;  %vm348_vm8 = vweird.f32 %v3517_v61 }
  0xa8   :  { %v150_v8 = vpop.xlane.xlu0 %149  ;;  %v221_v10 = vpop.xlane.xlu2 %220  ;;  %v327_v11 = vmul.f32 %v3040_v49, %v326_v2  ;;  %v333_v13 = vmul.f32 %v3042_v5, %v307_v50  ;;  %vm339_vm4 = vweird.f32 %v3042_v5 }
  0xa9   :  { %v3528_v19 = vmul.f32 %v3495_v30, %v150_v8  ;;  %3045 = vrsqrt.f32 %v3523_v6  ;;  %v247_v20 = vmul.f32 %v221_v10, %v3495_v30  ;;  %vm340_vm6 = vmor %vm338_vm5, %vm339_vm4  ;;  %vm358_vm10 = vweird.f32 %v3523_v6 }
  0xaa   :  { %v219_v21 = vpop.xlane.xlu1 %218  ;;  %v334_v24 = vmul.f32 %v3042_v5, %v333_v13  ;;  %v331_v28 = vsel %vm330_vm3, %v3040_v49, %v327_v11 }
  0xab   :  { %v263_v25 = vmul.f32 %v3528_v19, %v3528_v19  ;;  %v246_v26 = vmul.f32 %v219_v21, %v3495_v30  ;;  %v482_v35 = vmul.f32 %v331_v28, %v290_v23  ;;  %v293_v21 = vsub.f32 %v3445_v4, %v3509_v46 }
  0xac   :  { %v335_v31 = vmul.f32 0.5, %v334_v24 }
  0xad   :  { %v3044_v29 = vpop.eup %3043  ;;  %v279_v32 = vsub.f32 %v247_v20, %v263_v25  ;;  %v278_v34 = vsub.f32 %v246_v26, %v262_v15  ;;  %v501_v39 = vmul.f32 %v3536_v27, %v482_v35 }
  0xae   :  { %v343_v36 = vmul.f32 %v3044_v29, %v3517_v61  ;;  %v336_v33 = vsub.f32 1.5, %v335_v31  ;;  %vm349_vm7 = vweird.f32 %v3044_v29 }
  0xaf   :  { %v3544_v37 = vadd.f32 1e-05, %v279_v32  ;;  %v3546_v38 = vadd.f32 1e-05, %v278_v34  ;;  %v3046_v40 = vpop.eup %3045  ;;  %v3556_v53 = vadd.f32 %v3542_v0, %v501_v39  ;;  %vm350_vm9 = vmor %vm348_vm8, %vm349_vm7 }
  0xb0   :  { %v344_v42 = vmul.f32 %v3044_v29, %v343_v36  ;;  %v152_v44 = vpop.xlane.xlu0 %151  ;;  %v337_v45 = vmul.f32 %v3042_v5, %v336_v33  ;;  %v353_v47 = vmul.f32 %v3046_v40, %v3523_v6  ;;  %v223_v57 = vpop.xlane.xlu2 %222  ;;  %vm359_vm11 = vweird.f32 %v3046_v40 }
  0xb1   :  { %3047 = vrsqrt.f32 %v3544_v37  ;;  %538 = vadd.xlane.f32.xlu2 %v3556_v53  ;;  %v3563_v3 = vmul.f32 %v3495_v30, %v152_v44  ;;  %vm360_vm12 = vmor %vm358_vm10, %vm359_vm11  ;;  %vm368_vm13 = vweird.f32 %v3546_v38  ;;  %vm378_vm0 = vweird.f32 %v3544_v37 }
  0xb2   :  { %v345_v49 = vmul.f32 0.5, %v344_v42  ;;  %3049 = vrsqrt.f32 %v3546_v38  ;;  %v154_v51 = vpop.xlane.xlu1 %153  ;;  %v354_v52 = vmul.f32 %v3046_v40, %v353_v47  ;;  %v341_v54 = vsel %vm340_vm6, %v3042_v5, %v337_v45 }
  0xb3   :  { %v483_v50 = vmul.f32 %v341_v54, %v291_v48  ;;  %v3559_v56 = vmul.f32 %v3495_v30, %v154_v51  ;;  %v248_v5 = vmul.f32 %v223_v57, %v3495_v30  ;;  %v264_v20 = vmul.f32 %v3563_v3, %v3563_v3 }
  0xb4   :  { %v346_v55 = vsub.f32 1.5, %v345_v49  ;;  %v355_v58 = vmul.f32 0.5, %v354_v52 }
  0xb5   :  { %v502_v60 = vmul.f32 %v3536_v27, %v483_v50  ;;  %v265_v61 = vmul.f32 %v3559_v56, %v3559_v56  ;;  %v280_v33 = vsub.f32 %v248_v5, %v264_v20 }
  0xb6   :  { %v347_v59 = vmul.f32 %v3044_v29, %v346_v55  ;;  %v356_v2 = vsub.f32 1.5, %v355_v58 }
  0xb7   :  { %v3569_v63 = vpop.eup %3047  ;;  %v3578_v1 = vadd.f32 %v3542_v0, %v502_v60  ;;  %v3617_v54 = vadd.f32 1e-05, %v280_v33 }
  0xb8   :  { %v3573_v8 = vpop.eup %3049  ;;  %v373_v10 = vmul.f32 %v3569_v63, %v3544_v37  ;;  %v351_v43 = vsel %vm350_vm9, %v3044_v29, %v347_v59  ;;  %v225_v11 = vpop.xlane.xlu0 %224  ;;  %v357_v13 = vmul.f32 %v3046_v40, %v356_v2  ;;  %vm379_vm1 = vweird.f32 %v3569_v63 }
  0xb9   :  { %v363_v6 = vmul.f32 %v3573_v8, %v3546_v38  ;;  %v484_v15 = vmul.f32 %v351_v43, %v292_v41  ;;  %540 = vadd.xlane.f32.xlu0 %v3578_v1  ;;  %v249_v24 = vmul.f32 %v225_v11, %v3495_v30  ;;  %v158_v35 = vpop.xlane.xlu2 %157  ;;  %vm369_vm14 = vweird.f32 %v3573_v8  ;;  %vm3646_vm2 = vmor %vm378_vm0, %vm379_vm1 }
  0xba   :  { %v374_v23 = vmul.f32 %v3569_v63, %v373_v10  ;;  %v156_v25 = vpop.xlane.xlu1 %155  ;;  %v361_v29 = vsel %vm360_vm12, %v3046_v40, %v357_v13  ;;  %v3605_v40 = vld [vmem:[#allocation2 + $0x68] sm:$0xff]  ;;  %v3610_v47 = vmul.f32 %v3495_v30, %v158_v35  ;;  %vm3622_vm15 = vmor %vm368_vm13, %vm369_vm14  ;;  %v586_v38 = vmul.f32 %v3556_v53, %v3556_v53 }
  0xbb   :  { %v364_v26 = vmul.f32 %v3573_v8, %v363_v6  ;;  %v503_v28 = vmul.f32 %v3536_v27, %v484_v15  ;;  %v3594_v31 = vmul.f32 %v3495_v30, %v156_v25  ;;  %v485_v32 = vmul.f32 %v361_v29, %v293_v21 }
  0xbc   :  { %v281_v34 = vsub.f32 %v249_v24, %v265_v61  ;;  %v375_v4 = vmul.f32 0.5, %v374_v23  ;;  %v267_v57 = vmul.f32 %v3610_v47, %v3610_v47  ;;  %v294_v37 = vsub.f32 %v3453_v7, %v3520_v62  ;;  %v3659_v62 = vld [vmem:[#allocation2 + $0x60] sm:$0xff] }
  0xbd   :  { %v365_v46 = vmul.f32 0.5, %v364_v26  ;;  %v3597_v36 = vadd.f32 %v3542_v0, %v503_v28  ;;  %v504_v39 = vmul.f32 %v3536_v27, %v485_v32  ;;  %v266_v45 = vmul.f32 %v3594_v31, %v3594_v31 }
  0xbe   :  { %v3601_v42 = vadd.f32 1e-05, %v281_v34  ;;  %v376_v51 = vsub.f32 1.5, %v375_v4  ;;  %v295_v11 = vsub.f32 %v3458_v9, %v3528_v19  ;;  %v587_v7 = vmul.f32 %v3578_v1, %v3578_v1 }
  0xbf   :  { %v366_v44 = vsub.f32 1.5, %v365_v46  ;;  %542 = vadd.xlane.f32.xlu1 %v3597_v36  ;;  %v3613_v48 = vadd.f32 %v3542_v0, %v504_v39  ;;  %v588_v6 = vmul.f32 %v3597_v36, %v3597_v36  ;;  %v206_v26 = vmul.f32 %v3659_v62, %v3659_v62 }
  0xc0   :  { %3051 = vrsqrt.f32 %v3601_v42  ;;  %v227_v49 = vpop.xlane.xlu0 %226  ;;  %v377_v60 = vmul.f32 %v3569_v63, %v376_v51  ;;  %vm398_vm3 = vweird.f32 %v3601_v42  ;;  %vm388_vm6 = vweird.f32 %v3617_v54 }
  0xc1   :  { %v367_v52 = vmul.f32 %v3573_v8, %v366_v44  ;;  %v250_v55 = vmul.f32 %v227_v49, %v3495_v30  ;;  %165 = vadd.xlane.f32.xlu0 %v3605_v40  ;;  %544 = vadd.xlane.f32.xlu2 %v3613_v48  ;;  %3053 = vrsqrt.f32 %v3617_v54  ;;  %v231_v13 = vpop.xlane.xlu2 %230 }
  0xc2   :  { %v229_v58 = vpop.xlane.xlu1 %228  ;;  %v381_v9 = vsel %vm3646_vm2, %v3569_v63, %v377_v60  ;;  %v252_v23 = vmul.f32 %v231_v13, %v3495_v30  ;;  %v589_v60 = vmul.f32 %v3613_v48, %v3613_v48 }
  0xc3   :  { %v282_v41 = vsub.f32 %v250_v55, %v266_v45  ;;  %v251_v59 = vmul.f32 %v229_v58, %v3495_v30  ;;  %v371_v2 = vsel %vm3622_vm15, %v3573_v8, %v367_v52  ;;  %v487_v32 = vmul.f32 %v381_v9, %v295_v11 }
  0xc4   :  { %v486_v15 = vmul.f32 %v371_v2, %v294_v37  ;;  %v207_v37 = vmul.f32 %v3605_v40, %v3605_v40 }
  0xc5   :  { %v3640_v5 = vadd.f32 1e-05, %v282_v41  ;;  %v283_v61 = vsub.f32 %v251_v59, %v267_v57  ;;  %v506_v51 = vmul.f32 %v3536_v27, %v487_v32 }
  0xc6   :  { %v3642_v10 = vpop.eup %3051  ;;  %v505_v29 = vmul.f32 %v3536_v27, %v486_v15 }
  0xc7   :  { %602 = vadd.xlane.f32.xlu1 %v586_v38  ;;  %v393_v8 = vmul.f32 %v3642_v10, %v3601_v42  ;;  %3055 = vrsqrt.f32 %v3640_v5  ;;  %v3661_v20 = vadd.f32 1e-05, %v283_v61  ;;  %v3671_v24 = vpop.eup %3053  ;;  %v3707_v59 = vadd.f32 %v3542_v0, %v506_v51 }
  0xc8   :  { %v160_v21 = vpop.xlane.xlu0 %159  ;;  %v383_v4 = vmul.f32 %v3671_v24, %v3617_v54  ;;  %v3693_v49 = vadd.f32 %v3542_v0, %v505_v29  ;;  %vm399_vm4 = vweird.f32 %v3642_v10  ;;  %vm389_vm7 = vweird.f32 %v3671_v24  ;;  %v2886_v29 = vld [vmem:[#allocation10 + $0x70] sm:$0xf] }
  0xc9   :  { %v3667_v19 = vmul.f32 %v3495_v30, %v160_v21  ;;  %606 = vadd.xlane.f32.xlu0 %v588_v6  ;;  %604 = vadd.xlane.f32.xlu2 %v587_v7  ;;  %3057 = vrsqrt.f32 %v3661_v20  ;;  %v394_v25 = vmul.f32 %v3642_v10, %v393_v8  ;;  %vm3719_vm5 = vmor %vm398_vm3, %vm399_vm4  ;;  %v591_v6 = vmul.f32 %v3707_v59, %v3707_v59 }
  0xca   :  { %v162_v63 = vpop.xlane.xlu1 %161  ;;  %v384_v55 = vmul.f32 %v3671_v24, %v383_v4  ;;  %v297_v7 = vsub.f32 %v3469_v14, %v3559_v56  ;;  %vm408_vm8 = vweird.f32 %v3640_v5  ;;  %vm3744_vm10 = vmor %vm388_vm6, %vm389_vm7  ;;  %vm418_vm12 = vweird.f32 %v3661_v20 }
  0xcb   :  { %v268_v28 = vmul.f32 %v3667_v19, %v3667_v19  ;;  %v3684_v46 = vmul.f32 %v3495_v30, %v162_v63  ;;  %v395_v33 = vmul.f32 0.5, %v394_v25  ;;  %v3729_v25 = vld [vmem:[#allocation2 + $0x70] sm:$0xff]  ;;  %v296_v4 = vsub.f32 %v3465_v12, %v3563_v3  ;;  %v2999_v3 = vld [vmem:[#allocation10 + $0x54] sm:$0xf0] }
  0xcc   :  { %v385_v2 = vmul.f32 0.5, %v384_v55  ;;  %v208_v14 = vmul.f32 %v3729_v25, %v3729_v25 }
  0xcd   :  { %v3679_v34 = vpop.eup %3055  ;;  %v284_v35 = vsub.f32 %v252_v23, %v268_v28  ;;  %v269_v50 = vmul.f32 %v3684_v46, %v3684_v46  ;;  %v396_v58 = vsub.f32 1.5, %v395_v33  ;;  %v298_v33 = vsub.f32 %v3477_v17, %v3594_v31 }
  0xce   :  { %v403_v39 = vmul.f32 %v3679_v34, %v3640_v5  ;;  %v386_v15 = vsub.f32 1.5, %v385_v2  ;;  %vm409_vm9 = vweird.f32 %v3679_v34  ;;  %v3750_v5 = vld [vmem:[#allocation2 + $0x78] sm:$0xff]  ;;  %v299_v17 = vsub.f32 %v3475_v16, %v3610_v47 }
  0xcf   :  { %234 = vadd.xlane.f32.xlu1 %v206_v26  ;;  %v3688_v44 = vadd.f32 1e-05, %v284_v35  ;;  %v3690_v45 = vpop.eup %3057  ;;  %v397_v61 = vmul.f32 %v3642_v10, %v396_v58  ;;  %vm3753_vm11 = vmor %vm408_vm8, %vm409_vm9  ;;  %v2888_v35 = vld [vmem:[#allocation10 + $0x78] sm:$0xf0] }
  0xd0   :  { %v233_v52 = vpop.xlane.xlu0 %232  ;;  %v404_v41 = vmul.f32 %v3679_v34, %v403_v39  ;;  %v413_v38 = vmul.f32 %v3690_v45, %v3661_v20  ;;  %v387_v63 = vmul.f32 %v3671_v24, %v386_v15  ;;  %vm419_vm13 = vweird.f32 %v3690_v45 }
  0xd1   :  { %163 = vadd.xlane.f32.xlu2 %v3659_v62  ;;  %546 = vadd.xlane.f32.xlu0 %v3693_v49  ;;  %3059 = vrsqrt.f32 %v3688_v44  ;;  %v253_v57 = vmul.f32 %v233_v52, %v3495_v30  ;;  %v401_v28 = vsel %vm3719_vm5, %v3642_v10, %v397_v61  ;;  %vm3772_vm14 = vmor %vm418_vm12, %vm419_vm13  ;;  %vm428_vm15 = vweird.f32 %v3688_v44 }
  0xd2   :  { %v405_v11 = vmul.f32 0.5, %v404_v41  ;;  %v414_v8 = vmul.f32 %v3690_v45, %v413_v38  ;;  %v489_v56 = vmul.f32 %v401_v28, %v297_v7  ;;  %v391_v20 = vsel %vm3744_vm10, %v3671_v24, %v387_v63 }
  0xd3   :  { %v285_v43 = vsub.f32 %v253_v57, %v269_v50  ;;  %v488_v50 = vmul.f32 %v391_v20, %v296_v4  ;;  %v590_v41 = vmul.f32 %v3693_v49, %v3693_v49  ;;  %v2880_v20 = vld [vmem:[#allocation10 + $0x68] sm:$0xf0] }
  0xd4   :  { %v406_v9 = vsub.f32 1.5, %v405_v11  ;;  %v415_v23 = vmul.f32 0.5, %v414_v8  ;;  %v508_v39 = vmul.f32 %v3536_v27, %v489_v56 }
  0xd5   :  { %v3727_v21 = vadd.f32 1e-05, %v285_v43  ;;  %v507_v16 = vmul.f32 %v3536_v27, %v488_v50 }
  0xd6   :  { %v407_v54 = vmul.f32 %v3679_v34, %v406_v9  ;;  %v416_v10 = vsub.f32 1.5, %v415_v23  ;;  %v3779_v31 = vadd.f32 %v3542_v0, %v508_v39  ;;  %v301_v23 = vsub.f32 %v3489_v22, %v3684_v46  ;;  %v3001_v39 = vld [vmem:[#allocation10 + $0x64] sm:$0xf0] }
  0xd7   :  { %608 = vadd.xlane.f32.xlu1 %v589_v60  ;;  %v3717_v13 = vpop.eup %3059  ;;  %3061 = vrsqrt.f32 %v3727_v21  ;;  %vm438_vm2 = vweird.f32 %v3727_v21 }
  0xd8   :  { %v423_v26 = vmul.f32 %v3717_v13, %v3688_v44  ;;  %v417_v51 = vmul.f32 %v3690_v45, %v416_v10  ;;  %v411_v55 = vsel %vm3753_vm11, %v3679_v34, %v407_v54  ;;  %vm429_vm0 = vweird.f32 %v3717_v13  ;;  %v3003_v54 = vld [vmem:[#allocation10 + $0x74] sm:$0xf0]  ;;  %v3002_v10 = vld [vmem:[#allocation10 + $0x74] sm:$0xf] }
  0xd9   :  { %236 = vadd.xlane.f32.xlu2 %v207_v37  ;;  %612 = vadd.xlane.f32.xlu0 %v591_v6  ;;  %v490_v57 = vmul.f32 %v411_v55, %v298_v33  ;;  %vm430_vm1 = vmor %vm428_vm15, %vm429_vm0  ;;  %v300_v44 = vsub.f32 %v3481_v18, %v3667_v19  ;;  %v3799_v37 = vadd.f32 %v3542_v0, %v507_v16  ;;  %v2878_v33 = vld [vmem:[#allocation10 + $0x60] sm:$0xf] }
  0xda   :  { %v424_v32 = vmul.f32 %v3717_v13, %v423_v26  ;;  %v421_v34 = vsel %vm3772_vm14, %v3690_v45, %v417_v51  ;;  %v209_v45 = vmul.f32 %v3750_v5, %v3750_v5  ;;  %v593_v7 = vmul.f32 %v3779_v31, %v3779_v31  ;;  %v3000_v51 = vld [vmem:[#allocation10 + $0x64] sm:$0xf] }
  0xdb   :  { %v509_v47 = vmul.f32 %v3536_v27, %v490_v57  ;;  %v491_v38 = vmul.f32 %v421_v34, %v299_v17  ;;  %v592_v6 = vmul.f32 %v3799_v37, %v3799_v37  ;;  %v2891_v4 = vor.u32 %v3002_v10, %v2888_v35  ;;  %v2998_v17 = vld [vmem:[#allocation10 + $0x54] sm:$0xf]  ;;  %v2872_v57 = vld [vmem:[#allocation10 + $0x58] sm:$0xf0]  ;;  %v2997_v34 = vld [vmem:[#allocation10 + $0x44] sm:$0xf0] }
  0xdc   :  { %v425_v52 = vmul.f32 0.5, %v424_v32  ;;  %v2887_v32 = vor.u32 %v3003_v54, %v2886_v29  ;;  %v2883_v55 = vor.u32 %v3000_v51, %v2880_v20  ;;  %v2840_v29 = vld [vmem:[#allocation10 + $0x18] sm:$0xf0]  ;;  %v2830_v51 = vld [vmem:[#allocation10] sm:$0xf] }
  0xdd   :  { %v3062_v12 = vpop.eup %3061  ;;  %v3802_v43 = vadd.f32 %v3542_v0, %v509_v47  ;;  %v510_v61 = vmul.f32 %v3536_v27, %v491_v38  ;;  %1087 = vmatpush.bf16.msra.mxu1 %v2891_v4  ;;  %v2864_v47 = vld [vmem:[#allocation10 + $0x48] sm:$0xf0]  ;;  %v2988_v20 = vld [vmem:[#allocation10 + $0x4] sm:$0xf] }
  0xde   :  { %v426_v24 = vsub.f32 1.5, %v425_v52  ;;  %v433_v58 = vmul.f32 %v3062_v12, %v3727_v21  ;;  %vm439_vm3 = vweird.f32 %v3062_v12  ;;  %1038 = vmatpush.bf16.msra.mxu0 %v2887_v32  ;;  %v2879_v52 = vor.u32 %v3001_v39, %v2878_v33 }
  0xdf   :  { %548 = vadd.xlane.f32.xlu1 %v3707_v59  ;;  %v3809_v42 = vadd.f32 %v3542_v0, %v510_v61  ;;  %vm440_vm4 = vmor %vm438_vm2, %vm439_vm3  ;;  %v594_v28 = vmul.f32 %v3802_v43, %v3802_v43  ;;  %v2994_v61 = vld [vmem:[#allocation10 + $0x34] sm:$0xf] }
  0xe0   :  { %v427_v60 = vmul.f32 %v3717_v13, %v426_v24  ;;  %v434_v2 = vmul.f32 %v3062_v12, %v433_v58  ;;  %v2875_v24 = vor.u32 %v2998_v17, %v2872_v57  ;;  %v2862_v58 = vld [vmem:[#allocation10 + $0x40] sm:$0xf] }
  0xe1   :  { %169 = vadd.xlane.f32.xlu2 %v3750_v5  ;;  %238 = vadd.xlane.f32.xlu0 %v208_v14  ;;  %v2863_v16 = vor.u32 %v2997_v34, %v2862_v58 }
  0xe2   :  { %v435_v11 = vmul.f32 0.5, %v434_v2  ;;  %v431_v8 = vsel %vm430_vm1, %v3717_v13, %v427_v60  ;;  %v595_v13 = vmul.f32 %v3809_v42, %v3809_v42  ;;  %1039 = vmatpush.bf16.msra.mxu0 %v2879_v52  ;;  %1088 = vmatpush.bf16.msra.mxu1 %v2883_v55  ;;  %v2989_v52 = vld [vmem:[#allocation10 + $0x4] sm:$0xf0] }
  0xe3   :  { %v492_v18 = vmul.f32 %v431_v8, %v300_v44  ;;  %v2995_v44 = vld [vmem:[#allocation10 + $0x34] sm:$0xf0]  ;;  %v2856_v8 = vld [vmem:[#allocation10 + $0x38] sm:$0xf0]  ;;  %v2831_v55 = vor.u32 %v2989_v52, %v2830_v51 }
  0xe4   :  { %v436_v19 = vsub.f32 1.5, %v435_v11 }
  0xe5   :  { %v511_v15 = vmul.f32 %v3536_v27, %v492_v18  ;;  %v2859_v18 = vor.u32 %v2994_v61, %v2856_v8 }
  0xe6   :  { %v437_v9 = vmul.f32 %v3062_v12, %v436_v19  ;;  %1089 = vmatpush.bf16.msra.mxu1 %v2875_v24 }
  0xe7   :  { %167 = vadd.xlane.f32.xlu1 %v3729_v25  ;;  %v3822_v26 = vadd.f32 %v3542_v0, %v511_v15 }
  0xe8   :  { %v441_v21 = vsel %vm440_vm4, %v3062_v12, %v437_v9  ;;  %v2870_v12 = vld [vmem:[#allocation10 + $0x50] sm:$0xf]  ;;  %v2848_v9 = vld [vmem:[#allocation10 + $0x28] sm:$0xf0] }
  0xe9   :  { %610 = vadd.xlane.f32.xlu2 %v590_v41  ;;  %552 = vadd.xlane.f32.xlu0 %v3779_v31  ;;  %v596_v14 = vmul.f32 %v3822_v26, %v3822_v26  ;;  %v493_v56 = vmul.f32 %v441_v21, %v301_v23  ;;  %v2871_v50 = vor.u32 %v2999_v3, %v2870_v12  ;;  %v2996_v41 = vld [vmem:[#allocation10 + $0x44] sm:$0xf]  ;;  %v2832_v12 = vld [vmem:[#allocation10 + $0x8] sm:$0xf0] }
  0xea   :  { %v2867_v2 = vor.u32 %v2996_v41, %v2864_v47  ;;  %v2835_v57 = vor.u32 %v2988_v20, %v2832_v12 }
  0xeb   :  { %v512_v63 = vmul.f32 %v3536_v27, %v493_v56  ;;  %1040 = vmatpush.bf16.msra.mxu0 %v2871_v50  ;;  %v2838_v56 = vld [vmem:[#allocation10 + $0x10] sm:$0xf] }
  0xec   :  { %1090 = vmatpush.bf16.msra.mxu1 %v2867_v2 }
  0xed   :  { %v3831_v22 = vadd.f32 %v3542_v0, %v512_v63  ;;  %v2991_v63 = vld [vmem:[#allocation10 + $0x14] sm:$0xf0] }
  0xee   :  { %v2839_v54 = vor.u32 %v2991_v63, %v2838_v56 }
  0xef   :  { %240 = vadd.xlane.f32.xlu1 %v209_v45  ;;  %v597_v46 = vmul.f32 %v3831_v22, %v3831_v22  ;;  %1041 = vmatpush.bf16.msra.mxu0 %v2863_v16  ;;  %v2854_v45 = vld [vmem:[#allocation10 + $0x30] sm:$0xf] }
  0xf0   :  { %v2855_v11 = vor.u32 %v2995_v44, %v2854_v45  ;;  %1091 = vmatpush.bf16.msra.mxu1 %v2859_v18 }
  0xf1   :  { %550 = vadd.xlane.f32.xlu2 %v3799_v37  ;;  %554 = vadd.xlane.f32.xlu0 %v3802_v43 }
  0xf3   :  { %1042 = vmatpush.bf16.msra.mxu0 %v2855_v11 }
  0xf7   :  { %614 = vadd.xlane.f32.xlu1 %v592_v6  ;;  %v2846_v6 = vld [vmem:[#allocation10 + $0x20] sm:$0xf] }
  0xf9   :  { %616 = vadd.xlane.f32.xlu2 %v593_v7  ;;  %620 = vadd.xlane.f32.xlu0 %v595_v13  ;;  %v2993_v7 = vld [vmem:[#allocation10 + $0x24] sm:$0xf0]  ;;  %v2992_v13 = vld [vmem:[#allocation10 + $0x24] sm:$0xf] }
  0xfa   :  { %v2847_v15 = vor.u32 %v2993_v7, %v2846_v6 }
  0xfc   :  { %1043 = vmatpush.bf16.msra.mxu0 %v2847_v15 }
  0xff   :  { %556 = vadd.xlane.f32.xlu1 %v3809_v42 }
 0x100   :  { %1044 = vmatpush.bf16.msra.mxu0 %v2839_v54 }
 0x101   :  { %618 = vadd.xlane.f32.xlu2 %v594_v28  ;;  %622 = vadd.xlane.f32.xlu0 %v596_v14  ;;  %v2851_v28 = vor.u32 %v2992_v13, %v2848_v9 }
 0x103   :  { %1092 = vmatpush.bf16.msra.mxu1 %v2851_v28 }
 0x104   :  { %1045 = vmatpush.bf16.msra.mxu0 %v2831_v55 }
 0x107   :  { %558 = vadd.xlane.f32.xlu1 %v3822_v26 }
 0x109   :  { %560 = vadd.xlane.f32.xlu2 %v3831_v22 }
 0x10f   :  { %624 = vadd.xlane.f32.xlu1 %v597_v46  ;;  %v2990_v46 = vld [vmem:[#allocation10 + $0x14] sm:$0xf] }
 0x110   :  { %v2843_v10 = vor.u32 %v2990_v46, %v2840_v29 }
 0x112   :  { %1093 = vmatpush.bf16.msra.mxu1 %v2843_v10 }
 0x116   :  { %1094 = vmatpush.bf16.msra.mxu1 %v2835_v57 }
 0x124   :  { %v539_v38 = vpop.xlane.xlu2 %538 }
 0x125   :  { %v3838_v14 = vmul.f32 %v539_v38, %v3495_v30 }
 0x127   :  { %v650_v33 = vmul.f32 %v3838_v14, %v3838_v14 }
 0x12c   :  { %v541_v60 = vpop.xlane.xlu0 %540 }
 0x12d   :  { %v3841_v32 = vmul.f32 %v541_v60, %v3495_v30 }
 0x12f   :  { %v651_v24 = vmul.f32 %v3841_v32, %v3841_v32 }
 0x132   :  { %v543_v19 = vpop.xlane.xlu1 %542 }
 0x133   :  { %v3844_v35 = vmul.f32 %v543_v19, %v3495_v30 }
 0x134   :  { %v166_v23 = vpop.xlane.xlu0 %165  ;;  %v545_v21 = vpop.xlane.xlu2 %544 }
 0x135   :  { %v652_v58 = vmul.f32 %v3844_v35, %v3844_v35  ;;  %v3862_v18 = vmul.f32 %v545_v21, %v3495_v30  ;;  %v3870_v63 = vmul.f32 %v3495_v30, %v166_v23 }
 0x137   :  { %v653_v46 = vmul.f32 %v3862_v18, %v3862_v18  ;;  %v271_v23 = vmul.f32 %v3870_v63, %v3870_v63 }
 0x13a   :  { %v603_v4 = vpop.xlane.xlu1 %602 }
 0x13b   :  { %v634_v39 = vmul.f32 %v603_v4, %v3495_v30 }
 0x13c   :  { %v607_v17 = vpop.xlane.xlu0 %606  ;;  %v605_v50 = vpop.xlane.xlu2 %604 }
 0x13d   :  { %v666_v3 = vsub.f32 %v634_v39, %v650_v33  ;;  %v636_v34 = vmul.f32 %v607_v17, %v3495_v30  ;;  %v635_v41 = vmul.f32 %v605_v50, %v3495_v30 }
 0x13f   :  { %v698_v16 = vadd.f32 1e-05, %v666_v3  ;;  %v668_v47 = vsub.f32 %v636_v34, %v652_v58  ;;  %v667_v38 = vsub.f32 %v635_v41, %v651_v24 }
 0x141   :  { %3063 = vrsqrt.f32 %v698_v16  ;;  %v3855_v60 = vadd.f32 1e-05, %v668_v47  ;;  %v699_v2 = vadd.f32 1e-05, %v667_v38  ;;  %vm720_vm6 = vweird.f32 %v698_v16 }
 0x142   :  { %v235_v45 = vpop.xlane.xlu1 %234 }
 0x143   :  { %3065 = vrsqrt.f32 %v3855_v60  ;;  %v254_v6 = vmul.f32 %v235_v45, %v3495_v30  ;;  %v682_v45 = vsub.f32 %v3556_v53, %v3838_v14  ;;  %vm730_vm9 = vweird.f32 %v699_v2 }
 0x144   :  { %3067 = vrsqrt.f32 %v699_v2  ;;  %v164_v44 = vpop.xlane.xlu2 %163  ;;  %v547_v61 = vpop.xlane.xlu0 %546  ;;  %v684_v53 = vsub.f32 %v3597_v36, %v3844_v35  ;;  %vm740_vm12 = vweird.f32 %v3855_v60 }
 0x145   :  { %v3859_v11 = vmul.f32 %v3495_v30, %v164_v44 }
 0x147   :  { %v3064_v8 = vpop.eup %3063  ;;  %v270_v7 = vmul.f32 %v3859_v11, %v3859_v11 }
 0x148   :  { %v715_v19 = vmul.f32 %v3064_v8, %v698_v16  ;;  %vm721_vm5 = vweird.f32 %v3064_v8 }
 0x149   :  { %v3867_v13 = vpop.eup %3065  ;;  %v286_v9 = vsub.f32 %v254_v6, %v270_v7  ;;  %vm3887_vm7 = vmor %vm720_vm6, %vm721_vm5 }
 0x14a   :  { %v716_v15 = vmul.f32 %v3064_v8, %v715_v19  ;;  %v609_v28 = vpop.xlane.xlu1 %608  ;;  %v3068_v56 = vpop.eup %3067  ;;  %v735_v4 = vmul.f32 %v3867_v13, %v3855_v60  ;;  %v3899_v19 = vmul.f32 %v547_v61, %v3495_v30  ;;  %vm741_vm11 = vweird.f32 %v3867_v13 }
 0x14b   :  { %v637_v21 = vmul.f32 %v609_v28, %v3495_v30  ;;  %v725_v54 = vmul.f32 %v3068_v56, %v699_v2  ;;  %v3875_v10 = vadd.f32 1e-05, %v286_v9  ;;  %vm731_vm8 = vweird.f32 %v3068_v56  ;;  %vm3981_vm4 = vmor %vm740_vm12, %vm741_vm11 }
 0x14c   :  { %v717_v29 = vmul.f32 0.5, %v716_v15  ;;  %v237_v39 = vpop.xlane.xlu2 %236  ;;  %v613_v51 = vpop.xlane.xlu0 %612  ;;  %v736_v50 = vmul.f32 %v3867_v13, %v735_v4  ;;  %v683_v28 = vsub.f32 %v3578_v1, %v3841_v32  ;;  %vm3910_vm10 = vmor %vm730_vm9, %vm731_vm8 }
 0x14d   :  { %v669_v33 = vsub.f32 %v637_v21, %v653_v46  ;;  %v726_v20 = vmul.f32 %v3068_v56, %v725_v54  ;;  %3069 = vrsqrt.f32 %v3875_v10  ;;  %v255_v12 = vmul.f32 %v237_v39, %v3495_v30 }
 0x14e   :  { %v718_v52 = vsub.f32 1.5, %v717_v29  ;;  %v737_v6 = vmul.f32 0.5, %v736_v50  ;;  %v639_v61 = vmul.f32 %v613_v51, %v3495_v30  ;;  %v302_v46 = vsub.f32 %v3659_v62, %v3859_v11  ;;  %v3923_v29 = vld [vmem:[#allocation7] ss:$0 sm:$0xff] }
 0x14f   :  { %v3882_v55 = vadd.f32 1e-05, %v669_v33  ;;  %v727_v17 = vmul.f32 0.5, %v726_v20  ;;  %v287_v57 = vsub.f32 %v255_v12, %v271_v23  ;;  %v654_v54 = vmul.f32 %v3899_v19, %v3899_v19 }
 0x150   :  { %v719_v3 = vmul.f32 %v3064_v8, %v718_v52  ;;  %v738_v39 = vsub.f32 1.5, %v737_v6  ;;  %vm448_vm13 = vweird.f32 %v3875_v10 }
 0x151   :  { %3071 = vrsqrt.f32 %v3882_v55  ;;  %v728_v24 = vsub.f32 1.5, %v727_v17  ;;  %v3891_v41 = vadd.f32 1e-05, %v287_v57  ;;  %v3943_v57 = vld [vmem:[#allocation8] ss:$0 sm:$0xff]  ;;  %vm750_vm15 = vweird.f32 %v3882_v55 }
 0x152   :  { %v549_v58 = vpop.xlane.xlu1 %548  ;;  %v723_v16 = vsel %vm3887_vm7, %v3064_v8, %v719_v3  ;;  %v739_v34 = vmul.f32 %v3867_v13, %v738_v39 }
 0x153   :  { %v3894_v47 = vmul.f32 %v549_v58, %v3495_v30  ;;  %v3070_v38 = vpop.eup %3069  ;;  %v729_v44 = vmul.f32 %v3068_v56, %v728_v24  ;;  %3073 = vrsqrt.f32 %v3891_v41  ;;  %v874_v32 = vmul.f32 %v723_v16, %v682_v45 }
 0x154   :  { %v443_v7 = vmul.f32 %v3070_v38, %v3875_v10  ;;  %v170_v15 = vpop.xlane.xlu2 %169  ;;  %v239_v9 = vpop.xlane.xlu0 %238  ;;  %vm449_vm14 = vweird.f32 %v3070_v38  ;;  %vm458_vm5 = vweird.f32 %v3891_v41 }
 0x155   :  { %v655_v2 = vmul.f32 %v3894_v47, %v3894_v47  ;;  %v733_v1 = vsel %vm3910_vm10, %v3068_v56, %v729_v44  ;;  %v256_v52 = vmul.f32 %v239_v9, %v3495_v30  ;;  %v893_v17 = vmul.f32 %v3923_v29, %v874_v32  ;;  %vm450_vm0 = vmor %vm448_vm13, %vm449_vm14 }
 0x156   :  { %v444_v21 = vmul.f32 %v3070_v38, %v443_v7  ;;  %v875_v11 = vmul.f32 %v733_v1, %v683_v28  ;;  %v3951_v44 = vmul.f32 %v3495_v30, %v170_v15 }
 0x157   :  { %v3917_v8 = vpop.eup %3071  ;;  %v671_v33 = vsub.f32 %v639_v61, %v655_v2  ;;  %v912_v15 = vadd.f32 %v3943_v57, %v893_v17  ;;  %v743_v17 = vsel %vm3981_vm4, %v3867_v13, %v739_v34 }
 0x158   :  { %v745_v4 = vmul.f32 %v3917_v8, %v3882_v55  ;;  %v445_v62 = vmul.f32 0.5, %v444_v21  ;;  %v894_v50 = vmul.f32 %v3923_v29, %v875_v11  ;;  %vm751_vm1 = vweird.f32 %v3917_v8 }
 0x159   :  { %v3933_v51 = vadd.f32 1e-05, %v671_v33  ;;  %v3936_v23 = vpop.eup %3073  ;;  %vm3966_vm2 = vmor %vm750_vm15, %vm751_vm1 }
 0x15a   :  { %v746_v56 = vmul.f32 %v3917_v8, %v745_v4  ;;  %v168_v20 = vpop.xlane.xlu1 %167  ;;  %v446_v12 = vsub.f32 1.5, %v445_v62  ;;  %v453_v58 = vmul.f32 %v3936_v23, %v3891_v41  ;;  %v913_v21 = vadd.f32 %v3943_v57, %v894_v50 }
 0x15b   :  { %v3939_v3 = vmul.f32 %v3495_v30, %v168_v20  ;;  %3075 = vrsqrt.f32 %v3933_v51  ;;  %vm459_vm3 = vweird.f32 %v3936_v23  ;;  %vm770_vm7 = vweird.f32 %v3933_v51 }
 0x15c   :  { %v747_v24 = vmul.f32 0.5, %v746_v56  ;;  %v447_v45 = vmul.f32 %v3070_v38, %v446_v12  ;;  %v611_v6 = vpop.xlane.xlu2 %610  ;;  %v553_v7 = vpop.xlane.xlu0 %552  ;;  %v454_v28 = vmul.f32 %v3936_v23, %v453_v58  ;;  %v928_v62 = vpack.c.bf16 %v913_v21, %v912_v15  ;;  %vm460_vm6 = vmor %vm458_vm5, %vm459_vm3 }
 0x15d   :  { %v272_v16 = vmul.f32 %v3939_v3, %v3939_v3  ;;  %v638_v14 = vmul.f32 %v611_v6, %v3495_v30  ;;  %v685_v12 = vsub.f32 %v3613_v48, %v3862_v18  ;;  %v303_v48 = vsub.f32 %v3605_v40, %v3870_v63 }
 0x15e   :  { %v748_v9 = vsub.f32 1.5, %v747_v24  ;;  %v451_v61 = vsel %vm450_vm0, %v3070_v38, %v447_v45  ;;  %v455_v4 = vmul.f32 0.5, %v454_v28  ;;  %v273_v38 = vmul.f32 %v3951_v44, %v3951_v44  ;;  %1046 = vmatmul.bf16.vlgmr.msra.gmra.mxu0 %v928_v62  ;;  %1095 = vmatmul.bf16.vlgmr.msra.gmra.mxu1 %v928_v62 }
 0x15f   :  { %v288_v2 = vsub.f32 %v256_v52, %v272_v16  ;;  %v494_v1 = vmul.f32 %v451_v61, %v302_v46  ;;  %v670_v33 = vsub.f32 %v638_v14, %v654_v54  ;;  %v876_v16 = vmul.f32 %v743_v17, %v684_v53 }
 0x160   :  { %v749_v32 = vmul.f32 %v3917_v8, %v748_v9  ;;  %v456_v46 = vsub.f32 1.5, %v455_v4  ;;  %v687_v28 = vsub.f32 %v3707_v59, %v3894_v47  ;;  %v4037_v47 = vmul.f32 %v553_v7, %v3495_v30 }
 0x161   :  { %v3973_v39 = vadd.f32 1e-05, %v288_v2  ;;  %v3975_v11 = vpop.eup %3075  ;;  %v3985_v54 = vadd.f32 1e-05, %v670_v33  ;;  %v513_v52 = vmul.f32 %v3536_v27, %v494_v1  ;;  %v895_v21 = vmul.f32 %v3923_v29, %v876_v16 }
 0x162   :  { %v241_v56 = vpop.xlane.xlu1 %240  ;;  %v753_v20 = vsel %vm3966_vm2, %v3917_v8, %v749_v32  ;;  %v765_v60 = vmul.f32 %v3975_v11, %v3933_v51  ;;  %v457_v50 = vmul.f32 %v3936_v23, %v456_v46  ;;  %vm771_vm8 = vweird.f32 %v3975_v11 }
 0x163   :  { %3077 = vrsqrt.f32 %v3973_v39  ;;  %v257_v8 = vmul.f32 %v241_v56, %v3495_v30  ;;  %v4009_v58 = vadd.f32 %v3542_v0, %v513_v52  ;;  %v877_v13 = vmul.f32 %v753_v20, %v685_v12  ;;  %vm4059_vm10 = vmor %vm770_vm7, %vm771_vm8 }
 0x164   :  { %3079 = vrsqrt.f32 %v3985_v54  ;;  %v766_v18 = vmul.f32 %v3975_v11, %v765_v60  ;;  %v551_v24 = vpop.xlane.xlu2 %550  ;;  %v555_v45 = vpop.xlane.xlu0 %554  ;;  %v461_v41 = vsel %vm460_vm6, %v3936_v23, %v457_v50  ;;  %v304_v4 = vsub.f32 %v3729_v25, %v3939_v3 }
 0x165   :  { %v289_v34 = vsub.f32 %v257_v8, %v273_v38  ;;  %v4016_v40 = vmul.f32 %v551_v24, %v3495_v30  ;;  %562 = vadd.xlane.f32.xlu2 %v4009_v58  ;;  %v598_v63 = vmul.f32 %v4009_v58, %v4009_v58  ;;  %v495_v9 = vmul.f32 %v461_v41, %v303_v48 }
 0x166   :  { %v767_v6 = vmul.f32 0.5, %v766_v18  ;;  %v896_v61 = vmul.f32 %v3923_v29, %v877_v13  ;;  %v657_v33 = vmul.f32 %v4037_v47, %v4037_v47  ;;  %vm468_vm9 = vweird.f32 %v3973_v39 }
 0x167   :  { %v4024_v23 = vadd.f32 1e-05, %v289_v34  ;;  %v656_v35 = vmul.f32 %v4016_v40, %v4016_v40  ;;  %626 = vadd.xlane.f32.xlu1 %v598_v63  ;;  %v514_v53 = vmul.f32 %v3536_v27, %v495_v9  ;;  %v914_v52 = vadd.f32 %v3943_v57, %v895_v21 }
 0x168   :  { %v768_v36 = vsub.f32 1.5, %v767_v6  ;;  %v915_v46 = vadd.f32 %v3943_v57, %v896_v61  ;;  %v4072_v60 = vmul.f32 %v555_v45, %v3495_v30  ;;  %vm760_vm14 = vweird.f32 %v3985_v54 }
 0x169   :  { %v4026_v14 = vpop.eup %3077  ;;  %3081 = vrsqrt.f32 %v4024_v23  ;;  %v4052_v10 = vadd.f32 %v3542_v0, %v514_v53  ;;  %vm478_vm1 = vweird.f32 %v4024_v23 }
 0x16a   :  { %v4032_v2 = vpop.eup %3079  ;;  %v463_v59 = vmul.f32 %v4026_v14, %v3973_v39  ;;  %v615_v15 = vpop.xlane.xlu1 %614  ;;  %v769_v1 = vmul.f32 %v3975_v11, %v768_v36  ;;  %vm469_vm11 = vweird.f32 %v4026_v14  ;;  %v658_v36 = vmul.f32 %v4072_v60, %v4072_v60 }
 0x16b   :  { %v755_v27 = vmul.f32 %v4032_v2, %v3985_v54  ;;  %v640_v32 = vmul.f32 %v615_v15, %v3495_v30  ;;  %564 = vadd.xlane.f32.xlu0 %v4052_v10  ;;  %v599_v56 = vmul.f32 %v4052_v10, %v4052_v10  ;;  %vm761_vm12 = vweird.f32 %v4032_v2  ;;  %vm470_vm13 = vmor %vm468_vm9, %vm469_vm11 }
 0x16c   :  { %v464_v7 = vmul.f32 %v4026_v14, %v463_v59  ;;  %v617_v55 = vpop.xlane.xlu2 %616  ;;  %v621_v20 = vpop.xlane.xlu0 %620  ;;  %v773_v12 = vsel %vm4059_vm10, %v3975_v11, %v769_v1  ;;  %v929_v11 = vpack.c.bf16 %v915_v46, %v914_v52  ;;  %v686_v39 = vsub.f32 %v3693_v49, %v3899_v19  ;;  %vm762_vm15 = vmor %vm760_vm14, %vm761_vm12  ;;  %v3167_v49 = vld [vmem:[#allocation5] ss:$0 sm:$0xff] }
 0x16d   :  { %v756_v38 = vmul.f32 %v4032_v2, %v755_v27  ;;  %v672_v62 = vsub.f32 %v640_v32, %v656_v35  ;;  %v641_v0 = vmul.f32 %v617_v55, %v3495_v30  ;;  %628 = vadd.xlane.f32.xlu2 %v599_v56  ;;  %v879_v13 = vmul.f32 %v773_v12, %v687_v28  ;;  %v3168_v55 = vld [vmem:[%s5709_s2] ss:$0 sm:$0xff] }
 0x16e   :  { %v465_v3 = vmul.f32 0.5, %v464_v7  ;;  %v643_v16 = vmul.f32 %v621_v20, %v3495_v30  ;;  %1051 = vmatmul.bf16.gmra.mxu0 %v929_v11  ;;  %1100 = vmatmul.bf16.gmra.mxu1 %v929_v11 }
 0x16f   :  { %v757_v51 = vmul.f32 0.5, %v756_v38  ;;  %v4074_v17 = vadd.f32 1e-05, %v672_v62  ;;  %v4076_v50 = vpop.eup %3081  ;;  %v673_v48 = vsub.f32 %v641_v0, %v657_v33  ;;  %v898_v15 = vmul.f32 %v3923_v29, %v879_v13 }
 0x170   :  { %v466_v8 = vsub.f32 1.5, %v465_v3  ;;  %v473_v24 = vmul.f32 %v4076_v50, %v4024_v23  ;;  %vm479_vm0 = vweird.f32 %v4076_v50 }
 0x171   :  { %v758_v18 = vsub.f32 1.5, %v757_v51  ;;  %3083 = vrsqrt.f32 %v4074_v17  ;;  %v4084_v45 = vadd.f32 1e-05, %v673_v48  ;;  %vm780_vm2 = vweird.f32 %v4074_v17  ;;  %vm4136_vm3 = vmor %vm478_vm1, %vm479_vm0 }
 0x172   :  { %v467_v34 = vmul.f32 %v4026_v14, %v466_v8  ;;  %v557_v41 = vpop.xlane.xlu1 %556  ;;  %v474_v63 = vmul.f32 %v4076_v50, %v473_v24  ;;  %v917_v20 = vadd.f32 %v3943_v57, %v898_v15 }
 0x173   :  { %v759_v6 = vmul.f32 %v4032_v2, %v758_v18  ;;  %v4092_v9 = vmul.f32 %v557_v41, %v3495_v30  ;;  %3085 = vrsqrt.f32 %v4084_v45  ;;  %vm790_vm5 = vweird.f32 %v4084_v45 }
 0x174   :  { %v471_v28 = vsel %vm470_vm13, %v4026_v14, %v467_v34  ;;  %v475_v53 = vmul.f32 0.5, %v474_v63  ;;  %v619_v59 = vpop.xlane.xlu2 %618  ;;  %v623_v38 = vpop.xlane.xlu0 %622 }
 0x175   :  { %v496_v35 = vmul.f32 %v471_v28, %v304_v4  ;;  %v659_v61 = vmul.f32 %v4092_v9, %v4092_v9  ;;  %v642_v14 = vmul.f32 %v619_v59, %v3495_v30  ;;  %v763_v54 = vsel %vm762_vm15, %v4032_v2, %v759_v6 }
 0x176   :  { %v476_v1 = vsub.f32 1.5, %v475_v53  ;;  %v878_v32 = vmul.f32 %v763_v54, %v686_v39  ;;  %v305_v4 = vsub.f32 %v3750_v5, %v3951_v44  ;;  %v644_v52 = vmul.f32 %v623_v38, %v3495_v30 }
 0x177   :  { %v4108_v21 = vpop.eup %3083  ;;  %v675_v27 = vsub.f32 %v643_v16, %v659_v61  ;;  %v515_v19 = vmul.f32 %v3167_v49, %v496_v35  ;;  %v674_v33 = vsub.f32 %v642_v14, %v658_v36 }
 0x178   :  { %v775_v7 = vmul.f32 %v4108_v21, %v4074_v17  ;;  %v477_v2 = vmul.f32 %v4076_v50, %v476_v1  ;;  %v897_v25 = vmul.f32 %v3923_v29, %v878_v32  ;;  %vm781_vm4 = vweird.f32 %v4108_v21 }
 0x179   :  { %v4116_v62 = vadd.f32 1e-05, %v675_v27  ;;  %v4121_v46 = vadd.f32 %v3168_v55, %v515_v19  ;;  %v3086_v5 = vpop.eup %3085  ;;  %v4127_v3 = vadd.f32 1e-05, %v674_v33  ;;  %vm4156_vm6 = vmor %vm780_vm2, %vm781_vm4  ;;  %v688_v17 = vsub.f32 %v3799_v37, %v4016_v40 }
 0x17a   :  { %v776_v44 = vmul.f32 %v4108_v21, %v775_v7  ;;  %v559_v0 = vpop.xlane.xlu1 %558  ;;  %v785_v56 = vmul.f32 %v3086_v5, %v4084_v45  ;;  %v916_v18 = vadd.f32 %v3943_v57, %v897_v25  ;;  %v481_v11 = vsel %vm4136_vm3, %v4076_v50, %v477_v2 }
 0x17b   :  { %3087 = vrsqrt.f32 %v4116_v62  ;;  %566 = vadd.xlane.f32.xlu0 %v4121_v46  ;;  %v4143_v51 = vmul.f32 %v559_v0, %v3495_v30  ;;  %v600_v24 = vmul.f32 %v4121_v46, %v4121_v46  ;;  %vm791_vm7 = vweird.f32 %v3086_v5 }
 0x17c   :  { %v777_v12 = vmul.f32 0.5, %v776_v44  ;;  %3089 = vrsqrt.f32 %v4127_v3  ;;  %v786_v8 = vmul.f32 %v3086_v5, %v785_v56  ;;  %v561_v48 = vpop.xlane.xlu2 %560  ;;  %v930_v6 = vpack.c.bf16 %v917_v20, %v916_v18  ;;  %vm4168_vm8 = vmor %vm790_vm5, %vm791_vm7 }
 0x17d   :  { %v660_v34 = vmul.f32 %v4143_v51, %v4143_v51  ;;  %630 = vadd.xlane.f32.xlu2 %v600_v24  ;;  %v497_v63 = vmul.f32 %v481_v11, %v305_v4  ;;  %v4162_v36 = vmul.f32 %v561_v48, %v3495_v30  ;;  %v689_v45 = vsub.f32 %v3779_v31, %v4037_v47 }
 0x17e   :  { %v778_v13 = vsub.f32 1.5, %v777_v12  ;;  %v787_v16 = vmul.f32 0.5, %v786_v8  ;;  %1056 = vmatmul.bf16.gmra.mxu0 %v930_v6  ;;  %1105 = vmatmul.bf16.gmra.mxu1 %v930_v6  ;;  %vm810_vm9 = vweird.f32 %v4116_v62  ;;  %vm800_vm11 = vweird.f32 %v4127_v3 }
 0x17f   :  { %v676_v50 = vsub.f32 %v644_v52, %v660_v34  ;;  %v516_v53 = vmul.f32 %v3167_v49, %v497_v63  ;;  %v661_v54 = vmul.f32 %v4162_v36, %v4162_v36  ;;  %v693_v59 = vsub.f32 %v3831_v22, %v4162_v36  ;;  %v952_v36 = vld [vmem:[%s5713_s6] sm:$0x3] }
 0x180   :  { %v779_v28 = vmul.f32 %v4108_v21, %v778_v13  ;;  %v788_v35 = vsub.f32 1.5, %v787_v16  ;;  %v690_v13 = vsub.f32 %v3802_v43, %v4072_v60 }
 0x181   :  { %v3088_v39 = vpop.eup %3087  ;;  %v4179_v37 = vadd.f32 1e-05, %v676_v50  ;;  %v4181_v40 = vadd.f32 %v3168_v55, %v516_v53 }
 0x182   :  { %v3090_v61 = vpop.eup %3089  ;;  %v805_v14 = vmul.f32 %v3088_v39, %v4116_v62  ;;  %v625_v15 = vpop.xlane.xlu1 %624  ;;  %v783_v1 = vsel %vm4156_vm6, %v4108_v21, %v779_v28  ;;  %v789_v27 = vmul.f32 %v3086_v5, %v788_v35  ;;  %vm811_vm10 = vweird.f32 %v3088_v39 }
 0x183   :  { %v795_v49 = vmul.f32 %v3090_v61, %v4127_v3  ;;  %v645_v32 = vmul.f32 %v625_v15, %v3495_v30  ;;  %568 = vadd.xlane.f32.xlu1 %v4181_v40  ;;  %v601_v21 = vmul.f32 %v4181_v40, %v4181_v40  ;;  %v880_v33 = vmul.f32 %v783_v1, %v688_v17  ;;  %vm812_vm13 = vmor %vm810_vm9, %vm811_vm10 }
 0x184   :  { %v806_v19 = vmul.f32 %v3088_v39, %v805_v14  ;;  %v793_v7 = vsel %vm4168_vm8, %v3086_v5, %v789_v27  ;;  %3091 = vrsqrt.f32 %v4179_v37  ;;  %vm801_vm12 = vweird.f32 %v3090_v61 }
 0x185   :  { %v796_v4 = vmul.f32 %v3090_v61, %v795_v49  ;;  %v677_v2 = vsub.f32 %v645_v32, %v661_v54  ;;  %v881_v55 = vmul.f32 %v793_v7, %v689_v45  ;;  %632 = vadd.xlane.f32.xlu0 %v601_v21  ;;  %v899_v44 = vmul.f32 %v3923_v29, %v880_v33  ;;  %vm802_vm14 = vmor %vm800_vm11, %vm801_vm12 }
 0x186   :  { %v807_v38 = vmul.f32 0.5, %v806_v19  ;;  %v691_v3 = vsub.f32 %v3809_v42, %v4092_v9  ;;  %vm820_vm1 = vweird.f32 %v4179_v37  ;;  %v692_v54 = vsub.f32 %v3822_v26, %v4143_v51 }
 0x187   :  { %v797_v25 = vmul.f32 0.5, %v796_v4  ;;  %v709_v31 = vadd.f32 1e-05, %v677_v2  ;;  %v900_v47 = vmul.f32 %v3923_v29, %v881_v55  ;;  %v918_v20 = vadd.f32 %v3943_v57, %v899_v44 }
 0x188   :  { %v808_v56 = vsub.f32 1.5, %v807_v38  ;;  %v4222_v51 = vperm.slane %v952_v36, 0  ;;  %v4224_v32 = vperm.slane %v952_v36, 1 }
 0x189   :  { %v798_v0 = vsub.f32 1.5, %v797_v25  ;;  %3093 = vrsqrt.f32 %v709_v31  ;;  %v919_v5 = vadd.f32 %v3943_v57, %v900_v47  ;;  %vm830_vm15 = vweird.f32 %v709_v31 }
 0x18a   :  { %v3092_v52 = vpop.eup %3091  ;;  %v809_v12 = vmul.f32 %v3088_v39, %v808_v56  ;;  %5765 = vst [vmem:[#allocation19_spill] sm:$0xff] %v4222_v51 }
 0x18b   :  { %v799_v23 = vmul.f32 %v3090_v61, %v798_v0  ;;  %v931_v8 = vpack.c.bf16 %v919_v5, %v918_v20  ;;  %v815_v18 = vmul.f32 %v3092_v52, %v4179_v37  ;;  %vm821_vm2 = vweird.f32 %v3092_v52  ;;  %5766 = vst [vmem:[#allocation20_spill] sm:$0xff] %v4224_v32 }
 0x18c   :  { %v813_v62 = vsel %vm812_vm13, %v3088_v39, %v809_v12  ;;  %vm822_vm4 = vmor %vm820_vm1, %vm821_vm2 }
 0x18d   :  { %v803_v11 = vsel %vm802_vm14, %v3090_v61, %v799_v23  ;;  %v816_v41 = vmul.f32 %v3092_v52, %v815_v18  ;;  %v883_v6 = vmul.f32 %v813_v62, %v691_v3 }
 0x18e   :  { %1061 = vmatmul.bf16.gmra.mxu0 %v931_v8  ;;  %1110 = vmatmul.bf16.gmra.mxu1 %v931_v8  ;;  %v882_v16 = vmul.f32 %v803_v11, %v690_v13 }
 0x18f   :  { %v3094_v48 = vpop.eup %3093  ;;  %v817_v28 = vmul.f32 0.5, %v816_v41  ;;  %v902_v35 = vmul.f32 %v3923_v29, %v883_v6 }
 0x190   :  { %v825_v24 = vmul.f32 %v3094_v48, %v709_v31  ;;  %v901_v50 = vmul.f32 %v3923_v29, %v882_v16  ;;  %vm831_vm0 = vweird.f32 %v3094_v48 }
 0x191   :  { %v818_v39 = vsub.f32 1.5, %v817_v28  ;;  %v921_v42 = vadd.f32 %v3943_v57, %v902_v35  ;;  %vm832_vm3 = vmor %vm830_vm15, %vm831_vm0  ;;  %v3019_v28 = vld [vmem:[#allocation11 + $0x78] sm:$0xff] }
 0x192   :  { %v826_v34 = vmul.f32 %v3094_v48, %v825_v24  ;;  %v920_v43 = vadd.f32 %v3943_v57, %v901_v50  ;;  %2741 = vmatpush.bf16.msra.mxu3 %v3019_v28 }
 0x193   :  { %v819_v9 = vmul.f32 %v3092_v52, %v818_v39 }
 0x194   :  { %v827_v63 = vmul.f32 0.5, %v826_v34  ;;  %v932_v61 = vpack.c.bf16 %v921_v42, %v920_v43 }
 0x195   :  { %v823_v14 = vsel %vm822_vm4, %v3092_v52, %v819_v9 }
 0x196   :  { %v828_v53 = vsub.f32 1.5, %v827_v63  ;;  %v884_v1 = vmul.f32 %v823_v14, %v692_v54  ;;  %v3011_v63 = vld [vmem:[#allocation11 + $0x38] sm:$0xff] }
 0x197   :  { %2692 = vmatpush.bf16.msra.mxu2 %v3011_v63 }
 0x198   :  { %v829_v60 = vmul.f32 %v3094_v48, %v828_v53  ;;  %v903_v49 = vmul.f32 %v3923_v29, %v884_v1 }
 0x19a   :  { %v833_v17 = vsel %vm832_vm3, %v3094_v48, %v829_v60  ;;  %v922_v45 = vadd.f32 %v3943_v57, %v903_v49 }
 0x19b   :  { %v885_v15 = vmul.f32 %v833_v17, %v693_v59  ;;  %v3010_v17 = vld [vmem:[#allocation11 + $0x30] sm:$0xff] }
 0x19c   :  { %v3018_v59 = vld [vmem:[#allocation11 + $0x70] sm:$0xff]  ;;  %2693 = vmatpush.bf16.msra.mxu2 %v3010_v17 }
 0x19d   :  { %v904_v27 = vmul.f32 %v3923_v29, %v885_v15  ;;  %2742 = vmatpush.bf16.msra.mxu3 %v3018_v59 }
 0x19e   :  { %1066 = vmatmul.bf16.gmra.mxu0 %v932_v61  ;;  %1115 = vmatmul.bf16.gmra.mxu1 %v932_v61 }
 0x19f   :  { %v923_v37 = vadd.f32 %v3943_v57, %v904_v27 }
 0x1a1   :  { %v933_v19 = vpack.c.bf16 %v923_v37, %v922_v45 }
 0x1ae   :  { %1071 = vmatmul.bf16.gmra.mxu0 %v933_v19  ;;  %1120 = vmatmul.bf16.gmra.mxu1 %v933_v19 }
 0x1d8   :  { %v563_v22 = vpop.xlane.xlu2 %562 }
 0x1d9   :  { %v4220_v26 = vmul.f32 %v563_v22, %v3495_v30 }
 0x1da   :  { %v627_v4 = vpop.xlane.xlu1 %626 }
 0x1db   :  { %v662_v21 = vmul.f32 %v4220_v26, %v4220_v26  ;;  %v1047_v7 = vpop.f32.mrf.mxu0  ;;  %v1096_v33 = vpop.f32.mrf.mxu1  ;;  %v646_v38 = vmul.f32 %v627_v4, %v3495_v30 }
 0x1dc   :  { %v4230_v2 = vadd.f32 %v1047_v7, %v4222_v51  ;;  %v4233_v55 = vadd.f32 %v1096_v33, %v4224_v32 }
 0x1dd   :  { %v678_v56 = vsub.f32 %v646_v38, %v662_v21 }
 0x1de   :  { %v565_v25 = vpop.xlane.xlu0 %564  ;;  %v4239_v47 = vmul.f32 0.70710677, %v4230_v2  ;;  %v4242_v44 = vmul.f32 0.70710677, %v4233_v55 }
 0x1df   :  { %v4236_v31 = vmul.f32 %v565_v25, %v3495_v30  ;;  %v4255_v48 = vadd.f32 1e-05, %v678_v56 }
 0x1e0   :  { %v629_v0 = vpop.xlane.xlu2 %628  ;;  %v1200_v5 = vmul.f32 %v4239_v47, %v4239_v47  ;;  %v1240_v52 = vmul.f32 %v4242_v44, %v4242_v44 }
 0x1e1   :  { %v663_v20 = vmul.f32 %v4236_v31, %v4236_v31  ;;  %v647_v23 = vmul.f32 %v629_v0, %v3495_v30  ;;  %3095 = vrsqrt.f32 %v4255_v48  ;;  %vm840_vm6 = vweird.f32 %v4255_v48 }
 0x1e2   :  { %v4251_v12 = vmin.f32 %v1200_v5, 16.0  ;;  %v4253_v8 = vmin.f32 %v1240_v52, 16.0 }
 0x1e3   :  { %v1049_v18 = vpop.f32.mrf.mxu0  ;;  %v1098_v24 = vpop.f32.mrf.mxu1  ;;  %v679_v13 = vsub.f32 %v647_v23, %v663_v20 }
 0x1e4   :  { %v1202_v11 = vmul.f32 2.1237322e-06, %v4251_v12  ;;  %v1242_v62 = vmul.f32 2.1237322e-06, %v4253_v8  ;;  %v4260_v3 = vadd.f32 %v1049_v18, %v4222_v51  ;;  %v4263_v34 = vadd.f32 %v1098_v24, %v4224_v32 }
 0x1e5   :  { %v4270_v35 = vadd.f32 1e-05, %v679_v13 }
 0x1e6   :  { %v1203_v41 = vadd.f32 0.00028619796, %v1202_v11  ;;  %v1243_v16 = vadd.f32 0.00028619796, %v1242_v62  ;;  %v4267_v6 = vmul.f32 0.70710677, %v4260_v3 }
 0x1e7   :  { %v4276_v43 = vmul.f32 0.70710677, %v4263_v34  ;;  %3097 = vrsqrt.f32 %v4270_v35  ;;  %v4286_v15 = vpop.eup %3095  ;;  %vm850_vm7 = vweird.f32 %v4270_v35 }
 0x1e8   :  { %v1204_v50 = vmul.f32 %v1203_v41, %v4251_v12  ;;  %v1244_v53 = vmul.f32 %v1243_v16, %v4253_v8  ;;  %v1280_v39 = vmul.f32 %v4267_v6, %v4267_v6  ;;  %v835_v36 = vmul.f32 %v4286_v15, %v4255_v48 }
 0x1e9   :  { %v1320_v60 = vmul.f32 %v4276_v43, %v4276_v43  ;;  %vm841_vm5 = vweird.f32 %v4286_v15 }
 0x1ea   :  { %v4278_v42 = vmin.f32 %v1280_v39, 16.0  ;;  %v1205_v14 = vadd.f32 0.0036580483, %v1204_v50  ;;  %v1245_v1 = vadd.f32 0.0036580483, %v1244_v53  ;;  %v836_v24 = vmul.f32 %v4286_v15, %v835_v36  ;;  %vm4418_vm9 = vmor %vm840_vm6, %vm841_vm5 }
 0x1eb   :  { %v1052_v9 = vpop.f32.mrf.mxu0  ;;  %v1101_v61 = vpop.f32.mrf.mxu1  ;;  %v4289_v49 = vmin.f32 %v1320_v60, 16.0  ;;  %v1213_v39 = vmul.f32 3.8918573e-05, %v4251_v12 }
 0x1ec   :  { %v4284_v54 = vadd.f32 %v1052_v9, %v4222_v51  ;;  %v1282_v27 = vmul.f32 2.1237322e-06, %v4278_v42  ;;  %v4292_v37 = vadd.f32 %v1101_v61, %v4224_v32  ;;  %v1206_v22 = vmul.f32 %v1205_v14, %v4251_v12 }
 0x1ed   :  { %5767 = vst [vmem:[#allocation21_spill] sm:$0xff] %v4289_v49  ;;  %v1322_v19 = vmul.f32 2.1237322e-06, %v4289_v49  ;;  %v1246_v21 = vmul.f32 %v1245_v1, %v4253_v8  ;;  %v4306_v0 = vpop.eup %3097  ;;  %v837_v9 = vmul.f32 0.5, %v836_v24 }
 0x1ee   :  { %v1283_v45 = vadd.f32 0.00028619796, %v1282_v27  ;;  %v4299_v4 = vmul.f32 0.70710677, %v4284_v54  ;;  %v4304_v38 = vmul.f32 0.70710677, %v4292_v37  ;;  %v567_v25 = vpop.xlane.xlu0 %566  ;;  %v845_v16 = vmul.f32 %v4306_v0, %v4270_v35 }
 0x1ef   :  { %v1323_v33 = vadd.f32 0.00028619796, %v1322_v19  ;;  %v1207_v18 = vadd.f32 0.05243302, %v1206_v22  ;;  %v4314_v11 = vmul.f32 %v567_v25, %v3495_v30  ;;  %v1247_v62 = vadd.f32 0.05243302, %v1246_v21 }
 0x1f0   :  { %v1284_v7 = vmul.f32 %v1283_v45, %v4278_v42  ;;  %v1360_v56 = vmul.f32 %v4299_v4, %v4299_v4  ;;  %v1400_v52 = vmul.f32 %v4304_v38, %v4304_v38  ;;  %v631_v28 = vpop.xlane.xlu2 %630  ;;  %v846_v45 = vmul.f32 %v4306_v0, %v845_v16 }
 0x1f1   :  { %v1324_v13 = vmul.f32 %v1323_v33, %v4289_v49  ;;  %v1208_v60 = vmul.f32 %v1207_v18, %v4251_v12  ;;  %v664_v61 = vmul.f32 %v4314_v11, %v4314_v11  ;;  %v1248_v59 = vmul.f32 %v1247_v62, %v4253_v8 }
 0x1f2   :  { %v1285_v5 = vadd.f32 0.0036580483, %v1284_v7  ;;  %v4317_v41 = vmin.f32 %v1360_v56, 16.0  ;;  %v4324_v53 = vmin.f32 %v1400_v52, 16.0  ;;  %v648_v27 = vmul.f32 %v631_v28, %v3495_v30  ;;  %v3009_v52 = vld [vmem:[#allocation11 + $0x28] sm:$0xff] }
 0x1f3   :  { %v1054_v20 = vpop.f32.mrf.mxu0  ;;  %v1103_v23 = vpop.f32.mrf.mxu1  ;;  %v1325_v14 = vadd.f32 0.0036580483, %v1324_v13  ;;  %v4344_v21 = vmul.f32 0.5, %v4230_v2  ;;  %v4347_v7 = vmul.f32 0.5, %v4233_v55  ;;  %v1209_v18 = vadd.f32 0.18741608, %v1208_v60  ;;  %2694 = vmatpush.bf16.msra.mxu2 %v3009_v52 }
 0x1f4   :  { %v1286_v63 = vmul.f32 %v1285_v5, %v4278_v42  ;;  %v4331_v17 = vadd.f32 %v1054_v20, %v4222_v51  ;;  %v1362_v1 = vmul.f32 2.1237322e-06, %v4317_v41  ;;  %v4341_v36 = vadd.f32 %v1103_v23, %v4224_v32  ;;  %v3017_v20 = vld [vmem:[#allocation11 + $0x68] sm:$0xff] }
 0x1f5   :  { %5768 = vst [vmem:[#allocation22_spill] sm:$0xff] %v4344_v21  ;;  %v1402_v25 = vmul.f32 2.1237322e-06, %v4324_v53  ;;  %v838_v24 = vsub.f32 1.5, %v837_v9  ;;  %v1214_v2 = vadd.f32 0.001143296, %v1213_v39  ;;  %v1326_v55 = vmul.f32 %v1325_v14, %v4289_v49  ;;  %2743 = vmatpush.bf16.msra.mxu3 %v3017_v20 }
 0x1f6   :  { %v1287_v19 = vadd.f32 0.05243302, %v1286_v63  ;;  %v4338_v22 = vmul.f32 0.70710677, %v4331_v17  ;;  %5769 = vst [vmem:[#allocation23_spill] sm:$0xff] %v4347_v7  ;;  %v569_v56 = vpop.xlane.xlu1 %568  ;;  %v680_v16 = vsub.f32 %v648_v27, %v664_v61  ;;  %v847_v60 = vmul.f32 0.5, %v846_v45 }
 0x1f7   :  { %v1363_v13 = vadd.f32 0.00028619796, %v1362_v1  ;;  %v4357_v63 = vmul.f32 0.70710677, %v4341_v36  ;;  %v1249_v33 = vadd.f32 0.18741608, %v1248_v59  ;;  %v4361_v50 = vmul.f32 %v569_v56, %v3495_v30 }
 0x1f8   :  { %v1440_v23 = vmul.f32 %v4338_v22, %v4338_v22  ;;  %v633_v62 = vpop.xlane.xlu0 %632  ;;  %v1288_v9 = vmul.f32 %v1287_v19, %v4278_v42  ;;  %v1403_v39 = vadd.f32 0.00028619796, %v1402_v25  ;;  %v3008_v1 = vld [vmem:[#allocation11 + $0x20] sm:$0xff]  ;;  %v1210_v59 = vmul.f32 %v1209_v18, %v4251_v12 }
 0x1f9   :  { %v1480_v61 = vmul.f32 %v4357_v63, %v4357_v63  ;;  %v649_v14 = vmul.f32 %v633_v62, %v3495_v30  ;;  %v3016_v27 = vld [vmem:[#allocation11 + $0x60] sm:$0xff]  ;;  %v4371_v45 = vmul.f32 0.5, %v4260_v3  ;;  %v4374_v19 = vmul.f32 0.5, %v4263_v34  ;;  %2695 = vmatpush.bf16.msra.mxu2 %v3008_v1 }
 0x1fa   :  { %v4364_v7 = vmin.f32 %v1440_v23, 16.0  ;;  %v665_v25 = vmul.f32 %v4361_v50, %v4361_v50  ;;  %v1327_v56 = vadd.f32 0.05243302, %v1326_v55  ;;  %v1364_v52 = vmul.f32 %v1363_v13, %v4317_v41  ;;  %2744 = vmatpush.bf16.msra.mxu3 %v3016_v27 }
 0x1fb   :  { %v1057_v5 = vpop.f32.mrf.mxu0  ;;  %v1106_v28 = vpop.f32.mrf.mxu1  ;;  %5770 = vst [vmem:[#allocation24_spill] sm:$0xff] %v4371_v45  ;;  %v4380_v20 = vadd.f32 1e-05, %v680_v16  ;;  %v4382_v30 = vmin.f32 %v1480_v61, 16.0  ;;  %v1250_v3 = vmul.f32 %v1249_v33, %v4253_v8  ;;  %v839_v18 = vmul.f32 %v4286_v15, %v838_v24  ;;  %v3007_v45 = vld [vmem:[#allocation11 + $0x18] sm:$0xff] }
 0x1fc   :  { %5771 = vst [vmem:[#allocation25_spill] sm:$0xff] %v4374_v19  ;;  %v1289_v34 = vadd.f32 0.18741608, %v1288_v9  ;;  %v4387_v23 = vmul.f32 %v1214_v2, %v4251_v12  ;;  %v848_v62 = vsub.f32 1.5, %v847_v60  ;;  %v1404_v19 = vmul.f32 %v1403_v39, %v4324_v53  ;;  %v3015_v61 = vld [vmem:[#allocation11 + $0x58] sm:$0xff] }
 0x1fd   :  { %v1442_v55 = vmul.f32 2.1237322e-06, %v4364_v7  ;;  %v681_v13 = vsub.f32 %v649_v14, %v665_v25  ;;  %v1211_v21 = vadd.f32 1.1283791, %v1210_v59  ;;  %vm851_vm8 = vweird.f32 %v4306_v0  ;;  %2696 = vmatpush.bf16.msra.mxu2 %v3007_v45  ;;  %v3014_v45 = vld [vmem:[#allocation11 + $0x50] sm:$0xff] }
 0x1fe   :  { %v1482_v33 = vmul.f32 2.1237322e-06, %v4382_v30  ;;  %v4394_v24 = vadd.f32 %v1057_v5, %v4222_v51  ;;  %v1328_v2 = vmul.f32 %v1327_v56, %v4289_v49  ;;  %v1365_v9 = vadd.f32 0.0036580483, %v1364_v52  ;;  %2745 = vmatpush.bf16.msra.mxu3 %v3015_v61  ;;  %vm852_vm10 = vmor %vm850_vm7, %vm851_vm8 }
 0x1ff   :  { %3099 = vrsqrt.f32 %v4380_v20  ;;  %v4398_v60 = vadd.f32 1e-05, %v681_v13  ;;  %v1251_v39 = vadd.f32 1.1283791, %v1250_v3  ;;  %v1290_v14 = vmul.f32 %v1289_v34, %v4278_v42  ;;  %v3006_v13 = vld [vmem:[#allocation11 + $0x10] sm:$0xff] }
 0x200   :  { %v4402_v1 = vmul.f32 0.5, %v4284_v54  ;;  %v4405_v27 = vmul.f32 0.5, %v4292_v37  ;;  %v849_v5 = vmul.f32 %v4306_v0, %v848_v62  ;;  %v1405_v59 = vadd.f32 0.0036580483, %v1404_v19 }
 0x201   :  { %v1443_v25 = vadd.f32 0.00028619796, %v1442_v55  ;;  %v4409_v56 = vadd.f32 %v1106_v28, %v4224_v32  ;;  %v4412_v3 = vmul.f32 %v1211_v21, %v4239_v47  ;;  %v1483_v19 = vadd.f32 0.00028619796, %v1482_v33  ;;  %2697 = vmatpush.bf16.msra.mxu2 %v3006_v13 }
 0x202   :  { %5772 = vst [vmem:[#allocation26_spill] sm:$0xff] %v4402_v1  ;;  %v4425_v28 = vmul.f32 0.70710677, %v4394_v24  ;;  %v1329_v34 = vadd.f32 0.18741608, %v1328_v2  ;;  %v1366_v62 = vmul.f32 %v1365_v9, %v4317_v41  ;;  %3101 = vrsqrt.f32 %v4398_v60  ;;  %2746 = vmatpush.bf16.msra.mxu3 %v3014_v45  ;;  %v3005_v9 = vld [vmem:[#allocation11 + $0x8] sm:$0xff] }
 0x203   :  { %v1059_v16 = vpop.f32.mrf.mxu0  ;;  %5773 = vst [vmem:[#allocation27_spill] sm:$0xff] %v4405_v27  ;;  %v1108_v52 = vpop.f32.mrf.mxu1  ;;  %v843_v47 = vsel %vm4418_vm9, %v4286_v15, %v839_v18  ;;  %v4433_v48 = vmul.f32 %v1251_v39, %v4242_v44  ;;  %v1291_v21 = vadd.f32 1.1283791, %v1290_v14  ;;  %v4440_v55 = vmul.f32 0.5, %v4331_v17  ;;  %v3013_v39 = vld [vmem:[#allocation11 + $0x48] sm:$0xff] }
 0x204   :  { %5774 = vst [vmem:[#allocation28_spill] sm:$0xff] %v4412_v3  ;;  %v1520_v61 = vmul.f32 %v4425_v28, %v4425_v28  ;;  %v1406_v15 = vmul.f32 %v1405_v59, %v4324_v53  ;;  %v1444_v18 = vmul.f32 %v1443_v25, %v4364_v7  ;;  %v4449_v44 = vmul.f32 0.70710677, %v4409_v56 }
 0x205   :  { %5777 = vst [vmem:[#allocation29_spill] sm:$0xff] %v4433_v48  ;;  %v4444_v33 = vpop.eup %3099  ;;  %v853_v2 = vsel %vm852_vm10, %v4306_v0, %v849_v5  ;;  %v1484_v17 = vmul.f32 %v1483_v19, %v4382_v30  ;;  %v5779_v13 = vsub.f32 %v4009_v58, %v4220_v26  ;;  %v5780_v59 = vsub.f32 %v4052_v10, %v4236_v31 }
 0x206   :  { %5778 = vst [vmem:[#allocation30_spill] sm:$0xff] %v4440_v55  ;;  %v4453_v14 = vmin.f32 %v1520_v61, 16.0  ;;  %v1330_v54 = vmul.f32 %v1329_v34, %v4289_v49  ;;  %v1367_v37 = vadd.f32 0.05243302, %v1366_v62  ;;  %v4463_v0 = vmul.f32 0.5, %v4341_v36  ;;  %2698 = vmatpush.bf16.msra.mxu2 %v3005_v9  ;;  %2747 = vmatpush.bf16.msra.mxu3 %v3013_v39 }
 0x207   :  { %v886_v45 = vmul.f32 %v843_v47, %v5779_v13  ;;  %v887_v25 = vmul.f32 %v853_v2, %v5780_v59  ;;  %v1560_v5 = vmul.f32 %v4449_v44, %v4449_v44  ;;  %v855_v19 = vmul.f32 %v4444_v33, %v4380_v20  ;;  %v4480_v47 = vld [vmem:[#allocation7] ss:$0 sm:$0xff] }
 0x208   :  { %5781 = vst [vmem:[#allocation31_spill] sm:$0xff] %v4463_v0  ;;  %v1522_v10 = vmul.f32 2.1237322e-06, %v4453_v14  ;;  %v4473_v26 = vadd.f32 %v1059_v16, %v4222_v51  ;;  %v4475_v31 = vpop.eup %3101  ;;  %v1445_v36 = vadd.f32 0.0036580483, %v1444_v18  ;;  %v4484_v2 = vmul.f32 %v1291_v21, %v4267_v6 }
 0x209   :  { %v4477_v34 = vmin.f32 %v1560_v5, 16.0  ;;  %v905_v62 = vmul.f32 %v3923_v29, %v886_v45  ;;  %v906_v61 = vmul.f32 %v4480_v47, %v887_v25  ;;  %v1407_v9 = vadd.f32 0.05243302, %v1406_v15 }
 0x20a   :  { %5782 = vst [vmem:[#allocation32_spill] sm:$0xff] %v4484_v2  ;;  %v1485_v39 = vadd.f32 0.0036580483, %v1484_v17  ;;  %v1523_v13 = vadd.f32 0.00028619796, %v1522_v10  ;;  %v4490_v5 = vadd.f32 %v1108_v52, %v4224_v32  ;;  %v1368_v45 = vmul.f32 %v1367_v37, %v4317_v41  ;;  %v3012_v52 = vld [vmem:[#allocation11 + $0x40] sm:$0xff] }
 0x20b   :  { %v1062_v35 = vpop.f32.mrf.mxu0  ;;  %v1562_v16 = vmul.f32 2.1237322e-06, %v4477_v34  ;;  %v924_v59 = vadd.f32 %v3943_v57, %v905_v62  ;;  %v925_v18 = vadd.f32 %v3943_v57, %v906_v61  ;;  %v1111_v29 = vpop.f32.mrf.mxu1  ;;  %v865_v25 = vmul.f32 %v4475_v31, %v4398_v60  ;;  %v3004_v62 = vld [vmem:[#allocation11] sm:$0xff]  ;;  %2748 = vmatpush.bf16.msra.mxu3 %v3012_v52 }
 0x20c   :  { %v1524_v6 = vmul.f32 %v1523_v13, %v4453_v14  ;;  %v4497_v21 = vmul.f32 0.70710677, %v4473_v26  ;;  %v856_v15 = vmul.f32 %v4444_v33, %v855_v19  ;;  %v1446_v17 = vmul.f32 %v1445_v36, %v4364_v7  ;;  %2699 = vmatpush.bf16.msra.mxu2 %v3004_v62 }
 0x20d   :  { %v1563_v10 = vadd.f32 0.00028619796, %v1562_v16  ;;  %v934_v57 = vpack.c.bf16 %v925_v18, %v924_v59  ;;  %v1331_v61 = vadd.f32 1.1283791, %v1330_v54  ;;  %v1408_v58 = vmul.f32 %v1407_v9, %v4324_v53 }
 0x20e   :  { %5783 = vst [vmem:[#allocation33_spill] sm:$0xff] %v4497_v21  ;;  %v1486_v37 = vmul.f32 %v1485_v39, %v4382_v30  ;;  %v1600_v0 = vmul.f32 %v4497_v21, %v4497_v21  ;;  %v1525_v13 = vadd.f32 0.0036580483, %v1524_v6  ;;  %v4507_v19 = vmul.f32 0.70710677, %v4490_v5 }
 0x20f   :  { %v1564_v27 = vmul.f32 %v1563_v10, %v4477_v34  ;;  %1076 = vmatmul.bf16.gmra.mxu0 %v934_v57  ;;  %1125 = vmatmul.bf16.gmra.mxu1 %v934_v57  ;;  %v4510_v36 = vadd.f32 %v1062_v35, %v4222_v51  ;;  %v1369_v54 = vadd.f32 0.18741608, %v1368_v45  ;;  %v866_v9 = vmul.f32 %v4475_v31, %v865_v25 }
 0x210   :  { %5784 = vst [vmem:[#allocation34_spill] sm:$0xff] %v4507_v19  ;;  %v4513_v59 = vmin.f32 %v1600_v0, 16.0  ;;  %v4516_v39 = vadd.f32 %v1111_v29, %v4224_v32  ;;  %v857_v18 = vmul.f32 0.5, %v856_v15  ;;  %v1447_v6 = vadd.f32 0.05243302, %v1446_v17 }
 0x211   :  { %v1565_v10 = vadd.f32 0.0036580483, %v1564_v27  ;;  %v1640_v57 = vmul.f32 %v4507_v19, %v4507_v19  ;;  %v1487_v55 = vadd.f32 0.05243302, %v1486_v37  ;;  %v4522_v45 = vmul.f32 0.70710677, %v4510_v36 }
 0x212   :  { %v1602_v35 = vmul.f32 2.1237322e-06, %v4513_v59  ;;  %v1526_v29 = vmul.f32 %v1525_v13, %v4453_v14  ;;  %v4532_v27 = vmul.f32 0.70710677, %v4516_v39  ;;  %vm860_vm11 = vweird.f32 %v4380_v20 }
 0x213   :  { %v1064_v16 = vpop.f32.mrf.mxu0  ;;  %5785 = vst [vmem:[#allocation35_spill] sm:$0xff] %v4522_v45  ;;  %v1566_v25 = vmul.f32 %v1565_v10, %v4477_v34  ;;  %v4529_v62 = vmin.f32 %v1640_v57, 16.0  ;;  %vm861_vm12 = vweird.f32 %v4444_v33  ;;  %v867_v15 = vmul.f32 0.5, %v866_v9  ;;  %v1113_v57 = vpop.f32.mrf.mxu1 }
 0x214   :  { %v4525_v0 = vadd.f32 %v1064_v16, %v4222_v51  ;;  %5787 = vst [vmem:[#allocation37_spill] sm:$0xff] %v4532_v27  ;;  %v1603_v17 = vadd.f32 0.00028619796, %v1602_v35  ;;  %v1680_v52 = vmul.f32 %v4522_v45, %v4522_v45  ;;  %v1448_v37 = vmul.f32 %v1447_v6, %v4364_v7  ;;  %vm4578_vm14 = vmor %vm860_vm11, %vm861_vm12 }
 0x215   :  { %5786 = vst [vmem:[#allocation36_spill] sm:$0xff] %v4529_v62  ;;  %v1642_v13 = vmul.f32 2.1237322e-06, %v4529_v62  ;;  %v1720_v16 = vmul.f32 %v4532_v27, %v4532_v27  ;;  %v1409_v1 = vadd.f32 0.18741608, %v1408_v58  ;;  %v858_v19 = vsub.f32 1.5, %v857_v18 }
 0x216   :  { %v4543_v10 = vmul.f32 0.70710677, %v4525_v0  ;;  %v1488_v48 = vmul.f32 %v1487_v55, %v4382_v30  ;;  %v4546_v9 = vmin.f32 %v1680_v52, 16.0  ;;  %v1370_v35 = vmul.f32 %v1369_v54, %v4317_v41 }
 0x217   :  { %v1527_v45 = vadd.f32 0.05243302, %v1526_v29  ;;  %v1567_v2 = vadd.f32 0.05243302, %v1566_v25  ;;  %v1604_v6 = vmul.f32 %v1603_v17, %v4513_v59  ;;  %v4551_v3 = vmul.f32 %v1331_v61, %v4276_v43 }
 0x218   :  { %5788 = vst [vmem:[#allocation38_spill] sm:$0xff] %v4546_v9  ;;  %v868_v27 = vsub.f32 1.5, %v867_v15  ;;  %v1643_v21 = vadd.f32 0.00028619796, %v1642_v13  ;;  %v4554_v49 = vadd.f32 %v1113_v57, %v4224_v32  ;;  %v1449_v58 = vadd.f32 0.18741608, %v1448_v37 }
 0x219   :  { %v4557_v18 = vmul.f32 0.5, %v4394_v24  ;;  %v4559_v55 = vmin.f32 %v1720_v16, 16.0  ;;  %v1760_v54 = vmul.f32 %v4543_v10, %v4543_v10  ;;  %v1410_v29 = vmul.f32 %v1409_v1, %v4324_v53 }
 0x21a   :  { %v859_v25 = vmul.f32 %v4444_v33, %v858_v19  ;;  %v1489_v43 = vadd.f32 0.18741608, %v1488_v48  ;;  %v1682_v61 = vmul.f32 2.1237322e-06, %v4546_v9  ;;  %v1371_v15 = vadd.f32 1.1283791, %v1370_v35 }
 0x21b   :  { %5789 = vst [vmem:[#allocation39_spill] sm:$0xff] %v4557_v18  ;;  %v1528_v17 = vmul.f32 %v1527_v45, %v4453_v14  ;;  %v1568_v52 = vmul.f32 %v1567_v2, %v4477_v34  ;;  %v1605_v37 = vadd.f32 0.0036580483, %v1604_v6  ;;  %v869_v24 = vmul.f32 %v4475_v31, %v868_v27  ;;  %v1116_v57 = vpop.f32.mrf.mxu1 }
 0x21c   :  { %5790 = vst [vmem:[#allocation40_spill] sm:$0xff] %v4559_v55  ;;  %vm871_vm13 = vweird.f32 %v4475_v31  ;;  %v1644_v13 = vmul.f32 %v1643_v21, %v4529_v62  ;;  %v4572_v16 = vmul.f32 0.70710677, %v4554_v49  ;;  %v1450_v48 = vmul.f32 %v1449_v58, %v4364_v7 }
 0x21d   :  { %vm870_vm15 = vweird.f32 %v4398_v60  ;;  %v1722_v2 = vmul.f32 2.1237322e-06, %v4559_v55  ;;  %v4585_v19 = vmin.f32 %v1760_v54, 16.0  ;;  %v1411_v21 = vadd.f32 1.1283791, %v1410_v29 }
 0x21e   :  { %v1490_v45 = vmul.f32 %v1489_v43, %v4382_v30  ;;  %v1683_v27 = vadd.f32 0.00028619796, %v1682_v61  ;;  %v863_v20 = vsel %vm4578_vm14, %v4444_v33, %v859_v25  ;;  %vm4591_vm0 = vmor %vm870_vm15, %vm871_vm13  ;;  %v1529_v35 = vadd.f32 0.18741608, %v1528_v17 }
 0x21f   :  { %v4596_v6 = vmul.f32 0.5, %v4409_v56  ;;  %v1569_v60 = vadd.f32 0.18741608, %v1568_v52  ;;  %v1606_v58 = vmul.f32 %v1605_v37, %v4513_v59  ;;  %v4600_v54 = vmul.f32 %v1371_v15, %v4299_v4 }
 0x220   :  { %v1645_v29 = vadd.f32 0.0036580483, %v1644_v13  ;;  %v1800_v43 = vmul.f32 %v4572_v16, %v4572_v16  ;;  %v873_v33 = vsel %vm4591_vm0, %v4475_v31, %v869_v24  ;;  %v1451_v25 = vadd.f32 1.1283791, %v1450_v48 }
 0x221   :  { %5795 = vst [vmem:[#allocation41_spill] sm:$0xff] %v4596_v6  ;;  %v1723_v61 = vadd.f32 0.00028619796, %v1722_v2  ;;  %v1762_v17 = vmul.f32 2.1237322e-06, %v4585_v19  ;;  %v5796_v56 = vsub.f32 %v4121_v46, %v4314_v11  ;;  %v4612_v37 = vmul.f32 %v1411_v21, %v4304_v38 }
 0x222   :  { %v1491_v4 = vadd.f32 1.1283791, %v1490_v45  ;;  %v1684_v15 = vmul.f32 %v1683_v27, %v4546_v9  ;;  %v5798_v13 = vsub.f32 %v4181_v40, %v4361_v50  ;;  %v1530_v31 = vmul.f32 %v1529_v35, %v4453_v14  ;;  %v1067_v45 = vpop.f32.mrf.mxu0 }
 0x223   :  { %v888_v52 = vmul.f32 %v863_v20, %v5796_v56  ;;  %5797 = vst [vmem:[#allocation42_spill] sm:$0xff] %v4612_v37  ;;  %v1570_v24 = vmul.f32 %v1569_v60, %v4477_v34  ;;  %v1607_v48 = vadd.f32 0.05243302, %v1606_v58  ;;  %v4622_v46 = vmul.f32 0.5, %v4473_v26  ;;  %v3170_v60 = vld [vmem:[#allocation8] ss:$0 sm:$0xff] }
 0x224   :  { %v889_v1 = vmul.f32 %v873_v33, %v5798_v13  ;;  %v1646_v38 = vmul.f32 %v1645_v29, %v4529_v62  ;;  %v4625_v11 = vmin.f32 %v1800_v43, 16.0  ;;  %v4629_v40 = vmul.f32 %v1451_v25, %v4338_v22  ;;  %v5823_v37 = vld [vmem:[#allocation32_spill] sm:$0xff] }
 0x225   :  { %v907_v2 = vmul.f32 %v4480_v47, %v888_v52  ;;  %5799 = vst [vmem:[#allocation43_spill] sm:$0xff] %v4622_v46  ;;  %v4632_v50 = vmul.f32 0.5, %v4490_v5  ;;  %v1724_v27 = vmul.f32 %v1723_v61, %v4559_v55  ;;  %v1763_v20 = vadd.f32 0.00028619796, %v1762_v17  ;;  %v5817_v46 = vld [vmem:[#allocation28_spill] sm:$0xff] }
 0x226   :  { %v908_v21 = vmul.f32 %v4480_v47, %v889_v1  ;;  %5800 = vst [vmem:[#allocation44_spill] sm:$0xff] %v4629_v40  ;;  %v4636_v26 = vmul.f32 %v1491_v4, %v4357_v63  ;;  %v1685_v35 = vadd.f32 0.0036580483, %v1684_v15  ;;  %v1531_v43 = vadd.f32 1.1283791, %v1530_v31 }
 0x227   :  { %5801 = vst [vmem:[#allocation45_spill] sm:$0xff] %v4632_v50  ;;  %v926_v58 = vadd.f32 %v3170_v60, %v907_v2  ;;  %v1571_v47 = vadd.f32 1.1283791, %v1570_v24  ;;  %v1608_v33 = vmul.f32 %v1607_v48, %v4513_v59  ;;  %v4640_v22 = vadd.f32 %v1067_v45, %v4222_v51 }
 0x228   :  { %5802 = vst [vmem:[#allocation46_spill] sm:$0xff] %v4636_v26  ;;  %v927_v29 = vadd.f32 %v3170_v60, %v908_v21  ;;  %v1647_v5 = vadd.f32 0.05243302, %v1646_v38  ;;  %v1802_v25 = vmul.f32 2.1237322e-06, %v4625_v11  ;;  %v4644_v17 = vadd.f32 %v1116_v57, %v4224_v32 }
 0x229   :  { %v4647_v63 = vmul.f32 0.5, %v4510_v36  ;;  %v4650_v56 = vmul.f32 0.5, %v4516_v39  ;;  %v1725_v52 = vadd.f32 0.0036580483, %v1724_v27  ;;  %v1764_v4 = vmul.f32 %v1763_v20, %v4585_v19 }
 0x22a   :  { %v935_v61 = vpack.c.bf16 %v927_v29, %v926_v58  ;;  %v1686_v15 = vmul.f32 %v1685_v35, %v4546_v9  ;;  %v4655_v13 = vmul.f32 0.5, %v4525_v0  ;;  %v4658_v1 = vmul.f32 0.5, %v4554_v49  ;;  %v5809_v29 = vld [vmem:[#allocation21_spill] sm:$0xff] }
 0x22b   :  { %5803 = vst [vmem:[#allocation47_spill] sm:$0xff] %v4647_v63  ;;  %v4661_v31 = vmul.f32 0.70710677, %v4640_v22  ;;  %v4664_v36 = vmul.f32 %v1531_v43, %v4425_v28  ;;  %v4667_v39 = vmul.f32 %v1571_v47, %v4449_v44  ;;  %v1609_v24 = vadd.f32 0.18741608, %v1608_v33 }
 0x22c   :  { %5804 = vst [vmem:[#allocation48_spill] sm:$0xff] %v4650_v56  ;;  %1081 = vmatmul.bf16.gmra.mxu0 %v935_v61  ;;  %1130 = vmatmul.bf16.gmra.mxu1 %v935_v61  ;;  %v4670_v48 = vmul.f32 0.70710677, %v4644_v17  ;;  %v1648_v0 = vmul.f32 %v1647_v5, %v4529_v62  ;;  %v1803_v2 = vadd.f32 0.00028619796, %v1802_v25  ;;  %v1726_v21 = vmul.f32 %v1725_v52, %v4559_v55 }
 0x22d   :  { %5805 = vst [vmem:[#allocation49_spill] sm:$0xff] %v4655_v13  ;;  %v1840_v49 = vmul.f32 %v4661_v31, %v4661_v31  ;;  %v1216_v38 = vadd.f32 0.014752088, %v4387_v23  ;;  %v1765_v45 = vadd.f32 0.0036580483, %v1764_v4  ;;  %v1610_v60 = vmul.f32 %v1609_v24, %v4513_v59 }
 0x22e   :  { %5806 = vst [vmem:[#allocation50_spill] sm:$0xff] %v4658_v1  ;;  %v1880_v28 = vmul.f32 %v4670_v48, %v4670_v48  ;;  %v1293_v44 = vmul.f32 3.8918573e-05, %v4278_v42  ;;  %v1687_v27 = vadd.f32 0.05243302, %v1686_v15  ;;  %v1804_v47 = vmul.f32 %v1803_v2, %v4625_v11 }
 0x22f   :  { %5807 = vst [vmem:[#allocation51_spill] sm:$0xff] %v4664_v36  ;;  %v4680_v20 = vmin.f32 %v1840_v49, 16.0  ;;  %v1217_v57 = vmul.f32 %v1216_v38, %v4251_v12  ;;  %v1253_v35 = vmul.f32 3.8918573e-05, %v4253_v8  ;;  %v1333_v43 = vmul.f32 3.8918573e-05, %v5809_v29 }
 0x230   :  { %5808 = vst [vmem:[#allocation52_spill] sm:$0xff] %v4667_v39  ;;  %v4685_v58 = vmin.f32 %v1880_v28, 16.0  ;;  %v1294_v23 = vadd.f32 0.001143296, %v1293_v44  ;;  %v1373_v15 = vmul.f32 3.8918573e-05, %v4317_v41  ;;  %v1766_v44 = vmul.f32 %v1765_v45, %v4585_v19 }
 0x231   :  { %v1842_v33 = vmul.f32 2.1237322e-06, %v4680_v20  ;;  %v1218_v5 = vadd.f32 0.112945676, %v1217_v57  ;;  %v1254_v25 = vadd.f32 0.001143296, %v1253_v35  ;;  %v1688_v35 = vmul.f32 %v1687_v27, %v4546_v9 }
 0x232   :  { %v1882_v61 = vmul.f32 2.1237322e-06, %v4685_v58  ;;  %v1295_v52 = vmul.f32 %v1294_v23, %v4278_v42  ;;  %v1334_v4 = vadd.f32 0.001143296, %v1333_v43  ;;  %v1727_v49 = vadd.f32 0.05243302, %v1726_v21 }
 0x233   :  { %v1843_v24 = vadd.f32 0.00028619796, %v1842_v33  ;;  %v1219_v38 = vmul.f32 %v1218_v5, %v4251_v12  ;;  %v1255_v28 = vmul.f32 %v1254_v25, %v4253_v8  ;;  %v1374_v57 = vadd.f32 0.001143296, %v1373_v15 }
 0x234   :  { %v1296_v2 = vadd.f32 0.014752088, %v1295_v52  ;;  %v1335_v1 = vmul.f32 %v1334_v4, %v5809_v29  ;;  %v1883_v56 = vadd.f32 0.00028619796, %v1882_v61  ;;  %v1805_v43 = vadd.f32 0.0036580483, %v1804_v47 }
 0x235   :  { %v1220_v13 = vadd.f32 0.4994258, %v1219_v38  ;;  %v1256_v23 = vadd.f32 0.014752088, %v1255_v28  ;;  %v1375_v33 = vmul.f32 %v1374_v57, %v4317_v41  ;;  %v1649_v5 = vadd.f32 0.18741608, %v1648_v0 }
 0x236   :  { %v1297_v63 = vmul.f32 %v1296_v2, %v4278_v42  ;;  %v1336_v21 = vadd.f32 0.014752088, %v1335_v1  ;;  %v1844_v25 = vmul.f32 %v1843_v24, %v4680_v20  ;;  %v1728_v4 = vmul.f32 %v1727_v49, %v4559_v55 }
 0x237   :  { %v1221_v45 = vmul.f32 %v1220_v13, %v4251_v12  ;;  %v1257_v52 = vmul.f32 %v1256_v23, %v4253_v8  ;;  %v1376_v61 = vadd.f32 0.014752088, %v1375_v33  ;;  %v1767_v38 = vadd.f32 0.05243302, %v1766_v44 }
 0x238   :  { %v1298_v15 = vadd.f32 0.112945676, %v1297_v63  ;;  %v1337_v27 = vmul.f32 %v1336_v21, %v5809_v29  ;;  %v1884_v47 = vmul.f32 %v1883_v56, %v4685_v58  ;;  %v1689_v2 = vadd.f32 0.18741608, %v1688_v35 }
 0x239   :  { %v4706_v28 = vadd.f32 1.0, %v1221_v45  ;;  %v1258_v1 = vadd.f32 0.112945676, %v1257_v52  ;;  %v1806_v0 = vmul.f32 %v1805_v43, %v4625_v11  ;;  %v1611_v13 = vadd.f32 1.1283791, %v1610_v60 }
 0x23a   :  { %v1299_v24 = vmul.f32 %v1298_v15, %v4278_v42  ;;  %v1338_v12 = vadd.f32 0.112945676, %v1337_v27  ;;  %v1845_v57 = vadd.f32 0.0036580483, %v1844_v25  ;;  %v1377_v63 = vmul.f32 %v1376_v61, %v4317_v41  ;;  %v5810_v15 = vld [vmem:[#allocation33_spill] sm:$0xff] }
 0x23b   :  { %3103 = vrcp.f32 %v4706_v28  ;;  %v1650_v49 = vmul.f32 %v1649_v5, %v4529_v62  ;;  %v1259_v56 = vmul.f32 %v1258_v1, %v4253_v8  ;;  %v1453_v23 = vmul.f32 3.8918573e-05, %v4364_v7 }
 0x23c   :  { %v1300_v44 = vadd.f32 0.4994258, %v1299_v24  ;;  %v1729_v21 = vadd.f32 0.18741608, %v1728_v4  ;;  %v1768_v35 = vmul.f32 %v1767_v38, %v4585_v19  ;;  %v1885_v43 = vadd.f32 0.0036580483, %v1884_v47 }
 0x23d   :  { %v1339_v33 = vmul.f32 %v1338_v12, %v5809_v29  ;;  %v1690_v60 = vmul.f32 %v1689_v2, %v4546_v9  ;;  %v1807_v25 = vadd.f32 0.05243302, %v1806_v0  ;;  %v1260_v52 = vadd.f32 0.4994258, %v1259_v56 }
 0x23e   :  { %v1301_v45 = vmul.f32 %v1300_v44, %v4278_v42  ;;  %v4720_v27 = vmul.f32 %v1611_v13, %v5810_v15  ;;  %v1846_v5 = vmul.f32 %v1845_v57, %v4680_v20  ;;  %v1378_v1 = vadd.f32 0.112945676, %v1377_v63 }
 0x23f   :  { %v1340_v61 = vadd.f32 0.4994258, %v1339_v33  ;;  %v4723_v24 = vadd.f32 1.1283791, %v1650_v49  ;;  %v1261_v38 = vmul.f32 %v1260_v52, %v4253_v8  ;;  %v1454_v47 = vadd.f32 0.001143296, %v1453_v23  ;;  %v1069_v8 = vpop.f32.mrf.mxu0  ;;  %v1118_v33 = vpop.f32.mrf.mxu1 }
 0x240   :  { %5811 = vst [vmem:[#allocation21_spill] sm:$0xff] %v4720_v27  ;;  %v4725_v4 = vadd.f32 1.0, %v1301_v45  ;;  %v4729_v2 = vmul.f32 %v1729_v21, %v4559_v55  ;;  %v4731_v42 = vadd.f32 0.18741608, %v1768_v35  ;;  %v1886_v0 = vmul.f32 %v1885_v43, %v4685_v58 }
 0x241   :  { %v3104_v12 = vpop.eup %3103  ;;  %v1341_v13 = vmul.f32 %v1340_v61, %v5809_v29  ;;  %v4735_v57 = vadd.f32 1.1283791, %v1690_v60  ;;  %v4738_v63 = vmul.f32 %v1807_v25, %v4625_v11  ;;  %v1847_v44 = vadd.f32 0.05243302, %v1846_v5 }
 0x242   :  { %v1224_v49 = vmul.f32 %v3104_v12, %v4706_v28  ;;  %3105 = vrcp.f32 %v4725_v4  ;;  %v1232_v56 = vand.u32 2147483647, %v4706_v28  ;;  %v1234_v23 = vand.u32 2147483648, %v4706_v28 }
 0x243   :  { %v1379_v21 = vmul.f32 %v1378_v1, %v4317_v41  ;;  %v4745_v43 = vadd.f32 1.0, %v1261_v38  ;;  %v4747_v29 = vadd.f32 1.0, %v1341_v13  ;;  %v1455_v60 = vmul.f32 %v1454_v47, %v4364_v7 }
 0x244   :  { %v1225_v35 = vsub.f32 1.0, %v1224_v49  ;;  %v4750_v25 = vadd.f32 0.05243302, %v1886_v0  ;;  %vm1228_vm1 = vweird.f32 %v4706_v28  ;;  %v1312_v45 = vand.u32 2147483647, %v4725_v4 }
 0x245   :  { %v1314_v52 = vand.u32 2147483648, %v4725_v4  ;;  %vm1229_vm2 = vweird.f32 %v3104_v12  ;;  %3107 = vrcp.f32 %v4745_v43  ;;  %v4757_v5 = vadd.f32 %v1069_v8, %v4222_v51 }
 0x246   :  { %v1226_v15 = vmul.f32 %v3104_v12, %v1225_v35  ;;  %v4760_v61 = vmul.f32 %v1847_v44, %v4680_v20  ;;  %vm4762_vm3 = vcmp.eq.f32.partialorder %v1232_v56, 8.507059e+37  ;;  %v1235_v38 = vor.u32 1.1754944e-38, %v1234_v23  ;;  %vm1230_vm5 = vmor %vm1228_vm1, %vm1229_vm2 }
 0x247   :  { %3109 = vrcp.f32 %v4747_v29  ;;  %vm1308_vm4 = vweird.f32 %v4725_v4  ;;  %v1380_v13 = vadd.f32 0.4994258, %v1379_v21  ;;  %v4768_v49 = vadd.f32 0.014752088, %v1455_v60  ;;  %v1072_v28 = vpop.f32.mrf.mxu0 }
 0x248   :  { %v3106_v47 = vpop.eup %3105  ;;  %v1227_v0 = vadd.f32 %v3104_v12, %v1226_v15  ;;  %vm4773_vm6 = vcmp.eq.f32.partialorder %v1312_v45, 8.507059e+37  ;;  %v1315_v56 = vor.u32 1.1754944e-38, %v1314_v52  ;;  %v1272_v23 = vand.u32 2147483647, %v4745_v43 }
 0x249   :  { %v1304_v8 = vmul.f32 %v3106_v47, %v4725_v4  ;;  %v1274_v35 = vand.u32 2147483648, %v4745_v43  ;;  %v1352_v50 = vand.u32 2147483647, %v4747_v29  ;;  %v1354_v21 = vand.u32 2147483648, %v4747_v29 }
 0x24a   :  { %v1231_v15 = vsel %vm1230_vm5, %v3104_v12, %v1227_v0  ;;  %v4782_v60 = vmul.f32 0.70710677, %v4757_v5  ;;  %vm1268_vm7 = vweird.f32 %v4745_v43  ;;  %v4788_v52 = vadd.f32 %v1118_v33, %v4224_v32 }
 0x24b   :  { %v1236_v45 = vsel %vm4762_vm3, %v1235_v38, %v1231_v15  ;;  %v1305_v6 = vsub.f32 1.0, %v1304_v8  ;;  %v3108_v39 = vpop.eup %3107  ;;  %vm1309_vm8 = vweird.f32 %v3106_v47  ;;  %vm1348_vm9 = vweird.f32 %v4747_v29 }
 0x24c   :  { %5816 = vst [vmem:[#allocation33_spill] sm:$0xff] %v4782_v60  ;;  %v1237_v12 = vmul.f32 %v1236_v45, %v5817_v46  ;;  %v1920_v0 = vmul.f32 %v4782_v60, %v4782_v60  ;;  %v4795_v18 = vadd.f32 %v1072_v28, %v4222_v51  ;;  %v1264_v8 = vmul.f32 %v3108_v39, %v4745_v43  ;;  %v1121_v28 = vpop.f32.mrf.mxu1  ;;  %vm1310_vm13 = vmor %vm1308_vm4, %vm1309_vm8 }
 0x24d   :  { %v3110_v1 = vpop.eup %3109  ;;  %v1306_v38 = vmul.f32 %v3106_v47, %v1305_v6  ;;  %vm4798_vm10 = vcmp.eq.f32.partialorder %v1272_v23, 8.507059e+37  ;;  %v1275_v33 = vor.u32 1.1754944e-38, %v1274_v35  ;;  %vm4803_vm11 = vcmp.eq.f32.partialorder %v1352_v50, 8.507059e+37 }
 0x24e   :  { %v2892_v27 = vclamps-f32 %v1237_v12, 1.0  ;;  %v1344_v46 = vmul.f32 %v3110_v1, %v4747_v29  ;;  %v1355_v55 = vor.u32 1.1754944e-38, %v1354_v21  ;;  %v4807_v9 = vmin.f32 %v1920_v0, 16.0 }
 0x24f   :  { %v1307_v36 = vadd.f32 %v3106_v47, %v1306_v38  ;;  %v1265_v6 = vsub.f32 1.0, %v1264_v8  ;;  %vm1269_vm12 = vweird.f32 %v3108_v39  ;;  %v4810_v23 = vmul.f32 0.70710677, %v4788_v52 }
 0x250   :  { %v1345_v35 = vsub.f32 1.0, %v1344_v46  ;;  %vm1349_vm14 = vweird.f32 %v3110_v1  ;;  %v1922_v50 = vmul.f32 2.1237322e-06, %v4807_v9  ;;  %v4817_v12 = vmul.f32 0.70710677, %v4795_v18  ;;  %vm1270_vm15 = vmor %vm1268_vm7, %vm1269_vm12 }
 0x251   :  { %v1311_v21 = vsel %vm1310_vm13, %v3106_v47, %v1307_v36  ;;  %v1266_v0 = vmul.f32 %v3108_v39, %v1265_v6  ;;  %v1960_v38 = vmul.f32 %v4810_v23, %v4810_v23  ;;  %v4822_v8 = vadd.f32 %v1121_v28, %v4224_v32  ;;  %vm1350_vm0 = vmor %vm1348_vm9, %vm1349_vm14 }
 0x252   :  { %v1316_v60 = vsel %vm4773_vm6, %v1315_v56, %v1311_v21  ;;  %v2480_v4 = vadd.f32 1.0, %v2892_v27  ;;  %v1346_v26 = vmul.f32 %v3110_v1, %v1345_v35  ;;  %v1923_v46 = vadd.f32 0.00028619796, %v1922_v50 }
 0x253   :  { %5822 = vst [vmem:[#allocation28_spill] sm:$0xff] %v4822_v8  ;;  %v1317_v40 = vmul.f32 %v1316_v60, %v5823_v37  ;;  %v1267_v62 = vadd.f32 %v3108_v39, %v1266_v0  ;;  %v4827_v51 = vmin.f32 %v1960_v38, 16.0  ;;  %v2000_v36 = vmul.f32 %v4817_v12, %v4817_v12 }
 0x254   :  { %v1347_v47 = vadd.f32 %v3110_v1, %v1346_v26  ;;  %v1924_v28 = vmul.f32 %v1923_v46, %v4807_v9  ;;  %v4836_v44 = vmul.f32 0.70710677, %v4822_v8  ;;  %v1381_v27 = vmul.f32 %v1380_v13, %v4317_v41  ;;  %v5824_v41 = vld [vmem:[#allocation22_spill] sm:$0xff] }
 0x255   :  { %v2894_v56 = vclamps-f32 %v1317_v40, 1.0  ;;  %v1271_v37 = vsel %vm1270_vm15, %v3108_v39, %v1267_v62  ;;  %v1962_v60 = vmul.f32 2.1237322e-06, %v4827_v51  ;;  %v4843_v6 = vmin.f32 %v2000_v36, 16.0  ;;  %v5825_v62 = vld [vmem:[#allocation29_spill] sm:$0xff] }
 0x256   :  { %v1276_v26 = vsel %vm4798_vm10, %v1275_v33, %v1271_v37  ;;  %v1351_v43 = vsel %vm1350_vm0, %v3110_v1, %v1347_v47  ;;  %v1925_v35 = vadd.f32 0.0036580483, %v1924_v28  ;;  %v2040_v50 = vmul.f32 %v4836_v44, %v4836_v44  ;;  %v5826_v1 = vld [vmem:[#allocation24_spill] sm:$0xff] }
 0x257   :  { %v2482_v21 = vadd.f32 1.0, %v2894_v56  ;;  %v2512_v40 = vmul.f32 %v2480_v4, %v5824_v41  ;;  %v1277_v39 = vmul.f32 %v1276_v26, %v5825_v62  ;;  %v1356_v29 = vsel %vm4803_vm11, %v1355_v55, %v1351_v43 }
 0x258   :  { %v1357_v13 = vmul.f32 %v1356_v29, %v4551_v3  ;;  %v1926_v0 = vmul.f32 %v1925_v35, %v4807_v9  ;;  %v1963_v38 = vadd.f32 0.00028619796, %v1962_v60  ;;  %v2002_v15 = vmul.f32 2.1237322e-06, %v4843_v6 }
 0x259   :  { %v2514_v33 = vmul.f32 %v2482_v21, %v5826_v1  ;;  %v2893_v46 = vclamps-f32 %v1277_v39, 1.0  ;;  %v4857_v36 = vmin.f32 %v2040_v50, 16.0  ;;  %v4859_v47 = vadd.f32 1.0, %v1381_v27  ;;  %v5828_v21 = vld [vmem:[#allocation23_spill] sm:$0xff] }
 0x25a   :  { %v1770_v4 = vmul.f32 %v4731_v42, %v4585_v19  ;;  %v1809_v45 = vadd.f32 0.18741608, %v4738_v63  ;;  %v1888_v3 = vmul.f32 %v4750_v25, %v4685_v58  ;;  %v2895_v55 = vclamps-f32 %v1357_v13, 1.0  ;;  %v5827_v42 = vld [vmem:[#allocation34_spill] sm:$0xff] }
 0x25b   :  { %v1849_v28 = vadd.f32 0.18741608, %v4760_v61  ;;  %v2544_v56 = vpack.c.bf16 %v2514_v33, %v2512_v40  ;;  %v2481_v37 = vadd.f32 1.0, %v2893_v46  ;;  %v1457_v60 = vmul.f32 %v4768_v49, %v4364_v7  ;;  %v5829_v49 = vld [vmem:[#allocation25_spill] sm:$0xff] }
 0x25c   :  { %v2483_v26 = vadd.f32 1.0, %v2895_v55  ;;  %v1927_v43 = vadd.f32 0.05243302, %v1926_v0  ;;  %v1964_v27 = vmul.f32 %v1963_v38, %v4827_v51  ;;  %3111 = vrcp.f32 %v4859_v47  ;;  %v5830_v55 = vld [vmem:[#allocation35_spill] sm:$0xff] }
 0x25d   :  { %v4873_v63 = vmul.f32 %v4723_v24, %v5827_v42  ;;  %v1731_v25 = vadd.f32 1.1283791, %v4729_v2  ;;  %2700 = vmatmul.bf16.vlgmr.msra.gmra.mxu2 %v2544_v56  ;;  %v2003_v35 = vadd.f32 0.00028619796, %v2002_v15  ;;  %v2042_v61 = vmul.f32 2.1237322e-06, %v4857_v36 }
 0x25e   :  { %v1771_v50 = vadd.f32 1.1283791, %v1770_v4  ;;  %v2513_v41 = vmul.f32 %v2481_v37, %v5828_v21  ;;  %v2515_v40 = vmul.f32 %v2483_v26, %v5829_v49  ;;  %v1413_v62 = vmul.f32 3.8918573e-05, %v4324_v53 }
 0x25f   :  { %v1810_v39 = vmul.f32 %v1809_v45, %v4625_v11  ;;  %v1850_v29 = vmul.f32 %v1849_v28, %v4680_v20  ;;  %v1889_v13 = vadd.f32 0.18741608, %v1888_v3  ;;  %v1458_v24 = vadd.f32 0.112945676, %v1457_v60  ;;  %v5831_v28 = vld [vmem:[#allocation37_spill] sm:$0xff] }
 0x260   :  { %v4883_v0 = vmul.f32 0.5, %v4640_v22  ;;  %v2545_v2 = vpack.c.bf16 %v2515_v40, %v2513_v41  ;;  %v1928_v38 = vmul.f32 %v1927_v43, %v4807_v9  ;;  %v1965_v15 = vadd.f32 0.0036580483, %v1964_v27 }
 0x261   :  { %v4887_v1 = vmul.f32 0.5, %v4644_v17  ;;  %v2004_v33 = vmul.f32 %v2003_v35, %v4843_v6  ;;  %v2043_v46 = vadd.f32 0.00028619796, %v2042_v61  ;;  %v1459_v4 = vmul.f32 %v1458_v24, %v4364_v7 }
 0x262   :  { %v3112_v45 = vpop.eup %3111  ;;  %v4893_v3 = vmul.f32 %v4735_v57, %v5830_v55  ;;  %v4896_v22 = vmul.f32 %v1731_v25, %v5831_v28  ;;  %v4899_v56 = vmul.f32 %v1771_v50, %v4543_v10  ;;  %2749 = vmatmul.bf16.vlgmr.msra.gmra.mxu3 %v2545_v2  ;;  %v1414_v37 = vadd.f32 0.001143296, %v1413_v62 }
 0x263   :  { %v1811_v17 = vadd.f32 1.1283791, %v1810_v39  ;;  %v1851_v60 = vadd.f32 1.1283791, %v1850_v29  ;;  %v1890_v26 = vmul.f32 %v1889_v13, %v4685_v58  ;;  %v1384_v43 = vmul.f32 %v3112_v45, %v4859_v47 }
 0x264   :  { %v1929_v27 = vadd.f32 0.18741608, %v1928_v38  ;;  %v1966_v42 = vmul.f32 %v1965_v15, %v4827_v51  ;;  %v1460_v35 = vadd.f32 0.4994258, %v1459_v4  ;;  %v1415_v57 = vmul.f32 %v1414_v37, %v4324_v53 }
 0x265   :  { %v2005_v61 = vadd.f32 0.0036580483, %v2004_v33  ;;  %v2044_v25 = vmul.f32 %v2043_v46, %v4857_v36  ;;  %v1385_v21 = vsub.f32 1.0, %v1384_v43  ;;  %v1493_v10 = vmul.f32 3.8918573e-05, %v4382_v30 }
 0x266   :  { %v1394_v50 = vand.u32 2147483648, %v4859_v47  ;;  %v1461_v41 = vmul.f32 %v1460_v35, %v4364_v7  ;;  %v1416_v49 = vadd.f32 0.014752088, %v1415_v57  ;;  %v1533_v40 = vmul.f32 3.8918573e-05, %v4453_v14 }
 0x267   :  { %v1386_v62 = vmul.f32 %v3112_v45, %v1385_v21  ;;  %vm1389_vm1 = vweird.f32 %v3112_v45  ;;  %v1392_v39 = vand.u32 2147483647, %v4859_v47  ;;  %v1494_v29 = vadd.f32 0.001143296, %v1493_v10 }
 0x268   :  { %v1967_v13 = vadd.f32 0.05243302, %v1966_v42  ;;  %vm1388_vm2 = vweird.f32 %v4859_v47  ;;  %v4912_v24 = vadd.f32 1.0, %v1461_v41  ;;  %v1417_v2 = vmul.f32 %v1416_v49, %v4324_v53 }
 0x269   :  { %v2006_v38 = vmul.f32 %v2005_v61, %v4843_v6  ;;  %v2045_v15 = vadd.f32 0.0036580483, %v2044_v25  ;;  %v1387_v33 = vadd.f32 %v3112_v45, %v1386_v62  ;;  %v1495_v7 = vmul.f32 %v1494_v29, %v4382_v30  ;;  %vm1390_vm3 = vmor %vm1388_vm2, %vm1389_vm1 }
 0x26a   :  { %v4918_v46 = vmul.f32 %v1811_v17, %v4572_v16  ;;  %v1395_v4 = vor.u32 1.1754944e-38, %v1394_v50  ;;  %3113 = vrcp.f32 %v4912_v24  ;;  %v1534_v55 = vadd.f32 0.001143296, %v1533_v40 }
 0x26b   :  { %v1930_v47 = vmul.f32 %v1929_v27, %v4807_v9  ;;  %v1391_v28 = vsel %vm1390_vm3, %v3112_v45, %v1387_v33  ;;  %vm1393_vm4 = vcmp.eq.f32.partialorder %v1392_v39, 8.507059e+37  ;;  %v1418_v37 = vadd.f32 0.112945676, %v1417_v2 }
 0x26c   :  { %v4923_v43 = vmul.f32 %v1851_v60, %v4661_v31  ;;  %v1891_v42 = vadd.f32 1.1283791, %v1890_v26  ;;  %v1396_v35 = vsel %vm1393_vm4, %v1395_v4, %v1391_v28  ;;  %v1496_v57 = vadd.f32 0.014752088, %v1495_v7 }
 0x26d   :  { %v1968_v61 = vmul.f32 %v1967_v13, %v4827_v51  ;;  %v2007_v16 = vadd.f32 0.05243302, %v2006_v38  ;;  %v2046_v17 = vmul.f32 %v2045_v15, %v4857_v36  ;;  %v1419_v25 = vmul.f32 %v1418_v37, %v4324_v53 }
 0x26e   :  { %v1397_v21 = vmul.f32 %v1396_v35, %v4600_v54  ;;  %v1497_v27 = vmul.f32 %v1496_v57, %v4382_v30  ;;  %v1535_v45 = vmul.f32 %v1534_v55, %v4453_v14  ;;  %v1613_v10 = vmul.f32 3.8918573e-05, %v4513_v59  ;;  %v1123_v35 = vpop.f32.mrf.mxu1 }
 0x26f   :  { %v4933_v31 = vmul.f32 0.5, %v4757_v5  ;;  %v4935_v60 = vadd.f32 1.1283791, %v1930_v47  ;;  %v4938_v26 = vmul.f32 0.5, %v4788_v52  ;;  %v1420_v50 = vadd.f32 0.4994258, %v1419_v25 }
 0x270   :  { %v3114_v41 = vpop.eup %3113  ;;  %v4941_v49 = vmul.f32 %v1891_v42, %v4670_v48  ;;  %v1498_v54 = vadd.f32 0.112945676, %v1497_v27  ;;  %v1536_v40 = vadd.f32 0.014752088, %v1535_v45  ;;  %v1614_v62 = vadd.f32 0.001143296, %v1613_v10  ;;  %v1074_v42 = vpop.f32.mrf.mxu0 }
 0x271   :  { %5832 = vst [vmem:[#allocation32_spill] sm:$0xff] %v4938_v26  ;;  %v4943_v39 = vadd.f32 0.18741608, %v1968_v61  ;;  %v4946_v29 = vmul.f32 %v2007_v16, %v4843_v6  ;;  %v1464_v5 = vmul.f32 %v3114_v41, %v4912_v24  ;;  %v1421_v13 = vmul.f32 %v1420_v50, %v4324_v53  ;;  %v5833_v16 = vld [vmem:[#allocation19_spill] sm:$0xff]  ;;  %v5836_v10 = vld [vmem:[#allocation36_spill] sm:$0xff] }
 0x272   :  { %v2047_v2 = vadd.f32 0.05243302, %v2046_v17  ;;  %v2896_v52 = vclamps-f32 %v1397_v21, 1.0  ;;  %v1499_v38 = vmul.f32 %v1498_v54, %v4382_v30  ;;  %v1537_v15 = vmul.f32 %v1536_v40, %v4453_v14 }
 0x273   :  { %v1465_v48 = vsub.f32 1.0, %v1464_v5  ;;  %v1474_v33 = vand.u32 2147483648, %v4912_v24  ;;  %v4953_v7 = vadd.f32 1.0, %v1421_v13  ;;  %v1615_v4 = vmul.f32 %v1614_v62, %v4513_v59 }
 0x274   :  { %vm1468_vm5 = vweird.f32 %v4912_v24  ;;  %v1500_v55 = vadd.f32 0.4994258, %v1499_v38  ;;  %v1538_v47 = vadd.f32 0.112945676, %v1537_v15  ;;  %v1573_v28 = vmul.f32 3.8918573e-05, %v4477_v34 }
 0x275   :  { %v1466_v53 = vmul.f32 %v3114_v41, %v1465_v48  ;;  %vm1469_vm6 = vweird.f32 %v3114_v41  ;;  %v1472_v37 = vand.u32 2147483647, %v4912_v24  ;;  %3115 = vrcp.f32 %v4953_v7  ;;  %v5837_v48 = vld [vmem:[#allocation26_spill] sm:$0xff] }
 0x276   :  { %v2484_v57 = vadd.f32 1.0, %v2896_v52  ;;  %v1501_v61 = vmul.f32 %v1500_v55, %v4382_v30  ;;  %v4962_v17 = vadd.f32 %v1074_v42, %v5833_v16  ;;  %v4965_v25 = vadd.f32 %v1123_v35, %v4224_v32  ;;  %vm1470_vm7 = vmor %vm1468_vm5, %vm1469_vm6 }
 0x277   :  { %v1467_v21 = vadd.f32 %v3114_v41, %v1466_v53  ;;  %v1539_v27 = vmul.f32 %v1538_v47, %v4453_v14  ;;  %v1616_v45 = vadd.f32 0.014752088, %v1615_v4  ;;  %v1653_v50 = vmul.f32 3.8918573e-05, %v5836_v10  ;;  %v5838_v4 = vld [vmem:[#allocation44_spill] sm:$0xff] }
 0x278   :  { %5834 = vst [vmem:[#allocation22_spill] sm:$0xff] %v4962_v17  ;;  %v1475_v54 = vor.u32 1.1754944e-38, %v1474_v33  ;;  %v4971_v40 = vadd.f32 1.0, %v1501_v61  ;;  %v4974_v30 = vmul.f32 0.70710677, %v4962_v17  ;;  %vm1473_vm8 = vcmp.eq.f32.partialorder %v1472_v37, 8.507059e+37 }
 0x279   :  { %5835 = vst [vmem:[#allocation29_spill] sm:$0xff] %v4965_v25  ;;  %v1574_v62 = vadd.f32 0.001143296, %v1573_v28  ;;  %v1471_v5 = vsel %vm1470_vm7, %v3114_v41, %v1467_v21  ;;  %v4977_v13 = vmul.f32 0.70710677, %v4965_v25  ;;  %v4980_v38 = vmul.f32 %v2047_v2, %v4857_v36 }
 0x27a   :  { %v1540_v52 = vadd.f32 0.4994258, %v1539_v27  ;;  %v1476_v15 = vsel %vm1473_vm8, %v1475_v54, %v1471_v5  ;;  %v2516_v24 = vmul.f32 %v2484_v57, %v5837_v48  ;;  %3117 = vrcp.f32 %v4971_v40 }
 0x27b   :  { %v3116_v33 = vpop.eup %3115  ;;  %v1477_v55 = vmul.f32 %v1476_v15, %v5838_v4  ;;  %v2080_v47 = vmul.f32 %v4974_v30, %v4974_v30  ;;  %v2120_v41 = vmul.f32 %v4977_v13, %v4977_v13  ;;  %v1617_v28 = vmul.f32 %v1616_v45, %v4513_v59  ;;  %v5839_v4 = vld [vmem:[#allocation30_spill] sm:$0xff] }
 0x27c   :  { %v1424_v53 = vmul.f32 %v3116_v33, %v4953_v7  ;;  %v1541_v2 = vmul.f32 %v1540_v52, %v4453_v14  ;;  %v1575_v37 = vmul.f32 %v1574_v62, %v4477_v34  ;;  %v1654_v42 = vadd.f32 0.001143296, %v1653_v50 }
 0x27d   :  { %v2898_v35 = vclamps-f32 %v1477_v55, 1.0  ;;  %v1432_v57 = vand.u32 2147483647, %v4953_v7  ;;  %v4994_v61 = vmin.f32 %v2080_v47, 16.0  ;;  %v4996_v21 = vmin.f32 %v2120_v41, 16.0 }
 0x27e   :  { %v1425_v27 = vsub.f32 1.0, %v1424_v53  ;;  %vm1428_vm9 = vweird.f32 %v4953_v7  ;;  %v1434_v54 = vand.u32 2147483648, %v4953_v7  ;;  %v5000_v45 = vadd.f32 1.0, %v1541_v2 }
 0x27f   :  { %v2486_v5 = vadd.f32 1.0, %v2898_v35  ;;  %vm1429_vm10 = vweird.f32 %v3116_v33  ;;  %v2082_v14 = vmul.f32 2.1237322e-06, %v4994_v61  ;;  %v1618_v62 = vadd.f32 0.112945676, %v1617_v28 }
 0x280   :  { %v3118_v50 = vpop.eup %3117  ;;  %v1426_v52 = vmul.f32 %v3116_v33, %v1425_v27  ;;  %v2122_v15 = vmul.f32 2.1237322e-06, %v4996_v21  ;;  %3119 = vrcp.f32 %v5000_v45  ;;  %v1576_v48 = vadd.f32 0.014752088, %v1575_v37  ;;  %vm1430_vm12 = vmor %vm1428_vm9, %vm1429_vm10 }
 0x281   :  { %v2518_v55 = vmul.f32 %v2486_v5, %v5839_v4  ;;  %vm5006_vm11 = vcmp.eq.f32.partialorder %v1432_v57, 8.507059e+37  ;;  %v1504_v41 = vmul.f32 %v3118_v50, %v4971_v40  ;;  %v2083_v53 = vadd.f32 0.00028619796, %v2082_v14 }
 0x282   :  { %v1427_v2 = vadd.f32 %v3116_v33, %v1426_v52  ;;  %v1435_v35 = vor.u32 1.1754944e-38, %v1434_v54  ;;  %v1512_v28 = vand.u32 2147483647, %v4971_v40  ;;  %v1655_v27 = vmul.f32 %v1654_v42, %v5836_v10 }
 0x283   :  { %v2546_v25 = vpack.c.bf16 %v2518_v55, %v2516_v24  ;;  %v1505_v37 = vsub.f32 1.0, %v1504_v41  ;;  %v1514_v57 = vand.u32 2147483648, %v4971_v40  ;;  %v1619_v5 = vmul.f32 %v1618_v62, %v4513_v59  ;;  %v5842_v55 = vld [vmem:[#allocation42_spill] sm:$0xff] }
 0x284   :  { %v1431_v4 = vsel %vm1430_vm12, %v3116_v33, %v1427_v2  ;;  %v2084_v8 = vmul.f32 %v2083_v53, %v4994_v61  ;;  %v2123_v14 = vadd.f32 0.00028619796, %v2122_v15  ;;  %v1577_v54 = vmul.f32 %v1576_v48, %v4477_v34 }
 0x285   :  { %2705 = vmatmul.bf16.gmra.mxu2 %v2546_v25  ;;  %v1436_v42 = vsel %vm5006_vm11, %v1435_v35, %v1431_v4  ;;  %v1506_v24 = vmul.f32 %v3118_v50, %v1505_v37  ;;  %vm1509_vm13 = vweird.f32 %v3118_v50  ;;  %v1620_v52 = vadd.f32 0.4994258, %v1619_v5 }
 0x286   :  { %v3120_v7 = vpop.eup %3119  ;;  %v1437_v41 = vmul.f32 %v1436_v42, %v5842_v55  ;;  %vm1508_vm14 = vweird.f32 %v4971_v40  ;;  %v1578_v17 = vadd.f32 0.112945676, %v1577_v54  ;;  %v1656_v62 = vadd.f32 0.014752088, %v1655_v27  ;;  %v5843_v54 = vld [vmem:[#allocation46_spill] sm:$0xff] }
 0x287   :  { %v1507_v33 = vadd.f32 %v3118_v50, %v1506_v24  ;;  %vm1513_vm15 = vcmp.eq.f32.partialorder %v1512_v28, 8.507059e+37  ;;  %v1515_v53 = vor.u32 1.1754944e-38, %v1514_v57  ;;  %v1544_v15 = vmul.f32 %v3120_v7, %v5000_v45  ;;  %vm1510_vm0 = vmor %vm1508_vm14, %vm1509_vm13 }
 0x288   :  { %v2085_v25 = vadd.f32 0.0036580483, %v2084_v8  ;;  %v2124_v48 = vmul.f32 %v2123_v14, %v4996_v21  ;;  %v1621_v47 = vmul.f32 %v1620_v52, %v4513_v59  ;;  %v1579_v2 = vmul.f32 %v1578_v17, %v4477_v34  ;;  %v5844_v59 = vld [vmem:[#allocation33_spill] sm:$0xff] }
 0x289   :  { %v2897_v35 = vclamps-f32 %v1437_v41, 1.0  ;;  %v1511_v37 = vsel %vm1510_vm0, %v3118_v50, %v1507_v33  ;;  %v1545_v5 = vsub.f32 1.0, %v1544_v15  ;;  %v1552_v40 = vand.u32 2147483647, %v5000_v45 }
 0x28a   :  { %v1516_v4 = vsel %vm1513_vm15, %v1515_v53, %v1511_v37  ;;  %v1554_v27 = vand.u32 2147483648, %v5000_v45  ;;  %v5030_v28 = vadd.f32 1.0, %v1621_v47  ;;  %v1657_v57 = vmul.f32 %v1656_v62, %v5836_v10 }
 0x28b   :  { %v1517_v8 = vmul.f32 %v1516_v4, %v5843_v54  ;;  %v1546_v42 = vmul.f32 %v3120_v7, %v1545_v5  ;;  %vm1549_vm1 = vweird.f32 %v3120_v7  ;;  %v1580_v14 = vadd.f32 0.4994258, %v1579_v2  ;;  %v5845_v5 = vld [vmem:[#allocation27_spill] sm:$0xff] }
 0x28c   :  { %v5036_v17 = vmul.f32 %v4935_v60, %v5844_v59  ;;  %v2086_v50 = vmul.f32 %v2085_v25, %v4994_v61  ;;  %v2125_v24 = vadd.f32 0.0036580483, %v2124_v48  ;;  %3121 = vrcp.f32 %v5030_v28  ;;  %v5846_v4 = vld [vmem:[#allocation31_spill] sm:$0xff] }
 0x28d   :  { %v2899_v52 = vclamps-f32 %v1517_v8, 1.0  ;;  %v2485_v55 = vadd.f32 1.0, %v2897_v35  ;;  %v1547_v41 = vadd.f32 %v3120_v7, %v1546_v42  ;;  %vm1548_vm2 = vweird.f32 %v5000_v45 }
 0x28e   :  { %v2009_v62 = vadd.f32 0.18741608, %v4946_v29  ;;  %vm1550_vm3 = vmor %vm1548_vm2, %vm1549_vm1  ;;  %v1555_v33 = vor.u32 1.1754944e-38, %v1554_v27  ;;  %v1581_v53 = vmul.f32 %v1580_v14, %v4477_v34  ;;  %v1658_v15 = vadd.f32 0.112945676, %v1657_v57 }
 0x28f   :  { %v2049_v60 = vadd.f32 0.18741608, %v4980_v38  ;;  %v2487_v47 = vadd.f32 1.0, %v2899_v52  ;;  %v1551_v2 = vsel %vm1550_vm3, %v3120_v7, %v1547_v41  ;;  %vm1553_vm4 = vcmp.eq.f32.partialorder %v1552_v40, 8.507059e+37  ;;  %v5847_v7 = vld [vmem:[#allocation51_spill] sm:$0xff] }
 0x290   :  { %v2087_v25 = vadd.f32 0.05243302, %v2086_v50  ;;  %v2126_v48 = vmul.f32 %v2125_v24, %v4996_v21  ;;  %v1556_v37 = vsel %vm1553_vm4, %v1555_v33, %v1551_v2  ;;  %v5045_v35 = vadd.f32 1.0, %v1581_v53 }
 0x291   :  { %v2517_v45 = vmul.f32 %v2485_v55, %v5845_v5  ;;  %v2519_v29 = vmul.f32 %v2487_v47, %v5846_v4  ;;  %v1632_v27 = vand.u32 2147483647, %v5030_v28  ;;  %v1659_v34 = vmul.f32 %v1658_v15, %v5836_v10  ;;  %v5851_v47 = vld [vmem:[#allocation40_spill] sm:$0xff] }
 0x292   :  { %v3122_v57 = vpop.eup %3121  ;;  %v5053_v38 = vmul.f32 %v4943_v39, %v4827_v51  ;;  %v1557_v40 = vmul.f32 %v1556_v37, %v5847_v7  ;;  %v1634_v54 = vand.u32 2147483648, %v5030_v28  ;;  %3123 = vrcp.f32 %v5045_v35 }
 0x293   :  { %v5059_v8 = vmul.f32 %v2009_v62, %v4843_v6  ;;  %v5062_v42 = vmul.f32 %v2049_v60, %v4857_v36  ;;  %v2547_v14 = vpack.c.bf16 %v2519_v29, %v2517_v45  ;;  %v1624_v59 = vmul.f32 %v3122_v57, %v5030_v28  ;;  %v5850_v62 = vld [vmem:[#allocation38_spill] sm:$0xff] }
 0x294   :  { %v5066_v50 = vmul.f32 %v2087_v25, %v4994_v61  ;;  %v5068_v39 = vadd.f32 0.05243302, %v2126_v48  ;;  %vm1628_vm5 = vweird.f32 %v5030_v28  ;;  %v1592_v24 = vand.u32 2147483647, %v5045_v35 }
 0x295   :  { %2754 = vmatmul.bf16.gmra.mxu3 %v2547_v14  ;;  %v1625_v52 = vsub.f32 1.0, %v1624_v59  ;;  %vm5072_vm6 = vcmp.eq.f32.partialorder %v1632_v27, 8.507059e+37  ;;  %v1660_v41 = vadd.f32 0.4994258, %v1659_v34  ;;  %v1693_v33 = vmul.f32 3.8918573e-05, %v5850_v62 }
 0x296   :  { %v2900_v53 = vclamps-f32 %v1557_v40, 1.0  ;;  %v1635_v15 = vor.u32 1.1754944e-38, %v1634_v54  ;;  %v1773_v60 = vmul.f32 3.8918573e-05, %v4585_v19  ;;  %v1733_v2 = vmul.f32 3.8918573e-05, %v5851_v47 }
 0x297   :  { %v1626_v25 = vmul.f32 %v3122_v57, %v1625_v52  ;;  %vm1629_vm7 = vweird.f32 %v3122_v57  ;;  %v1661_v48 = vmul.f32 %v1660_v41, %v5836_v10  ;;  %v1694_v37 = vadd.f32 0.001143296, %v1693_v33 }
 0x298   :  { %v3124_v5 = vpop.eup %3123  ;;  %vm1588_vm8 = vweird.f32 %v5045_v35  ;;  %v1774_v45 = vadd.f32 0.001143296, %v1773_v60  ;;  %v1734_v4 = vadd.f32 0.001143296, %v1733_v2  ;;  %v1813_v29 = vmul.f32 3.8918573e-05, %v4625_v11  ;;  %vm1630_vm9 = vmor %vm1628_vm5, %vm1629_vm7 }
 0x299   :  { %v1627_v27 = vadd.f32 %v3122_v57, %v1626_v25  ;;  %v1584_v34 = vmul.f32 %v3124_v5, %v5045_v35  ;;  %v1594_v7 = vand.u32 2147483648, %v5045_v35  ;;  %v5084_v40 = vadd.f32 1.0, %v1661_v48  ;;  %v5854_v25 = vld [vmem:[#allocation21_spill] sm:$0xff]  ;;  %v5856_v35 = vld [vmem:[#allocation43_spill] sm:$0xff] }
 0x29a   :  { %v1695_v10 = vmul.f32 %v1694_v37, %v5850_v62  ;;  %v1775_v54 = vmul.f32 %v1774_v45, %v4585_v19  ;;  %v1735_v14 = vmul.f32 %v1734_v4, %v5851_v47  ;;  %v1814_v59 = vadd.f32 0.001143296, %v1813_v29 }
 0x29b   :  { %v1631_v52 = vsel %vm1630_vm9, %v3122_v57, %v1627_v27  ;;  %v1585_v41 = vsub.f32 1.0, %v1584_v34  ;;  %vm5091_vm10 = vcmp.eq.f32.partialorder %v1592_v24, 8.507059e+37  ;;  %3125 = vrcp.f32 %v5084_v40 }
 0x29c   :  { %v1636_v60 = vsel %vm5072_vm6, %v1635_v15, %v1631_v52  ;;  %v2488_v28 = vadd.f32 1.0, %v2900_v53  ;;  %vm1589_vm11 = vweird.f32 %v3124_v5  ;;  %v1696_v2 = vadd.f32 0.014752088, %v1695_v10  ;;  %v5855_v15 = vld [vmem:[#allocation39_spill] sm:$0xff] }
 0x29d   :  { %v1637_v48 = vmul.f32 %v1636_v60, %v5854_v25  ;;  %v1586_v37 = vmul.f32 %v3124_v5, %v1585_v41  ;;  %v1776_v45 = vadd.f32 0.014752088, %v1775_v54  ;;  %v1736_v4 = vadd.f32 0.014752088, %v1735_v14  ;;  %vm1590_vm12 = vmor %vm1588_vm8, %vm1589_vm11 }
 0x29e   :  { %v1595_v29 = vor.u32 1.1754944e-38, %v1594_v7  ;;  %v1672_v57 = vand.u32 2147483647, %v5084_v40  ;;  %v1697_v24 = vmul.f32 %v1696_v2, %v5850_v62  ;;  %v1815_v27 = vmul.f32 %v1814_v59, %v4625_v11 }
 0x29f   :  { %v2902_v34 = vclamps-f32 %v1637_v48, 1.0  ;;  %v1587_v26 = vadd.f32 %v3124_v5, %v1586_v37  ;;  %v1777_v55 = vmul.f32 %v1776_v45, %v4585_v19  ;;  %v1737_v53 = vmul.f32 %v1736_v4, %v5851_v47  ;;  %v5857_v4 = vld [vmem:[#allocation52_spill] sm:$0xff] }
 0x2a0   :  { %v2520_v10 = vmul.f32 %v2488_v28, %v5855_v15  ;;  %v1698_v54 = vadd.f32 0.112945676, %v1697_v24  ;;  %v1816_v7 = vadd.f32 0.014752088, %v1815_v27  ;;  %v1853_v14 = vmul.f32 3.8918573e-05, %v4680_v20 }
 0x2a1   :  { %v3126_v52 = vpop.eup %3125  ;;  %v2490_v41 = vadd.f32 1.0, %v2902_v34  ;;  %v1591_v60 = vsel %vm1590_vm12, %v3124_v5, %v1587_v26  ;;  %v1778_v59 = vadd.f32 0.112945676, %v1777_v55  ;;  %v1738_v2 = vadd.f32 0.112945676, %v1737_v53 }
 0x2a2   :  { %v1596_v25 = vsel %vm5091_vm10, %v1595_v29, %v1591_v60  ;;  %v1664_v48 = vmul.f32 %v3126_v52, %v5084_v40  ;;  %v1674_v28 = vand.u32 2147483648, %v5084_v40  ;;  %v1699_v37 = vmul.f32 %v1698_v54, %v5850_v62 }
 0x2a3   :  { %v2522_v45 = vmul.f32 %v2490_v41, %v5856_v35  ;;  %v1597_v24 = vmul.f32 %v1596_v25, %v5857_v4  ;;  %v1779_v27 = vmul.f32 %v1778_v59, %v4585_v19  ;;  %v1739_v34 = vmul.f32 %v1738_v2, %v5851_v47 }
 0x2a4   :  { %v1665_v26 = vsub.f32 1.0, %v1664_v48  ;;  %v1700_v5 = vadd.f32 0.4994258, %v1699_v37  ;;  %v1817_v55 = vmul.f32 %v1816_v7, %v4625_v11  ;;  %v1854_v33 = vadd.f32 0.001143296, %v1853_v14 }
 0x2a5   :  { %v2548_v29 = vpack.c.bf16 %v2522_v45, %v2520_v10  ;;  %vm1669_vm13 = vweird.f32 %v3126_v52  ;;  %v1780_v53 = vadd.f32 0.4994258, %v1779_v27  ;;  %v1740_v15 = vadd.f32 0.4994258, %v1739_v34 }
 0x2a6   :  { %v2901_v60 = vclamps-f32 %v1597_v24, 1.0  ;;  %v1666_v32 = vmul.f32 %v3126_v52, %v1665_v26  ;;  %v1701_v54 = vmul.f32 %v1700_v5, %v5850_v62  ;;  %v1818_v41 = vadd.f32 0.112945676, %v1817_v55  ;;  %v5858_v5 = vld [vmem:[#allocation41_spill] sm:$0xff] }
 0x2a7   :  { %2710 = vmatmul.bf16.gmra.mxu2 %v2548_v29  ;;  %v1781_v25 = vmul.f32 %v1780_v53, %v4585_v19  ;;  %v1741_v59 = vmul.f32 %v1740_v15, %v5851_v47  ;;  %v1855_v2 = vmul.f32 %v1854_v33, %v4680_v20  ;;  %v1933_v48 = vmul.f32 3.8918573e-05, %v4807_v9 }
 0x2a8   :  { %v2128_v10 = vmul.f32 %v5068_v39, %v4996_v21  ;;  %v1667_v7 = vadd.f32 %v3126_v52, %v1666_v32  ;;  %vm1668_vm14 = vweird.f32 %v5084_v40  ;;  %v5127_v14 = vadd.f32 1.0, %v1701_v54 }
 0x2a9   :  { %vm1670_vm15 = vmor %vm1668_vm14, %vm1669_vm13  ;;  %vm1673_vm0 = vcmp.eq.f32.partialorder %v1672_v57, 8.507059e+37  ;;  %v1675_v62 = vor.u32 1.1754944e-38, %v1674_v28  ;;  %v5130_v37 = vadd.f32 1.0, %v1781_v25  ;;  %v5132_v19 = vadd.f32 1.0, %v1741_v59 }
 0x2aa   :  { %v1671_v47 = vsel %vm1670_vm15, %v3126_v52, %v1667_v7  ;;  %v2489_v35 = vadd.f32 1.0, %v2901_v60  ;;  %3127 = vrcp.f32 %v5127_v14  ;;  %v1819_v45 = vmul.f32 %v1818_v41, %v4625_v11 }
 0x2ab   :  { %v1676_v39 = vsel %vm1673_vm0, %v1675_v62, %v1671_v47  ;;  %3129 = vrcp.f32 %v5130_v37  ;;  %v1856_v32 = vadd.f32 0.014752088, %v1855_v2  ;;  %v1934_v40 = vadd.f32 0.001143296, %v1933_v48 }
 0x2ac   :  { %v5138_v4 = vadd.f32 1.1283791, %v5053_v38  ;;  %v5141_v57 = vadd.f32 1.1283791, %v5059_v8  ;;  %v1677_v28 = vmul.f32 %v1676_v39, %v4873_v63  ;;  %v1714_v52 = vand.u32 2147483648, %v5127_v14 }
 0x2ad   :  { %v5146_v24 = vadd.f32 1.1283791, %v5062_v42  ;;  %v5149_v27 = vadd.f32 0.18741608, %v5066_v50  ;;  %v1712_v34 = vand.u32 2147483647, %v5127_v14  ;;  %3131 = vrcp.f32 %v5132_v19 }
 0x2ae   :  { %v5153_v26 = vadd.f32 0.18741608, %v2128_v10  ;;  %v2903_v38 = vclamps-f32 %v1677_v28, 1.0  ;;  %v2521_v8 = vmul.f32 %v2489_v35, %v5858_v5  ;;  %v1792_v55 = vand.u32 2147483647, %v5130_v37  ;;  %v5861_v10 = vld [vmem:[#allocation45_spill] sm:$0xff] }
 0x2af   :  { %vm1708_vm1 = vweird.f32 %v5127_v14  ;;  %v1820_v63 = vadd.f32 0.4994258, %v1819_v45  ;;  %v1857_v42 = vmul.f32 %v1856_v32, %v4680_v20  ;;  %v1935_v33 = vmul.f32 %v1934_v40, %v4807_v9 }
 0x2b0   :  { %v3128_v50 = vpop.eup %3127  ;;  %v2491_v29 = vadd.f32 1.0, %v2903_v38  ;;  %v1715_v53 = vor.u32 1.1754944e-38, %v1714_v52  ;;  %vm1788_vm2 = vweird.f32 %v5130_v37  ;;  %v1794_v15 = vand.u32 2147483648, %v5130_v37 }
 0x2b1   :  { %v1893_v60 = vmul.f32 3.8918573e-05, %v4685_v58  ;;  %v3130_v54 = vpop.eup %3129  ;;  %v1704_v41 = vmul.f32 %v3128_v50, %v5127_v14  ;;  %vm5164_vm3 = vcmp.eq.f32.partialorder %v1712_v34, 8.507059e+37  ;;  %v1752_v59 = vand.u32 2147483647, %v5132_v19 }
 0x2b2   :  { %v1821_v2 = vmul.f32 %v1820_v63, %v4625_v11  ;;  %v1858_v48 = vadd.f32 0.112945676, %v1857_v42  ;;  %v2523_v7 = vmul.f32 %v2491_v29, %v5861_v10  ;;  %v1784_v62 = vmul.f32 %v3130_v54, %v5130_v37 }
 0x2b3   :  { %vm5172_vm4 = vcmp.eq.f32.partialorder %v1792_v55, 8.507059e+37  ;;  %vm1748_vm5 = vweird.f32 %v5132_v19  ;;  %v1754_v35 = vand.u32 2147483648, %v5132_v19  ;;  %v1936_v45 = vadd.f32 0.014752088, %v1935_v33  ;;  %v3132_v39 = vpop.eup %3131 }
 0x2b4   :  { %v1705_v32 = vsub.f32 1.0, %v1704_v41  ;;  %v5178_v40 = vadd.f32 1.0, %v1821_v2  ;;  %v1859_v11 = vmul.f32 %v1858_v48, %v4680_v20  ;;  %v1894_v28 = vadd.f32 0.001143296, %v1893_v60 }
 0x2b5   :  { %v2549_v52 = vpack.c.bf16 %v2523_v7, %v2521_v8  ;;  %v1785_v34 = vsub.f32 1.0, %v1784_v62  ;;  %v1795_v38 = vor.u32 1.1754944e-38, %v1794_v15  ;;  %v1744_v5 = vmul.f32 %v3132_v39, %v5132_v19 }
 0x2b6   :  { %v1706_v55 = vmul.f32 %v3128_v50, %v1705_v32  ;;  %vm1709_vm6 = vweird.f32 %v3128_v50  ;;  %vm5182_vm7 = vcmp.eq.f32.partialorder %v1752_v59, 8.507059e+37  ;;  %3133 = vrcp.f32 %v5178_v40 }
 0x2b7   :  { %2759 = vmatmul.bf16.gmra.mxu3 %v2549_v52  ;;  %v1786_v42 = vmul.f32 %v3130_v54, %v1785_v34  ;;  %vm1789_vm8 = vweird.f32 %v3130_v54  ;;  %v1745_v33 = vsub.f32 1.0, %v1744_v5  ;;  %v1860_v29 = vadd.f32 0.4994258, %v1859_v11  ;;  %vm1710_vm9 = vmor %vm1708_vm1, %vm1709_vm6 }
 0x2b8   :  { %v1707_v41 = vadd.f32 %v3128_v50, %v1706_v55  ;;  %v1755_v60 = vor.u32 1.1754944e-38, %v1754_v35  ;;  %v1937_v8 = vmul.f32 %v1936_v45, %v4807_v9  ;;  %v1895_v15 = vmul.f32 %v1894_v28, %v4685_v58  ;;  %vm1790_vm11 = vmor %vm1788_vm2, %vm1789_vm8 }
 0x2b9   :  { %v1787_v59 = vadd.f32 %v3130_v54, %v1786_v42  ;;  %v1746_v2 = vmul.f32 %v3132_v39, %v1745_v33  ;;  %vm1749_vm10 = vweird.f32 %v3132_v39  ;;  %v1861_v48 = vmul.f32 %v1860_v29, %v4680_v20 }
 0x2ba   :  { %v1711_v10 = vsel %vm1710_vm9, %v3128_v50, %v1707_v41  ;;  %v1938_v7 = vadd.f32 0.112945676, %v1937_v8  ;;  %v1896_v62 = vadd.f32 0.014752088, %v1895_v15  ;;  %v1973_v35 = vmul.f32 3.8918573e-05, %v4827_v51  ;;  %vm1750_vm12 = vmor %vm1748_vm5, %vm1749_vm10 }
 0x2bb   :  { %v1716_v45 = vsel %vm5164_vm3, %v1715_v53, %v1711_v10  ;;  %v1791_v32 = vsel %vm1790_vm11, %v3130_v54, %v1787_v59  ;;  %v1747_v11 = vadd.f32 %v3132_v39, %v1746_v2  ;;  %v5197_v14 = vadd.f32 1.0, %v1861_v48  ;;  %v5868_v59 = vld [vmem:[#allocation47_spill] sm:$0xff]  ;;  %v5869_v48 = vld [vmem:[#allocation49_spill] sm:$0xff] }
 0x2bc   :  { %v3134_v28 = vpop.eup %3133  ;;  %v1717_v52 = vmul.f32 %v1716_v45, %v4893_v3  ;;  %v1796_v20 = vsel %vm5172_vm4, %v1795_v38, %v1791_v32  ;;  %v1939_v37 = vmul.f32 %v1938_v7, %v4807_v9  ;;  %v1897_v50 = vmul.f32 %v1896_v62, %v4685_v58 }
 0x2bd   :  { %v1797_v25 = vmul.f32 %v1796_v20, %v4899_v56  ;;  %v1751_v53 = vsel %vm1750_vm12, %v3132_v39, %v1747_v11  ;;  %v1824_v54 = vmul.f32 %v3134_v28, %v5178_v40  ;;  %v1832_v34 = vand.u32 2147483647, %v5178_v40 }
 0x2be   :  { %v2904_v5 = vclamps-f32 %v1717_v52, 1.0  ;;  %v1756_v3 = vsel %vm5182_vm7, %v1755_v60, %v1751_v53  ;;  %v1834_v47 = vand.u32 2147483648, %v5178_v40  ;;  %3135 = vrcp.f32 %v5197_v14 }
 0x2bf   :  { %v2906_v19 = vclamps-f32 %v1797_v25, 1.0  ;;  %v1757_v38 = vmul.f32 %v1756_v3, %v4896_v22  ;;  %v1825_v55 = vsub.f32 1.0, %v1824_v54  ;;  %v1974_v42 = vadd.f32 0.001143296, %v1973_v35 }
 0x2c0   :  { %v2492_v33 = vadd.f32 1.0, %v2904_v5  ;;  %vm1828_vm13 = vweird.f32 %v5178_v40  ;;  %v1940_v56 = vadd.f32 0.4994258, %v1939_v37  ;;  %v1898_v39 = vadd.f32 0.112945676, %v1897_v50 }
 0x2c1   :  { %v2494_v29 = vadd.f32 1.0, %v2906_v19  ;;  %v1826_v41 = vmul.f32 %v3134_v28, %v1825_v55  ;;  %vm1829_vm14 = vweird.f32 %v3134_v28  ;;  %vm5215_vm15 = vcmp.eq.f32.partialorder %v1832_v34, 8.507059e+37 }
 0x2c2   :  { %v1835_v60 = vor.u32 1.1754944e-38, %v1834_v47  ;;  %v1872_v8 = vand.u32 2147483647, %v5197_v14  ;;  %v1941_v15 = vmul.f32 %v1940_v56, %v4807_v9  ;;  %v1899_v22 = vmul.f32 %v1898_v39, %v4685_v58  ;;  %vm1830_vm0 = vmor %vm1828_vm13, %vm1829_vm14 }
 0x2c3   :  { %v2524_v2 = vmul.f32 %v2492_v33, %v5868_v59  ;;  %v2526_v10 = vmul.f32 %v2494_v29, %v5869_v48  ;;  %v2905_v7 = vclamps-f32 %v1757_v38, 1.0  ;;  %v1827_v62 = vadd.f32 %v3134_v28, %v1826_v41  ;;  %v5872_v29 = vld [vmem:[#allocation48_spill] sm:$0xff]  ;;  %v5873_v59 = vld [vmem:[#allocation50_spill] sm:$0xff] }
 0x2c4   :  { %v3136_v35 = vpop.eup %3135  ;;  %v5226_v45 = vadd.f32 1.0, %v1941_v15  ;;  %v1900_v32 = vadd.f32 0.4994258, %v1899_v22  ;;  %v1975_v11 = vmul.f32 %v1974_v42, %v4827_v51  ;;  %v2013_v52 = vmul.f32 3.8918573e-05, %v4843_v6 }
 0x2c5   :  { %v2550_v9 = vpack.c.bf16 %v2526_v10, %v2524_v2  ;;  %v1831_v20 = vsel %vm1830_vm0, %v3134_v28, %v1827_v62  ;;  %v1864_v37 = vmul.f32 %v3136_v35, %v5197_v14  ;;  %v1874_v50 = vand.u32 2147483648, %v5197_v14 }
 0x2c6   :  { %v5234_v25 = vmul.f32 %v5149_v27, %v4994_v61  ;;  %v1836_v40 = vsel %vm5215_vm15, %v1835_v60, %v1831_v20  ;;  %vm1868_vm1 = vweird.f32 %v5197_v14  ;;  %3137 = vrcp.f32 %v5226_v45 }
 0x2c7   :  { %2715 = vmatmul.bf16.gmra.mxu2 %v2550_v9  ;;  %v1837_v53 = vmul.f32 %v1836_v40, %v4918_v46  ;;  %v2493_v54 = vadd.f32 1.0, %v2905_v7  ;;  %v1865_v28 = vsub.f32 1.0, %v1864_v37  ;;  %vm5241_vm2 = vcmp.eq.f32.partialorder %v1872_v8, 8.507059e+37 }
 0x2c8   :  { %v1901_v5 = vmul.f32 %v1900_v32, %v4685_v58  ;;  %v1976_v27 = vadd.f32 0.014752088, %v1975_v11  ;;  %v2014_v3 = vadd.f32 0.001143296, %v2013_v52  ;;  %v2093_v47 = vmul.f32 3.8918573e-05, %v4994_v61 }
 0x2c9   :  { %v2907_v19 = vclamps-f32 %v1837_v53, 1.0  ;;  %v1866_v38 = vmul.f32 %v3136_v35, %v1865_v28  ;;  %vm1869_vm3 = vweird.f32 %v3136_v35  ;;  %v1875_v55 = vor.u32 1.1754944e-38, %v1874_v50 }
 0x2ca   :  { %v1952_v42 = vand.u32 2147483647, %v5226_v45  ;;  %v1954_v46 = vand.u32 2147483648, %v5226_v45  ;;  %v5249_v33 = vadd.f32 1.0, %v1901_v5  ;;  %v1977_v56 = vmul.f32 %v1976_v27, %v4827_v51  ;;  %vm1870_vm4 = vmor %vm1868_vm1, %vm1869_vm3 }
 0x2cb   :  { %v2495_v39 = vadd.f32 1.0, %v2907_v19  ;;  %v2525_v41 = vmul.f32 %v2493_v54, %v5872_v29  ;;  %v1867_v58 = vadd.f32 %v3136_v35, %v1866_v38  ;;  %v2015_v63 = vmul.f32 %v2014_v3, %v4843_v6 }
 0x2cc   :  { %v3138_v60 = vpop.eup %3137  ;;  %3139 = vrcp.f32 %v5249_v33  ;;  %v2094_v8 = vadd.f32 0.001143296, %v2093_v47  ;;  %v2053_v15 = vmul.f32 3.8918573e-05, %v4857_v36  ;;  %v2133_v22 = vmul.f32 3.8918573e-05, %v4996_v21 }
 0x2cd   :  { %v2527_v2 = vmul.f32 %v2495_v39, %v5873_v59  ;;  %v1871_v48 = vsel %vm1870_vm4, %v3136_v35, %v1867_v58  ;;  %v1944_v10 = vmul.f32 %v3138_v60, %v5226_v45  ;;  %vm1948_vm5 = vweird.f32 %v5226_v45 }
 0x2ce   :  { %v1876_v7 = vsel %vm5241_vm2, %v1875_v55, %v1871_v48  ;;  %vm5264_vm6 = vcmp.eq.f32.partialorder %v1952_v42, 8.507059e+37  ;;  %v1955_v62 = vor.u32 1.1754944e-38, %v1954_v46  ;;  %v1978_v32 = vadd.f32 0.112945676, %v1977_v56 }
 0x2cf   :  { %v2551_v11 = vpack.c.bf16 %v2527_v2, %v2525_v41  ;;  %v1877_v52 = vmul.f32 %v1876_v7, %v4923_v43  ;;  %v1945_v9 = vsub.f32 1.0, %v1944_v10  ;;  %v2016_v20 = vadd.f32 0.014752088, %v2015_v63 }
 0x2d0   :  { %v1979_v35 = vmul.f32 %v1978_v32, %v4827_v51  ;;  %v2095_v37 = vmul.f32 %v2094_v8, %v4994_v61  ;;  %v2054_v50 = vadd.f32 0.001143296, %v2053_v15  ;;  %v2134_v40 = vadd.f32 0.001143296, %v2133_v22 }
 0x2d1   :  { %2764 = vmatmul.bf16.gmra.mxu3 %v2551_v11  ;;  %v1946_v53 = vmul.f32 %v3138_v60, %v1945_v9  ;;  %vm1949_vm7 = vweird.f32 %v3138_v60  ;;  %v1912_v54 = vand.u32 2147483647, %v5249_v33  ;;  %v2017_v28 = vmul.f32 %v2016_v20, %v4843_v6 }
 0x2d2   :  { %v3140_v34 = vpop.eup %3139  ;;  %v1980_v5 = vadd.f32 0.4994258, %v1979_v35  ;;  %v2096_v27 = vadd.f32 0.014752088, %v2095_v37  ;;  %v2055_v43 = vmul.f32 %v2054_v50, %v4857_v36  ;;  %v2135_v3 = vmul.f32 %v2134_v40, %v4996_v21  ;;  %vm1950_vm8 = vmor %vm1948_vm5, %vm1949_vm7 }
 0x2d3   :  { %v2908_v47 = vclamps-f32 %v1877_v52, 1.0  ;;  %v1947_v19 = vadd.f32 %v3138_v60, %v1946_v53  ;;  %v1904_v38 = vmul.f32 %v3140_v34, %v5249_v33  ;;  %v1914_v55 = vand.u32 2147483648, %v5249_v33 }
 0x2d4   :  { %v1981_v42 = vmul.f32 %v1980_v5, %v4827_v51  ;;  %v2018_v46 = vadd.f32 0.112945676, %v2017_v28  ;;  %v2097_v56 = vmul.f32 %v2096_v27, %v4994_v61  ;;  %v2056_v39 = vadd.f32 0.014752088, %v2055_v43 }
 0x2d5   :  { %v1951_v29 = vsel %vm1950_vm8, %v3138_v60, %v1947_v19  ;;  %v1905_v41 = vsub.f32 1.0, %v1904_v38  ;;  %vm1909_vm9 = vweird.f32 %v3140_v34  ;;  %v2136_v58 = vadd.f32 0.014752088, %v2135_v3 }
 0x2d6   :  { %v1956_v63 = vsel %vm5264_vm6, %v1955_v62, %v1951_v29  ;;  %v5283_v8 = vadd.f32 1.0, %v1981_v42  ;;  %v2019_v15 = vmul.f32 %v2018_v46, %v4843_v6  ;;  %v2098_v22 = vadd.f32 0.112945676, %v2097_v56 }
 0x2d7   :  { %v1957_v45 = vmul.f32 %v1956_v63, %v5036_v17  ;;  %v1906_v59 = vmul.f32 %v3140_v34, %v1905_v41  ;;  %v2057_v51 = vmul.f32 %v2056_v39, %v4857_v36  ;;  %v2137_v2 = vmul.f32 %v2136_v58, %v4996_v21 }
 0x2d8   :  { %v2130_v60 = vmul.f32 %v5153_v26, %v4996_v21  ;;  %v2496_v48 = vadd.f32 1.0, %v2908_v47  ;;  %vm1908_vm10 = vweird.f32 %v5249_v33  ;;  %3141 = vrcp.f32 %v5283_v8 }
 0x2d9   :  { %v2910_v10 = vclamps-f32 %v1957_v45, 1.0  ;;  %v1907_v7 = vadd.f32 %v3140_v34, %v1906_v59  ;;  %v2020_v14 = vadd.f32 0.4994258, %v2019_v15  ;;  %v2099_v62 = vmul.f32 %v2098_v22, %v4994_v61  ;;  %vm1910_vm11 = vmor %vm1908_vm10, %vm1909_vm9 }
 0x2da   :  { %vm1913_vm12 = vcmp.eq.f32.partialorder %v1912_v54, 8.507059e+37  ;;  %v1915_v17 = vor.u32 1.1754944e-38, %v1914_v55  ;;  %v2058_v32 = vadd.f32 0.112945676, %v2057_v51  ;;  %v2138_v11 = vadd.f32 0.112945676, %v2137_v2 }
 0x2db   :  { %v2498_v52 = vadd.f32 1.0, %v2910_v10  ;;  %v1911_v9 = vsel %vm1910_vm11, %v3140_v34, %v1907_v7  ;;  %v2021_v26 = vmul.f32 %v2020_v14, %v4843_v6  ;;  %v2100_v20 = vadd.f32 0.4994258, %v2099_v62  ;;  %v1126_v10 = vpop.f32.mrf.mxu1 }
 0x2dc   :  { %v2528_v33 = vmul.f32 %v2496_v48, %v4883_v0  ;;  %v1916_v35 = vsel %vm1913_vm12, %v1915_v17, %v1911_v9  ;;  %v2059_v37 = vmul.f32 %v2058_v32, %v4857_v36  ;;  %v2139_v50 = vmul.f32 %v2138_v11, %v4996_v21 }
 0x2dd   :  { %v2530_v40 = vmul.f32 %v2498_v52, %v4933_v31  ;;  %v1917_v53 = vmul.f32 %v1916_v35, %v4941_v49  ;;  %v5301_v54 = vadd.f32 1.0, %v2021_v26  ;;  %v2101_v28 = vmul.f32 %v2100_v20, %v4994_v61  ;;  %v5880_v20 = vld [vmem:[#allocation20_spill] sm:$0xff] }
 0x2de   :  { %v3142_v5 = vpop.eup %3141  ;;  %v2091_v34 = vadd.f32 1.1283791, %v5234_v25  ;;  %v2060_v6 = vadd.f32 0.4994258, %v2059_v37  ;;  %v2140_v27 = vadd.f32 0.4994258, %v2139_v50  ;;  %v1972_v0 = vmul.f32 %v5138_v4, %v4810_v23 }
 0x2df   :  { %v5308_v43 = vmul.f32 0.5, %v4795_v18  ;;  %v2552_v3 = vpack.c.bf16 %v2530_v40, %v2528_v33  ;;  %v1984_v31 = vmul.f32 %v3142_v5, %v5283_v8  ;;  %v5313_v49 = vmul.f32 %v5141_v57, %v4817_v12 }
 0x2e0   :  { %v2131_v47 = vadd.f32 1.1283791, %v2130_v60  ;;  %v1992_v61 = vand.u32 2147483647, %v5283_v8  ;;  %3143 = vrcp.f32 %v5301_v54  ;;  %v2909_v25 = vclamps-f32 %v1917_v53, 1.0 }
 0x2e1   :  { %2720 = vmatmul.bf16.gmra.mxu2 %v2552_v3  ;;  %v1985_v19 = vsub.f32 1.0, %v1984_v31  ;;  %v5317_v38 = vadd.f32 1.0, %v2101_v28  ;;  %v2061_v18 = vmul.f32 %v2060_v6, %v4857_v36  ;;  %v5322_v23 = vmul.f32 %v5146_v24, %v4836_v44 }
 0x2e2   :  { %v5325_v4 = vmul.f32 %v2091_v34, %v4974_v30  ;;  %v1994_v12 = vand.u32 2147483648, %v5283_v8  ;;  %v2141_v57 = vmul.f32 %v2140_v27, %v4996_v21  ;;  %vm1989_vm13 = vweird.f32 %v3142_v5  ;;  %v1077_v30 = vpop.f32.mrf.mxu0 }
 0x2e3   :  { %v1986_v55 = vmul.f32 %v3142_v5, %v1985_v19  ;;  %v2032_v42 = vand.u32 2147483647, %v5301_v54  ;;  %3145 = vrcp.f32 %v5317_v38  ;;  %v5332_v46 = vmul.f32 %v2131_v47, %v4977_v13 }
 0x2e4   :  { %v2034_v36 = vand.u32 2147483648, %v5301_v54  ;;  %v5335_v44 = vadd.f32 1.0, %v2061_v18  ;;  %v5337_v24 = vadd.f32 1.0, %v2141_v57  ;;  %vm1988_vm14 = vweird.f32 %v5283_v8 }
 0x2e5   :  { %v1987_v56 = vadd.f32 %v3142_v5, %v1986_v55  ;;  %vm1993_vm15 = vcmp.eq.f32.partialorder %v1992_v61, 8.507059e+37  ;;  %v2497_v21 = vadd.f32 1.0, %v2909_v25  ;;  %vm1990_vm0 = vmor %vm1988_vm14, %vm1989_vm13  ;;  %v1995_v29 = vor.u32 1.1754944e-38, %v1994_v12 }
 0x2e6   :  { %v3144_v39 = vpop.eup %3143  ;;  %v2112_v41 = vand.u32 2147483647, %v5317_v38  ;;  %v2114_v13 = vand.u32 2147483648, %v5317_v38  ;;  %3147 = vrcp.f32 %v5335_v44  ;;  %vm2028_vm1 = vweird.f32 %v5301_v54 }
 0x2e7   :  { %v1991_v58 = vsel %vm1990_vm0, %v3142_v5, %v1987_v56  ;;  %v2024_v63 = vmul.f32 %v3144_v39, %v5301_v54  ;;  %vm5345_vm2 = vcmp.eq.f32.partialorder %v2032_v42, 8.507059e+37  ;;  %v2035_v22 = vor.u32 1.1754944e-38, %v2034_v36 }
 0x2e8   :  { %v1996_v8 = vsel %vm1993_vm15, %v1995_v29, %v1991_v58  ;;  %3149 = vrcp.f32 %v5337_v24  ;;  %v5351_v45 = vadd.f32 %v1077_v30, %v5833_v16  ;;  %v2529_v2 = vmul.f32 %v2497_v21, %v4887_v1 }
 0x2e9   :  { %v3146_v59 = vpop.eup %3145  ;;  %v1997_v51 = vmul.f32 %v1996_v8, %v1972_v0  ;;  %v2025_v60 = vsub.f32 1.0, %v2024_v63  ;;  %v2072_v48 = vand.u32 2147483647, %v5335_v44  ;;  %vm2108_vm3 = vweird.f32 %v5317_v38  ;;  %v5883_v0 = vld [vmem:[#allocation32_spill] sm:$0xff] }
 0x2ea   :  { %v2104_v7 = vmul.f32 %v3146_v59, %v5317_v38  ;;  %vm5357_vm4 = vcmp.eq.f32.partialorder %v2112_v41, 8.507059e+37  ;;  %v2115_v62 = vor.u32 1.1754944e-38, %v2114_v13  ;;  %vm2029_vm5 = vweird.f32 %v3144_v39  ;;  %v1079_v27 = vpop.f32.mrf.mxu0 }
 0x2eb   :  { %v2911_v17 = vclamps-f32 %v1997_v51, 1.0  ;;  %v2026_v32 = vmul.f32 %v3144_v39, %v2025_v60  ;;  %vm2068_vm6 = vweird.f32 %v5335_v44  ;;  %v2074_v1 = vand.u32 2147483648, %v5335_v44  ;;  %vm2030_vm10 = vmor %vm2028_vm1, %vm2029_vm5 }
 0x2ec   :  { %v3148_v11 = vpop.eup %3147  ;;  %v2105_v52 = vsub.f32 1.0, %v2104_v7  ;;  %v2152_v9 = vand.u32 2147483647, %v5337_v24  ;;  %v5365_v26 = vmul.f32 0.70710677, %v5351_v45  ;;  %v5368_v33 = vadd.f32 %v1126_v10, %v5880_v20  ;;  %v5884_v7 = vld [vmem:[#allocation22_spill] sm:$0xff] }
 0x2ed   :  { %v2499_v35 = vadd.f32 1.0, %v2911_v17  ;;  %v2027_v37 = vadd.f32 %v3144_v39, %v2026_v32  ;;  %vm2109_vm7 = vweird.f32 %v3146_v59  ;;  %v2064_v50 = vmul.f32 %v3148_v11, %v5335_v44 }
 0x2ee   :  { %vm5371_vm8 = vcmp.eq.f32.partialorder %v2072_v48, 8.507059e+37  ;;  %vm2148_vm9 = vweird.f32 %v5337_v24  ;;  %v3150_v53 = vpop.eup %3149  ;;  %v2106_v28 = vmul.f32 %v3146_v59, %v2105_v52  ;;  %v2154_v5 = vand.u32 2147483648, %v5337_v24  ;;  %vm2110_vm12 = vmor %vm2108_vm3, %vm2109_vm7 }
 0x2ef   :  { %v2160_v34 = vmul.f32 %v5365_v26, %v5365_v26  ;;  %v5383_v6 = vmul.f32 0.70710677, %v5368_v33  ;;  %v2531_v3 = vmul.f32 %v2499_v35, %v5883_v0  ;;  %v2031_v31 = vsel %vm2030_vm10, %v3144_v39, %v2027_v37 }
 0x2f0   :  { %v2065_v47 = vsub.f32 1.0, %v2064_v50  ;;  %v2144_v61 = vmul.f32 %v3150_v53, %v5337_v24  ;;  %v2036_v54 = vsel %vm5345_vm2, %v2035_v22, %v2031_v31  ;;  %v2107_v25 = vadd.f32 %v3146_v59, %v2106_v28  ;;  %v5885_v28 = vld [vmem:[#allocation28_spill] sm:$0xff] }
 0x2f1   :  { %vm2069_vm11 = vweird.f32 %v3148_v11  ;;  %v5389_v19 = vmin.f32 %v2160_v34, 16.0  ;;  %v2553_v18 = vpack.c.bf16 %v2531_v3, %v2529_v2  ;;  %v2037_v12 = vmul.f32 %v2036_v54, %v5313_v49 }
 0x2f2   :  { %v2066_v57 = vmul.f32 %v3148_v11, %v2065_v47  ;;  %v2145_v55 = vsub.f32 1.0, %v2144_v61  ;;  %v2111_v42 = vsel %vm2110_vm12, %v3146_v59, %v2107_v25  ;;  %vm2149_vm13 = vweird.f32 %v3150_v53  ;;  %vm2070_vm14 = vmor %vm2068_vm6, %vm2069_vm11  ;;  %v1128_v59 = vpop.f32.mrf.mxu1  ;;  %v1082_v51 = vpop.f32.mrf.mxu0 }
 0x2f3   :  { %v2200_v36 = vmul.f32 %v5383_v6, %v5383_v6  ;;  %v5398_v30 = vadd.f32 %v1079_v27, %v5833_v16  ;;  %2769 = vmatmul.bf16.gmra.mxu3 %v2553_v18  ;;  %v2912_v56 = vclamps-f32 %v2037_v12, 1.0  ;;  %v2116_v21 = vsel %vm5357_vm4, %v2115_v62, %v2111_v42  ;;  %vm2150_vm0 = vmor %vm2148_vm9, %vm2149_vm13  ;;  %v5886_v27 = vld [vmem:[#allocation29_spill] sm:$0xff] }
 0x2f4   :  { %v2067_v49 = vadd.f32 %v3148_v11, %v2066_v57  ;;  %v2146_v39 = vmul.f32 %v3150_v53, %v2145_v55  ;;  %v2117_v38 = vmul.f32 %v2116_v21, %v5325_v4  ;;  %v2075_v29 = vor.u32 1.1754944e-38, %v2074_v1 }
 0x2f5   :  { %v2162_v41 = vmul.f32 2.1237322e-06, %v5389_v19  ;;  %v5407_v13 = vmin.f32 %v2200_v36, 16.0  ;;  %vm2153_vm15 = vcmp.eq.f32.partialorder %v2152_v9, 8.507059e+37  ;;  %v5410_v15 = vmul.f32 0.70710677, %v5398_v30 }
 0x2f6   :  { %v2071_v58 = vsel %vm2070_vm14, %v3148_v11, %v2067_v49  ;;  %v2147_v63 = vadd.f32 %v3150_v53, %v2146_v39  ;;  %v2914_v8 = vclamps-f32 %v2117_v38, 1.0  ;;  %v2500_v22 = vadd.f32 1.0, %v2912_v56  ;;  %v2701_v39 = vpop.f32.mrf.mxu2 }
 0x2f7   :  { %v2076_v4 = vsel %vm5371_vm8, %v2075_v29, %v2071_v58  ;;  %v2155_v44 = vor.u32 1.1754944e-38, %v2154_v5  ;;  %v2202_v48 = vmul.f32 2.1237322e-06, %v5407_v13  ;;  %v2240_v10 = vmul.f32 %v5410_v15, %v5410_v15  ;;  %v2750_v58 = vpop.f32.mrf.mxu3 }
 0x2f8   :  { %v2077_v2 = vmul.f32 %v2076_v4, %v5322_v23  ;;  %v2151_v60 = vsel %vm2150_vm0, %v3150_v53, %v2147_v63  ;;  %v1158_v14 = vmul.f32 0.5, %v5884_v7  ;;  %v2502_v62 = vadd.f32 1.0, %v2914_v8  ;;  %v5460_v8 = vld [vmem:[%s5715_s8] ss:$0 sm:$0xff]  ;;  %s3360_s8 = smov [#allocation13]  }
 0x2f9   :  { %v2156_v17 = vsel %vm2153_vm15, %v2155_v44, %v2151_v60  ;;  %v2163_v32 = vadd.f32 0.00028619796, %v2162_v41  ;;  %v5423_v11 = vmin.f32 %v2240_v10, 16.0  ;;  %v5426_v52 = vadd.f32 %v1128_v59, %v5880_v20  ;;  %s2810_s1 = sshll.u32 %s3360_s8, 4  ;;  %s2811_s1 = int_to_ptr.vmem [resolvable:$true] %s2810_s1 }
 0x2fa   :  { %v2913_v1 = vclamps-f32 %v2077_v2, 1.0  ;;  %v2157_v24 = vmul.f32 %v2156_v17, %v5332_v46  ;;  %v2532_v23 = vmul.f32 %v2500_v22, %v5308_v43  ;;  %v2534_v9 = vmul.f32 %v2502_v62, %v1158_v14  ;;  %v1131_v57 = vpop.f32.mrf.mxu1  ;;  %v1084_v42 = vpop.f32.mrf.mxu0 }
 0x2fb   :  { %v5430_v35 = vadd.f32 %v1082_v51, %v5833_v16  ;;  %v2203_v40 = vadd.f32 0.00028619796, %v2202_v48  ;;  %v2242_v53 = vmul.f32 2.1237322e-06, %v5423_v11  ;;  %v1157_v5 = vmul.f32 0.5, %v5885_v28 }
 0x2fc   :  { %v2915_v37 = vclamps-f32 %v2157_v24, 1.0  ;;  %v2501_v50 = vadd.f32 1.0, %v2913_v1  ;;  %v2554_v34 = vpack.c.bf16 %v2534_v9, %v2532_v23  ;;  %v5435_v46 = vmul.f32 0.70710677, %v5426_v52 }
 0x2fd   :  { %v1159_v0 = vmul.f32 0.5, %v5886_v27  ;;  %v2164_v43 = vmul.f32 %v2163_v32, %v5389_v19  ;;  %v2243_v31 = vadd.f32 0.00028619796, %v2242_v53  ;;  %v5442_v61 = vmul.f32 0.70710677, %v5430_v35 }
 0x2fe   :  { %v2503_v3 = vadd.f32 1.0, %v2915_v37  ;;  %2725 = vmatmul.bf16.gmra.mxu2 %v2554_v34  ;;  %v2280_v47 = vmul.f32 %v5435_v46, %v5435_v46  ;;  %v2533_v54 = vmul.f32 %v2501_v50, %v1157_v5  ;;  %v2204_v18 = vmul.f32 %v2203_v40, %v5407_v13  ;;  %v2703_v17 = vpop.f32.mrf.mxu2 }
 0x2ff   :  { %v2244_v12 = vmul.f32 %v2243_v31, %v5423_v11  ;;  %v2165_v56 = vadd.f32 0.0036580483, %v2164_v43  ;;  %v2320_v21 = vmul.f32 %v5442_v61, %v5442_v61  ;;  %v5451_v49 = vadd.f32 %v1131_v57, %v5880_v20  ;;  %v2752_v28 = vpop.f32.mrf.mxu3 }
 0x300   :  { %v2535_v25 = vmul.f32 %v2503_v3, %v1159_v0  ;;  %v5446_v55 = vmin.f32 %v2280_v47, 16.0  ;;  %v2205_v38 = vadd.f32 0.0036580483, %v2204_v18  ;;  %v5454_v41 = vadd.f32 %v1084_v42, %v5833_v16 }
 0x301   :  { %v2245_v29 = vadd.f32 0.0036580483, %v2244_v12  ;;  %v2166_v22 = vmul.f32 %v2165_v56, %v5389_v19  ;;  %v5463_v4 = vmin.f32 %v2320_v21, 16.0  ;;  %v5466_v44 = vmul.f32 0.70710677, %v5451_v49 }
 0x302   :  { %v2555_v36 = vpack.c.bf16 %v2535_v25, %v2533_v54  ;;  %v2282_v63 = vmul.f32 2.1237322e-06, %v5446_v55  ;;  %v2206_v59 = vmul.f32 %v2205_v38, %v5407_v13  ;;  %v5471_v51 = vmul.f32 0.70710677, %v5454_v41  ;;  %v1133_v7 = vpop.f32.mrf.mxu1 }
 0x303   :  { %v2246_v16 = vmul.f32 %v2245_v29, %v5423_v11  ;;  %v2702_v60 = vadd.f32 %v5460_v8, %v2701_v39  ;;  %v2167_v48 = vadd.f32 0.05243302, %v2166_v22  ;;  %v2322_v10 = vmul.f32 2.1237322e-06, %v5463_v4 }
 0x304   :  { %2774 = vmatmul.bf16.gmra.mxu3 %v2555_v36  ;;  %v2283_v2 = vadd.f32 0.00028619796, %v2282_v63  ;;  %v2360_v14 = vmul.f32 %v5466_v44, %v5466_v44  ;;  %v2207_v32 = vadd.f32 0.05243302, %v2206_v59  ;;  %v2400_v24 = vmul.f32 %v5471_v51, %v5471_v51 }
 0x305   :  { %v2751_v62 = vadd.f32 %v2750_v58, %v2702_v60  ;;  %v2247_v1 = vadd.f32 0.05243302, %v2246_v16  ;;  %v5481_v9 = vadd.f32 %v1133_v7, %v5880_v20  ;;  %v2704_v37 = vadd.f32 %v5460_v8, %v2703_v17 }
 0x306   :  { %v2284_v23 = vmul.f32 %v2283_v2, %v5446_v55  ;;  %v2173_v50 = vmul.f32 3.8918573e-05, %v5389_v19  ;;  %v2168_v40 = vmul.f32 %v2167_v48, %v5389_v19  ;;  %v2323_v53 = vadd.f32 0.00028619796, %v2322_v10 }
 0x307   :  { %2790 = vst [vmem:[#allocation13] sm:$0xff] %v2751_v62  ;;  %v5486_v5 = vmin.f32 %v2360_v14, 16.0  ;;  %v2753_v34 = vadd.f32 %v2752_v28, %v2704_v37  ;;  %v2208_v0 = vmul.f32 %v2207_v32, %v5407_v13  ;;  %v2248_v3 = vmul.f32 %v2247_v1, %v5423_v11 }
 0x308   :  { %v2174_v27 = vadd.f32 0.001143296, %v2173_v50  ;;  %v5490_v43 = vmin.f32 %v2400_v24, 16.0  ;;  %v5493_v20 = vmul.f32 0.5, %v5351_v45  ;;  %v2285_v31 = vadd.f32 0.0036580483, %v2284_v23  ;;  %v2706_v36 = vpop.f32.mrf.mxu2 }
 0x309   :  { %v5496_v47 = vmul.f32 0.70710677, %v5481_v9  ;;  %2791 = vst [vmem:[#allocation13 + $0x8] sm:$0xff] %v2753_v34  ;;  %v2169_v25 = vadd.f32 0.18741608, %v2168_v40  ;;  %v5500_v18 = vmul.f32 0.5, %v5368_v33  ;;  %v2324_v12 = vmul.f32 %v2323_v53, %v5463_v4 }
 0x30a   :  { %v2175_v54 = vmul.f32 %v2174_v27, %v5389_v19  ;;  %v2253_v57 = vmul.f32 3.8918573e-05, %v5423_v11  ;;  %v2362_v42 = vmul.f32 2.1237322e-06, %v5486_v5  ;;  %v2213_v56 = vmul.f32 3.8918573e-05, %v5407_v13 }
 0x30b   :  { %v2209_v21 = vadd.f32 0.18741608, %v2208_v0  ;;  %v2249_v39 = vadd.f32 0.18741608, %v2248_v3  ;;  %v2402_v38 = vmul.f32 2.1237322e-06, %v5490_v43  ;;  %v2286_v29 = vmul.f32 %v2285_v31, %v5446_v55 }
 0x30c   :  { %v2176_v45 = vadd.f32 0.014752088, %v2175_v54  ;;  %v2440_v33 = vmul.f32 %v5496_v47, %v5496_v47  ;;  %v2254_v63 = vadd.f32 0.001143296, %v2253_v57  ;;  %v2170_v22 = vmul.f32 %v2169_v25, %v5389_v19 }
 0x30d   :  { %v5513_v59 = vmul.f32 0.5, %v5398_v30  ;;  %v2325_v16 = vadd.f32 0.0036580483, %v2324_v12  ;;  %v2214_v2 = vadd.f32 0.001143296, %v2213_v56  ;;  %v2707_v48 = vadd.f32 %v5460_v8, %v2706_v36 }
 0x30e   :  { %v2177_v58 = vmul.f32 %v2176_v45, %v5389_v19  ;;  %v2363_v60 = vadd.f32 0.00028619796, %v2362_v42  ;;  %v2255_v7 = vmul.f32 %v2254_v63, %v5423_v11  ;;  %v2210_v14 = vmul.f32 %v2209_v21, %v5407_v13 }
 0x30f   :  { %v2250_v62 = vmul.f32 %v2249_v39, %v5423_v11  ;;  %v2403_v17 = vadd.f32 0.00028619796, %v2402_v38  ;;  %v2215_v32 = vmul.f32 %v2214_v2, %v5407_v13  ;;  %v2287_v1 = vadd.f32 0.05243302, %v2286_v29 }
 0x310   :  { %v2178_v10 = vadd.f32 0.112945676, %v2177_v58  ;;  %v5520_v24 = vmin.f32 %v2440_v33, 16.0  ;;  %v2256_v23 = vadd.f32 0.014752088, %v2255_v7  ;;  %v2326_v50 = vmul.f32 %v2325_v16, %v5463_v4  ;;  %v2708_v12 = vpop.f32.mrf.mxu2 }
 0x311   :  { %v2171_v37 = vadd.f32 1.1283791, %v2170_v22  ;;  %v2216_v53 = vadd.f32 0.014752088, %v2215_v32  ;;  %v2293_v28 = vmul.f32 3.8918573e-05, %v5446_v55  ;;  %v2364_v34 = vmul.f32 %v2363_v60, %v5486_v5 }
 0x312   :  { %v2179_v30 = vmul.f32 %v2178_v10, %v5389_v19  ;;  %v2257_v3 = vmul.f32 %v2256_v23, %v5423_v11  ;;  %v2211_v31 = vadd.f32 1.1283791, %v2210_v14  ;;  %v2251_v54 = vadd.f32 1.1283791, %v2250_v62 }
 0x313   :  { %v2404_v25 = vmul.f32 %v2403_v17, %v5490_v43  ;;  %v2217_v57 = vmul.f32 %v2216_v53, %v5407_v13  ;;  %v2288_v42 = vmul.f32 %v2287_v1, %v5446_v55  ;;  %v2442_v36 = vmul.f32 2.1237322e-06, %v5520_v24 }
 0x314   :  { %v2180_v0 = vadd.f32 0.4994258, %v2179_v30  ;;  %v2258_v56 = vadd.f32 0.112945676, %v2257_v3  ;;  %v2327_v21 = vadd.f32 0.05243302, %v2326_v50  ;;  %v2709_v33 = vadd.f32 %v5460_v8, %v2708_v12 }
 0x315   :  { %v2218_v39 = vadd.f32 0.112945676, %v2217_v57  ;;  %v2294_v38 = vadd.f32 0.001143296, %v2293_v28  ;;  %v2365_v29 = vadd.f32 0.0036580483, %v2364_v34  ;;  %v5537_v22 = vmul.f32 %v2171_v37, %v5365_v26 }
 0x316   :  { %v2181_v45 = vmul.f32 %v2180_v0, %v5389_v19  ;;  %v2259_v63 = vmul.f32 %v2258_v56, %v5423_v11  ;;  %v2333_v19 = vmul.f32 3.8918573e-05, %v5463_v4  ;;  %v2289_v60 = vadd.f32 0.18741608, %v2288_v42 }
 0x317   :  { %v2219_v16 = vmul.f32 %v2218_v39, %v5407_v13  ;;  %v2295_v2 = vmul.f32 %v2294_v38, %v5446_v55  ;;  %v2443_v10 = vadd.f32 0.00028619796, %v2442_v36  ;;  %v5544_v7 = vmul.f32 %v2211_v31, %v5383_v6 }
 0x318   :  { %v2755_v40 = vpop.f32.mrf.mxu3  ;;  %v5533_v58 = vadd.f32 1.0, %v2181_v45  ;;  %v2328_v14 = vmul.f32 %v2327_v21, %v5463_v4  ;;  %v2260_v17 = vadd.f32 0.4994258, %v2259_v63  ;;  %v5548_v32 = vmul.f32 %v2251_v54, %v5410_v15 }
 0x319   :  { %v2756_v27 = vadd.f32 %v2755_v40, %v2707_v48  ;;  %v2405_v48 = vadd.f32 0.0036580483, %v2404_v25  ;;  %v2220_v26 = vadd.f32 0.4994258, %v2219_v16  ;;  %v2366_v1 = vmul.f32 %v2365_v29, %v5486_v5 }
 0x31a   :  { %3151 = vrcp.f32 %v5533_v58  ;;  %v2296_v23 = vadd.f32 0.014752088, %v2295_v2  ;;  %v2261_v37 = vmul.f32 %v2260_v17, %v5423_v11  ;;  %v2334_v40 = vadd.f32 0.001143296, %v2333_v19 }
 0x31b   :  { %2792 = vst [vmem:[#allocation13 + $0x10] sm:$0xff] %v2756_v27  ;;  %v2221_v50 = vmul.f32 %v2220_v26, %v5407_v13  ;;  %v2373_v6 = vmul.f32 3.8918573e-05, %v5486_v5  ;;  %v2290_v53 = vmul.f32 %v2289_v60, %v5446_v55  ;;  %v2406_v28 = vmul.f32 %v2405_v48, %v5490_v43 }
 0x31c   :  { %v2444_v34 = vmul.f32 %v2443_v10, %v5520_v24  ;;  %v2297_v15 = vmul.f32 %v2296_v23, %v5446_v55  ;;  %v2329_v27 = vadd.f32 0.18741608, %v2328_v14  ;;  %v2192_v0 = vand.u32 2147483647, %v5533_v58 }
 0x31d   :  { %v5559_v3 = vadd.f32 1.0, %v2261_v37  ;;  %v5561_v11 = vadd.f32 1.0, %v2221_v50  ;;  %v2194_v31 = vand.u32 2147483648, %v5533_v58  ;;  %v2335_v25 = vmul.f32 %v2334_v40, %v5463_v4 }
 0x31e   :  { %v2298_v54 = vadd.f32 0.112945676, %v2297_v15  ;;  %v2413_v12 = vmul.f32 3.8918573e-05, %v5490_v43  ;;  %v5566_v57 = vadd.f32 0.05243302, %v2366_v1  ;;  %v5578_v39 = vmul.f32 %v2329_v27, %v5463_v4 }
 0x31f   :  { %3153 = vrcp.f32 %v5559_v3  ;;  %v2374_v36 = vadd.f32 0.001143296, %v2373_v6  ;;  %v5570_v45 = vadd.f32 1.1283791, %v2290_v53  ;;  %v5572_v56 = vadd.f32 0.05243302, %v2406_v28 }
 0x320   :  { %v2757_v62 = vpop.f32.mrf.mxu3  ;;  %v3152_v13 = vpop.eup %3151  ;;  %v5574_v21 = vadd.f32 0.0036580483, %v2444_v34  ;;  %3155 = vrcp.f32 %v5561_v11  ;;  %vm2188_vm1 = vweird.f32 %v5533_v58  ;;  %v2299_v29 = vmul.f32 %v2298_v54, %v5446_v55 }
 0x321   :  { %v2758_v30 = vadd.f32 %v2757_v62, %v2709_v33  ;;  %v2184_v42 = vmul.f32 %v3152_v13, %v5533_v58  ;;  %vm5582_vm2 = vcmp.eq.f32.partialorder %v2192_v0, 8.507059e+37  ;;  %v2195_v63 = vor.u32 1.1754944e-38, %v2194_v31 }
 0x322   :  { %v2336_v16 = vadd.f32 0.014752088, %v2335_v25  ;;  %v2414_v2 = vadd.f32 0.001143296, %v2413_v12  ;;  %vm2189_vm3 = vweird.f32 %v3152_v13  ;;  %v2300_v60 = vadd.f32 0.4994258, %v2299_v29 }
 0x323   :  { %2793 = vst [vmem:[#allocation13 + $0x18] sm:$0xff] %v2758_v30  ;;  %v2185_v38 = vsub.f32 1.0, %v2184_v42  ;;  %v2375_v48 = vmul.f32 %v2374_v36, %v5486_v5  ;;  %vm2268_vm4 = vweird.f32 %v5559_v3  ;;  %v2453_v62 = vmul.f32 3.8918573e-05, %v5520_v24  ;;  %vm2190_vm5 = vmor %vm2188_vm1, %vm2189_vm3 }
 0x324   :  { %v2337_v10 = vmul.f32 %v2336_v16, %v5463_v4  ;;  %v2415_v14 = vmul.f32 %v2414_v2, %v5490_v43  ;;  %v2272_v1 = vand.u32 2147483647, %v5559_v3  ;;  %v2274_v30 = vand.u32 2147483648, %v5559_v3 }
 0x325   :  { %v2186_v19 = vmul.f32 %v3152_v13, %v2185_v38  ;;  %v3154_v17 = vpop.eup %3153  ;;  %v2301_v23 = vmul.f32 %v2300_v60, %v5446_v55  ;;  %v2232_v40 = vand.u32 2147483647, %v5561_v11  ;;  %v2376_v27 = vadd.f32 0.014752088, %v2375_v48 }
 0x326   :  { %v3156_v37 = vpop.eup %3155  ;;  %v2264_v50 = vmul.f32 %v3154_v17, %v5559_v3  ;;  %v2338_v6 = vadd.f32 0.112945676, %v2337_v10  ;;  %v2416_v53 = vadd.f32 0.014752088, %v2415_v14  ;;  %vm2228_vm6 = vweird.f32 %v5561_v11 }
 0x327   :  { %v2187_v26 = vadd.f32 %v3152_v13, %v2186_v19  ;;  %v2224_v34 = vmul.f32 %v3156_v37, %v5561_v11  ;;  %v5599_v15 = vadd.f32 1.0, %v2301_v23  ;;  %v2234_v25 = vand.u32 2147483648, %v5561_v11 }
 0x328   :  { %v2265_v55 = vsub.f32 1.0, %v2264_v50  ;;  %v2339_v31 = vmul.f32 %v2338_v6, %v5463_v4  ;;  %v2417_v58 = vmul.f32 %v2416_v53, %v5490_v43  ;;  %vm2269_vm7 = vweird.f32 %v3154_v17 }
 0x329   :  { %v2191_v28 = vsel %vm2190_vm5, %v3152_v13, %v2187_v26  ;;  %v2225_v54 = vsub.f32 1.0, %v2224_v34  ;;  %3157 = vrcp.f32 %v5599_v15  ;;  %vm2229_vm8 = vweird.f32 %v3156_v37  ;;  %vm2270_vm11 = vmor %vm2268_vm4, %vm2269_vm7 }
 0x32a   :  { %v2196_v0 = vsel %vm5582_vm2, %v2195_v63, %v2191_v28  ;;  %v2711_v13 = vpop.f32.mrf.mxu2  ;;  %v2266_v42 = vmul.f32 %v3154_v17, %v2265_v55  ;;  %v2340_v36 = vadd.f32 0.4994258, %v2339_v31  ;;  %v2418_v29 = vadd.f32 0.112945676, %v2417_v58  ;;  %vm2230_vm12 = vmor %vm2228_vm6, %vm2229_vm8 }
 0x32b   :  { %v2197_v12 = vmul.f32 %v2196_v0, %v5537_v22  ;;  %v2226_v38 = vmul.f32 %v3156_v37, %v2225_v54  ;;  %v2377_v33 = vmul.f32 %v2376_v27, %v5486_v5  ;;  %vm2273_vm9 = vcmp.eq.f32.partialorder %v2272_v1, 8.507059e+37 }
 0x32c   :  { %v2267_v63 = vadd.f32 %v3154_v17, %v2266_v42  ;;  %v2275_v16 = vor.u32 1.1754944e-38, %v2274_v30  ;;  %vm5610_vm10 = vcmp.eq.f32.partialorder %v2232_v40, 8.507059e+37  ;;  %v2235_v22 = vor.u32 1.1754944e-38, %v2234_v25 }
 0x32d   :  { %v2227_v19 = vadd.f32 %v3156_v37, %v2226_v38  ;;  %v2341_v60 = vmul.f32 %v2340_v36, %v5463_v4  ;;  %v2454_v48 = vadd.f32 0.001143296, %v2453_v62  ;;  %v2712_v10 = vadd.f32 %v5460_v8, %v2711_v13 }
 0x32e   :  { %v2916_v14 = vclamps-f32 %v2197_v12, 1.0  ;;  %v2271_v26 = vsel %vm2270_vm11, %v3154_v17, %v2267_v63  ;;  %v2419_v1 = vmul.f32 %v2418_v29, %v5490_v43  ;;  %v2378_v40 = vadd.f32 0.112945676, %v2377_v33 }
 0x32f   :  { %v3158_v30 = vpop.eup %3157  ;;  %v2276_v23 = vsel %vm2273_vm9, %v2275_v16, %v2271_v26  ;;  %v2231_v50 = vsel %vm2230_vm12, %v3156_v37, %v2227_v19  ;;  %v5622_v3 = vadd.f32 1.0, %v2341_v60  ;;  %v2408_v4 = vmul.f32 %v5572_v56, %v5490_v43 }
 0x330   :  { %v2277_v62 = vmul.f32 %v2276_v23, %v5548_v32  ;;  %v2236_v17 = vsel %vm5610_vm10, %v2235_v22, %v2231_v50  ;;  %v2304_v6 = vmul.f32 %v3158_v30, %v5599_v15  ;;  %v2292_v11 = vmul.f32 %v5570_v45, %v5435_v46 }
 0x331   :  { %v2314_v53 = vand.u32 2147483648, %v5599_v15  ;;  %3159 = vrcp.f32 %v5622_v3  ;;  %v2455_v37 = vmul.f32 %v2454_v48, %v5520_v24  ;;  %v2504_v27 = vadd.f32 1.0, %v2916_v14 }
 0x332   :  { %v2918_v34 = vclamps-f32 %v2277_v62, 1.0  ;;  %v2305_v56 = vsub.f32 1.0, %v2304_v6  ;;  %v2420_v0 = vadd.f32 0.4994258, %v2419_v1  ;;  %v2237_v55 = vmul.f32 %v2236_v17, %v5544_v7  ;;  %v2713_v45 = vpop.f32.mrf.mxu2 }
 0x333   :  { %v2312_v31 = vand.u32 2147483647, %v5599_v15  ;;  %v2379_v58 = vmul.f32 %v2378_v40, %v5486_v5  ;;  %vm2309_vm13 = vweird.f32 %v3158_v30  ;;  %vm2308_vm14 = vweird.f32 %v5599_v15 }
 0x334   :  { %v2506_v54 = vadd.f32 1.0, %v2918_v34  ;;  %v2306_v46 = vmul.f32 %v3158_v30, %v2305_v56  ;;  %v2421_v25 = vmul.f32 %v2420_v0, %v5490_v43  ;;  %v2315_v13 = vor.u32 1.1754944e-38, %v2314_v53  ;;  %vm2310_vm15 = vmor %vm2308_vm14, %vm2309_vm13 }
 0x335   :  { %v2380_v12 = vadd.f32 0.4994258, %v2379_v58  ;;  %v2456_v42 = vadd.f32 0.014752088, %v2455_v37  ;;  %v2536_v36 = vmul.f32 %v2504_v27, %v5493_v20  ;;  %v2917_v63 = vclamps-f32 %v2237_v55, 1.0 }
 0x336   :  { %v2538_v7 = vmul.f32 %v2506_v54, %v5513_v59  ;;  %v2307_v38 = vadd.f32 %v3158_v30, %v2306_v46  ;;  %v5642_v29 = vadd.f32 1.0, %v2421_v25  ;;  %v2714_v16 = vadd.f32 %v5460_v8, %v2713_v45 }
 0x337   :  { %v3160_v33 = vpop.eup %3159  ;;  %v2381_v2 = vmul.f32 %v2380_v12, %v5486_v5  ;;  %v2457_v19 = vmul.f32 %v2456_v42, %v5520_v24  ;;  %vm2313_vm0 = vcmp.eq.f32.partialorder %v2312_v31, 8.507059e+37  ;;  %v2409_v20 = vadd.f32 0.18741608, %v2408_v4 }
 0x338   :  { %v2556_v15 = vpack.c.bf16 %v2538_v7, %v2536_v36  ;;  %v2311_v22 = vsel %vm2310_vm15, %v3158_v30, %v2307_v38  ;;  %v2344_v60 = vmul.f32 %v3160_v33, %v5622_v3  ;;  %v2446_v59 = vmul.f32 %v5574_v21, %v5520_v24 }
 0x339   :  { %v2316_v48 = vsel %vm2313_vm0, %v2315_v13, %v2311_v22  ;;  %3161 = vrcp.f32 %v5642_v29  ;;  %v2352_v1 = vand.u32 2147483647, %v5622_v3  ;;  %v5652_v23 = vadd.f32 1.0, %v2381_v2 }
 0x33a   :  { %v2760_v28 = vpop.f32.mrf.mxu3  ;;  %2730 = vmatmul.bf16.gmra.mxu2 %v2556_v15  ;;  %v2345_v26 = vsub.f32 1.0, %v2344_v60  ;;  %v2505_v50 = vadd.f32 1.0, %v2917_v63  ;;  %v2354_v40 = vand.u32 2147483648, %v5622_v3  ;;  %v2458_v62 = vadd.f32 0.112945676, %v2457_v19 }
 0x33b   :  { %v2761_v32 = vadd.f32 %v2760_v28, %v2712_v10  ;;  %v2317_v10 = vmul.f32 %v2316_v48, %v2292_v11  ;;  %vm2349_vm1 = vweird.f32 %v3160_v33  ;;  %3163 = vrcp.f32 %v5652_v23 }
 0x33c   :  { %v2346_v17 = vmul.f32 %v3160_v33, %v2345_v26  ;;  %v1163_v21 = vmul.f32 0.5, %v5426_v52  ;;  %v2331_v6 = vadd.f32 1.1283791, %v5578_v39  ;;  %v2368_v11 = vmul.f32 %v5566_v57, %v5486_v5 }
 0x33d   :  { %2794 = vst [vmem:[#allocation13 + $0x20] sm:$0xff] %v2761_v32  ;;  %v2919_v4 = vclamps-f32 %v2317_v10, 1.0  ;;  %v2459_v53 = vmul.f32 %v2458_v62, %v5520_v24  ;;  %v2447_v37 = vadd.f32 0.05243302, %v2446_v59  ;;  %vm2348_vm2 = vweird.f32 %v5622_v3 }
 0x33e   :  { %v2347_v34 = vadd.f32 %v3160_v33, %v2346_v17  ;;  %v2410_v56 = vmul.f32 %v2409_v20, %v5490_v43  ;;  %vm2350_vm3 = vmor %vm2348_vm2, %vm2349_vm1  ;;  %vm2353_vm4 = vcmp.eq.f32.partialorder %v2352_v1, 8.507059e+37  ;;  %v2355_v0 = vor.u32 1.1754944e-38, %v2354_v40 }
 0x33f   :  { %v2507_v28 = vadd.f32 1.0, %v2919_v4  ;;  %v3162_v27 = vpop.eup %3161  ;;  %v2460_v52 = vadd.f32 0.4994258, %v2459_v53  ;;  %v2537_v39 = vmul.f32 %v2505_v50, %v5500_v18  ;;  %v2332_v31 = vmul.f32 %v2331_v6, %v5442_v61 }
 0x340   :  { %v2351_v55 = vsel %vm2350_vm3, %v3160_v33, %v2347_v34  ;;  %v2424_v57 = vmul.f32 %v3162_v27, %v5642_v29  ;;  %v2369_v58 = vadd.f32 0.18741608, %v2368_v11  ;;  %v2448_v45 = vmul.f32 %v2447_v37, %v5520_v24 }
 0x341   :  { %v2539_v32 = vmul.f32 %v2507_v28, %v1163_v21  ;;  %v2356_v54 = vsel %vm2353_vm4, %v2355_v0, %v2351_v55  ;;  %v2461_v46 = vmul.f32 %v2460_v52, %v5520_v24  ;;  %v3164_v3 = vpop.eup %3163  ;;  %v2434_v13 = vand.u32 2147483648, %v5642_v29 }
 0x342   :  { %v2762_v14 = vpop.f32.mrf.mxu3  ;;  %v2425_v25 = vsub.f32 1.0, %v2424_v57  ;;  %v2357_v12 = vmul.f32 %v2356_v54, %v2332_v31  ;;  %v2384_v18 = vmul.f32 %v3164_v3, %v5652_v23  ;;  %v2411_v36 = vadd.f32 1.1283791, %v2410_v56 }
 0x343   :  { %v2763_v30 = vadd.f32 %v2762_v14, %v2714_v16  ;;  %v2557_v43 = vpack.c.bf16 %v2539_v32, %v2537_v39  ;;  %v5670_v42 = vadd.f32 1.0, %v2461_v46  ;;  %vm2429_vm5 = vweird.f32 %v3162_v27 }
 0x344   :  { %v2426_v61 = vmul.f32 %v3162_v27, %v2425_v25  ;;  %v2432_v38 = vand.u32 2147483647, %v5642_v29  ;;  %v2370_v33 = vmul.f32 %v2369_v58, %v5486_v5  ;;  %v2385_v63 = vsub.f32 1.0, %v2384_v18 }
 0x345   :  { %2795 = vst [vmem:[#allocation13 + $0x28] sm:$0xff] %v2763_v30  ;;  %2779 = vmatmul.bf16.gmra.mxu3 %v2557_v43  ;;  %3165 = vrcp.f32 %v5670_v42  ;;  %v2449_v16 = vadd.f32 0.18741608, %v2448_v45  ;;  %vm2428_vm6 = vweird.f32 %v5642_v29  ;;  %v2435_v19 = vor.u32 1.1754944e-38, %v2434_v13 }
 0x346   :  { %v2427_v2 = vadd.f32 %v3162_v27, %v2426_v61  ;;  %v2920_v15 = vclamps-f32 %v2357_v12, 1.0  ;;  %vm2430_vm7 = vmor %vm2428_vm6, %vm2429_vm5  ;;  %v2386_v22 = vmul.f32 %v3164_v3, %v2385_v63  ;;  %vm2389_vm8 = vweird.f32 %v3164_v3 }
 0x347   :  { %v2394_v60 = vand.u32 2147483648, %v5652_v23  ;;  %v2412_v20 = vmul.f32 %v2411_v36, %v5471_v51  ;;  %vm2433_vm9 = vcmp.eq.f32.partialorder %v2432_v38, 8.507059e+37  ;;  %v2392_v5 = vand.u32 2147483647, %v5652_v23 }
 0x348   :  { %v2431_v59 = vsel %vm2430_vm7, %v3162_v27, %v2427_v2  ;;  %v2387_v14 = vadd.f32 %v3164_v3, %v2386_v22  ;;  %vm2388_vm10 = vweird.f32 %v5652_v23  ;;  %v2371_v29 = vadd.f32 1.1283791, %v2370_v33 }
 0x349   :  { %v2436_v10 = vsel %vm2433_vm9, %v2435_v19, %v2431_v59  ;;  %vm2390_vm11 = vmor %vm2388_vm10, %vm2389_vm8  ;;  %v2450_v50 = vmul.f32 %v2449_v16, %v5520_v24  ;;  %v2508_v30 = vadd.f32 1.0, %v2920_v15  ;;  %v2395_v62 = vor.u32 1.1754944e-38, %v2394_v60 }
 0x34a   :  { %v2716_v7 = vpop.f32.mrf.mxu2  ;;  %v2437_v26 = vmul.f32 %v2436_v10, %v2412_v20  ;;  %v2391_v40 = vsel %vm2390_vm11, %v3164_v3, %v2387_v14  ;;  %vm2393_vm12 = vcmp.eq.f32.partialorder %v2392_v5, 8.507059e+37  ;;  %v1164_v21 = vmul.f32 0.5, %v5430_v35 }
 0x34b   :  { %v2717_v48 = vadd.f32 %v5460_v8, %v2716_v7  ;;  %v3166_v1 = vpop.eup %3165  ;;  %v2396_v11 = vsel %vm2393_vm12, %v2395_v62, %v2391_v40  ;;  %v2372_v23 = vmul.f32 %v2371_v29, %v5466_v44  ;;  %v1166_v53 = vmul.f32 0.5, %v5454_v41 }
 0x34c   :  { %v2922_v4 = vclamps-f32 %v2437_v26, 1.0  ;;  %v2464_v17 = vmul.f32 %v3166_v1, %v5670_v42  ;;  %v2451_v24 = vadd.f32 1.1283791, %v2450_v50  ;;  %v2540_v27 = vmul.f32 %v2508_v30, %v1164_v21 }
 0x34d   :  { %v2472_v56 = vand.u32 2147483647, %v5670_v42  ;;  %v2474_v0 = vand.u32 2147483648, %v5670_v42  ;;  %v2397_v39 = vmul.f32 %v2396_v11, %v2372_v23  ;;  %vm2469_vm13 = vweird.f32 %v3166_v1 }
 0x34e   :  { %v2510_v37 = vadd.f32 1.0, %v2922_v4  ;;  %v2465_v28 = vsub.f32 1.0, %v2464_v17  ;;  %vm2468_vm14 = vweird.f32 %v5670_v42  ;;  %v2452_v57 = vmul.f32 %v2451_v24, %v5496_v47 }
 0x34f   :  { %vm2470_vm15 = vmor %vm2468_vm14, %vm2469_vm13  ;;  %v2475_v41 = vor.u32 1.1754944e-38, %v2474_v0  ;;  %v2921_v31 = vclamps-f32 %v2397_v39, 1.0  ;;  %vm2473_vm0 = vcmp.eq.f32.partialorder %v2472_v56, 8.507059e+37  ;;  %v1165_v13 = vmul.f32 0.5, %v5451_v49 }
 0x350   :  { %v2542_v52 = vmul.f32 %v2510_v37, %v1166_v53  ;;  %v2466_v32 = vmul.f32 %v3166_v1, %v2465_v28  ;;  %v1167_v12 = vmul.f32 0.5, %v5481_v9 }
 0x351   :  { %v2509_v25 = vadd.f32 1.0, %v2921_v31 }
 0x352   :  { %v2718_v34 = vpop.f32.mrf.mxu2  ;;  %v2558_v55 = vpack.c.bf16 %v2542_v52, %v2540_v27  ;;  %v2467_v44 = vadd.f32 %v3166_v1, %v2466_v32 }
 0x353   :  { %v2719_v35 = vadd.f32 %v5460_v8, %v2718_v34  ;;  %v2541_v42 = vmul.f32 %v2509_v25, %v1165_v13 }
 0x354   :  { %v2765_v51 = vpop.f32.mrf.mxu3  ;;  %2735 = vmatmul.bf16.gmra.mxu2 %v2558_v55  ;;  %v2471_v58 = vsel %vm2470_vm15, %v3166_v1, %v2467_v44 }
 0x355   :  { %v2766_v6 = vadd.f32 %v2765_v51, %v2717_v48  ;;  %v2476_v46 = vsel %vm2473_vm0, %v2475_v41, %v2471_v58 }
 0x356   :  { %v2477_v45 = vmul.f32 %v2476_v46, %v2452_v57 }
 0x357   :  { %2796 = vst [vmem:[#allocation13 + $0x30] sm:$0xff] %v2766_v6 }
 0x358   :  { %v2923_v43 = vclamps-f32 %v2477_v45, 1.0 }
 0x35a   :  { %v2511_v18 = vadd.f32 1.0, %v2923_v43 }
 0x35c   :  { %v2767_v54 = vpop.f32.mrf.mxu3  ;;  %v2543_v36 = vmul.f32 %v2511_v18, %v1167_v12 }
 0x35d   :  { %v2768_v3 = vadd.f32 %v2767_v54, %v2719_v35 }
 0x35e   :  { %v2559_v7 = vpack.c.bf16 %v2543_v36, %v2541_v42 }
 0x35f   :  { %2797 = vst [vmem:[#allocation13 + $0x38] sm:$0xff] %v2768_v3 }
 0x360   :  { %2784 = vmatmul.bf16.gmra.mxu3 %v2559_v7 }
 0x364   :  { %v2721_v47 = vpop.f32.mrf.mxu2 }
 0x365   :  { %v2722_v61 = vadd.f32 %v5460_v8, %v2721_v47 }
 0x36c   :  { %v2723_v63 = vpop.f32.mrf.mxu2 }
 0x36d   :  { %v2724_v16 = vadd.f32 %v5460_v8, %v2723_v63 }
 0x376   :  { %v2770_v38 = vpop.f32.mrf.mxu3 }
 0x377   :  { %v2771_v33 = vadd.f32 %v2770_v38, %v2722_v61 }
 0x379   :  { %2798 = vst [vmem:[#allocation13 + $0x40] sm:$0xff] %v2771_v33 }
 0x37e   :  { %v2772_v2 = vpop.f32.mrf.mxu3 }
 0x37f   :  { %v2773_v19 = vadd.f32 %v2772_v2, %v2724_v16 }
 0x381   :  { %2799 = vst [vmem:[#allocation13 + $0x48] sm:$0xff] %v2773_v19  ;;  %v2726_v49 = vpop.f32.mrf.mxu2 }
 0x382   :  { %v2727_v9 = vadd.f32 %v5460_v8, %v2726_v49 }
 0x387   :  { %v2775_v15 = vpop.f32.mrf.mxu3 }
 0x388   :  { %v2776_v22 = vadd.f32 %v2775_v15, %v2727_v9 }
 0x389   :  { %v2728_v60 = vpop.f32.mrf.mxu2 }
 0x38a   :  { %2800 = vst [vmem:[#allocation13 + $0x50] sm:$0xff] %v2776_v22  ;;  %v2729_v20 = vadd.f32 %v5460_v8, %v2728_v60 }
 0x38f   :  { %v2777_v59 = vpop.f32.mrf.mxu3 }
 0x390   :  { %v2778_v5 = vadd.f32 %v2777_v59, %v2729_v20 }
 0x392   :  { %2801 = vst [vmem:[#allocation13 + $0x58] sm:$0xff] %v2778_v5 }
 0x3bd   :  { %v2731_v48 = vpop.f32.mrf.mxu2 }
 0x3be   :  { %v2732_v10 = vadd.f32 %v5460_v8, %v2731_v48 }
 0x3c5   :  { %v2733_v26 = vpop.f32.mrf.mxu2 }
 0x3c6   :  { %v2734_v1 = vadd.f32 %v5460_v8, %v2733_v26 }
 0x3c8   :  { %v2780_v14 = vpop.f32.mrf.mxu3 }
 0x3c9   :  { %v2781_v29 = vadd.f32 %v2780_v14, %v2732_v10 }
 0x3cb   :  { %2802 = vst [vmem:[#allocation13 + $0x60] sm:$0xff] %v2781_v29 }
 0x3d0   :  { %v2782_v50 = vpop.f32.mrf.mxu3 }
 0x3d1   :  { %v2783_v30 = vadd.f32 %v2782_v50, %v2734_v1 }
 0x3d3   :  { %2803 = vst [vmem:[#allocation13 + $0x68] sm:$0xff] %v2783_v30 }
 0x3d7   :  { %v2736_v40 = vpop.f32.mrf.mxu2 }
 0x3d8   :  { %v2737_v62 = vadd.f32 %v5460_v8, %v2736_v40 }
 0x3df   :  { %v2738_v17 = vpop.f32.mrf.mxu2 }
 0x3e0   :  { %v2739_v21 = vadd.f32 %v5460_v8, %v2738_v17 }
 0x3e3   :  { %v2785_v51 = vpop.f32.mrf.mxu3 }
 0x3e4   :  { %v2786_v4 = vadd.f32 %v2785_v51, %v2737_v62 }
 0x3e6   :  { %2804 = vst [vmem:[#allocation13 + $0x70] sm:$0xff] %v2786_v4 }
 0x3eb   :  { %v2787_v6 = vpop.f32.mrf.mxu3 }
 0x3ec   :  { %v2788_v11 = vadd.f32 %v2787_v6, %v2739_v21 }
 0x3ee   :  { %2805 = vst [vmem:[#allocation13 + $0x78] sm:$0xff] %v2788_v11 }
 0x3ef   :  { %2818 = dma.vmem_to_hbm [thread:$0]  %s2811_s1, 2048, %s2813_s24, [#allocation4], %s3352_s26, %s3352_s26, %s3353_s4  }
 0x3f0   :  { %3347 = dma.done.wait [#allocation4], 2048  }
 0x3f1   :  { %3348 = vsyncadd [#allocation4], 4294965248 }
 0x3f2   :  { %2823 = vsyncpa [#allocation3], 1 }
 0x3f3   :  { %2824 = vsyncpa [#allocation6], 1 }
 0x3f4   :  { %2825 = vsyncpa [#allocation9], 1 }
 0x3f5   :  { %2826 = vsyncpa [#allocation12], 1 }
 0x3f6   :  { %2827 = vsyncpa [#allocation4], 1 }

</bundles_post_ra>
